<compile_context>
chip_gen: v7x
topology: tpu7x:2x2x1
jax: 0.10.0
libtpu: 0.0.40
codegen_flags: <defaults>
</compile_context>

<pallas_src>
import functools

import jax
import jax.numpy as jnp
from jax.experimental import pallas as pl
from jax.experimental.pallas import tpu as pltpu


# Set to jnp.bfloat16 on v6e/v7x to feed the MXU bf16 operands (fp32 accumulation
# is kept).  None == fp32 operands, keeps the numerical self-check tight and all
# elementwise math fp32 (v5e has no bf16 VPU/EUP).
MXU_DTYPE = None

# Scoped-VMEM limit; 48 MiB fits every generation (v7x physical VMEM is 64 MiB).
VMEM_LIMIT_BYTES = 48 * 1024 * 1024


def _pick_tile(total, target):
    """Largest divisor of `total` that is a multiple of 8 and <= target, else total."""
    cands = [t for t in range(8, min(total, target) + 1, 8) if total % t == 0]
    return max(cands) if cands else total


def _compiler_params(*semantics):
    return pltpu.CompilerParams(dimension_semantics=semantics,
                                vmem_limit_bytes=VMEM_LIMIT_BYTES)


# =============================================================================
# Conv input slab: zero-pad H and W, split into stride phases, flatten rows.
# Every conv tap then becomes a static row offset into the slab (mask free).
# =============================================================================
def _build_slab(x, kh, kw, stride, padding):
    """x: (N, H, W, C) channels-last -> (slab (N, Ltot, C), meta)."""
    N, H, W, C = x.shape
    s, p = stride, padding
    Hp, Wp = H + 2 * p, W + 2 * p
    Ho = (Hp - kh) // s + 1
    Wo = (Wp - kw) // s + 1
    SH = Ho + (kh - 1) // s            # slab rows per phase
    SW = Wo + (kw - 1) // s            # slab cols per phase (junk cols >= Wo)

    xp = jnp.pad(x, ((0, 0), (p, p), (p, p), (0, 0)))
    phases = []
    for py in range(s):
        for px in range(s):
            ph = xp[:, py::s, px::s, :][:, :SH, :SW, :]
            dh, dw = SH - ph.shape[1], SW - ph.shape[2]
            if dh or dw:
                ph = jnp.pad(ph, ((0, 0), (0, dh), (0, dw), (0, 0)))
            phases.append(ph.reshape(N, SH * SW, C))
    slab = phases[0] if len(phases) == 1 else jnp.concatenate(phases, axis=1)

    Lph = SH * SW
    offsets = []
    for ky in range(kh):
        for kx in range(kw):
            py, dy = ky % s, ky // s
            px, dx = kx % s, kx // s
            offsets.append((py * s + px) * Lph + dy * SW + dx)

    M = Ho * SW                                     # output rows per image
    Ltot = max(slab.shape[1], max(offsets) + M)     # keep every tap read in-bounds
    Ltot = -(-Ltot // 8) * 8                        # sublane-aligned row count
    if Ltot > slab.shape[1]:
        slab = jnp.pad(slab, ((0, 0), (0, Ltot - slab.shape[1]), (0, 0)))
    return slab, dict(Ho=Ho, Wo=Wo, SW=SW, M=M, offsets=tuple(offsets))


# =============================================================================
# Pallas kernel 1: per-frame 2D conv over the flat slab, row tiled.
#   grid = (image n, row tile t); each tap is a ref-sliced (TM, Cin) load
#   matmul'ed with its (Cin, Cout) weight; bias (per image -> temb folded in),
#   residual add (identity or fused 1x1 shortcut matmul) and output scaling are
#   applied in the epilogue.  res_mode: 0 none, 1 identity add, 2 projected.
# =============================================================================
def _make_conv_kernel(offsets, TM, Cout, res_mode, res_scale, mm_dtype):
    K = len(offsets)

    def kernel(*refs):
        if res_mode == 0:
            x_ref, w_ref, b_ref, o_ref = refs
        elif res_mode == 1:
            x_ref, w_ref, b_ref, r_ref, o_ref = refs
        else:
            x_ref, w_ref, b_ref, r_ref, rw_ref, o_ref = refs

        t = pl.program_id(1)
        row0 = t * TM
        if TM % 8 == 0:
            row0 = pl.multiple_of(row0, 8)

        acc = jnp.zeros((TM, Cout), jnp.float32)
        for k in range(K):
            lhs = x_ref[0, pl.ds(row0 + offsets[k], TM), :].astype(mm_dtype)
            acc = acc + jnp.dot(lhs, w_ref[k].astype(mm_dtype),
                                preferred_element_type=jnp.float32)
        acc = acc + b_ref[0].astype(jnp.float32)               # (1, Cout) bcast
        if res_mode == 1:
            acc = acc + r_ref[0].astype(jnp.float32)
        elif res_mode == 2:
            acc = acc + jnp.dot(r_ref[0].astype(mm_dtype),
                                rw_ref[...].astype(mm_dtype),
                                preferred_element_type=jnp.float32)
        if res_scale != 1.0:
            acc = acc * res_scale
        o_ref[0] = acc.astype(o_ref.dtype)

    return kernel


def _conv_slab(slab, meta, w, bias_img, *, res_slab=None, res_w=None,
               res_scale=1.0, out_dtype=jnp.float32, tile_target=256):
    """Conv over a prebuilt slab.  Returns (N, M, Cout) rows (junk cols included)."""
    N, Ltot, Cin = slab.shape
    Cout, _, kh, kw = w.shape
    K = kh * kw
    M, offsets = meta["M"], meta["offsets"]
    assert len(offsets) == K
    TM = _pick_tile(M, tile_target)        # v7x prefers 256-384; v5e/v6e up to ~512
    nT = M // TM

    mm = MXU_DTYPE if MXU_DTYPE is not None else jnp.float32
    slab_in = slab.astype(mm) if MXU_DTYPE is not None else slab
    wk = jnp.transpose(w, (2, 3, 1, 0)).reshape(K, Cin, Cout).astype(mm)
    bias3 = bias_img.astype(jnp.float32).reshape(N, 1, Cout)

    inputs = [slab_in, wk, bias3]
    in_specs = [
        pl.BlockSpec((1, Ltot, Cin), lambda n, t: (n, 0, 0)),   # resident per image
        pl.BlockSpec((K, Cin, Cout), lambda n, t: (0, 0, 0)),
        pl.BlockSpec((1, 1, Cout), lambda n, t: (n, 0, 0)),
    ]
    res_mode = 0
    if res_slab is not None:
        Cres = res_slab.shape[-1]
        inputs.append(res_slab)
        in_specs.append(pl.BlockSpec((1, TM, Cres), lambda n, t: (n, t, 0)))
        if res_w is not None:
            res_mode = 2
            inputs.append(res_w.astype(mm))
            in_specs.append(pl.BlockSpec(res_w.shape, lambda n, t: (0, 0)))
        else:
            res_mode = 1

    kernel = _make_conv_kernel(offsets, TM, Cout, res_mode, float(res_scale), mm)
    return pl.pallas_call(
        kernel,
        out_shape=jax.ShapeDtypeStruct((N, M, Cout), out_dtype),
        grid=(N, nT),
        in_specs=in_specs,
        out_specs=pl.BlockSpec((1, TM, Cout), lambda n, t: (n, t, 0)),
        compiler_params=_compiler_params("parallel", "parallel"),
    )(*inputs)


def conv2d(x, w, b=None, *, stride=1, padding=1, bias_per_image=None,
           tile_target=256):
    """Per-frame 2D conv (InflatedConv3d applied per frame), channels-last."""
    N, H, W, Cin = x.shape
    Cout = w.shape[0]
    slab, meta = _build_slab(x, w.shape[2], w.shape[3], stride, padding)
    if bias_per_image is None:
        bvec = jnp.zeros((Cout,), jnp.float32) if b is None else b.astype(jnp.float32)
        bias_per_image = jnp.broadcast_to(bvec[None, :], (N, Cout))
    out = _conv_slab(slab, meta, w, bias_per_image, out_dtype=x.dtype,
                     tile_target=tile_target)
    Ho, Wo, SW = meta["Ho"], meta["Wo"], meta["SW"]
    return out.reshape(N, Ho, SW, Cout)[:, :, :Wo, :]


# =============================================================================
# Pallas kernel 2: GroupNorm statistics -> per-channel (scale, shift).
# Row tiles accumulate per-channel sum / sum-of-squares into the resident
# output block ("arbitrary" axis); the final step converts them to group
# mean / var via small (C, G) and (G, C) matmuls (no C x C matrix) and emits
# scale = gamma * rsqrt(var + eps), shift = beta - mean * scale.
# =============================================================================
def _gn_stats_kernel(eps):
    def kernel(x_ref, ag_ref, bg_ref, g_ref, b_ref, o_ref):
        r = pl.program_id(1)
        xv = x_ref[0].astype(jnp.float32)                          # (TR, C)
        part = jnp.concatenate(
            [jnp.sum(xv, axis=0, keepdims=True),
             jnp.sum(xv * xv, axis=0, keepdims=True)], axis=0)     # (2, C)

        @pl.when(r == 0)
        def _():
            o_ref[0] = part

        @pl.when(r != 0)
        def _():
            o_ref[0] = o_ref[0] + part

        @pl.when(r == pl.num_programs(1) - 1)
        def _():
            sums = o_ref[0]                                        # (2, C)
            gm = jnp.dot(sums, ag_ref[...],
                         preferred_element_type=jnp.float32)       # (2, G) group means
            mc = jnp.dot(gm, bg_ref[...],
                         preferred_element_type=jnp.float32)       # (2, C) broadcast back
            mean, ex2 = mc[0:1, :], mc[1:2, :]
            var = jnp.maximum(ex2 - mean * mean, 0.0)              # clamp cancellation
            rstd = jax.lax.rsqrt(var + eps)
            scale = g_ref[...] * rstd
            shift = b_ref[...] - mean * scale
            o_ref[0] = jnp.concatenate([scale, shift], axis=0)

    return kernel


def groupnorm_stats(x, gamma, beta, groups, eps, *, row_tile=512):
    """x: (B, R, C) with R = F*H*W.  Returns (B, 2, C) fp32 [scale; shift]."""
    B, R, C = x.shape
    G, Cg = groups, C // groups
    gidx = jnp.arange(C) // Cg
    Ag = (gidx[:, None] == jnp.arange(G)[None, :]).astype(jnp.float32) / float(R * Cg)
    Bg = (jnp.arange(G)[:, None] == gidx[None, :]).astype(jnp.float32)
    gam = gamma.astype(jnp.float32).reshape(1, C)
    bet = beta.astype(jnp.float32).reshape(1, C)

    TR = _pick_tile(R, row_tile)
    nR = R // TR
    return pl.pallas_call(
        _gn_stats_kernel(float(eps)),
        out_shape=jax.ShapeDtypeStruct((B, 2, C), jnp.float32),
        grid=(B, nR),
        in_specs=[
            pl.BlockSpec((1, TR, C), lambda b, r: (b, r, 0)),
            pl.BlockSpec((C, G), lambda b, r: (0, 0)),
            pl.BlockSpec((G, C), lambda b, r: (0, 0)),
            pl.BlockSpec((1, C), lambda b, r: (0, 0)),
            pl.BlockSpec((1, C), lambda b, r: (0, 0)),
        ],
        out_specs=pl.BlockSpec((1, 2, C), lambda b, r: (b, 0, 0)),
        compiler_params=_compiler_params("parallel", "arbitrary"),
    )(x, Ag, Bg, gam, bet)


def _apply_gn_silu(x_cl, stats):
    """GN apply + SiLU (fused by XLA into the following conv slab construction)."""
    scale = stats[:, 0, :][:, None, None, None, :]
    shift = stats[:, 1, :][:, None, None, None, :]
    y = x_cl.astype(jnp.float32) * scale + shift
    return (y * jax.nn.sigmoid(y)).astype(x_cl.dtype)


# =============================================================================
# ResnetBlock3D / Downsample3D / DownBlock3D (channels-last glue).
# =============================================================================
def resnet_block_3d(h_cl, temb, p, groups, eps, output_scale_factor=1.0):
    """h_cl: (B, F, H, W, Cin).  Returns (B, F, H, W, Cout)."""
    B, F, H, W, Cin = h_cl.shape
    Cout = p["conv1_w"].shape[0]
    N, R = B * F, F * H * W

    # ---- norm1 (Pallas stats) + SiLU fused into conv1's slab build -----------
    stats1 = groupnorm_stats(h_cl.reshape(B, R, Cin), p["norm1_g"], p["norm1_b"],
                             groups, eps)
    y = _apply_gn_silu(h_cl, stats1).reshape(N, H, W, Cin)

    # temb: Linear(SiLU(temb)) folded into conv1's per-image bias (no extra pass).
    bias1 = p["conv1_b"].astype(jnp.float32)[None, :]
    if temb is not None:
        t = jax.nn.silu(temb.astype(jnp.float32))
        t = t @ p["time_w"].astype(jnp.float32).T + p["time_b"].astype(jnp.float32)
        bias1 = jnp.repeat(bias1 + t, F, axis=0)                 # (B*F, Cout)
    else:
        bias1 = jnp.broadcast_to(bias1, (N, Cout))

    slab1, meta1 = _build_slab(y, 3, 3, 1, 1)
    h1 = _conv_slab(slab1, meta1, p["conv1_w"], bias1, out_dtype=h_cl.dtype)
    h1 = h1.reshape(N, H, meta1["SW"], Cout)[:, :, :W, :]        # (N, H, W, Cout)

    # ---- norm2 + SiLU fused into conv2's slab build ---------------------------
    stats2 = groupnorm_stats(h1.reshape(B, R, Cout), p["norm2_g"], p["norm2_b"],
                             groups, eps)
    y2 = _apply_gn_silu(h1.reshape(B, F, H, W, Cout), stats2).reshape(N, H, W, Cout)
    # TODO(synk): nn.Dropout(p=0.0) in eval mode is the identity; omitted.

    # ---- conv2 with the residual (and optional 1x1 shortcut) fused in epilogue
    slab2, meta2 = _build_slab(y2, 3, 3, 1, 1)
    SW2, M2 = meta2["SW"], meta2["M"]
    xres = jnp.pad(h_cl.reshape(N, H, W, Cin),
                   ((0, 0), (0, 0), (0, SW2 - W), (0, 0))).reshape(N, M2, Cin)
    bias2 = p["conv2_b"].astype(jnp.float32)
    if "short_w" in p:
        res_w = p["short_w"].reshape(Cout, Cin).T                # (Cin, Cout)
        bias2 = bias2 + p["short_b"].astype(jnp.float32)
    else:
        res_w = None                                             # identity residual
    bias2 = jnp.broadcast_to(bias2[None, :], (N, Cout))

    out = _conv_slab(slab2, meta2, p["conv2_w"], bias2,
                     res_slab=xres, res_w=res_w,
                     res_scale=1.0 / output_scale_factor, out_dtype=h_cl.dtype)
    out = out.reshape(N, H, SW2, Cout)[:, :, :W, :]
    return out.reshape(B, F, H, W, Cout)


def downsample_3d(h_cl, w, b):
    B, F, H, W, C = h_cl.shape
    y = conv2d(h_cl.reshape(B * F, H, W, C), w, b, stride=2, padding=1)
    _, Ho, Wo, Cout = y.shape
    return y.reshape(B, F, Ho, Wo, Cout)


def down_block_3d(x, temb, params, *, groups, eps, output_scale_factor=1.0):
    """x: (B, C, F, H, W).  Returns (hidden_states, output_states) like PyTorch."""
    h = jnp.transpose(x, (0, 2, 3, 4, 1))                        # (B, F, H, W, C)
    output_states = ()
    for rp in params["resnets"]:
        h = resnet_block_3d(h, temb, rp, groups, eps, output_scale_factor)
        output_states += (jnp.transpose(h, (0, 4, 1, 2, 3)),)
    if params.get("down") is not None:
        h = downsample_3d(h, params["down"]["w"], params["down"]["b"])
        output_states += (jnp.transpose(h, (0, 4, 1, 2, 3)),)
    return output_states[-1], output_states


# =============================================================================
# Pure-JAX reference (numerical self-check).
# =============================================================================
def _ref_groupnorm_silu(x_cl, gamma, beta, groups, eps):
    B, F, H, W, C = x_cl.shape
    xg = x_cl.reshape(B, F * H * W, groups, C // groups).astype(jnp.float32)
    mean = xg.mean(axis=(1, 3), keepdims=True)
    var = jnp.mean((xg - mean) ** 2, axis=(1, 3), keepdims=True)
    y = ((xg - mean) / jnp.sqrt(var + eps)).reshape(B, F, H, W, C)
    y = y * gamma + beta
    return y * jax.nn.sigmoid(y)


def _ref_conv(x, w, b, stride, padding):
    out = jax.lax.conv_general_dilated(
        x.astype(jnp.float32), jnp.transpose(w, (2, 3, 1, 0)).astype(jnp.float32),
        window_strides=(stride, stride),
        padding=[(padding, padding), (padding, padding)],
        dimension_numbers=("NHWC", "HWIO", "NHWC"))
    return out + b


def _ref_resnet(h_cl, temb, p, groups, eps, osf=1.0):
    B, F, H, W, Cin = h_cl.shape
    Cout = p["conv1_w"].shape[0]
    y = _ref_groupnorm_silu(h_cl, p["norm1_g"], p["norm1_b"], groups, eps)
    y = _ref_conv(y.reshape(B * F, H, W, Cin), p["conv1_w"], p["conv1_b"], 1, 1)
    y = y.reshape(B, F, H, W, Cout)
    if temb is not None:
        t = jax.nn.silu(temb) @ p["time_w"].T + p["time_b"]
        y = y + t[:, None, None, None, :]
    y = _ref_groupnorm_silu(y, p["norm2_g"], p["norm2_b"], groups, eps)
    y = _ref_conv(y.reshape(B * F, H, W, Cout), p["conv2_w"], p["conv2_b"], 1, 1)
    if "short_w" in p:
        xs = _ref_conv(h_cl.reshape(B * F, H, W, Cin), p["short_w"],
                       p["short_b"], 1, 0)
    else:
        xs = h_cl.reshape(B * F, H, W, Cin)
    return ((xs + y) / osf).reshape(B, F, H, W, Cout)


def _ref_down_block(x, temb, params, *, groups, eps, output_scale_factor=1.0):
    h = jnp.transpose(x, (0, 2, 3, 4, 1))
    outs = ()
    for rp in params["resnets"]:
        h = _ref_resnet(h, temb, rp, groups, eps, output_scale_factor)
        outs += (jnp.transpose(h, (0, 4, 1, 2, 3)),)
    if params.get("down") is not None:
        B, F, H, W, C = h.shape
        y = _ref_conv(h.reshape(B * F, H, W, C), params["down"]["w"],
                      params["down"]["b"], 2, 1)
        h = y.reshape(B, F, (H + 2 - 3) // 2 + 1, (W + 2 - 3) // 2 + 1, C)
        outs += (jnp.transpose(h, (0, 4, 1, 2, 3)),)
    return outs[-1], outs


# =============================================================================
# Deterministic synthetic parameters (shapes match the PyTorch module).
# =============================================================================
def init_params(key, in_channels, out_channels, temb_channels, num_layers):
    params = {"resnets": []}
    for i in range(num_layers):
        cin = in_channels if i == 0 else out_channels
        key, *ks = jax.random.split(key, 13)
        rp = {
            "norm1_g": 1.0 + 0.1 * jax.random.normal(ks[0], (cin,), jnp.float32),
            "norm1_b": 0.1 * jax.random.normal(ks[1], (cin,), jnp.float32),
            "conv1_w": 0.05 * jax.random.normal(ks[2], (out_channels, cin, 3, 3), jnp.float32),
            "conv1_b": 0.05 * jax.random.normal(ks[3], (out_channels,), jnp.float32),
            "time_w": 0.05 * jax.random.normal(ks[4], (out_channels, temb_channels), jnp.float32),
            "time_b": 0.05 * jax.random.normal(ks[5], (out_channels,), jnp.float32),
            "norm2_g": 1.0 + 0.1 * jax.random.normal(ks[6], (out_channels,), jnp.float32),
            "norm2_b": 0.1 * jax.random.normal(ks[7], (out_channels,), jnp.float32),
            "conv2_w": 0.05 * jax.random.normal(ks[8], (out_channels, out_channels, 3, 3), jnp.float32),
            "conv2_b": 0.05 * jax.random.normal(ks[9], (out_channels,), jnp.float32),
        }
        if cin != out_channels:
            rp["short_w"] = 0.05 * jax.random.normal(ks[10], (out_channels, cin, 1, 1), jnp.float32)
            rp["short_b"] = 0.05 * jax.random.normal(ks[11], (out_channels,), jnp.float32)
        params["resnets"].append(rp)
    key, k1, k2 = jax.random.split(key, 3)
    params["down"] = {
        "w": 0.05 * jax.random.normal(k1, (out_channels, out_channels, 3, 3), jnp.float32),
        "b": 0.05 * jax.random.normal(k2, (out_channels,), jnp.float32),
    }
    return params


if __name__ == "__main__":
    B, Cin, Cout, Tch = 2, 8, 16, 32
    F, H, W = 4, 16, 16
    groups, num_layers = 4, 2          # layer0 has a 1x1 shortcut, layer1 is identity
    eps = 1e-6

    key = jax.random.PRNGKey(0)
    kx, kt, kp = jax.random.split(key, 3)
    hidden_states = jax.random.normal(kx, (B, Cin, F, H, W), jnp.float32)
    temb = jax.random.normal(kt, (B, Tch), jnp.float32)
    params = init_params(kp, Cin, Cout, Tch, num_layers)

    fwd = jax.jit(functools.partial(down_block_3d, groups=groups, eps=eps))
    hidden_out, output_states = fwd(hidden_states, temb, params)

    jax.block_until_ready(hidden_out)
    for s in output_states:
        jax.block_until_ready(s)

    assert len(output_states) == num_layers + 1
    assert hidden_out.shape == (B, Cout, F, H // 2, W // 2), hidden_out.shape
    assert output_states[0].shape == (B, Cout, F, H, W)
    assert output_states[-1].shape == (B, Cout, F, H // 2, W // 2)

    # Numerical self-check against a pure-JAX reference of the same module.
    ref_fwd = jax.jit(functools.partial(_ref_down_block, groups=groups, eps=eps))
    ref_out, ref_states = ref_fwd(hidden_states, temb, params)
    for got, want in zip(output_states, ref_states):
        err = float(jnp.max(jnp.abs(got - want)))
        assert err < 5e-4, f"max abs err {err}"

    print("KERNEL_OK")
</pallas_src>

<mosaic_0001>
module attributes {stable_mosaic.version = 11 : i64} {
  func.func @kernel(%arg0: i32, %arg1: i32, %arg2: memref<1x512x8xf32, #tpu.memory_space<vmem>>, %arg3: memref<8x4xf32, #tpu.memory_space<vmem>>, %arg4: memref<4x8xf32, #tpu.memory_space<vmem>>, %arg5: memref<1x8xf32, #tpu.memory_space<vmem>>, %arg6: memref<1x8xf32, #tpu.memory_space<vmem>>, %arg7: memref<1x2x8xf32, #tpu.memory_space<vmem>>) attributes {dimension_semantics = [#tpu.dimension_semantics<parallel>, #tpu.dimension_semantics<arbitrary>], iteration_bounds = array<i64: 2, 2>, scalar_prefetch = 0 : i64, scratch_operands = 0 : i64, tpu.core_type = #tpu.core_type<tc>, window_params = [{transform_indices = @transform_0, window_bounds = array<i64: 1, 512, 8>}, {pipeline_mode = #tpu.pipeline_mode<synchronous>, transform_indices = @transform_1, window_bounds = array<i64: 8, 4>}, {pipeline_mode = #tpu.pipeline_mode<synchronous>, transform_indices = @transform_2, window_bounds = array<i64: 4, 8>}, {pipeline_mode = #tpu.pipeline_mode<synchronous>, transform_indices = @transform_3, window_bounds = array<i64: 1, 8>}, {pipeline_mode = #tpu.pipeline_mode<synchronous>, transform_indices = @transform_4, window_bounds = array<i64: 1, 8>}, {transform_indices = @transform_5, window_bounds = array<i64: 1, 2, 8>}]} {
    %c0 = arith.constant 0 : index
    %c0_0 = arith.constant 0 : index
    %c0_1 = arith.constant 0 : index
    %0 = vector.load %arg2[%c0, %c0_0, %c0_1] : memref<1x512x8xf32, #tpu.memory_space<vmem>>, vector<1x512x8xf32>
    %1 = vector.shape_cast %0 : vector<1x512x8xf32> to vector<512x8xf32>
    %cst = arith.constant dense<0.000000e+00> : vector<8xf32>
    %2 = vector.multi_reduction <add>, %1, %cst [0] : vector<512x8xf32> to vector<8xf32>
    %3 = vector.shape_cast %2 : vector<8xf32> to vector<1x8xf32>
    %4 = arith.mulf %1, %1 : vector<512x8xf32>
    %cst_2 = arith.constant dense<0.000000e+00> : vector<8xf32>
    %5 = vector.multi_reduction <add>, %4, %cst_2 [0] : vector<512x8xf32> to vector<8xf32>
    %6 = vector.shape_cast %5 : vector<8xf32> to vector<1x8xf32>
    %7 = tpu.concatenate %3, %6 in 0 : vector<1x8xf32>, vector<1x8xf32> -> vector<2x8xf32>
    %c0_i32 = arith.constant 0 : i32
    %8 = arith.cmpi eq, %arg1, %c0_i32 : i32
    %9 = arith.extui %8 : i1 to i32
    %c0_i32_3 = arith.constant 0 : i32
    %10 = arith.cmpi ne, %9, %c0_i32_3 : i32
    scf.if %10 {
      %c0_7 = arith.constant 0 : index
      %c0_8 = arith.constant 0 : index
      %c0_9 = arith.constant 0 : index
      %17 = vector.load %arg7[%c0_7, %c0_8, %c0_9] : memref<1x2x8xf32, #tpu.memory_space<vmem>>, vector<1x2x8xf32>
      %18 = vector.shape_cast %17 : vector<1x2x8xf32> to vector<2x8xf32>
      %19 = vector.shape_cast %7 : vector<2x8xf32> to vector<1x2x8xf32>
      tpu.vector_store %arg7[%c0_7, %c0_8, %c0_9], %19 {strides = array<i32>} : memref<1x2x8xf32, #tpu.memory_space<vmem>>, vector<1x2x8xf32>,
    } else {
    }
    %c0_i32_4 = arith.constant 0 : i32
    %11 = arith.cmpi ne, %arg1, %c0_i32_4 : i32
    %12 = arith.extui %11 : i1 to i32
    %c0_i32_5 = arith.constant 0 : i32
    %13 = arith.cmpi ne, %12, %c0_i32_5 : i32
    scf.if %13 {
      %c0_7 = arith.constant 0 : index
      %c0_8 = arith.constant 0 : index
      %c0_9 = arith.constant 0 : index
      %17 = vector.load %arg7[%c0_7, %c0_8, %c0_9] : memref<1x2x8xf32, #tpu.memory_space<vmem>>, vector<1x2x8xf32>
      %18 = vector.shape_cast %17 : vector<1x2x8xf32> to vector<2x8xf32>
      %19 = arith.addf %18, %7 : vector<2x8xf32>
      %c0_10 = arith.constant 0 : index
      %c0_11 = arith.constant 0 : index
      %c0_12 = arith.constant 0 : index
      %20 = vector.load %arg7[%c0_10, %c0_11, %c0_12] : memref<1x2x8xf32, #tpu.memory_space<vmem>>, vector<1x2x8xf32>
      %21 = vector.shape_cast %20 : vector<1x2x8xf32> to vector<2x8xf32>
      %22 = vector.shape_cast %19 : vector<2x8xf32> to vector<1x2x8xf32>
      tpu.vector_store %arg7[%c0_10, %c0_11, %c0_12], %22 {strides = array<i32>} : memref<1x2x8xf32, #tpu.memory_space<vmem>>, vector<1x2x8xf32>,
    } else {
    }
    %c1_i32 = arith.constant 1 : i32
    %14 = arith.cmpi eq, %arg1, %c1_i32 : i32
    %15 = arith.extui %14 : i1 to i32
    %c0_i32_6 = arith.constant 0 : i32
    %16 = arith.cmpi ne, %15, %c0_i32_6 : i32
    scf.if %16 {
      %c0_7 = arith.constant 0 : index
      %c0_8 = arith.constant 0 : index
      %c0_9 = arith.constant 0 : index
      %17 = vector.load %arg7[%c0_7, %c0_8, %c0_9] : memref<1x2x8xf32, #tpu.memory_space<vmem>>, vector<1x2x8xf32>
      %18 = vector.shape_cast %17 : vector<1x2x8xf32> to vector<2x8xf32>
      %c0_10 = arith.constant 0 : index
      %c0_11 = arith.constant 0 : index
      %19 = vector.load %arg3[%c0_10, %c0_11] : memref<8x4xf32, #tpu.memory_space<vmem>>, vector<8x4xf32>
      %cst_12 = arith.constant dense<0.000000e+00> : vector<2x4xf32>
      %20 = tpu.matmul %18, %19, %cst_12 {dimension_numbers = #tpu.dot_dimension_numbers<[1], [0], [0], [1], [0, 0, 1, 1], [], []>} : vector<2x8xf32>, vector<8x4xf32>, vector<2x4xf32> -> vector<2x4xf32>
      %c0_13 = arith.constant 0 : index
      %c0_14 = arith.constant 0 : index
      %21 = vector.load %arg4[%c0_13, %c0_14] : memref<4x8xf32, #tpu.memory_space<vmem>>, vector<4x8xf32>
      %cst_15 = arith.constant dense<0.000000e+00> : vector<2x8xf32>
      %22 = tpu.matmul %20, %21, %cst_15 {dimension_numbers = #tpu.dot_dimension_numbers<[1], [0], [0], [1], [0, 0, 1, 1], [], []>} : vector<2x4xf32>, vector<4x8xf32>, vector<2x8xf32> -> vector<2x8xf32>
      %23 = vector.extract_strided_slice %22 {offsets = [0, 0], sizes = [1, 8], strides = [1, 1]} : vector<2x8xf32> to vector<1x8xf32>
      %24 = vector.extract_strided_slice %22 {offsets = [1, 0], sizes = [1, 8], strides = [1, 1]} : vector<2x8xf32> to vector<1x8xf32>
      %25 = arith.mulf %23, %23 : vector<1x8xf32>
      %26 = arith.subf %24, %25 : vector<1x8xf32>
      %cst_16 = arith.constant 0.000000e+00 : f32
      %27 = vector.broadcast %cst_16 : f32 to vector<1x8xf32>
      %28 = arith.maximumf %26, %27 : vector<1x8xf32>
      %cst_17 = arith.constant 9.99999997E-7 : f32
      %29 = vector.broadcast %cst_17 : f32 to vector<1x8xf32>
      %30 = arith.addf %28, %29 : vector<1x8xf32>
      %31 = math.rsqrt %30 : vector<1x8xf32>
      %c0_18 = arith.constant 0 : index
      %c0_19 = arith.constant 0 : index
      %32 = vector.load %arg5[%c0_18, %c0_19] : memref<1x8xf32, #tpu.memory_space<vmem>>, vector<1x8xf32>
      %33 = arith.mulf %32, %31 : vector<1x8xf32>
      %c0_20 = arith.constant 0 : index
      %c0_21 = arith.constant 0 : index
      %34 = vector.load %arg6[%c0_20, %c0_21] : memref<1x8xf32, #tpu.memory_space<vmem>>, vector<1x8xf32>
      %35 = arith.mulf %23, %33 : vector<1x8xf32>
      %36 = arith.subf %34, %35 : vector<1x8xf32>
      %37 = tpu.concatenate %33, %36 in 0 : vector<1x8xf32>, vector<1x8xf32> -> vector<2x8xf32>
      %c0_22 = arith.constant 0 : index
      %c0_23 = arith.constant 0 : index
      %c0_24 = arith.constant 0 : index
      %38 = vector.load %arg7[%c0_22, %c0_23, %c0_24] : memref<1x2x8xf32, #tpu.memory_space<vmem>>, vector<1x2x8xf32>
      %39 = vector.shape_cast %38 : vector<1x2x8xf32> to vector<2x8xf32>
      %40 = vector.shape_cast %37 : vector<2x8xf32> to vector<1x2x8xf32>
      tpu.vector_store %arg7[%c0_22, %c0_23, %c0_24], %40 {strides = array<i32>} : memref<1x2x8xf32, #tpu.memory_space<vmem>>, vector<1x2x8xf32>,
    } else {
    }
    return
  }
  func.func @transform_0(%arg0: i32, %arg1: i32) -> (i32, i32, i32) {
    %c0_i32 = arith.constant 0 : i32
    %c0_i32_0 = arith.constant 0 : i32
    return %arg0, %arg1, %c0_i32 : i32, i32, i32
  }
  func.func @transform_1(%arg0: i32, %arg1: i32) -> (i32, i32) {
    %c0_i32 = arith.constant 0 : i32
    %c0_i32_0 = arith.constant 0 : i32
    %c0_i32_1 = arith.constant 0 : i32
    return %c0_i32, %c0_i32_0 : i32, i32
  }
  func.func @transform_2(%arg0: i32, %arg1: i32) -> (i32, i32) {
    %c0_i32 = arith.constant 0 : i32
    %c0_i32_0 = arith.constant 0 : i32
    %c0_i32_1 = arith.constant 0 : i32
    return %c0_i32, %c0_i32_0 : i32, i32
  }
  func.func @transform_3(%arg0: i32, %arg1: i32) -> (i32, i32) {
    %c0_i32 = arith.constant 0 : i32
    %c0_i32_0 = arith.constant 0 : i32
    %c0_i32_1 = arith.constant 0 : i32
    return %c0_i32, %c0_i32_0 : i32, i32
  }
  func.func @transform_4(%arg0: i32, %arg1: i32) -> (i32, i32) {
    %c0_i32 = arith.constant 0 : i32
    %c0_i32_0 = arith.constant 0 : i32
    %c0_i32_1 = arith.constant 0 : i32
    return %c0_i32, %c0_i32_0 : i32, i32
  }
  func.func @transform_5(%arg0: i32, %arg1: i32) -> (i32, i32, i32) {
    %c0_i32 = arith.constant 0 : i32
    %c0_i32_0 = arith.constant 0 : i32
    %c0_i32_1 = arith.constant 0 : i32
    return %arg0, %c0_i32, %c0_i32_0 : i32, i32, i32
  }
}

module attributes {stable_mosaic.version = 11 : i64} {
  func.func @kernel(%arg0: i32, %arg1: i32, %arg2: memref<1x328x8xf32, #tpu.memory_space<vmem>>, %arg3: memref<9x8x16xf32, #tpu.memory_space<vmem>>, %arg4: memref<1x1x16xf32, #tpu.memory_space<vmem>>, %arg5: memref<1x144x16xf32, #tpu.memory_space<vmem>>) attributes {dimension_semantics = [#tpu.dimension_semantics<parallel>, #tpu.dimension_semantics<parallel>], iteration_bounds = array<i64: 8, 2>, scalar_prefetch = 0 : i64, scratch_operands = 0 : i64, tpu.core_type = #tpu.core_type<tc>, window_params = [{transform_indices = @transform_0, window_bounds = array<i64: 1, 328, 8>}, {pipeline_mode = #tpu.pipeline_mode<synchronous>, transform_indices = @transform_1, window_bounds = array<i64: 9, 8, 16>}, {transform_indices = @transform_2, window_bounds = array<i64: 1, 1, 16>}, {transform_indices = @transform_3, window_bounds = array<i64: 1, 144, 16>}]} {
    %c144_i32 = arith.constant 144 : i32
    %0 = arith.muli %arg1, %c144_i32 : i32
    %1 = tpu.assume_multiple %0, 8 : i32
    %cst = arith.constant 0.000000e+00 : f32
    %2 = vector.broadcast %cst : f32 to vector<144x16xf32>
    %c0_i32 = arith.constant 0 : i32
    %3 = arith.addi %1, %c0_i32 : i32
    %c0 = arith.constant 0 : index
    %4 = arith.index_cast %3 : i32 to index
    %c0_0 = arith.constant 0 : index
    %5 = vector.load %arg2[%c0, %4, %c0_0] : memref<1x328x8xf32, #tpu.memory_space<vmem>>, vector<1x144x8xf32>
    %6 = vector.shape_cast %5 : vector<1x144x8xf32> to vector<144x8xf32>
    %c0_1 = arith.constant 0 : index
    %c0_2 = arith.constant 0 : index
    %c0_3 = arith.constant 0 : index
    %7 = vector.load %arg3[%c0_1, %c0_2, %c0_3] : memref<9x8x16xf32, #tpu.memory_space<vmem>>, vector<1x8x16xf32>
    %8 = vector.shape_cast %7 : vector<1x8x16xf32> to vector<8x16xf32>
    %cst_4 = arith.constant dense<0.000000e+00> : vector<144x16xf32>
    %9 = tpu.matmul %6, %8, %cst_4 {dimension_numbers = #tpu.dot_dimension_numbers<[1], [0], [0], [1], [0, 0, 1, 1], [], []>} : vector<144x8xf32>, vector<8x16xf32>, vector<144x16xf32> -> vector<144x16xf32>
    %10 = arith.addf %2, %9 : vector<144x16xf32>
    %c1_i32 = arith.constant 1 : i32
    %11 = arith.addi %1, %c1_i32 : i32
    %c0_5 = arith.constant 0 : index
    %12 = arith.index_cast %11 : i32 to index
    %c0_6 = arith.constant 0 : index
    %13 = vector.load %arg2[%c0_5, %12, %c0_6] : memref<1x328x8xf32, #tpu.memory_space<vmem>>, vector<1x144x8xf32>
    %14 = vector.shape_cast %13 : vector<1x144x8xf32> to vector<144x8xf32>
    %c1 = arith.constant 1 : index
    %c0_7 = arith.constant 0 : index
    %c0_8 = arith.constant 0 : index
    %15 = vector.load %arg3[%c1, %c0_7, %c0_8] : memref<9x8x16xf32, #tpu.memory_space<vmem>>, vector<1x8x16xf32>
    %16 = vector.shape_cast %15 : vector<1x8x16xf32> to vector<8x16xf32>
    %cst_9 = arith.constant dense<0.000000e+00> : vector<144x16xf32>
    %17 = tpu.matmul %14, %16, %cst_9 {dimension_numbers = #tpu.dot_dimension_numbers<[1], [0], [0], [1], [0, 0, 1, 1], [], []>} : vector<144x8xf32>, vector<8x16xf32>, vector<144x16xf32> -> vector<144x16xf32>
    %18 = arith.addf %10, %17 : vector<144x16xf32>
    %c2_i32 = arith.constant 2 : i32
    %19 = arith.addi %1, %c2_i32 : i32
    %c0_10 = arith.constant 0 : index
    %20 = arith.index_cast %19 : i32 to index
    %c0_11 = arith.constant 0 : index
    %21 = vector.load %arg2[%c0_10, %20, %c0_11] : memref<1x328x8xf32, #tpu.memory_space<vmem>>, vector<1x144x8xf32>
    %22 = vector.shape_cast %21 : vector<1x144x8xf32> to vector<144x8xf32>
    %c2 = arith.constant 2 : index
    %c0_12 = arith.constant 0 : index
    %c0_13 = arith.constant 0 : index
    %23 = vector.load %arg3[%c2, %c0_12, %c0_13] : memref<9x8x16xf32, #tpu.memory_space<vmem>>, vector<1x8x16xf32>
    %24 = vector.shape_cast %23 : vector<1x8x16xf32> to vector<8x16xf32>
    %cst_14 = arith.constant dense<0.000000e+00> : vector<144x16xf32>
    %25 = tpu.matmul %22, %24, %cst_14 {dimension_numbers = #tpu.dot_dimension_numbers<[1], [0], [0], [1], [0, 0, 1, 1], [], []>} : vector<144x8xf32>, vector<8x16xf32>, vector<144x16xf32> -> vector<144x16xf32>
    %26 = arith.addf %18, %25 : vector<144x16xf32>
    %c18_i32 = arith.constant 18 : i32
    %27 = arith.addi %1, %c18_i32 : i32
    %c0_15 = arith.constant 0 : index
    %28 = arith.index_cast %27 : i32 to index
    %c0_16 = arith.constant 0 : index
    %29 = vector.load %arg2[%c0_15, %28, %c0_16] : memref<1x328x8xf32, #tpu.memory_space<vmem>>, vector<1x144x8xf32>
    %30 = vector.shape_cast %29 : vector<1x144x8xf32> to vector<144x8xf32>
    %c3 = arith.constant 3 : index
    %c0_17 = arith.constant 0 : index
    %c0_18 = arith.constant 0 : index
    %31 = vector.load %arg3[%c3, %c0_17, %c0_18] : memref<9x8x16xf32, #tpu.memory_space<vmem>>, vector<1x8x16xf32>
    %32 = vector.shape_cast %31 : vector<1x8x16xf32> to vector<8x16xf32>
    %cst_19 = arith.constant dense<0.000000e+00> : vector<144x16xf32>
    %33 = tpu.matmul %30, %32, %cst_19 {dimension_numbers = #tpu.dot_dimension_numbers<[1], [0], [0], [1], [0, 0, 1, 1], [], []>} : vector<144x8xf32>, vector<8x16xf32>, vector<144x16xf32> -> vector<144x16xf32>
    %34 = arith.addf %26, %33 : vector<144x16xf32>
    %c19_i32 = arith.constant 19 : i32
    %35 = arith.addi %1, %c19_i32 : i32
    %c0_20 = arith.constant 0 : index
    %36 = arith.index_cast %35 : i32 to index
    %c0_21 = arith.constant 0 : index
    %37 = vector.load %arg2[%c0_20, %36, %c0_21] : memref<1x328x8xf32, #tpu.memory_space<vmem>>, vector<1x144x8xf32>
    %38 = vector.shape_cast %37 : vector<1x144x8xf32> to vector<144x8xf32>
    %c4 = arith.constant 4 : index
    %c0_22 = arith.constant 0 : index
    %c0_23 = arith.constant 0 : index
    %39 = vector.load %arg3[%c4, %c0_22, %c0_23] : memref<9x8x16xf32, #tpu.memory_space<vmem>>, vector<1x8x16xf32>
    %40 = vector.shape_cast %39 : vector<1x8x16xf32> to vector<8x16xf32>
    %cst_24 = arith.constant dense<0.000000e+00> : vector<144x16xf32>
    %41 = tpu.matmul %38, %40, %cst_24 {dimension_numbers = #tpu.dot_dimension_numbers<[1], [0], [0], [1], [0, 0, 1, 1], [], []>} : vector<144x8xf32>, vector<8x16xf32>, vector<144x16xf32> -> vector<144x16xf32>
    %42 = arith.addf %34, %41 : vector<144x16xf32>
    %c20_i32 = arith.constant 20 : i32
    %43 = arith.addi %1, %c20_i32 : i32
    %c0_25 = arith.constant 0 : index
    %44 = arith.index_cast %43 : i32 to index
    %c0_26 = arith.constant 0 : index
    %45 = vector.load %arg2[%c0_25, %44, %c0_26] : memref<1x328x8xf32, #tpu.memory_space<vmem>>, vector<1x144x8xf32>
    %46 = vector.shape_cast %45 : vector<1x144x8xf32> to vector<144x8xf32>
    %c5 = arith.constant 5 : index
    %c0_27 = arith.constant 0 : index
    %c0_28 = arith.constant 0 : index
    %47 = vector.load %arg3[%c5, %c0_27, %c0_28] : memref<9x8x16xf32, #tpu.memory_space<vmem>>, vector<1x8x16xf32>
    %48 = vector.shape_cast %47 : vector<1x8x16xf32> to vector<8x16xf32>
    %cst_29 = arith.constant dense<0.000000e+00> : vector<144x16xf32>
    %49 = tpu.matmul %46, %48, %cst_29 {dimension_numbers = #tpu.dot_dimension_numbers<[1], [0], [0], [1], [0, 0, 1, 1], [], []>} : vector<144x8xf32>, vector<8x16xf32>, vector<144x16xf32> -> vector<144x16xf32>
    %50 = arith.addf %42, %49 : vector<144x16xf32>
    %c36_i32 = arith.constant 36 : i32
    %51 = arith.addi %1, %c36_i32 : i32
    %c0_30 = arith.constant 0 : index
    %52 = arith.index_cast %51 : i32 to index
    %c0_31 = arith.constant 0 : index
    %53 = vector.load %arg2[%c0_30, %52, %c0_31] : memref<1x328x8xf32, #tpu.memory_space<vmem>>, vector<1x144x8xf32>
    %54 = vector.shape_cast %53 : vector<1x144x8xf32> to vector<144x8xf32>
    %c6 = arith.constant 6 : index
    %c0_32 = arith.constant 0 : index
    %c0_33 = arith.constant 0 : index
    %55 = vector.load %arg3[%c6, %c0_32, %c0_33] : memref<9x8x16xf32, #tpu.memory_space<vmem>>, vector<1x8x16xf32>
    %56 = vector.shape_cast %55 : vector<1x8x16xf32> to vector<8x16xf32>
    %cst_34 = arith.constant dense<0.000000e+00> : vector<144x16xf32>
    %57 = tpu.matmul %54, %56, %cst_34 {dimension_numbers = #tpu.dot_dimension_numbers<[1], [0], [0], [1], [0, 0, 1, 1], [], []>} : vector<144x8xf32>, vector<8x16xf32>, vector<144x16xf32> -> vector<144x16xf32>
    %58 = arith.addf %50, %57 : vector<144x16xf32>
    %c37_i32 = arith.constant 37 : i32
    %59 = arith.addi %1, %c37_i32 : i32
    %c0_35 = arith.constant 0 : index
    %60 = arith.index_cast %59 : i32 to index
    %c0_36 = arith.constant 0 : index
    %61 = vector.load %arg2[%c0_35, %60, %c0_36] : memref<1x328x8xf32, #tpu.memory_space<vmem>>, vector<1x144x8xf32>
    %62 = vector.shape_cast %61 : vector<1x144x8xf32> to vector<144x8xf32>
    %c7 = arith.constant 7 : index
    %c0_37 = arith.constant 0 : index
    %c0_38 = arith.constant 0 : index
    %63 = vector.load %arg3[%c7, %c0_37, %c0_38] : memref<9x8x16xf32, #tpu.memory_space<vmem>>, vector<1x8x16xf32>
    %64 = vector.shape_cast %63 : vector<1x8x16xf32> to vector<8x16xf32>
    %cst_39 = arith.constant dense<0.000000e+00> : vector<144x16xf32>
    %65 = tpu.matmul %62, %64, %cst_39 {dimension_numbers = #tpu.dot_dimension_numbers<[1], [0], [0], [1], [0, 0, 1, 1], [], []>} : vector<144x8xf32>, vector<8x16xf32>, vector<144x16xf32> -> vector<144x16xf32>
    %66 = arith.addf %58, %65 : vector<144x16xf32>
    %c38_i32 = arith.constant 38 : i32
    %67 = arith.addi %1, %c38_i32 : i32
    %c0_40 = arith.constant 0 : index
    %68 = arith.index_cast %67 : i32 to index
    %c0_41 = arith.constant 0 : index
    %69 = vector.load %arg2[%c0_40, %68, %c0_41] : memref<1x328x8xf32, #tpu.memory_space<vmem>>, vector<1x144x8xf32>
    %70 = vector.shape_cast %69 : vector<1x144x8xf32> to vector<144x8xf32>
    %c8 = arith.constant 8 : index
    %c0_42 = arith.constant 0 : index
    %c0_43 = arith.constant 0 : index
    %71 = vector.load %arg3[%c8, %c0_42, %c0_43] : memref<9x8x16xf32, #tpu.memory_space<vmem>>, vector<1x8x16xf32>
    %72 = vector.shape_cast %71 : vector<1x8x16xf32> to vector<8x16xf32>
    %cst_44 = arith.constant dense<0.000000e+00> : vector<144x16xf32>
    %73 = tpu.matmul %70, %72, %cst_44 {dimension_numbers = #tpu.dot_dimension_numbers<[1], [0], [0], [1], [0, 0, 1, 1], [], []>} : vector<144x8xf32>, vector<8x16xf32>, vector<144x16xf32> -> vector<144x16xf32>
    %74 = arith.addf %66, %73 : vector<144x16xf32>
    %c0_45 = arith.constant 0 : index
    %c0_46 = arith.constant 0 : index
    %c0_47 = arith.constant 0 : index
    %75 = vector.load %arg4[%c0_45, %c0_46, %c0_47] : memref<1x1x16xf32, #tpu.memory_space<vmem>>, vector<1x1x16xf32>
    %76 = vector.shape_cast %75 : vector<1x1x16xf32> to vector<1x16xf32>
    %77 = vector.broadcast %76 : vector<1x16xf32> to vector<144x16xf32>
    %78 = arith.addf %74, %77 : vector<144x16xf32>
    %c0_48 = arith.constant 0 : index
    %c0_49 = arith.constant 0 : index
    %c0_50 = arith.constant 0 : index
    %79 = vector.load %arg5[%c0_48, %c0_49, %c0_50] : memref<1x144x16xf32, #tpu.memory_space<vmem>>, vector<1x144x16xf32>
    %80 = vector.shape_cast %79 : vector<1x144x16xf32> to vector<144x16xf32>
    %81 = vector.shape_cast %78 : vector<144x16xf32> to vector<1x144x16xf32>
    tpu.vector_store %arg5[%c0_48, %c0_49, %c0_50], %81 {strides = array<i32>} : memref<1x144x16xf32, #tpu.memory_space<vmem>>, vector<1x144x16xf32>,
    return
  }
  func.func @transform_0(%arg0: i32, %arg1: i32) -> (i32, i32, i32) {
    %c0_i32 = arith.constant 0 : i32
    %c0_i32_0 = arith.constant 0 : i32
    %c0_i32_1 = arith.constant 0 : i32
    return %arg0, %c0_i32, %c0_i32_0 : i32, i32, i32
  }
  func.func @transform_1(%arg0: i32, %arg1: i32) -> (i32, i32, i32) {
    %c0_i32 = arith.constant 0 : i32
    %c0_i32_0 = arith.constant 0 : i32
    %c0_i32_1 = arith.constant 0 : i32
    %c0_i32_2 = arith.constant 0 : i32
    return %c0_i32, %c0_i32_0, %c0_i32_1 : i32, i32, i32
  }
  func.func @transform_2(%arg0: i32, %arg1: i32) -> (i32, i32, i32) {
    %c0_i32 = arith.constant 0 : i32
    %c0_i32_0 = arith.constant 0 : i32
    %c0_i32_1 = arith.constant 0 : i32
    return %arg0, %c0_i32, %c0_i32_0 : i32, i32, i32
  }
  func.func @transform_3(%arg0: i32, %arg1: i32) -> (i32, i32, i32) {
    %c0_i32 = arith.constant 0 : i32
    %c0_i32_0 = arith.constant 0 : i32
    return %arg0, %arg1, %c0_i32 : i32, i32, i32
  }
}

module attributes {stable_mosaic.version = 11 : i64} {
  func.func @kernel(%arg0: i32, %arg1: i32, %arg2: memref<1x512x16xf32, #tpu.memory_space<vmem>>, %arg3: memref<16x4xf32, #tpu.memory_space<vmem>>, %arg4: memref<4x16xf32, #tpu.memory_space<vmem>>, %arg5: memref<1x16xf32, #tpu.memory_space<vmem>>, %arg6: memref<1x16xf32, #tpu.memory_space<vmem>>, %arg7: memref<1x2x16xf32, #tpu.memory_space<vmem>>) attributes {dimension_semantics = [#tpu.dimension_semantics<parallel>, #tpu.dimension_semantics<arbitrary>], iteration_bounds = array<i64: 2, 2>, scalar_prefetch = 0 : i64, scratch_operands = 0 : i64, tpu.core_type = #tpu.core_type<tc>, window_params = [{transform_indices = @transform_0, window_bounds = array<i64: 1, 512, 16>}, {pipeline_mode = #tpu.pipeline_mode<synchronous>, transform_indices = @transform_1, window_bounds = array<i64: 16, 4>}, {pipeline_mode = #tpu.pipeline_mode<synchronous>, transform_indices = @transform_2, window_bounds = array<i64: 4, 16>}, {pipeline_mode = #tpu.pipeline_mode<synchronous>, transform_indices = @transform_3, window_bounds = array<i64: 1, 16>}, {pipeline_mode = #tpu.pipeline_mode<synchronous>, transform_indices = @transform_4, window_bounds = array<i64: 1, 16>}, {transform_indices = @transform_5, window_bounds = array<i64: 1, 2, 16>}]} {
    %c0 = arith.constant 0 : index
    %c0_0 = arith.constant 0 : index
    %c0_1 = arith.constant 0 : index
    %0 = vector.load %arg2[%c0, %c0_0, %c0_1] : memref<1x512x16xf32, #tpu.memory_space<vmem>>, vector<1x512x16xf32>
    %1 = vector.shape_cast %0 : vector<1x512x16xf32> to vector<512x16xf32>
    %cst = arith.constant dense<0.000000e+00> : vector<16xf32>
    %2 = vector.multi_reduction <add>, %1, %cst [0] : vector<512x16xf32> to vector<16xf32>
    %3 = vector.shape_cast %2 : vector<16xf32> to vector<1x16xf32>
    %4 = arith.mulf %1, %1 : vector<512x16xf32>
    %cst_2 = arith.constant dense<0.000000e+00> : vector<16xf32>
    %5 = vector.multi_reduction <add>, %4, %cst_2 [0] : vector<512x16xf32> to vector<16xf32>
    %6 = vector.shape_cast %5 : vector<16xf32> to vector<1x16xf32>
    %7 = tpu.concatenate %3, %6 in 0 : vector<1x16xf32>, vector<1x16xf32> -> vector<2x16xf32>
    %c0_i32 = arith.constant 0 : i32
    %8 = arith.cmpi eq, %arg1, %c0_i32 : i32
    %9 = arith.extui %8 : i1 to i32
    %c0_i32_3 = arith.constant 0 : i32
    %10 = arith.cmpi ne, %9, %c0_i32_3 : i32
    scf.if %10 {
      %c0_7 = arith.constant 0 : index
      %c0_8 = arith.constant 0 : index
      %c0_9 = arith.constant 0 : index
      %17 = vector.load %arg7[%c0_7, %c0_8, %c0_9] : memref<1x2x16xf32, #tpu.memory_space<vmem>>, vector<1x2x16xf32>
      %18 = vector.shape_cast %17 : vector<1x2x16xf32> to vector<2x16xf32>
      %19 = vector.shape_cast %7 : vector<2x16xf32> to vector<1x2x16xf32>
      tpu.vector_store %arg7[%c0_7, %c0_8, %c0_9], %19 {strides = array<i32>} : memref<1x2x16xf32, #tpu.memory_space<vmem>>, vector<1x2x16xf32>,
    } else {
    }
    %c0_i32_4 = arith.constant 0 : i32
    %11 = arith.cmpi ne, %arg1, %c0_i32_4 : i32
    %12 = arith.extui %11 : i1 to i32
    %c0_i32_5 = arith.constant 0 : i32
    %13 = arith.cmpi ne, %12, %c0_i32_5 : i32
    scf.if %13 {
      %c0_7 = arith.constant 0 : index
      %c0_8 = arith.constant 0 : index
      %c0_9 = arith.constant 0 : index
      %17 = vector.load %arg7[%c0_7, %c0_8, %c0_9] : memref<1x2x16xf32, #tpu.memory_space<vmem>>, vector<1x2x16xf32>
      %18 = vector.shape_cast %17 : vector<1x2x16xf32> to vector<2x16xf32>
      %19 = arith.addf %18, %7 : vector<2x16xf32>
      %c0_10 = arith.constant 0 : index
      %c0_11 = arith.constant 0 : index
      %c0_12 = arith.constant 0 : index
      %20 = vector.load %arg7[%c0_10, %c0_11, %c0_12] : memref<1x2x16xf32, #tpu.memory_space<vmem>>, vector<1x2x16xf32>
      %21 = vector.shape_cast %20 : vector<1x2x16xf32> to vector<2x16xf32>
      %22 = vector.shape_cast %19 : vector<2x16xf32> to vector<1x2x16xf32>
      tpu.vector_store %arg7[%c0_10, %c0_11, %c0_12], %22 {strides = array<i32>} : memref<1x2x16xf32, #tpu.memory_space<vmem>>, vector<1x2x16xf32>,
    } else {
    }
    %c1_i32 = arith.constant 1 : i32
    %14 = arith.cmpi eq, %arg1, %c1_i32 : i32
    %15 = arith.extui %14 : i1 to i32
    %c0_i32_6 = arith.constant 0 : i32
    %16 = arith.cmpi ne, %15, %c0_i32_6 : i32
    scf.if %16 {
      %c0_7 = arith.constant 0 : index
      %c0_8 = arith.constant 0 : index
      %c0_9 = arith.constant 0 : index
      %17 = vector.load %arg7[%c0_7, %c0_8, %c0_9] : memref<1x2x16xf32, #tpu.memory_space<vmem>>, vector<1x2x16xf32>
      %18 = vector.shape_cast %17 : vector<1x2x16xf32> to vector<2x16xf32>
      %c0_10 = arith.constant 0 : index
      %c0_11 = arith.constant 0 : index
      %19 = vector.load %arg3[%c0_10, %c0_11] : memref<16x4xf32, #tpu.memory_space<vmem>>, vector<16x4xf32>
      %cst_12 = arith.constant dense<0.000000e+00> : vector<2x4xf32>
      %20 = tpu.matmul %18, %19, %cst_12 {dimension_numbers = #tpu.dot_dimension_numbers<[1], [0], [0], [1], [0, 0, 1, 1], [], []>} : vector<2x16xf32>, vector<16x4xf32>, vector<2x4xf32> -> vector<2x4xf32>
      %c0_13 = arith.constant 0 : index
      %c0_14 = arith.constant 0 : index
      %21 = vector.load %arg4[%c0_13, %c0_14] : memref<4x16xf32, #tpu.memory_space<vmem>>, vector<4x16xf32>
      %cst_15 = arith.constant dense<0.000000e+00> : vector<2x16xf32>
      %22 = tpu.matmul %20, %21, %cst_15 {dimension_numbers = #tpu.dot_dimension_numbers<[1], [0], [0], [1], [0, 0, 1, 1], [], []>} : vector<2x4xf32>, vector<4x16xf32>, vector<2x16xf32> -> vector<2x16xf32>
      %23 = vector.extract_strided_slice %22 {offsets = [0, 0], sizes = [1, 16], strides = [1, 1]} : vector<2x16xf32> to vector<1x16xf32>
      %24 = vector.extract_strided_slice %22 {offsets = [1, 0], sizes = [1, 16], strides = [1, 1]} : vector<2x16xf32> to vector<1x16xf32>
      %25 = arith.mulf %23, %23 : vector<1x16xf32>
      %26 = arith.subf %24, %25 : vector<1x16xf32>
      %cst_16 = arith.constant 0.000000e+00 : f32
      %27 = vector.broadcast %cst_16 : f32 to vector<1x16xf32>
      %28 = arith.maximumf %26, %27 : vector<1x16xf32>
      %cst_17 = arith.constant 9.99999997E-7 : f32
      %29 = vector.broadcast %cst_17 : f32 to vector<1x16xf32>
      %30 = arith.addf %28, %29 : vector<1x16xf32>
      %31 = math.rsqrt %30 : vector<1x16xf32>
      %c0_18 = arith.constant 0 : index
      %c0_19 = arith.constant 0 : index
      %32 = vector.load %arg5[%c0_18, %c0_19] : memref<1x16xf32, #tpu.memory_space<vmem>>, vector<1x16xf32>
      %33 = arith.mulf %32, %31 : vector<1x16xf32>
      %c0_20 = arith.constant 0 : index
      %c0_21 = arith.constant 0 : index
      %34 = vector.load %arg6[%c0_20, %c0_21] : memref<1x16xf32, #tpu.memory_space<vmem>>, vector<1x16xf32>
      %35 = arith.mulf %23, %33 : vector<1x16xf32>
      %36 = arith.subf %34, %35 : vector<1x16xf32>
      %37 = tpu.concatenate %33, %36 in 0 : vector<1x16xf32>, vector<1x16xf32> -> vector<2x16xf32>
      %c0_22 = arith.constant 0 : index
      %c0_23 = arith.constant 0 : index
      %c0_24 = arith.constant 0 : index
      %38 = vector.load %arg7[%c0_22, %c0_23, %c0_24] : memref<1x2x16xf32, #tpu.memory_space<vmem>>, vector<1x2x16xf32>
      %39 = vector.shape_cast %38 : vector<1x2x16xf32> to vector<2x16xf32>
      %40 = vector.shape_cast %37 : vector<2x16xf32> to vector<1x2x16xf32>
      tpu.vector_store %arg7[%c0_22, %c0_23, %c0_24], %40 {strides = array<i32>} : memref<1x2x16xf32, #tpu.memory_space<vmem>>, vector<1x2x16xf32>,
    } else {
    }
    return
  }
  func.func @transform_0(%arg0: i32, %arg1: i32) -> (i32, i32, i32) {
    %c0_i32 = arith.constant 0 : i32
    %c0_i32_0 = arith.constant 0 : i32
    return %arg0, %arg1, %c0_i32 : i32, i32, i32
  }
  func.func @transform_1(%arg0: i32, %arg1: i32) -> (i32, i32) {
    %c0_i32 = arith.constant 0 : i32
    %c0_i32_0 = arith.constant 0 : i32
    %c0_i32_1 = arith.constant 0 : i32
    return %c0_i32, %c0_i32_0 : i32, i32
  }
  func.func @transform_2(%arg0: i32, %arg1: i32) -> (i32, i32) {
    %c0_i32 = arith.constant 0 : i32
    %c0_i32_0 = arith.constant 0 : i32
    %c0_i32_1 = arith.constant 0 : i32
    return %c0_i32, %c0_i32_0 : i32, i32
  }
  func.func @transform_3(%arg0: i32, %arg1: i32) -> (i32, i32) {
    %c0_i32 = arith.constant 0 : i32
    %c0_i32_0 = arith.constant 0 : i32
    %c0_i32_1 = arith.constant 0 : i32
    return %c0_i32, %c0_i32_0 : i32, i32
  }
  func.func @transform_4(%arg0: i32, %arg1: i32) -> (i32, i32) {
    %c0_i32 = arith.constant 0 : i32
    %c0_i32_0 = arith.constant 0 : i32
    %c0_i32_1 = arith.constant 0 : i32
    return %c0_i32, %c0_i32_0 : i32, i32
  }
  func.func @transform_5(%arg0: i32, %arg1: i32) -> (i32, i32, i32) {
    %c0_i32 = arith.constant 0 : i32
    %c0_i32_0 = arith.constant 0 : i32
    %c0_i32_1 = arith.constant 0 : i32
    return %arg0, %c0_i32, %c0_i32_0 : i32, i32, i32
  }
}

module attributes {stable_mosaic.version = 11 : i64} {
  func.func @kernel(%arg0: i32, %arg1: i32, %arg2: memref<1x328x16xf32, #tpu.memory_space<vmem>>, %arg3: memref<9x16x16xf32, #tpu.memory_space<vmem>>, %arg4: memref<1x1x16xf32, #tpu.memory_space<vmem>>, %arg5: memref<1x144x8xf32, #tpu.memory_space<vmem>>, %arg6: memref<8x16xf32, #tpu.memory_space<vmem>>, %arg7: memref<1x144x16xf32, #tpu.memory_space<vmem>>) attributes {dimension_semantics = [#tpu.dimension_semantics<parallel>, #tpu.dimension_semantics<parallel>], iteration_bounds = array<i64: 8, 2>, scalar_prefetch = 0 : i64, scratch_operands = 0 : i64, tpu.core_type = #tpu.core_type<tc>, window_params = [{transform_indices = @transform_0, window_bounds = array<i64: 1, 328, 16>}, {pipeline_mode = #tpu.pipeline_mode<synchronous>, transform_indices = @transform_1, window_bounds = array<i64: 9, 16, 16>}, {transform_indices = @transform_2, window_bounds = array<i64: 1, 1, 16>}, {transform_indices = @transform_3, window_bounds = array<i64: 1, 144, 8>}, {pipeline_mode = #tpu.pipeline_mode<synchronous>, transform_indices = @transform_4, window_bounds = array<i64: 8, 16>}, {transform_indices = @transform_5, window_bounds = array<i64: 1, 144, 16>}]} {
    %c144_i32 = arith.constant 144 : i32
    %0 = arith.muli %arg1, %c144_i32 : i32
    %1 = tpu.assume_multiple %0, 8 : i32
    %cst = arith.constant 0.000000e+00 : f32
    %2 = vector.broadcast %cst : f32 to vector<144x16xf32>
    %c0_i32 = arith.constant 0 : i32
    %3 = arith.addi %1, %c0_i32 : i32
    %c0 = arith.constant 0 : index
    %4 = arith.index_cast %3 : i32 to index
    %c0_0 = arith.constant 0 : index
    %5 = vector.load %arg2[%c0, %4, %c0_0] : memref<1x328x16xf32, #tpu.memory_space<vmem>>, vector<1x144x16xf32>
    %6 = vector.shape_cast %5 : vector<1x144x16xf32> to vector<144x16xf32>
    %c0_1 = arith.constant 0 : index
    %c0_2 = arith.constant 0 : index
    %c0_3 = arith.constant 0 : index
    %7 = vector.load %arg3[%c0_1, %c0_2, %c0_3] : memref<9x16x16xf32, #tpu.memory_space<vmem>>, vector<1x16x16xf32>
    %8 = vector.shape_cast %7 : vector<1x16x16xf32> to vector<16x16xf32>
    %cst_4 = arith.constant dense<0.000000e+00> : vector<144x16xf32>
    %9 = tpu.matmul %6, %8, %cst_4 {dimension_numbers = #tpu.dot_dimension_numbers<[1], [0], [0], [1], [0, 0, 1, 1], [], []>} : vector<144x16xf32>, vector<16x16xf32>, vector<144x16xf32> -> vector<144x16xf32>
    %10 = arith.addf %2, %9 : vector<144x16xf32>
    %c1_i32 = arith.constant 1 : i32
    %11 = arith.addi %1, %c1_i32 : i32
    %c0_5 = arith.constant 0 : index
    %12 = arith.index_cast %11 : i32 to index
    %c0_6 = arith.constant 0 : index
    %13 = vector.load %arg2[%c0_5, %12, %c0_6] : memref<1x328x16xf32, #tpu.memory_space<vmem>>, vector<1x144x16xf32>
    %14 = vector.shape_cast %13 : vector<1x144x16xf32> to vector<144x16xf32>
    %c1 = arith.constant 1 : index
    %c0_7 = arith.constant 0 : index
    %c0_8 = arith.constant 0 : index
    %15 = vector.load %arg3[%c1, %c0_7, %c0_8] : memref<9x16x16xf32, #tpu.memory_space<vmem>>, vector<1x16x16xf32>
    %16 = vector.shape_cast %15 : vector<1x16x16xf32> to vector<16x16xf32>
    %cst_9 = arith.constant dense<0.000000e+00> : vector<144x16xf32>
    %17 = tpu.matmul %14, %16, %cst_9 {dimension_numbers = #tpu.dot_dimension_numbers<[1], [0], [0], [1], [0, 0, 1, 1], [], []>} : vector<144x16xf32>, vector<16x16xf32>, vector<144x16xf32> -> vector<144x16xf32>
    %18 = arith.addf %10, %17 : vector<144x16xf32>
    %c2_i32 = arith.constant 2 : i32
    %19 = arith.addi %1, %c2_i32 : i32
    %c0_10 = arith.constant 0 : index
    %20 = arith.index_cast %19 : i32 to index
    %c0_11 = arith.constant 0 : index
    %21 = vector.load %arg2[%c0_10, %20, %c0_11] : memref<1x328x16xf32, #tpu.memory_space<vmem>>, vector<1x144x16xf32>
    %22 = vector.shape_cast %21 : vector<1x144x16xf32> to vector<144x16xf32>
    %c2 = arith.constant 2 : index
    %c0_12 = arith.constant 0 : index
    %c0_13 = arith.constant 0 : index
    %23 = vector.load %arg3[%c2, %c0_12, %c0_13] : memref<9x16x16xf32, #tpu.memory_space<vmem>>, vector<1x16x16xf32>
    %24 = vector.shape_cast %23 : vector<1x16x16xf32> to vector<16x16xf32>
    %cst_14 = arith.constant dense<0.000000e+00> : vector<144x16xf32>
    %25 = tpu.matmul %22, %24, %cst_14 {dimension_numbers = #tpu.dot_dimension_numbers<[1], [0], [0], [1], [0, 0, 1, 1], [], []>} : vector<144x16xf32>, vector<16x16xf32>, vector<144x16xf32> -> vector<144x16xf32>
    %26 = arith.addf %18, %25 : vector<144x16xf32>
    %c18_i32 = arith.constant 18 : i32
    %27 = arith.addi %1, %c18_i32 : i32
    %c0_15 = arith.constant 0 : index
    %28 = arith.index_cast %27 : i32 to index
    %c0_16 = arith.constant 0 : index
    %29 = vector.load %arg2[%c0_15, %28, %c0_16] : memref<1x328x16xf32, #tpu.memory_space<vmem>>, vector<1x144x16xf32>
    %30 = vector.shape_cast %29 : vector<1x144x16xf32> to vector<144x16xf32>
    %c3 = arith.constant 3 : index
    %c0_17 = arith.constant 0 : index
    %c0_18 = arith.constant 0 : index
    %31 = vector.load %arg3[%c3, %c0_17, %c0_18] : memref<9x16x16xf32, #tpu.memory_space<vmem>>, vector<1x16x16xf32>
    %32 = vector.shape_cast %31 : vector<1x16x16xf32> to vector<16x16xf32>
    %cst_19 = arith.constant dense<0.000000e+00> : vector<144x16xf32>
    %33 = tpu.matmul %30, %32, %cst_19 {dimension_numbers = #tpu.dot_dimension_numbers<[1], [0], [0], [1], [0, 0, 1, 1], [], []>} : vector<144x16xf32>, vector<16x16xf32>, vector<144x16xf32> -> vector<144x16xf32>
    %34 = arith.addf %26, %33 : vector<144x16xf32>
    %c19_i32 = arith.constant 19 : i32
    %35 = arith.addi %1, %c19_i32 : i32
    %c0_20 = arith.constant 0 : index
    %36 = arith.index_cast %35 : i32 to index
    %c0_21 = arith.constant 0 : index
    %37 = vector.load %arg2[%c0_20, %36, %c0_21] : memref<1x328x16xf32, #tpu.memory_space<vmem>>, vector<1x144x16xf32>
    %38 = vector.shape_cast %37 : vector<1x144x16xf32> to vector<144x16xf32>
    %c4 = arith.constant 4 : index
    %c0_22 = arith.constant 0 : index
    %c0_23 = arith.constant 0 : index
    %39 = vector.load %arg3[%c4, %c0_22, %c0_23] : memref<9x16x16xf32, #tpu.memory_space<vmem>>, vector<1x16x16xf32>
    %40 = vector.shape_cast %39 : vector<1x16x16xf32> to vector<16x16xf32>
    %cst_24 = arith.constant dense<0.000000e+00> : vector<144x16xf32>
    %41 = tpu.matmul %38, %40, %cst_24 {dimension_numbers = #tpu.dot_dimension_numbers<[1], [0], [0], [1], [0, 0, 1, 1], [], []>} : vector<144x16xf32>, vector<16x16xf32>, vector<144x16xf32> -> vector<144x16xf32>
    %42 = arith.addf %34, %41 : vector<144x16xf32>
    %c20_i32 = arith.constant 20 : i32
    %43 = arith.addi %1, %c20_i32 : i32
    %c0_25 = arith.constant 0 : index
    %44 = arith.index_cast %43 : i32 to index
    %c0_26 = arith.constant 0 : index
    %45 = vector.load %arg2[%c0_25, %44, %c0_26] : memref<1x328x16xf32, #tpu.memory_space<vmem>>, vector<1x144x16xf32>
    %46 = vector.shape_cast %45 : vector<1x144x16xf32> to vector<144x16xf32>
    %c5 = arith.constant 5 : index
    %c0_27 = arith.constant 0 : index
    %c0_28 = arith.constant 0 : index
    %47 = vector.load %arg3[%c5, %c0_27, %c0_28] : memref<9x16x16xf32, #tpu.memory_space<vmem>>, vector<1x16x16xf32>
    %48 = vector.shape_cast %47 : vector<1x16x16xf32> to vector<16x16xf32>
    %cst_29 = arith.constant dense<0.000000e+00> : vector<144x16xf32>
    %49 = tpu.matmul %46, %48, %cst_29 {dimension_numbers = #tpu.dot_dimension_numbers<[1], [0], [0], [1], [0, 0, 1, 1], [], []>} : vector<144x16xf32>, vector<16x16xf32>, vector<144x16xf32> -> vector<144x16xf32>
    %50 = arith.addf %42, %49 : vector<144x16xf32>
    %c36_i32 = arith.constant 36 : i32
    %51 = arith.addi %1, %c36_i32 : i32
    %c0_30 = arith.constant 0 : index
    %52 = arith.index_cast %51 : i32 to index
    %c0_31 = arith.constant 0 : index
    %53 = vector.load %arg2[%c0_30, %52, %c0_31] : memref<1x328x16xf32, #tpu.memory_space<vmem>>, vector<1x144x16xf32>
    %54 = vector.shape_cast %53 : vector<1x144x16xf32> to vector<144x16xf32>
    %c6 = arith.constant 6 : index
    %c0_32 = arith.constant 0 : index
    %c0_33 = arith.constant 0 : index
    %55 = vector.load %arg3[%c6, %c0_32, %c0_33] : memref<9x16x16xf32, #tpu.memory_space<vmem>>, vector<1x16x16xf32>
    %56 = vector.shape_cast %55 : vector<1x16x16xf32> to vector<16x16xf32>
    %cst_34 = arith.constant dense<0.000000e+00> : vector<144x16xf32>
    %57 = tpu.matmul %54, %56, %cst_34 {dimension_numbers = #tpu.dot_dimension_numbers<[1], [0], [0], [1], [0, 0, 1, 1], [], []>} : vector<144x16xf32>, vector<16x16xf32>, vector<144x16xf32> -> vector<144x16xf32>
    %58 = arith.addf %50, %57 : vector<144x16xf32>
    %c37_i32 = arith.constant 37 : i32
    %59 = arith.addi %1, %c37_i32 : i32
    %c0_35 = arith.constant 0 : index
    %60 = arith.index_cast %59 : i32 to index
    %c0_36 = arith.constant 0 : index
    %61 = vector.load %arg2[%c0_35, %60, %c0_36] : memref<1x328x16xf32, #tpu.memory_space<vmem>>, vector<1x144x16xf32>
    %62 = vector.shape_cast %61 : vector<1x144x16xf32> to vector<144x16xf32>
    %c7 = arith.constant 7 : index
    %c0_37 = arith.constant 0 : index
    %c0_38 = arith.constant 0 : index
    %63 = vector.load %arg3[%c7, %c0_37, %c0_38] : memref<9x16x16xf32, #tpu.memory_space<vmem>>, vector<1x16x16xf32>
    %64 = vector.shape_cast %63 : vector<1x16x16xf32> to vector<16x16xf32>
    %cst_39 = arith.constant dense<0.000000e+00> : vector<144x16xf32>
    %65 = tpu.matmul %62, %64, %cst_39 {dimension_numbers = #tpu.dot_dimension_numbers<[1], [0], [0], [1], [0, 0, 1, 1], [], []>} : vector<144x16xf32>, vector<16x16xf32>, vector<144x16xf32> -> vector<144x16xf32>
    %66 = arith.addf %58, %65 : vector<144x16xf32>
    %c38_i32 = arith.constant 38 : i32
    %67 = arith.addi %1, %c38_i32 : i32
    %c0_40 = arith.constant 0 : index
    %68 = arith.index_cast %67 : i32 to index
    %c0_41 = arith.constant 0 : index
    %69 = vector.load %arg2[%c0_40, %68, %c0_41] : memref<1x328x16xf32, #tpu.memory_space<vmem>>, vector<1x144x16xf32>
    %70 = vector.shape_cast %69 : vector<1x144x16xf32> to vector<144x16xf32>
    %c8 = arith.constant 8 : index
    %c0_42 = arith.constant 0 : index
    %c0_43 = arith.constant 0 : index
    %71 = vector.load %arg3[%c8, %c0_42, %c0_43] : memref<9x16x16xf32, #tpu.memory_space<vmem>>, vector<1x16x16xf32>
    %72 = vector.shape_cast %71 : vector<1x16x16xf32> to vector<16x16xf32>
    %cst_44 = arith.constant dense<0.000000e+00> : vector<144x16xf32>
    %73 = tpu.matmul %70, %72, %cst_44 {dimension_numbers = #tpu.dot_dimension_numbers<[1], [0], [0], [1], [0, 0, 1, 1], [], []>} : vector<144x16xf32>, vector<16x16xf32>, vector<144x16xf32> -> vector<144x16xf32>
    %74 = arith.addf %66, %73 : vector<144x16xf32>
    %c0_45 = arith.constant 0 : index
    %c0_46 = arith.constant 0 : index
    %c0_47 = arith.constant 0 : index
    %75 = vector.load %arg4[%c0_45, %c0_46, %c0_47] : memref<1x1x16xf32, #tpu.memory_space<vmem>>, vector<1x1x16xf32>
    %76 = vector.shape_cast %75 : vector<1x1x16xf32> to vector<1x16xf32>
    %77 = vector.broadcast %76 : vector<1x16xf32> to vector<144x16xf32>
    %78 = arith.addf %74, %77 : vector<144x16xf32>
    %c0_48 = arith.constant 0 : index
    %c0_49 = arith.constant 0 : index
    %c0_50 = arith.constant 0 : index
    %79 = vector.load %arg5[%c0_48, %c0_49, %c0_50] : memref<1x144x8xf32, #tpu.memory_space<vmem>>, vector<1x144x8xf32>
    %80 = vector.shape_cast %79 : vector<1x144x8xf32> to vector<144x8xf32>
    %c0_51 = arith.constant 0 : index
    %c0_52 = arith.constant 0 : index
    %81 = vector.load %arg6[%c0_51, %c0_52] : memref<8x16xf32, #tpu.memory_space<vmem>>, vector<8x16xf32>
    %cst_53 = arith.constant dense<0.000000e+00> : vector<144x16xf32>
    %82 = tpu.matmul %80, %81, %cst_53 {dimension_numbers = #tpu.dot_dimension_numbers<[1], [0], [0], [1], [0, 0, 1, 1], [], []>} : vector<144x8xf32>, vector<8x16xf32>, vector<144x16xf32> -> vector<144x16xf32>
    %83 = arith.addf %78, %82 : vector<144x16xf32>
    %c0_54 = arith.constant 0 : index
    %c0_55 = arith.constant 0 : index
    %c0_56 = arith.constant 0 : index
    %84 = vector.load %arg7[%c0_54, %c0_55, %c0_56] : memref<1x144x16xf32, #tpu.memory_space<vmem>>, vector<1x144x16xf32>
    %85 = vector.shape_cast %84 : vector<1x144x16xf32> to vector<144x16xf32>
    %86 = vector.shape_cast %83 : vector<144x16xf32> to vector<1x144x16xf32>
    tpu.vector_store %arg7[%c0_54, %c0_55, %c0_56], %86 {strides = array<i32>} : memref<1x144x16xf32, #tpu.memory_space<vmem>>, vector<1x144x16xf32>,
    return
  }
  func.func @transform_0(%arg0: i32, %arg1: i32) -> (i32, i32, i32) {
    %c0_i32 = arith.constant 0 : i32
    %c0_i32_0 = arith.constant 0 : i32
    %c0_i32_1 = arith.constant 0 : i32
    return %arg0, %c0_i32, %c0_i32_0 : i32, i32, i32
  }
  func.func @transform_1(%arg0: i32, %arg1: i32) -> (i32, i32, i32) {
    %c0_i32 = arith.constant 0 : i32
    %c0_i32_0 = arith.constant 0 : i32
    %c0_i32_1 = arith.constant 0 : i32
    %c0_i32_2 = arith.constant 0 : i32
    return %c0_i32, %c0_i32_0, %c0_i32_1 : i32, i32, i32
  }
  func.func @transform_2(%arg0: i32, %arg1: i32) -> (i32, i32, i32) {
    %c0_i32 = arith.constant 0 : i32
    %c0_i32_0 = arith.constant 0 : i32
    %c0_i32_1 = arith.constant 0 : i32
    return %arg0, %c0_i32, %c0_i32_0 : i32, i32, i32
  }
  func.func @transform_3(%arg0: i32, %arg1: i32) -> (i32, i32, i32) {
    %c0_i32 = arith.constant 0 : i32
    %c0_i32_0 = arith.constant 0 : i32
    return %arg0, %arg1, %c0_i32 : i32, i32, i32
  }
  func.func @transform_4(%arg0: i32, %arg1: i32) -> (i32, i32) {
    %c0_i32 = arith.constant 0 : i32
    %c0_i32_0 = arith.constant 0 : i32
    %c0_i32_1 = arith.constant 0 : i32
    return %c0_i32, %c0_i32_0 : i32, i32
  }
  func.func @transform_5(%arg0: i32, %arg1: i32) -> (i32, i32, i32) {
    %c0_i32 = arith.constant 0 : i32
    %c0_i32_0 = arith.constant 0 : i32
    return %arg0, %arg1, %c0_i32 : i32, i32, i32
  }
}

module attributes {stable_mosaic.version = 11 : i64} {
  func.func @kernel(%arg0: i32, %arg1: i32, %arg2: memref<1x328x16xf32, #tpu.memory_space<vmem>>, %arg3: memref<9x16x16xf32, #tpu.memory_space<vmem>>, %arg4: memref<1x1x16xf32, #tpu.memory_space<vmem>>, %arg5: memref<1x144x16xf32, #tpu.memory_space<vmem>>) attributes {dimension_semantics = [#tpu.dimension_semantics<parallel>, #tpu.dimension_semantics<parallel>], iteration_bounds = array<i64: 8, 2>, scalar_prefetch = 0 : i64, scratch_operands = 0 : i64, tpu.core_type = #tpu.core_type<tc>, window_params = [{transform_indices = @transform_0, window_bounds = array<i64: 1, 328, 16>}, {pipeline_mode = #tpu.pipeline_mode<synchronous>, transform_indices = @transform_1, window_bounds = array<i64: 9, 16, 16>}, {transform_indices = @transform_2, window_bounds = array<i64: 1, 1, 16>}, {transform_indices = @transform_3, window_bounds = array<i64: 1, 144, 16>}]} {
    %c144_i32 = arith.constant 144 : i32
    %0 = arith.muli %arg1, %c144_i32 : i32
    %1 = tpu.assume_multiple %0, 8 : i32
    %cst = arith.constant 0.000000e+00 : f32
    %2 = vector.broadcast %cst : f32 to vector<144x16xf32>
    %c0_i32 = arith.constant 0 : i32
    %3 = arith.addi %1, %c0_i32 : i32
    %c0 = arith.constant 0 : index
    %4 = arith.index_cast %3 : i32 to index
    %c0_0 = arith.constant 0 : index
    %5 = vector.load %arg2[%c0, %4, %c0_0] : memref<1x328x16xf32, #tpu.memory_space<vmem>>, vector<1x144x16xf32>
    %6 = vector.shape_cast %5 : vector<1x144x16xf32> to vector<144x16xf32>
    %c0_1 = arith.constant 0 : index
    %c0_2 = arith.constant 0 : index
    %c0_3 = arith.constant 0 : index
    %7 = vector.load %arg3[%c0_1, %c0_2, %c0_3] : memref<9x16x16xf32, #tpu.memory_space<vmem>>, vector<1x16x16xf32>
    %8 = vector.shape_cast %7 : vector<1x16x16xf32> to vector<16x16xf32>
    %cst_4 = arith.constant dense<0.000000e+00> : vector<144x16xf32>
    %9 = tpu.matmul %6, %8, %cst_4 {dimension_numbers = #tpu.dot_dimension_numbers<[1], [0], [0], [1], [0, 0, 1, 1], [], []>} : vector<144x16xf32>, vector<16x16xf32>, vector<144x16xf32> -> vector<144x16xf32>
    %10 = arith.addf %2, %9 : vector<144x16xf32>
    %c1_i32 = arith.constant 1 : i32
    %11 = arith.addi %1, %c1_i32 : i32
    %c0_5 = arith.constant 0 : index
    %12 = arith.index_cast %11 : i32 to index
    %c0_6 = arith.constant 0 : index
    %13 = vector.load %arg2[%c0_5, %12, %c0_6] : memref<1x328x16xf32, #tpu.memory_space<vmem>>, vector<1x144x16xf32>
    %14 = vector.shape_cast %13 : vector<1x144x16xf32> to vector<144x16xf32>
    %c1 = arith.constant 1 : index
    %c0_7 = arith.constant 0 : index
    %c0_8 = arith.constant 0 : index
    %15 = vector.load %arg3[%c1, %c0_7, %c0_8] : memref<9x16x16xf32, #tpu.memory_space<vmem>>, vector<1x16x16xf32>
    %16 = vector.shape_cast %15 : vector<1x16x16xf32> to vector<16x16xf32>
    %cst_9 = arith.constant dense<0.000000e+00> : vector<144x16xf32>
    %17 = tpu.matmul %14, %16, %cst_9 {dimension_numbers = #tpu.dot_dimension_numbers<[1], [0], [0], [1], [0, 0, 1, 1], [], []>} : vector<144x16xf32>, vector<16x16xf32>, vector<144x16xf32> -> vector<144x16xf32>
    %18 = arith.addf %10, %17 : vector<144x16xf32>
    %c2_i32 = arith.constant 2 : i32
    %19 = arith.addi %1, %c2_i32 : i32
    %c0_10 = arith.constant 0 : index
    %20 = arith.index_cast %19 : i32 to index
    %c0_11 = arith.constant 0 : index
    %21 = vector.load %arg2[%c0_10, %20, %c0_11] : memref<1x328x16xf32, #tpu.memory_space<vmem>>, vector<1x144x16xf32>
    %22 = vector.shape_cast %21 : vector<1x144x16xf32> to vector<144x16xf32>
    %c2 = arith.constant 2 : index
    %c0_12 = arith.constant 0 : index
    %c0_13 = arith.constant 0 : index
    %23 = vector.load %arg3[%c2, %c0_12, %c0_13] : memref<9x16x16xf32, #tpu.memory_space<vmem>>, vector<1x16x16xf32>
    %24 = vector.shape_cast %23 : vector<1x16x16xf32> to vector<16x16xf32>
    %cst_14 = arith.constant dense<0.000000e+00> : vector<144x16xf32>
    %25 = tpu.matmul %22, %24, %cst_14 {dimension_numbers = #tpu.dot_dimension_numbers<[1], [0], [0], [1], [0, 0, 1, 1], [], []>} : vector<144x16xf32>, vector<16x16xf32>, vector<144x16xf32> -> vector<144x16xf32>
    %26 = arith.addf %18, %25 : vector<144x16xf32>
    %c18_i32 = arith.constant 18 : i32
    %27 = arith.addi %1, %c18_i32 : i32
    %c0_15 = arith.constant 0 : index
    %28 = arith.index_cast %27 : i32 to index
    %c0_16 = arith.constant 0 : index
    %29 = vector.load %arg2[%c0_15, %28, %c0_16] : memref<1x328x16xf32, #tpu.memory_space<vmem>>, vector<1x144x16xf32>
    %30 = vector.shape_cast %29 : vector<1x144x16xf32> to vector<144x16xf32>
    %c3 = arith.constant 3 : index
    %c0_17 = arith.constant 0 : index
    %c0_18 = arith.constant 0 : index
    %31 = vector.load %arg3[%c3, %c0_17, %c0_18] : memref<9x16x16xf32, #tpu.memory_space<vmem>>, vector<1x16x16xf32>
    %32 = vector.shape_cast %31 : vector<1x16x16xf32> to vector<16x16xf32>
    %cst_19 = arith.constant dense<0.000000e+00> : vector<144x16xf32>
    %33 = tpu.matmul %30, %32, %cst_19 {dimension_numbers = #tpu.dot_dimension_numbers<[1], [0], [0], [1], [0, 0, 1, 1], [], []>} : vector<144x16xf32>, vector<16x16xf32>, vector<144x16xf32> -> vector<144x16xf32>
    %34 = arith.addf %26, %33 : vector<144x16xf32>
    %c19_i32 = arith.constant 19 : i32
    %35 = arith.addi %1, %c19_i32 : i32
    %c0_20 = arith.constant 0 : index
    %36 = arith.index_cast %35 : i32 to index
    %c0_21 = arith.constant 0 : index
    %37 = vector.load %arg2[%c0_20, %36, %c0_21] : memref<1x328x16xf32, #tpu.memory_space<vmem>>, vector<1x144x16xf32>
    %38 = vector.shape_cast %37 : vector<1x144x16xf32> to vector<144x16xf32>
    %c4 = arith.constant 4 : index
    %c0_22 = arith.constant 0 : index
    %c0_23 = arith.constant 0 : index
    %39 = vector.load %arg3[%c4, %c0_22, %c0_23] : memref<9x16x16xf32, #tpu.memory_space<vmem>>, vector<1x16x16xf32>
    %40 = vector.shape_cast %39 : vector<1x16x16xf32> to vector<16x16xf32>
    %cst_24 = arith.constant dense<0.000000e+00> : vector<144x16xf32>
    %41 = tpu.matmul %38, %40, %cst_24 {dimension_numbers = #tpu.dot_dimension_numbers<[1], [0], [0], [1], [0, 0, 1, 1], [], []>} : vector<144x16xf32>, vector<16x16xf32>, vector<144x16xf32> -> vector<144x16xf32>
    %42 = arith.addf %34, %41 : vector<144x16xf32>
    %c20_i32 = arith.constant 20 : i32
    %43 = arith.addi %1, %c20_i32 : i32
    %c0_25 = arith.constant 0 : index
    %44 = arith.index_cast %43 : i32 to index
    %c0_26 = arith.constant 0 : index
    %45 = vector.load %arg2[%c0_25, %44, %c0_26] : memref<1x328x16xf32, #tpu.memory_space<vmem>>, vector<1x144x16xf32>
    %46 = vector.shape_cast %45 : vector<1x144x16xf32> to vector<144x16xf32>
    %c5 = arith.constant 5 : index
    %c0_27 = arith.constant 0 : index
    %c0_28 = arith.constant 0 : index
    %47 = vector.load %arg3[%c5, %c0_27, %c0_28] : memref<9x16x16xf32, #tpu.memory_space<vmem>>, vector<1x16x16xf32>
    %48 = vector.shape_cast %47 : vector<1x16x16xf32> to vector<16x16xf32>
    %cst_29 = arith.constant dense<0.000000e+00> : vector<144x16xf32>
    %49 = tpu.matmul %46, %48, %cst_29 {dimension_numbers = #tpu.dot_dimension_numbers<[1], [0], [0], [1], [0, 0, 1, 1], [], []>} : vector<144x16xf32>, vector<16x16xf32>, vector<144x16xf32> -> vector<144x16xf32>
    %50 = arith.addf %42, %49 : vector<144x16xf32>
    %c36_i32 = arith.constant 36 : i32
    %51 = arith.addi %1, %c36_i32 : i32
    %c0_30 = arith.constant 0 : index
    %52 = arith.index_cast %51 : i32 to index
    %c0_31 = arith.constant 0 : index
    %53 = vector.load %arg2[%c0_30, %52, %c0_31] : memref<1x328x16xf32, #tpu.memory_space<vmem>>, vector<1x144x16xf32>
    %54 = vector.shape_cast %53 : vector<1x144x16xf32> to vector<144x16xf32>
    %c6 = arith.constant 6 : index
    %c0_32 = arith.constant 0 : index
    %c0_33 = arith.constant 0 : index
    %55 = vector.load %arg3[%c6, %c0_32, %c0_33] : memref<9x16x16xf32, #tpu.memory_space<vmem>>, vector<1x16x16xf32>
    %56 = vector.shape_cast %55 : vector<1x16x16xf32> to vector<16x16xf32>
    %cst_34 = arith.constant dense<0.000000e+00> : vector<144x16xf32>
    %57 = tpu.matmul %54, %56, %cst_34 {dimension_numbers = #tpu.dot_dimension_numbers<[1], [0], [0], [1], [0, 0, 1, 1], [], []>} : vector<144x16xf32>, vector<16x16xf32>, vector<144x16xf32> -> vector<144x16xf32>
    %58 = arith.addf %50, %57 : vector<144x16xf32>
    %c37_i32 = arith.constant 37 : i32
    %59 = arith.addi %1, %c37_i32 : i32
    %c0_35 = arith.constant 0 : index
    %60 = arith.index_cast %59 : i32 to index
    %c0_36 = arith.constant 0 : index
    %61 = vector.load %arg2[%c0_35, %60, %c0_36] : memref<1x328x16xf32, #tpu.memory_space<vmem>>, vector<1x144x16xf32>
    %62 = vector.shape_cast %61 : vector<1x144x16xf32> to vector<144x16xf32>
    %c7 = arith.constant 7 : index
    %c0_37 = arith.constant 0 : index
    %c0_38 = arith.constant 0 : index
    %63 = vector.load %arg3[%c7, %c0_37, %c0_38] : memref<9x16x16xf32, #tpu.memory_space<vmem>>, vector<1x16x16xf32>
    %64 = vector.shape_cast %63 : vector<1x16x16xf32> to vector<16x16xf32>
    %cst_39 = arith.constant dense<0.000000e+00> : vector<144x16xf32>
    %65 = tpu.matmul %62, %64, %cst_39 {dimension_numbers = #tpu.dot_dimension_numbers<[1], [0], [0], [1], [0, 0, 1, 1], [], []>} : vector<144x16xf32>, vector<16x16xf32>, vector<144x16xf32> -> vector<144x16xf32>
    %66 = arith.addf %58, %65 : vector<144x16xf32>
    %c38_i32 = arith.constant 38 : i32
    %67 = arith.addi %1, %c38_i32 : i32
    %c0_40 = arith.constant 0 : index
    %68 = arith.index_cast %67 : i32 to index
    %c0_41 = arith.constant 0 : index
    %69 = vector.load %arg2[%c0_40, %68, %c0_41] : memref<1x328x16xf32, #tpu.memory_space<vmem>>, vector<1x144x16xf32>
    %70 = vector.shape_cast %69 : vector<1x144x16xf32> to vector<144x16xf32>
    %c8 = arith.constant 8 : index
    %c0_42 = arith.constant 0 : index
    %c0_43 = arith.constant 0 : index
    %71 = vector.load %arg3[%c8, %c0_42, %c0_43] : memref<9x16x16xf32, #tpu.memory_space<vmem>>, vector<1x16x16xf32>
    %72 = vector.shape_cast %71 : vector<1x16x16xf32> to vector<16x16xf32>
    %cst_44 = arith.constant dense<0.000000e+00> : vector<144x16xf32>
    %73 = tpu.matmul %70, %72, %cst_44 {dimension_numbers = #tpu.dot_dimension_numbers<[1], [0], [0], [1], [0, 0, 1, 1], [], []>} : vector<144x16xf32>, vector<16x16xf32>, vector<144x16xf32> -> vector<144x16xf32>
    %74 = arith.addf %66, %73 : vector<144x16xf32>
    %c0_45 = arith.constant 0 : index
    %c0_46 = arith.constant 0 : index
    %c0_47 = arith.constant 0 : index
    %75 = vector.load %arg4[%c0_45, %c0_46, %c0_47] : memref<1x1x16xf32, #tpu.memory_space<vmem>>, vector<1x1x16xf32>
    %76 = vector.shape_cast %75 : vector<1x1x16xf32> to vector<1x16xf32>
    %77 = vector.broadcast %76 : vector<1x16xf32> to vector<144x16xf32>
    %78 = arith.addf %74, %77 : vector<144x16xf32>
    %c0_48 = arith.constant 0 : index
    %c0_49 = arith.constant 0 : index
    %c0_50 = arith.constant 0 : index
    %79 = vector.load %arg5[%c0_48, %c0_49, %c0_50] : memref<1x144x16xf32, #tpu.memory_space<vmem>>, vector<1x144x16xf32>
    %80 = vector.shape_cast %79 : vector<1x144x16xf32> to vector<144x16xf32>
    %81 = vector.shape_cast %78 : vector<144x16xf32> to vector<1x144x16xf32>
    tpu.vector_store %arg5[%c0_48, %c0_49, %c0_50], %81 {strides = array<i32>} : memref<1x144x16xf32, #tpu.memory_space<vmem>>, vector<1x144x16xf32>,
    return
  }
  func.func @transform_0(%arg0: i32, %arg1: i32) -> (i32, i32, i32) {
    %c0_i32 = arith.constant 0 : i32
    %c0_i32_0 = arith.constant 0 : i32
    %c0_i32_1 = arith.constant 0 : i32
    return %arg0, %c0_i32, %c0_i32_0 : i32, i32, i32
  }
  func.func @transform_1(%arg0: i32, %arg1: i32) -> (i32, i32, i32) {
    %c0_i32 = arith.constant 0 : i32
    %c0_i32_0 = arith.constant 0 : i32
    %c0_i32_1 = arith.constant 0 : i32
    %c0_i32_2 = arith.constant 0 : i32
    return %c0_i32, %c0_i32_0, %c0_i32_1 : i32, i32, i32
  }
  func.func @transform_2(%arg0: i32, %arg1: i32) -> (i32, i32, i32) {
    %c0_i32 = arith.constant 0 : i32
    %c0_i32_0 = arith.constant 0 : i32
    %c0_i32_1 = arith.constant 0 : i32
    return %arg0, %c0_i32, %c0_i32_0 : i32, i32, i32
  }
  func.func @transform_3(%arg0: i32, %arg1: i32) -> (i32, i32, i32) {
    %c0_i32 = arith.constant 0 : i32
    %c0_i32_0 = arith.constant 0 : i32
    return %arg0, %arg1, %c0_i32 : i32, i32, i32
  }
}

module attributes {stable_mosaic.version = 11 : i64} {
  func.func @kernel(%arg0: i32, %arg1: i32, %arg2: memref<1x328x16xf32, #tpu.memory_space<vmem>>, %arg3: memref<9x16x16xf32, #tpu.memory_space<vmem>>, %arg4: memref<1x1x16xf32, #tpu.memory_space<vmem>>, %arg5: memref<1x144x16xf32, #tpu.memory_space<vmem>>, %arg6: memref<1x144x16xf32, #tpu.memory_space<vmem>>) attributes {dimension_semantics = [#tpu.dimension_semantics<parallel>, #tpu.dimension_semantics<parallel>], iteration_bounds = array<i64: 8, 2>, scalar_prefetch = 0 : i64, scratch_operands = 0 : i64, tpu.core_type = #tpu.core_type<tc>, window_params = [{transform_indices = @transform_0, window_bounds = array<i64: 1, 328, 16>}, {pipeline_mode = #tpu.pipeline_mode<synchronous>, transform_indices = @transform_1, window_bounds = array<i64: 9, 16, 16>}, {transform_indices = @transform_2, window_bounds = array<i64: 1, 1, 16>}, {transform_indices = @transform_3, window_bounds = array<i64: 1, 144, 16>}, {transform_indices = @transform_4, window_bounds = array<i64: 1, 144, 16>}]} {
    %c144_i32 = arith.constant 144 : i32
    %0 = arith.muli %arg1, %c144_i32 : i32
    %1 = tpu.assume_multiple %0, 8 : i32
    %cst = arith.constant 0.000000e+00 : f32
    %2 = vector.broadcast %cst : f32 to vector<144x16xf32>
    %c0_i32 = arith.constant 0 : i32
    %3 = arith.addi %1, %c0_i32 : i32
    %c0 = arith.constant 0 : index
    %4 = arith.index_cast %3 : i32 to index
    %c0_0 = arith.constant 0 : index
    %5 = vector.load %arg2[%c0, %4, %c0_0] : memref<1x328x16xf32, #tpu.memory_space<vmem>>, vector<1x144x16xf32>
    %6 = vector.shape_cast %5 : vector<1x144x16xf32> to vector<144x16xf32>
    %c0_1 = arith.constant 0 : index
    %c0_2 = arith.constant 0 : index
    %c0_3 = arith.constant 0 : index
    %7 = vector.load %arg3[%c0_1, %c0_2, %c0_3] : memref<9x16x16xf32, #tpu.memory_space<vmem>>, vector<1x16x16xf32>
    %8 = vector.shape_cast %7 : vector<1x16x16xf32> to vector<16x16xf32>
    %cst_4 = arith.constant dense<0.000000e+00> : vector<144x16xf32>
    %9 = tpu.matmul %6, %8, %cst_4 {dimension_numbers = #tpu.dot_dimension_numbers<[1], [0], [0], [1], [0, 0, 1, 1], [], []>} : vector<144x16xf32>, vector<16x16xf32>, vector<144x16xf32> -> vector<144x16xf32>
    %10 = arith.addf %2, %9 : vector<144x16xf32>
    %c1_i32 = arith.constant 1 : i32
    %11 = arith.addi %1, %c1_i32 : i32
    %c0_5 = arith.constant 0 : index
    %12 = arith.index_cast %11 : i32 to index
    %c0_6 = arith.constant 0 : index
    %13 = vector.load %arg2[%c0_5, %12, %c0_6] : memref<1x328x16xf32, #tpu.memory_space<vmem>>, vector<1x144x16xf32>
    %14 = vector.shape_cast %13 : vector<1x144x16xf32> to vector<144x16xf32>
    %c1 = arith.constant 1 : index
    %c0_7 = arith.constant 0 : index
    %c0_8 = arith.constant 0 : index
    %15 = vector.load %arg3[%c1, %c0_7, %c0_8] : memref<9x16x16xf32, #tpu.memory_space<vmem>>, vector<1x16x16xf32>
    %16 = vector.shape_cast %15 : vector<1x16x16xf32> to vector<16x16xf32>
    %cst_9 = arith.constant dense<0.000000e+00> : vector<144x16xf32>
    %17 = tpu.matmul %14, %16, %cst_9 {dimension_numbers = #tpu.dot_dimension_numbers<[1], [0], [0], [1], [0, 0, 1, 1], [], []>} : vector<144x16xf32>, vector<16x16xf32>, vector<144x16xf32> -> vector<144x16xf32>
    %18 = arith.addf %10, %17 : vector<144x16xf32>
    %c2_i32 = arith.constant 2 : i32
    %19 = arith.addi %1, %c2_i32 : i32
    %c0_10 = arith.constant 0 : index
    %20 = arith.index_cast %19 : i32 to index
    %c0_11 = arith.constant 0 : index
    %21 = vector.load %arg2[%c0_10, %20, %c0_11] : memref<1x328x16xf32, #tpu.memory_space<vmem>>, vector<1x144x16xf32>
    %22 = vector.shape_cast %21 : vector<1x144x16xf32> to vector<144x16xf32>
    %c2 = arith.constant 2 : index
    %c0_12 = arith.constant 0 : index
    %c0_13 = arith.constant 0 : index
    %23 = vector.load %arg3[%c2, %c0_12, %c0_13] : memref<9x16x16xf32, #tpu.memory_space<vmem>>, vector<1x16x16xf32>
    %24 = vector.shape_cast %23 : vector<1x16x16xf32> to vector<16x16xf32>
    %cst_14 = arith.constant dense<0.000000e+00> : vector<144x16xf32>
    %25 = tpu.matmul %22, %24, %cst_14 {dimension_numbers = #tpu.dot_dimension_numbers<[1], [0], [0], [1], [0, 0, 1, 1], [], []>} : vector<144x16xf32>, vector<16x16xf32>, vector<144x16xf32> -> vector<144x16xf32>
    %26 = arith.addf %18, %25 : vector<144x16xf32>
    %c18_i32 = arith.constant 18 : i32
    %27 = arith.addi %1, %c18_i32 : i32
    %c0_15 = arith.constant 0 : index
    %28 = arith.index_cast %27 : i32 to index
    %c0_16 = arith.constant 0 : index
    %29 = vector.load %arg2[%c0_15, %28, %c0_16] : memref<1x328x16xf32, #tpu.memory_space<vmem>>, vector<1x144x16xf32>
    %30 = vector.shape_cast %29 : vector<1x144x16xf32> to vector<144x16xf32>
    %c3 = arith.constant 3 : index
    %c0_17 = arith.constant 0 : index
    %c0_18 = arith.constant 0 : index
    %31 = vector.load %arg3[%c3, %c0_17, %c0_18] : memref<9x16x16xf32, #tpu.memory_space<vmem>>, vector<1x16x16xf32>
    %32 = vector.shape_cast %31 : vector<1x16x16xf32> to vector<16x16xf32>
    %cst_19 = arith.constant dense<0.000000e+00> : vector<144x16xf32>
    %33 = tpu.matmul %30, %32, %cst_19 {dimension_numbers = #tpu.dot_dimension_numbers<[1], [0], [0], [1], [0, 0, 1, 1], [], []>} : vector<144x16xf32>, vector<16x16xf32>, vector<144x16xf32> -> vector<144x16xf32>
    %34 = arith.addf %26, %33 : vector<144x16xf32>
    %c19_i32 = arith.constant 19 : i32
    %35 = arith.addi %1, %c19_i32 : i32
    %c0_20 = arith.constant 0 : index
    %36 = arith.index_cast %35 : i32 to index
    %c0_21 = arith.constant 0 : index
    %37 = vector.load %arg2[%c0_20, %36, %c0_21] : memref<1x328x16xf32, #tpu.memory_space<vmem>>, vector<1x144x16xf32>
    %38 = vector.shape_cast %37 : vector<1x144x16xf32> to vector<144x16xf32>
    %c4 = arith.constant 4 : index
    %c0_22 = arith.constant 0 : index
    %c0_23 = arith.constant 0 : index
    %39 = vector.load %arg3[%c4, %c0_22, %c0_23] : memref<9x16x16xf32, #tpu.memory_space<vmem>>, vector<1x16x16xf32>
    %40 = vector.shape_cast %39 : vector<1x16x16xf32> to vector<16x16xf32>
    %cst_24 = arith.constant dense<0.000000e+00> : vector<144x16xf32>
    %41 = tpu.matmul %38, %40, %cst_24 {dimension_numbers = #tpu.dot_dimension_numbers<[1], [0], [0], [1], [0, 0, 1, 1], [], []>} : vector<144x16xf32>, vector<16x16xf32>, vector<144x16xf32> -> vector<144x16xf32>
    %42 = arith.addf %34, %41 : vector<144x16xf32>
    %c20_i32 = arith.constant 20 : i32
    %43 = arith.addi %1, %c20_i32 : i32
    %c0_25 = arith.constant 0 : index
    %44 = arith.index_cast %43 : i32 to index
    %c0_26 = arith.constant 0 : index
    %45 = vector.load %arg2[%c0_25, %44, %c0_26] : memref<1x328x16xf32, #tpu.memory_space<vmem>>, vector<1x144x16xf32>
    %46 = vector.shape_cast %45 : vector<1x144x16xf32> to vector<144x16xf32>
    %c5 = arith.constant 5 : index
    %c0_27 = arith.constant 0 : index
    %c0_28 = arith.constant 0 : index
    %47 = vector.load %arg3[%c5, %c0_27, %c0_28] : memref<9x16x16xf32, #tpu.memory_space<vmem>>, vector<1x16x16xf32>
    %48 = vector.shape_cast %47 : vector<1x16x16xf32> to vector<16x16xf32>
    %cst_29 = arith.constant dense<0.000000e+00> : vector<144x16xf32>
    %49 = tpu.matmul %46, %48, %cst_29 {dimension_numbers = #tpu.dot_dimension_numbers<[1], [0], [0], [1], [0, 0, 1, 1], [], []>} : vector<144x16xf32>, vector<16x16xf32>, vector<144x16xf32> -> vector<144x16xf32>
    %50 = arith.addf %42, %49 : vector<144x16xf32>
    %c36_i32 = arith.constant 36 : i32
    %51 = arith.addi %1, %c36_i32 : i32
    %c0_30 = arith.constant 0 : index
    %52 = arith.index_cast %51 : i32 to index
    %c0_31 = arith.constant 0 : index
    %53 = vector.load %arg2[%c0_30, %52, %c0_31] : memref<1x328x16xf32, #tpu.memory_space<vmem>>, vector<1x144x16xf32>
    %54 = vector.shape_cast %53 : vector<1x144x16xf32> to vector<144x16xf32>
    %c6 = arith.constant 6 : index
    %c0_32 = arith.constant 0 : index
    %c0_33 = arith.constant 0 : index
    %55 = vector.load %arg3[%c6, %c0_32, %c0_33] : memref<9x16x16xf32, #tpu.memory_space<vmem>>, vector<1x16x16xf32>
    %56 = vector.shape_cast %55 : vector<1x16x16xf32> to vector<16x16xf32>
    %cst_34 = arith.constant dense<0.000000e+00> : vector<144x16xf32>
    %57 = tpu.matmul %54, %56, %cst_34 {dimension_numbers = #tpu.dot_dimension_numbers<[1], [0], [0], [1], [0, 0, 1, 1], [], []>} : vector<144x16xf32>, vector<16x16xf32>, vector<144x16xf32> -> vector<144x16xf32>
    %58 = arith.addf %50, %57 : vector<144x16xf32>
    %c37_i32 = arith.constant 37 : i32
    %59 = arith.addi %1, %c37_i32 : i32
    %c0_35 = arith.constant 0 : index
    %60 = arith.index_cast %59 : i32 to index
    %c0_36 = arith.constant 0 : index
    %61 = vector.load %arg2[%c0_35, %60, %c0_36] : memref<1x328x16xf32, #tpu.memory_space<vmem>>, vector<1x144x16xf32>
    %62 = vector.shape_cast %61 : vector<1x144x16xf32> to vector<144x16xf32>
    %c7 = arith.constant 7 : index
    %c0_37 = arith.constant 0 : index
    %c0_38 = arith.constant 0 : index
    %63 = vector.load %arg3[%c7, %c0_37, %c0_38] : memref<9x16x16xf32, #tpu.memory_space<vmem>>, vector<1x16x16xf32>
    %64 = vector.shape_cast %63 : vector<1x16x16xf32> to vector<16x16xf32>
    %cst_39 = arith.constant dense<0.000000e+00> : vector<144x16xf32>
    %65 = tpu.matmul %62, %64, %cst_39 {dimension_numbers = #tpu.dot_dimension_numbers<[1], [0], [0], [1], [0, 0, 1, 1], [], []>} : vector<144x16xf32>, vector<16x16xf32>, vector<144x16xf32> -> vector<144x16xf32>
    %66 = arith.addf %58, %65 : vector<144x16xf32>
    %c38_i32 = arith.constant 38 : i32
    %67 = arith.addi %1, %c38_i32 : i32
    %c0_40 = arith.constant 0 : index
    %68 = arith.index_cast %67 : i32 to index
    %c0_41 = arith.constant 0 : index
    %69 = vector.load %arg2[%c0_40, %68, %c0_41] : memref<1x328x16xf32, #tpu.memory_space<vmem>>, vector<1x144x16xf32>
    %70 = vector.shape_cast %69 : vector<1x144x16xf32> to vector<144x16xf32>
    %c8 = arith.constant 8 : index
    %c0_42 = arith.constant 0 : index
    %c0_43 = arith.constant 0 : index
    %71 = vector.load %arg3[%c8, %c0_42, %c0_43] : memref<9x16x16xf32, #tpu.memory_space<vmem>>, vector<1x16x16xf32>
    %72 = vector.shape_cast %71 : vector<1x16x16xf32> to vector<16x16xf32>
    %cst_44 = arith.constant dense<0.000000e+00> : vector<144x16xf32>
    %73 = tpu.matmul %70, %72, %cst_44 {dimension_numbers = #tpu.dot_dimension_numbers<[1], [0], [0], [1], [0, 0, 1, 1], [], []>} : vector<144x16xf32>, vector<16x16xf32>, vector<144x16xf32> -> vector<144x16xf32>
    %74 = arith.addf %66, %73 : vector<144x16xf32>
    %c0_45 = arith.constant 0 : index
    %c0_46 = arith.constant 0 : index
    %c0_47 = arith.constant 0 : index
    %75 = vector.load %arg4[%c0_45, %c0_46, %c0_47] : memref<1x1x16xf32, #tpu.memory_space<vmem>>, vector<1x1x16xf32>
    %76 = vector.shape_cast %75 : vector<1x1x16xf32> to vector<1x16xf32>
    %77 = vector.broadcast %76 : vector<1x16xf32> to vector<144x16xf32>
    %78 = arith.addf %74, %77 : vector<144x16xf32>
    %c0_48 = arith.constant 0 : index
    %c0_49 = arith.constant 0 : index
    %c0_50 = arith.constant 0 : index
    %79 = vector.load %arg5[%c0_48, %c0_49, %c0_50] : memref<1x144x16xf32, #tpu.memory_space<vmem>>, vector<1x144x16xf32>
    %80 = vector.shape_cast %79 : vector<1x144x16xf32> to vector<144x16xf32>
    %81 = arith.addf %78, %80 : vector<144x16xf32>
    %c0_51 = arith.constant 0 : index
    %c0_52 = arith.constant 0 : index
    %c0_53 = arith.constant 0 : index
    %82 = vector.load %arg6[%c0_51, %c0_52, %c0_53] : memref<1x144x16xf32, #tpu.memory_space<vmem>>, vector<1x144x16xf32>
    %83 = vector.shape_cast %82 : vector<1x144x16xf32> to vector<144x16xf32>
    %84 = vector.shape_cast %81 : vector<144x16xf32> to vector<1x144x16xf32>
    tpu.vector_store %arg6[%c0_51, %c0_52, %c0_53], %84 {strides = array<i32>} : memref<1x144x16xf32, #tpu.memory_space<vmem>>, vector<1x144x16xf32>,
    return
  }
  func.func @transform_0(%arg0: i32, %arg1: i32) -> (i32, i32, i32) {
    %c0_i32 = arith.constant 0 : i32
    %c0_i32_0 = arith.constant 0 : i32
    %c0_i32_1 = arith.constant 0 : i32
    return %arg0, %c0_i32, %c0_i32_0 : i32, i32, i32
  }
  func.func @transform_1(%arg0: i32, %arg1: i32) -> (i32, i32, i32) {
    %c0_i32 = arith.constant 0 : i32
    %c0_i32_0 = arith.constant 0 : i32
    %c0_i32_1 = arith.constant 0 : i32
    %c0_i32_2 = arith.constant 0 : i32
    return %c0_i32, %c0_i32_0, %c0_i32_1 : i32, i32, i32
  }
  func.func @transform_2(%arg0: i32, %arg1: i32) -> (i32, i32, i32) {
    %c0_i32 = arith.constant 0 : i32
    %c0_i32_0 = arith.constant 0 : i32
    %c0_i32_1 = arith.constant 0 : i32
    return %arg0, %c0_i32, %c0_i32_0 : i32, i32, i32
  }
  func.func @transform_3(%arg0: i32, %arg1: i32) -> (i32, i32, i32) {
    %c0_i32 = arith.constant 0 : i32
    %c0_i32_0 = arith.constant 0 : i32
    return %arg0, %arg1, %c0_i32 : i32, i32, i32
  }
  func.func @transform_4(%arg0: i32, %arg1: i32) -> (i32, i32, i32) {
    %c0_i32 = arith.constant 0 : i32
    %c0_i32_0 = arith.constant 0 : i32
    return %arg0, %arg1, %c0_i32 : i32, i32, i32
  }
}

module attributes {stable_mosaic.version = 11 : i64} {
  func.func @kernel(%arg0: i32, %arg1: i32, %arg2: memref<1x328x16xf32, #tpu.memory_space<vmem>>, %arg3: memref<9x16x16xf32, #tpu.memory_space<vmem>>, %arg4: memref<1x1x16xf32, #tpu.memory_space<vmem>>, %arg5: memref<1x72x16xf32, #tpu.memory_space<vmem>>) attributes {dimension_semantics = [#tpu.dimension_semantics<parallel>, #tpu.dimension_semantics<parallel>], iteration_bounds = array<i64: 8, 1>, scalar_prefetch = 0 : i64, scratch_operands = 0 : i64, tpu.core_type = #tpu.core_type<tc>, window_params = [{transform_indices = @transform_0, window_bounds = array<i64: 1, 328, 16>}, {pipeline_mode = #tpu.pipeline_mode<synchronous>, transform_indices = @transform_1, window_bounds = array<i64: 9, 16, 16>}, {transform_indices = @transform_2, window_bounds = array<i64: 1, 1, 16>}, {transform_indices = @transform_3, window_bounds = array<i64: 1, 72, 16>}]} {
    %c72_i32 = arith.constant 72 : i32
    %0 = arith.muli %arg1, %c72_i32 : i32
    %1 = tpu.assume_multiple %0, 8 : i32
    %cst = arith.constant 0.000000e+00 : f32
    %2 = vector.broadcast %cst : f32 to vector<72x16xf32>
    %c0_i32 = arith.constant 0 : i32
    %3 = arith.addi %1, %c0_i32 : i32
    %c0 = arith.constant 0 : index
    %4 = arith.index_cast %3 : i32 to index
    %c0_0 = arith.constant 0 : index
    %5 = vector.load %arg2[%c0, %4, %c0_0] : memref<1x328x16xf32, #tpu.memory_space<vmem>>, vector<1x72x16xf32>
    %6 = vector.shape_cast %5 : vector<1x72x16xf32> to vector<72x16xf32>
    %c0_1 = arith.constant 0 : index
    %c0_2 = arith.constant 0 : index
    %c0_3 = arith.constant 0 : index
    %7 = vector.load %arg3[%c0_1, %c0_2, %c0_3] : memref<9x16x16xf32, #tpu.memory_space<vmem>>, vector<1x16x16xf32>
    %8 = vector.shape_cast %7 : vector<1x16x16xf32> to vector<16x16xf32>
    %cst_4 = arith.constant dense<0.000000e+00> : vector<72x16xf32>
    %9 = tpu.matmul %6, %8, %cst_4 {dimension_numbers = #tpu.dot_dimension_numbers<[1], [0], [0], [1], [0, 0, 1, 1], [], []>} : vector<72x16xf32>, vector<16x16xf32>, vector<72x16xf32> -> vector<72x16xf32>
    %10 = arith.addf %2, %9 : vector<72x16xf32>
    %c81_i32 = arith.constant 81 : i32
    %11 = arith.addi %1, %c81_i32 : i32
    %c0_5 = arith.constant 0 : index
    %12 = arith.index_cast %11 : i32 to index
    %c0_6 = arith.constant 0 : index
    %13 = vector.load %arg2[%c0_5, %12, %c0_6] : memref<1x328x16xf32, #tpu.memory_space<vmem>>, vector<1x72x16xf32>
    %14 = vector.shape_cast %13 : vector<1x72x16xf32> to vector<72x16xf32>
    %c1 = arith.constant 1 : index
    %c0_7 = arith.constant 0 : index
    %c0_8 = arith.constant 0 : index
    %15 = vector.load %arg3[%c1, %c0_7, %c0_8] : memref<9x16x16xf32, #tpu.memory_space<vmem>>, vector<1x16x16xf32>
    %16 = vector.shape_cast %15 : vector<1x16x16xf32> to vector<16x16xf32>
    %cst_9 = arith.constant dense<0.000000e+00> : vector<72x16xf32>
    %17 = tpu.matmul %14, %16, %cst_9 {dimension_numbers = #tpu.dot_dimension_numbers<[1], [0], [0], [1], [0, 0, 1, 1], [], []>} : vector<72x16xf32>, vector<16x16xf32>, vector<72x16xf32> -> vector<72x16xf32>
    %18 = arith.addf %10, %17 : vector<72x16xf32>
    %c1_i32 = arith.constant 1 : i32
    %19 = arith.addi %1, %c1_i32 : i32
    %c0_10 = arith.constant 0 : index
    %20 = arith.index_cast %19 : i32 to index
    %c0_11 = arith.constant 0 : index
    %21 = vector.load %arg2[%c0_10, %20, %c0_11] : memref<1x328x16xf32, #tpu.memory_space<vmem>>, vector<1x72x16xf32>
    %22 = vector.shape_cast %21 : vector<1x72x16xf32> to vector<72x16xf32>
    %c2 = arith.constant 2 : index
    %c0_12 = arith.constant 0 : index
    %c0_13 = arith.constant 0 : index
    %23 = vector.load %arg3[%c2, %c0_12, %c0_13] : memref<9x16x16xf32, #tpu.memory_space<vmem>>, vector<1x16x16xf32>
    %24 = vector.shape_cast %23 : vector<1x16x16xf32> to vector<16x16xf32>
    %cst_14 = arith.constant dense<0.000000e+00> : vector<72x16xf32>
    %25 = tpu.matmul %22, %24, %cst_14 {dimension_numbers = #tpu.dot_dimension_numbers<[1], [0], [0], [1], [0, 0, 1, 1], [], []>} : vector<72x16xf32>, vector<16x16xf32>, vector<72x16xf32> -> vector<72x16xf32>
    %26 = arith.addf %18, %25 : vector<72x16xf32>
    %c162_i32 = arith.constant 162 : i32
    %27 = arith.addi %1, %c162_i32 : i32
    %c0_15 = arith.constant 0 : index
    %28 = arith.index_cast %27 : i32 to index
    %c0_16 = arith.constant 0 : index
    %29 = vector.load %arg2[%c0_15, %28, %c0_16] : memref<1x328x16xf32, #tpu.memory_space<vmem>>, vector<1x72x16xf32>
    %30 = vector.shape_cast %29 : vector<1x72x16xf32> to vector<72x16xf32>
    %c3 = arith.constant 3 : index
    %c0_17 = arith.constant 0 : index
    %c0_18 = arith.constant 0 : index
    %31 = vector.load %arg3[%c3, %c0_17, %c0_18] : memref<9x16x16xf32, #tpu.memory_space<vmem>>, vector<1x16x16xf32>
    %32 = vector.shape_cast %31 : vector<1x16x16xf32> to vector<16x16xf32>
    %cst_19 = arith.constant dense<0.000000e+00> : vector<72x16xf32>
    %33 = tpu.matmul %30, %32, %cst_19 {dimension_numbers = #tpu.dot_dimension_numbers<[1], [0], [0], [1], [0, 0, 1, 1], [], []>} : vector<72x16xf32>, vector<16x16xf32>, vector<72x16xf32> -> vector<72x16xf32>
    %34 = arith.addf %26, %33 : vector<72x16xf32>
    %c243_i32 = arith.constant 243 : i32
    %35 = arith.addi %1, %c243_i32 : i32
    %c0_20 = arith.constant 0 : index
    %36 = arith.index_cast %35 : i32 to index
    %c0_21 = arith.constant 0 : index
    %37 = vector.load %arg2[%c0_20, %36, %c0_21] : memref<1x328x16xf32, #tpu.memory_space<vmem>>, vector<1x72x16xf32>
    %38 = vector.shape_cast %37 : vector<1x72x16xf32> to vector<72x16xf32>
    %c4 = arith.constant 4 : index
    %c0_22 = arith.constant 0 : index
    %c0_23 = arith.constant 0 : index
    %39 = vector.load %arg3[%c4, %c0_22, %c0_23] : memref<9x16x16xf32, #tpu.memory_space<vmem>>, vector<1x16x16xf32>
    %40 = vector.shape_cast %39 : vector<1x16x16xf32> to vector<16x16xf32>
    %cst_24 = arith.constant dense<0.000000e+00> : vector<72x16xf32>
    %41 = tpu.matmul %38, %40, %cst_24 {dimension_numbers = #tpu.dot_dimension_numbers<[1], [0], [0], [1], [0, 0, 1, 1], [], []>} : vector<72x16xf32>, vector<16x16xf32>, vector<72x16xf32> -> vector<72x16xf32>
    %42 = arith.addf %34, %41 : vector<72x16xf32>
    %c163_i32 = arith.constant 163 : i32
    %43 = arith.addi %1, %c163_i32 : i32
    %c0_25 = arith.constant 0 : index
    %44 = arith.index_cast %43 : i32 to index
    %c0_26 = arith.constant 0 : index
    %45 = vector.load %arg2[%c0_25, %44, %c0_26] : memref<1x328x16xf32, #tpu.memory_space<vmem>>, vector<1x72x16xf32>
    %46 = vector.shape_cast %45 : vector<1x72x16xf32> to vector<72x16xf32>
    %c5 = arith.constant 5 : index
    %c0_27 = arith.constant 0 : index
    %c0_28 = arith.constant 0 : index
    %47 = vector.load %arg3[%c5, %c0_27, %c0_28] : memref<9x16x16xf32, #tpu.memory_space<vmem>>, vector<1x16x16xf32>
    %48 = vector.shape_cast %47 : vector<1x16x16xf32> to vector<16x16xf32>
    %cst_29 = arith.constant dense<0.000000e+00> : vector<72x16xf32>
    %49 = tpu.matmul %46, %48, %cst_29 {dimension_numbers = #tpu.dot_dimension_numbers<[1], [0], [0], [1], [0, 0, 1, 1], [], []>} : vector<72x16xf32>, vector<16x16xf32>, vector<72x16xf32> -> vector<72x16xf32>
    %50 = arith.addf %42, %49 : vector<72x16xf32>
    %c9_i32 = arith.constant 9 : i32
    %51 = arith.addi %1, %c9_i32 : i32
    %c0_30 = arith.constant 0 : index
    %52 = arith.index_cast %51 : i32 to index
    %c0_31 = arith.constant 0 : index
    %53 = vector.load %arg2[%c0_30, %52, %c0_31] : memref<1x328x16xf32, #tpu.memory_space<vmem>>, vector<1x72x16xf32>
    %54 = vector.shape_cast %53 : vector<1x72x16xf32> to vector<72x16xf32>
    %c6 = arith.constant 6 : index
    %c0_32 = arith.constant 0 : index
    %c0_33 = arith.constant 0 : index
    %55 = vector.load %arg3[%c6, %c0_32, %c0_33] : memref<9x16x16xf32, #tpu.memory_space<vmem>>, vector<1x16x16xf32>
    %56 = vector.shape_cast %55 : vector<1x16x16xf32> to vector<16x16xf32>
    %cst_34 = arith.constant dense<0.000000e+00> : vector<72x16xf32>
    %57 = tpu.matmul %54, %56, %cst_34 {dimension_numbers = #tpu.dot_dimension_numbers<[1], [0], [0], [1], [0, 0, 1, 1], [], []>} : vector<72x16xf32>, vector<16x16xf32>, vector<72x16xf32> -> vector<72x16xf32>
    %58 = arith.addf %50, %57 : vector<72x16xf32>
    %c90_i32 = arith.constant 90 : i32
    %59 = arith.addi %1, %c90_i32 : i32
    %c0_35 = arith.constant 0 : index
    %60 = arith.index_cast %59 : i32 to index
    %c0_36 = arith.constant 0 : index
    %61 = vector.load %arg2[%c0_35, %60, %c0_36] : memref<1x328x16xf32, #tpu.memory_space<vmem>>, vector<1x72x16xf32>
    %62 = vector.shape_cast %61 : vector<1x72x16xf32> to vector<72x16xf32>
    %c7 = arith.constant 7 : index
    %c0_37 = arith.constant 0 : index
    %c0_38 = arith.constant 0 : index
    %63 = vector.load %arg3[%c7, %c0_37, %c0_38] : memref<9x16x16xf32, #tpu.memory_space<vmem>>, vector<1x16x16xf32>
    %64 = vector.shape_cast %63 : vector<1x16x16xf32> to vector<16x16xf32>
    %cst_39 = arith.constant dense<0.000000e+00> : vector<72x16xf32>
    %65 = tpu.matmul %62, %64, %cst_39 {dimension_numbers = #tpu.dot_dimension_numbers<[1], [0], [0], [1], [0, 0, 1, 1], [], []>} : vector<72x16xf32>, vector<16x16xf32>, vector<72x16xf32> -> vector<72x16xf32>
    %66 = arith.addf %58, %65 : vector<72x16xf32>
    %c10_i32 = arith.constant 10 : i32
    %67 = arith.addi %1, %c10_i32 : i32
    %c0_40 = arith.constant 0 : index
    %68 = arith.index_cast %67 : i32 to index
    %c0_41 = arith.constant 0 : index
    %69 = vector.load %arg2[%c0_40, %68, %c0_41] : memref<1x328x16xf32, #tpu.memory_space<vmem>>, vector<1x72x16xf32>
    %70 = vector.shape_cast %69 : vector<1x72x16xf32> to vector<72x16xf32>
    %c8 = arith.constant 8 : index
    %c0_42 = arith.constant 0 : index
    %c0_43 = arith.constant 0 : index
    %71 = vector.load %arg3[%c8, %c0_42, %c0_43] : memref<9x16x16xf32, #tpu.memory_space<vmem>>, vector<1x16x16xf32>
    %72 = vector.shape_cast %71 : vector<1x16x16xf32> to vector<16x16xf32>
    %cst_44 = arith.constant dense<0.000000e+00> : vector<72x16xf32>
    %73 = tpu.matmul %70, %72, %cst_44 {dimension_numbers = #tpu.dot_dimension_numbers<[1], [0], [0], [1], [0, 0, 1, 1], [], []>} : vector<72x16xf32>, vector<16x16xf32>, vector<72x16xf32> -> vector<72x16xf32>
    %74 = arith.addf %66, %73 : vector<72x16xf32>
    %c0_45 = arith.constant 0 : index
    %c0_46 = arith.constant 0 : index
    %c0_47 = arith.constant 0 : index
    %75 = vector.load %arg4[%c0_45, %c0_46, %c0_47] : memref<1x1x16xf32, #tpu.memory_space<vmem>>, vector<1x1x16xf32>
    %76 = vector.shape_cast %75 : vector<1x1x16xf32> to vector<1x16xf32>
    %77 = vector.broadcast %76 : vector<1x16xf32> to vector<72x16xf32>
    %78 = arith.addf %74, %77 : vector<72x16xf32>
    %c0_48 = arith.constant 0 : index
    %c0_49 = arith.constant 0 : index
    %c0_50 = arith.constant 0 : index
    %79 = vector.load %arg5[%c0_48, %c0_49, %c0_50] : memref<1x72x16xf32, #tpu.memory_space<vmem>>, vector<1x72x16xf32>
    %80 = vector.shape_cast %79 : vector<1x72x16xf32> to vector<72x16xf32>
    %81 = vector.shape_cast %78 : vector<72x16xf32> to vector<1x72x16xf32>
    tpu.vector_store %arg5[%c0_48, %c0_49, %c0_50], %81 {strides = array<i32>} : memref<1x72x16xf32, #tpu.memory_space<vmem>>, vector<1x72x16xf32>,
    return
  }
  func.func @transform_0(%arg0: i32, %arg1: i32) -> (i32, i32, i32) {
    %c0_i32 = arith.constant 0 : i32
    %c0_i32_0 = arith.constant 0 : i32
    %c0_i32_1 = arith.constant 0 : i32
    return %arg0, %c0_i32, %c0_i32_0 : i32, i32, i32
  }
  func.func @transform_1(%arg0: i32, %arg1: i32) -> (i32, i32, i32) {
    %c0_i32 = arith.constant 0 : i32
    %c0_i32_0 = arith.constant 0 : i32
    %c0_i32_1 = arith.constant 0 : i32
    %c0_i32_2 = arith.constant 0 : i32
    return %c0_i32, %c0_i32_0, %c0_i32_1 : i32, i32, i32
  }
  func.func @transform_2(%arg0: i32, %arg1: i32) -> (i32, i32, i32) {
    %c0_i32 = arith.constant 0 : i32
    %c0_i32_0 = arith.constant 0 : i32
    %c0_i32_1 = arith.constant 0 : i32
    return %arg0, %c0_i32, %c0_i32_0 : i32, i32, i32
  }
  func.func @transform_3(%arg0: i32, %arg1: i32) -> (i32, i32, i32) {
    %c0_i32 = arith.constant 0 : i32
    %c0_i32_0 = arith.constant 0 : i32
    return %arg0, %arg1, %c0_i32 : i32, i32, i32
  }
}

</mosaic_0001>

<bundles_post_ra>
// kernel: down_block_3d.9
= control target key start
LH: loop header
LB: loop body
LE: loop exit
PB: predicated region body
PF: predicated region fallthrough
CT: control target
= control target key end

     0   :  { %s1078_s18 = smov 0   ;;  %s1080_s19 = smov 0   ;;  %s1883_s0 = inlined_call_operand.vmem [shape: f32[2,1024,8], index: 0, kind: input, shape index: {}]   ;;  %s1884_s1 = inlined_call_operand.vmem [shape: f32[8,4], index: 1, kind: input, shape index: {}]   ;;  %s1885_s2 = inlined_call_operand.vmem [shape: f32[4,8], index: 2, kind: input, shape index: {}]   ;;  %s1886_s3 = inlined_call_operand.vmem [shape: f32[1,8], index: 3, kind: input, shape index: {}]   ;;  %s1887_s4 = inlined_call_operand.vmem [shape: f32[1,8], index: 4, kind: input, shape index: {}]   ;;  %s1888_s5 = inlined_call_operand.vmem [shape: f32[2,2,8], index: 5, kind: output, shape index: {}]  }
   0x1   :  { %s1082_s20 = smov 0   ;;  %s1084_s21 = smov 0  }
   0x2   :  { %s1086_s22 = smov 0  }
   0x3 LB: > { %s24_s23 = sadd.s32 1, %s1035_s20  ;;  %s27_s24 = sadd.s32 1, %s1039_s21  ;;  %s1043_s22 = sphi %s1086_s22, %s15_s22   ;;  %s1039_s21 = sphi %s1084_s21, %s2018_s21   ;;  %s1035_s20 = sphi %s1082_s20, %s2017_s20   ;;  %s1031_s19 = sphi %s1080_s19, %s2016_s19   ;;  %s1027_s18 = sphi %s1078_s18, %s2015_s18  }
   0x4   : > { %p25_p0 = scmp.ge.s32.totalorder %s24_s23, 2  ;;  %p933_p1 = scmp.ge.s32.totalorder %s1043_s22, 1 }
   0x5   : > { %p206_p2 = scmp.lt.s32.totalorder %s1043_s22, 5 }
   0x6   : > { %s2020_s23 = smov (%p25_p0, %s24_s23), 0  ;;  %s2022_s24 = smov (!%p25_p0, %s27_s24), %s1039_s21 }
   0x7   : > { %p207_p3 = pnand %p933_p1, %p206_p2  ;;  %p29_p4 = scmp.ge.s32.totalorder %s2022_s24, 2 }
   0x9   : > { %s2024_s24 = smov (%p29_p4, %s2022_s24), 0  ;;  %210 = sbr.rel (%p207_p3) target bundleno = 679 (0x2a7), region = 40 }
  0x10   : > { %s934_s25 = sshll.u32 %s1027_s18, 6  ;;  %p238_p5 = scmp.lt.s32.totalorder %s1031_s19, 1  ;;  %vm315_vm0 = vcmask 64512   ;;  %vm646_vm1 = vcmask 1040384  }
  0x11   : > { %p240_p6 = scmp.lt.s32.totalorder %s934_s25, 127  ;;  %p938_p7 = scmp.ne.s32.totalorder %s1027_s18, 0 }
  0x12   : > { %s2026_s19 = smov (!%p238_p5, %s1031_s19), 1  ;;  %vm652_vm2 = vcmask (!%p938_p7), 58368  }
  0x13   : > { %s2028_s25 = smov (!%p240_p6, %s934_s25), 127  ;;  %s935_s26 = sshll.u32 %s2026_s19, 7 }
  0x14   : > { %s937_s27 = sshll.u32 %s2026_s19, 1  ;;  %s243_s28 = sadd.s32 %s935_s26, %s2028_s25 }
  0x15   : > { %s1114_s6 = scalar_lea.vmem %s1888_s5, %s937_s27  ;;  %s936_s7 = sshll.u32 %s243_s28, 3 }
  0x16   : > { %s1119_s10 = scalar_lea.vmem %s1883_s0, %s936_s7 }
  0x17   : > { %v1122_v0 = vld [vmem:[%s1119_s10] sm:$0xff]  ;;  %v1125_v1 = vld [vmem:[%s1119_s10 + $0x8] sm:$0xff]  ;;  %v1128_v2 = vld [vmem:[%s1119_s10 + $0x10] sm:$0xff] }
  0x18   : > { %v316_v3 = vsel %vm315_vm0, %v1122_v0, 0.0  ;;  %v317_v4 = vsel %vm315_vm0, %v1125_v1, 0.0  ;;  %v319_v5 = vsel %vm315_vm0, %v1128_v2, 0.0  ;;  %v1137_v6 = vld [vmem:[%s1119_s10 + $0x18] sm:$0xff]  ;;  %v1142_v9 = vld [vmem:[%s1119_s10 + $0x20] sm:$0xff]  ;;  %v1147_v12 = vld [vmem:[%s1119_s10 + $0x28] sm:$0xff] }
  0x19   : > { %v318_v7 = vadd.f32 %v317_v4, %v316_v3  ;;  %v321_v8 = vsel %vm315_vm0, %v1137_v6, 0.0  ;;  %v323_v11 = vsel %vm315_vm0, %v1142_v9, 0.0  ;;  %v325_v14 = vsel %vm315_vm0, %v1147_v12, 0.0  ;;  %v1152_v15 = vld [vmem:[%s1119_s10 + $0x30] sm:$0xff]  ;;  %v1155_v17 = vld [vmem:[%s1119_s10 + $0x38] sm:$0xff]  ;;  %v1158_v18 = vld [vmem:[%s1119_s10 + $0x40] sm:$0xff] }
  0x1a   : > { %v327_v19 = vsel %vm315_vm0, %v1152_v15, 0.0  ;;  %v1163_v20 = vld [vmem:[%s1119_s10 + $0x48] sm:$0xff]  ;;  %v1166_v21 = vld [vmem:[%s1119_s10 + $0x50] sm:$0xff]  ;;  %v1169_v22 = vld [vmem:[%s1119_s10 + $0x58] sm:$0xff]  ;;  %v329_v24 = vsel %vm315_vm0, %v1155_v17, 0.0  ;;  %v331_v25 = vsel %vm315_vm0, %v1158_v18, 0.0 }
  0x1b   : > { %v320_v10 = vadd.f32 %v319_v5, %v318_v7  ;;  %v1176_v26 = vld [vmem:[%s1119_s10 + $0x108] sm:$0xff]  ;;  %v1179_v27 = vld [vmem:[%s1119_s10 + $0x110] sm:$0xff]  ;;  %v1182_v28 = vld [vmem:[%s1119_s10 + $0x118] sm:$0xff]  ;;  %v333_v29 = vsel %vm315_vm0, %v1163_v20, 0.0  ;;  %v335_v30 = vsel %vm315_vm0, %v1166_v21, 0.0  ;;  %v1190_v31 = vsel %vm315_vm0, %v1169_v22, 0.0 }
  0x1c   : > { %v1193_v32 = vld [vmem:[%s1119_s10 + $0x120] sm:$0xff]  ;;  %v1196_v33 = vld [vmem:[%s1119_s10 + $0x128] sm:$0xff]  ;;  %v1199_v34 = vld [vmem:[%s1119_s10 + $0x130] sm:$0xff]  ;;  %v1203_v36 = vsel %vm315_vm0, %v1176_v26, 0.0  ;;  %v1207_v37 = vsel %vm315_vm0, %v1179_v27, 0.0  ;;  %v1211_v38 = vsel %vm315_vm0, %v1182_v28, 0.0 }
  0x1d   : > { %v322_v13 = vadd.f32 %v321_v8, %v320_v10  ;;  %1909 = vst [vmem:[#allocation2_spill] sm:$0xff] %v1203_v36  ;;  %1910 = vst [vmem:[#allocation3_spill] sm:$0xff] %v1207_v37  ;;  %v1214_v39 = vld [vmem:[%s1119_s10 + $0x138] sm:$0xff]  ;;  %v1217_v40 = vld [vmem:[%s1119_s10 + $0x140] sm:$0xff]  ;;  %v1224_v42 = vsel %vm315_vm0, %v1193_v32, 0.0  ;;  %v1228_v43 = vsel %vm315_vm0, %v1196_v33, 0.0  ;;  %v451_v36 = vmul.f32 %v1128_v2, %v1128_v2 }
  0x1e   : > { %1911 = vst [vmem:[#allocation4_spill] sm:$0xff] %v1211_v38  ;;  %v1220_v41 = vld [vmem:[%s1119_s10 + $0x148] sm:$0xff]  ;;  %1912 = vst [vmem:[#allocation5_spill] sm:$0xff] %v1224_v42  ;;  %v1232_v44 = vsel %vm315_vm0, %v1199_v34, 0.0  ;;  %v1235_v45 = vld [vmem:[%s1119_s10 + $0x150] sm:$0xff]  ;;  %v1245_v49 = vsel %vm315_vm0, %v1214_v39, 0.0 }
  0x1f   : > { %v324_v16 = vadd.f32 %v323_v11, %v322_v13  ;;  %1913 = vst [vmem:[#allocation6_spill] sm:$0xff] %v1228_v43  ;;  %1914 = vst [vmem:[#allocation7_spill] sm:$0xff] %v1232_v44  ;;  %v1238_v46 = vld [vmem:[%s1119_s10 + $0x158] sm:$0xff]  ;;  %v1241_v47 = vld [vmem:[%s1119_s10 + $0x160] sm:$0xff]  ;;  %v1249_v50 = vsel %vm315_vm0, %v1217_v40, 0.0  ;;  %v1253_v51 = vsel %vm315_vm0, %v1220_v41, 0.0 }
  0x20   : > { %1915 = vst [vmem:[#allocation8_spill] sm:$0xff] %v1245_v49  ;;  %1916 = vst [vmem:[#allocation9_spill] sm:$0xff] %v1249_v50  ;;  %v1256_v52 = vld [vmem:[%s1119_s10 + $0x168] sm:$0xff]  ;;  %v1259_v53 = vld [vmem:[%s1119_s10 + $0x170] sm:$0xff]  ;;  %v1266_v55 = vsel %vm315_vm0, %v1235_v45, 0.0  ;;  %v1270_v56 = vsel %vm315_vm0, %v1238_v46, 0.0 }
  0x21   : > { %v326_v23 = vadd.f32 %v325_v14, %v324_v16  ;;  %1917 = vst [vmem:[#allocation10_spill] sm:$0xff] %v1253_v51  ;;  %v1262_v54 = vld [vmem:[%s1119_s10 + $0x178] sm:$0xff]  ;;  %1918 = vst [vmem:[#allocation11_spill] sm:$0xff] %v1266_v55  ;;  %v1274_v57 = vsel %vm315_vm0, %v1241_v47, 0.0  ;;  %v1277_v58 = vld [vmem:[%s1119_s10 + $0x180] sm:$0xff]  ;;  %v1287_v62 = vsel %vm315_vm0, %v1256_v52, 0.0 }
  0x22   : > { %1919 = vst [vmem:[#allocation12_spill] sm:$0xff] %v1270_v56  ;;  %1920 = vst [vmem:[#allocation13_spill] sm:$0xff] %v1274_v57  ;;  %v1280_v59 = vld [vmem:[%s1119_s10 + $0x188] sm:$0xff]  ;;  %v1283_v60 = vld [vmem:[%s1119_s10 + $0x190] sm:$0xff]  ;;  %v1291_v63 = vsel %vm315_vm0, %v1259_v53, 0.0  ;;  %v1295_v3 = vsel %vm315_vm0, %v1262_v54, 0.0 }
  0x23   : > { %v328_v35 = vadd.f32 %v327_v19, %v326_v23  ;;  %1921 = vst [vmem:[#allocation14_spill] sm:$0xff] %v1287_v62  ;;  %1922 = vst [vmem:[#allocation15_spill] sm:$0xff] %v1291_v63  ;;  %v1298_v4 = vld [vmem:[%s1119_s10 + $0x198] sm:$0xff]  ;;  %v1301_v5 = vld [vmem:[%s1119_s10 + $0x1a0] sm:$0xff]  ;;  %v1308_v8 = vsel %vm315_vm0, %v1277_v58, 0.0  ;;  %v1312_v10 = vsel %vm315_vm0, %v1280_v59, 0.0 }
  0x24   : > { %1923 = vst [vmem:[#allocation16_spill] sm:$0xff] %v1295_v3  ;;  %v1304_v7 = vld [vmem:[%s1119_s10 + $0x1a8] sm:$0xff]  ;;  %1924 = vst [vmem:[#allocation17_spill] sm:$0xff] %v1308_v8  ;;  %v1316_v11 = vsel %vm315_vm0, %v1283_v60, 0.0  ;;  %v1319_v13 = vld [vmem:[%s1119_s10 + $0x60] sm:$0xff] }
  0x25   : > { %v330_v48 = vadd.f32 %v329_v24, %v328_v35  ;;  %1925 = vst [vmem:[#allocation18_spill] sm:$0xff] %v1312_v10  ;;  %1926 = vst [vmem:[#allocation19_spill] sm:$0xff] %v1316_v11  ;;  %v1322_v14 = vld [vmem:[%s1119_s10 + $0x1b0] sm:$0xff]  ;;  %v1325_v16 = vld [vmem:[%s1119_s10 + $0x1b8] sm:$0xff]  ;;  %v1332_v24 = vsel %vm315_vm0, %v1298_v4, 0.0  ;;  %v1340_v35 = vsel %vm315_vm0, %v1304_v7, 0.0 }
  0x26   : > { %v1328_v19 = vld [vmem:[%s1119_s10 + $0x1c0] sm:$0xff]  ;;  %1927 = vst [vmem:[#allocation20_spill] sm:$0xff] %v1332_v24  ;;  %1929 = vst [vmem:[#allocation22_spill] sm:$0xff] %v1340_v35  ;;  %v1346_v11 = vld [vmem:[%s1119_s10 + $0x1d0] sm:$0xff]  ;;  %v339_v62 = vsel %vm315_vm0, %v1319_v13, 0.0 }
  0x27   : > { %v332_v61 = vadd.f32 %v331_v25, %v330_v48  ;;  %v1336_v25 = vsel %vm315_vm0, %v1301_v5, 0.0  ;;  %v1343_v48 = vld [vmem:[%s1119_s10 + $0x1c8] sm:$0xff]  ;;  %v1349_v10 = vld [vmem:[%s1119_s10 + $0x1d8] sm:$0xff]  ;;  %v1364_v35 = vld [vmem:[%s1119_s10 + $0x1e0] sm:$0xff] }
  0x28   : > { %1928 = vst [vmem:[#allocation21_spill] sm:$0xff] %v1336_v25  ;;  %v1361_v25 = vsel %vm315_vm0, %v1328_v19, 0.0  ;;  %1933 = vst [vmem:[#allocation26_spill] sm:$0xff] %v1364_v35  ;;  %v1367_v24 = vld [vmem:[%s1119_s10 + $0x1e8] sm:$0xff]  ;;  %v1370_v8 = vld [vmem:[%s1119_s10 + $0x1f0] sm:$0xff] }
  0x29   : > { %v334_v23 = vadd.f32 %v333_v29, %v332_v61  ;;  %v1353_v29 = vsel %vm315_vm0, %v1322_v14, 0.0  ;;  %v1357_v61 = vsel %vm315_vm0, %v1325_v16, 0.0  ;;  %1932 = vst [vmem:[#allocation25_spill] sm:$0xff] %v1361_v25  ;;  %1934 = vst [vmem:[#allocation27_spill] sm:$0xff] %v1367_v24  ;;  %v1382_v25 = vsel %vm315_vm0, %v1349_v10, 0.0  ;;  %v1385_v63 = vld [vmem:[%s1119_s10 + $0x1f8] sm:$0xff] }
  0x2a   : > { %1930 = vst [vmem:[#allocation23_spill] sm:$0xff] %v1353_v29  ;;  %1931 = vst [vmem:[#allocation24_spill] sm:$0xff] %v1357_v61  ;;  %v1374_v29 = vsel %vm315_vm0, %v1343_v48, 0.0  ;;  %v1378_v61 = vsel %vm315_vm0, %v1346_v11, 0.0  ;;  %v1405_v57 = vsel %vm315_vm0, %v1385_v63, 0.0  ;;  %v1413_v51 = vld [vmem:[%s1119_s10 + $0x80] sm:$0xff] }
  0x2b   : > { %1935 = vst [vmem:[#allocation28_spill] sm:$0xff] %v1370_v8  ;;  %v336_v3 = vadd.f32 %v335_v30, %v334_v23  ;;  %1936 = vst [vmem:[#allocation29_spill] sm:$0xff] %v1374_v29  ;;  %v1391_v30 = vsel %vm315_vm0, %v1364_v35, 0.0  ;;  %v1395_v23 = vsel %vm315_vm0, %v1367_v24, 0.0  ;;  %v1416_v50 = vld [vmem:[%s1119_s10 + $0x88] sm:$0xff]  ;;  %v347_v43 = vsel %vm315_vm0, %v1413_v51, 0.0 }
  0x2c   : > { %1937 = vst [vmem:[#allocation30_spill] sm:$0xff] %v1378_v61  ;;  %1938 = vst [vmem:[#allocation31_spill] sm:$0xff] %v1382_v25  ;;  %v1399_v61 = vsel %vm315_vm0, %v1370_v8, 0.0  ;;  %v264_v25 = vld [vmem:[%s1119_s10 + $0x68] sm:$0xff]  ;;  %v1442_v42 = vld [vmem:[%s1119_s10 + $0xb0] sm:$0xff] }
  0x2d   : > { %1939 = vst [vmem:[#allocation32_spill] sm:$0xff] %v1385_v63  ;;  %1940 = vst [vmem:[#allocation33_spill] sm:$0xff] %v1391_v30  ;;  %v338_v29 = vadd.f32 %v1190_v31, %v336_v3  ;;  %v341_v56 = vsel %vm315_vm0, %v264_v25, 0.0  ;;  %v265_v30 = vld [vmem:[%s1119_s10 + $0x70] sm:$0xff]  ;;  %v449_v31 = vmul.f32 %v1122_v0, %v1122_v0  ;;  %v450_v3 = vmul.f32 %v1125_v1, %v1125_v1  ;;  %v1439_v1 = vld [vmem:[%s1119_s10 + $0xa8] sm:$0xff] }
  0x2e   : > { %1941 = vst [vmem:[#allocation34_spill] sm:$0xff] %v1395_v23  ;;  %1942 = vst [vmem:[#allocation35_spill] sm:$0xff] %v1399_v61  ;;  %v1410_v23 = vld [vmem:[%s1119_s10 + $0x78] sm:$0xff]  ;;  %v343_v61 = vsel %vm315_vm0, %v265_v30, 0.0  ;;  %v349_v0 = vsel %vm315_vm0, %v1416_v50, 0.0  ;;  %v1476_v2 = vld [vmem:[%s1119_s10 + $0xe0] sm:$0xff] }
  0x2f   : > { %1943 = vst [vmem:[#allocation36_spill] sm:$0xff] %v1405_v57  ;;  %v340_v55 = vadd.f32 %v339_v62, %v338_v29  ;;  %1944 = vst [vmem:[#allocation37_spill] sm:$0xff] %v1410_v23  ;;  %v1424_v57 = vld [vmem:[%s1119_s10 + $0x90] sm:$0xff]  ;;  %v1427_v62 = vld [vmem:[%s1119_s10 + $0x98] sm:$0xff]  ;;  %v345_v44 = vsel %vm315_vm0, %v1410_v23, 0.0 }
  0x30   : > { %1945 = vst [vmem:[#allocation38_spill] sm:$0xff] %v1413_v51  ;;  %1946 = vst [vmem:[#allocation39_spill] sm:$0xff] %v1416_v50  ;;  %v1430_v29 = vld [vmem:[%s1119_s10 + $0xa0] sm:$0xff]  ;;  %v1445_v38 = vld [vmem:[%s1119_s10 + $0xb8] sm:$0xff] }
  0x31   : > { %1947 = vst [vmem:[#allocation40_spill] sm:$0xff] %v1424_v57  ;;  %1948 = vst [vmem:[#allocation41_spill] sm:$0xff] %v1427_v62  ;;  %v342_v49 = vadd.f32 %v341_v56, %v340_v55  ;;  %v351_v55 = vsel %vm315_vm0, %v1424_v57, 0.0  ;;  %v353_v56 = vsel %vm315_vm0, %v1427_v62, 0.0  ;;  %v355_v37 = vsel %vm315_vm0, %v1430_v29, 0.0  ;;  %v1456_v50 = vld [vmem:[%s1119_s10 + $0xc0] sm:$0xff] }
  0x32   : > { %1949 = vst [vmem:[#allocation42_spill] sm:$0xff] %v1430_v29  ;;  %1950 = vst [vmem:[#allocation43_spill] sm:$0xff] %v1439_v1  ;;  %v1459_v51 = vld [vmem:[%s1119_s10 + $0xc8] sm:$0xff]  ;;  %v1462_v23 = vld [vmem:[%s1119_s10 + $0xd0] sm:$0xff]  ;;  %v357_v57 = vsel %vm315_vm0, %v1439_v1, 0.0  ;;  %v1468_v62 = vsel %vm315_vm0, %v1442_v42, 0.0  ;;  %v452_v29 = vmul.f32 %v1137_v6, %v1137_v6 }
  0x33   : > { %1951 = vst [vmem:[#allocation44_spill] sm:$0xff] %v1442_v42  ;;  %1952 = vst [vmem:[#allocation45_spill] sm:$0xff] %v1445_v38  ;;  %v344_v63 = vadd.f32 %v343_v61, %v342_v49  ;;  %v1473_v8 = vld [vmem:[%s1119_s10 + $0xd8] sm:$0xff]  ;;  %v1480_v24 = vsel %vm315_vm0, %v1445_v38, 0.0  ;;  %v1484_v49 = vsel %vm315_vm0, %v1456_v50, 0.0  ;;  %v1488_v61 = vsel %vm315_vm0, %v1459_v51, 0.0 }
  0x34   : > { %1953 = vst [vmem:[#allocation46_spill] sm:$0xff] %v1456_v50  ;;  %1954 = vst [vmem:[#allocation47_spill] sm:$0xff] %v1459_v51  ;;  %v1492_v42 = vsel %vm315_vm0, %v1462_v23, 0.0  ;;  %v1495_v6 = vld [vmem:[%s1119_s10 + $0xe8] sm:$0xff]  ;;  %v1498_v1 = vld [vmem:[%s1119_s10 + $0xf0] sm:$0xff]  ;;  %v1502_v38 = vsel %vm315_vm0, %v1473_v8, 0.0  ;;  %v453_v51 = vmul.f32 %v1142_v9, %v1142_v9  ;;  %v457_v9 = vmul.f32 %v1158_v18, %v1158_v18 }
  0x35   : > { %1955 = vst [vmem:[#allocation48_spill] sm:$0xff] %v1462_v23  ;;  %1956 = vst [vmem:[#allocation49_spill] sm:$0xff] %v1473_v8  ;;  %v346_v35 = vadd.f32 %v345_v44, %v344_v63  ;;  %v1506_v50 = vsel %vm315_vm0, %v1476_v2, 0.0  ;;  %v1512_v23 = vsel %vm315_vm0, %v1495_v6, 0.0  ;;  %v454_v44 = vmul.f32 %v1147_v12, %v1147_v12 }
  0x36   : > { %1957 = vst [vmem:[#allocation50_spill] sm:$0xff] %v1476_v2  ;;  %1958 = vst [vmem:[#allocation51_spill] sm:$0xff] %v1492_v42  ;;  %v1516_v42 = vsel %vm315_vm0, %v1498_v1, 0.0  ;;  %v455_v63 = vmul.f32 %v1152_v15, %v1152_v15  ;;  %v456_v2 = vmul.f32 %v1155_v17, %v1155_v17  ;;  %v461_v12 = vmul.f32 %v1319_v13, %v1319_v13 }
  0x37   : > { %1959 = vst [vmem:[#allocation52_spill] sm:$0xff] %v1495_v6  ;;  %1960 = vst [vmem:[#allocation53_spill] sm:$0xff] %v1498_v1  ;;  %v348_v8 = vadd.f32 %v347_v43, %v346_v35  ;;  %v458_v6 = vmul.f32 %v1163_v20, %v1163_v20  ;;  %v459_v1 = vmul.f32 %v1166_v21, %v1166_v21 }
  0x38   : > { %1961 = vst [vmem:[#allocation54_spill] sm:$0xff] %v1516_v42  ;;  %v460_v42 = vmul.f32 %v1169_v22, %v1169_v22  ;;  %v1534_v15 = vmul.f32 %v264_v25, %v264_v25  ;;  %v1536_v35 = vmul.f32 %v265_v30, %v265_v30  ;;  %v482_v17 = vmul.f32 %v1176_v26, %v1176_v26 }
  0x39   : > { %v350_v43 = vadd.f32 %v349_v0, %v348_v8  ;;  %v483_v18 = vmul.f32 %v1179_v27, %v1179_v27  ;;  %v484_v20 = vmul.f32 %v1182_v28, %v1182_v28  ;;  %v485_v21 = vmul.f32 %v1193_v32, %v1193_v32 }
  0x3a   : > { %v486_v22 = vmul.f32 %v1196_v33, %v1196_v33  ;;  %v487_v8 = vmul.f32 %v1199_v34, %v1199_v34  ;;  %v488_v25 = vmul.f32 %v1214_v39, %v1214_v39  ;;  %v489_v26 = vmul.f32 %v1217_v40, %v1217_v40 }
  0x3b   : > { %v352_v13 = vadd.f32 %v351_v55, %v350_v43  ;;  %v490_v27 = vmul.f32 %v1220_v41, %v1220_v41  ;;  %v491_v28 = vmul.f32 %v1235_v45, %v1235_v45  ;;  %v492_v32 = vmul.f32 %v1238_v46, %v1238_v46 }
  0x3c   : > { %v513_v33 = vsel %vm315_vm0, %v449_v31, 0.0  ;;  %v514_v34 = vsel %vm315_vm0, %v450_v3, 0.0  ;;  %v493_v39 = vmul.f32 %v1241_v47, %v1241_v47  ;;  %v516_v40 = vsel %vm315_vm0, %v451_v36, 0.0 }
  0x3d   : > { %v354_v30 = vadd.f32 %v353_v56, %v352_v13  ;;  %v515_v0 = vadd.f32 %v514_v34, %v513_v33  ;;  %v494_v41 = vmul.f32 %v1256_v52, %v1256_v52  ;;  %v495_v45 = vmul.f32 %v1259_v53, %v1259_v53  ;;  %v1962_v13 = vld [vmem:[#allocation26_spill] sm:$0xff]  ;;  %v1963_v33 = vld [vmem:[#allocation27_spill] sm:$0xff]  ;;  %v1964_v34 = vld [vmem:[#allocation28_spill] sm:$0xff] }
  0x3e   : > { %v496_v46 = vmul.f32 %v1262_v54, %v1262_v54  ;;  %v518_v31 = vsel %vm315_vm0, %v452_v29, 0.0  ;;  %v497_v3 = vmul.f32 %v1277_v58, %v1277_v58  ;;  %v498_v47 = vmul.f32 %v1280_v59, %v1280_v59 }
  0x3f   : > { %v356_v55 = vadd.f32 %v355_v37, %v354_v30  ;;  %v517_v56 = vadd.f32 %v516_v40, %v515_v0  ;;  %v499_v36 = vmul.f32 %v1283_v60, %v1283_v60  ;;  %v500_v52 = vmul.f32 %v1298_v4, %v1298_v4  ;;  %v1965_v30 = vld [vmem:[#allocation32_spill] sm:$0xff] }
  0x40   : > { %v501_v53 = vmul.f32 %v1301_v5, %v1301_v5  ;;  %v520_v54 = vsel %vm315_vm0, %v453_v51, 0.0  ;;  %v502_v37 = vmul.f32 %v1304_v7, %v1304_v7  ;;  %v503_v58 = vmul.f32 %v1322_v14, %v1322_v14 }
  0x41   : > { %v358_v29 = vadd.f32 %v357_v57, %v356_v55  ;;  %v519_v59 = vadd.f32 %v518_v31, %v517_v56  ;;  %v504_v43 = vmul.f32 %v1325_v16, %v1325_v16  ;;  %v505_v60 = vmul.f32 %v1328_v19, %v1328_v19 }
  0x42   : > { %v506_v4 = vmul.f32 %v1343_v48, %v1343_v48  ;;  %v522_v5 = vsel %vm315_vm0, %v454_v44, 0.0  ;;  %v507_v57 = vmul.f32 %v1346_v11, %v1346_v11  ;;  %v508_v7 = vmul.f32 %v1349_v10, %v1349_v10 }
  0x43   : > { %v360_v51 = vadd.f32 %v1468_v62, %v358_v29  ;;  %v521_v14 = vadd.f32 %v520_v54, %v519_v59  ;;  %v509_v16 = vmul.f32 %v1962_v13, %v1962_v13  ;;  %v510_v19 = vmul.f32 %v1963_v33, %v1963_v33 }
  0x44   : > { %v511_v48 = vmul.f32 %v1964_v34, %v1964_v34  ;;  %v524_v44 = vsel %vm315_vm0, %v455_v63, 0.0  ;;  %v512_v11 = vmul.f32 %v1965_v30, %v1965_v30  ;;  %v526_v10 = vsel %vm315_vm0, %v456_v2, 0.0  ;;  %v1967_v34 = vld [vmem:[#allocation37_spill] sm:$0xff] }
  0x45   : > { %v362_v62 = vadd.f32 %v1480_v24, %v360_v51  ;;  %v523_v0 = vadd.f32 %v522_v5, %v521_v14  ;;  %v528_v40 = vsel %vm315_vm0, %v457_v9, 0.0  ;;  %v530_v31 = vsel %vm315_vm0, %v458_v6, 0.0 }
  0x46   : > { %v532_v55 = vsel %vm315_vm0, %v459_v1, 0.0  ;;  %v534_v56 = vsel %vm315_vm0, %v460_v42, 0.0  ;;  %v536_v63 = vsel %vm315_vm0, %v461_v12, 0.0  ;;  %v1617_v24 = vsel %vm315_vm0, %v482_v17, 0.0 }
  0x47   : > { %v364_v54 = vadd.f32 %v1484_v49, %v362_v62  ;;  %v525_v29 = vadd.f32 %v524_v44, %v523_v0  ;;  %v1620_v59 = vsel %vm315_vm0, %v483_v18, 0.0  ;;  %v1623_v2 = vsel %vm315_vm0, %v484_v20, 0.0  ;;  %v1724_v44 = vld [vmem:[%s1119_s10 + $0x100] sm:$0xff] }
  0x48   : > { %v1626_v6 = vsel %vm315_vm0, %v485_v21, 0.0  ;;  %v1629_v1 = vsel %vm315_vm0, %v486_v22, 0.0  ;;  %v1633_v9 = vsel %vm315_vm0, %v487_v8, 0.0  ;;  %v1636_v12 = vsel %vm315_vm0, %v488_v25, 0.0  ;;  %v1968_v62 = vld [vmem:[#allocation54_spill] sm:$0xff] }
  0x49   : > { %v366_v42 = vadd.f32 %v1488_v61, %v364_v54  ;;  %v527_v49 = vadd.f32 %v526_v10, %v525_v29  ;;  %v1639_v17 = vsel %vm315_vm0, %v489_v26, 0.0  ;;  %v1642_v18 = vsel %vm315_vm0, %v490_v27, 0.0  ;;  %v1966_v61 = vld [vmem:[#allocation51_spill] sm:$0xff]  ;;  %v1969_v0 = vld [vmem:[#allocation38_spill] sm:$0xff] }
  0x4a   : > { %v1645_v20 = vsel %vm315_vm0, %v491_v28, 0.0  ;;  %v1648_v21 = vsel %vm315_vm0, %v492_v32, 0.0  ;;  %v1652_v8 = vsel %vm315_vm0, %v493_v39, 0.0  ;;  %v1655_v25 = vsel %vm315_vm0, %v494_v41, 0.0 }
  0x4b   : > { %v368_v22 = vadd.f32 %v1966_v61, %v366_v42  ;;  %v529_v5 = vadd.f32 %v528_v40, %v527_v49  ;;  %v1658_v26 = vsel %vm315_vm0, %v495_v45, 0.0  ;;  %v1661_v27 = vsel %vm315_vm0, %v496_v46, 0.0  ;;  %v1971_v42 = vld [vmem:[#allocation40_spill] sm:$0xff]  ;;  %v1972_v61 = vld [vmem:[#allocation2_spill] sm:$0xff] }
  0x4c   : > { %v1664_v28 = vsel %vm315_vm0, %v497_v3, 0.0  ;;  %v1667_v32 = vsel %vm315_vm0, %v498_v47, 0.0  ;;  %v1671_v14 = vsel %vm315_vm0, %v499_v36, 0.0  ;;  %v1674_v41 = vsel %vm315_vm0, %v500_v52, 0.0 }
  0x4d   : > { %v370_v51 = vadd.f32 %v1502_v38, %v368_v22  ;;  %v531_v39 = vadd.f32 %v530_v31, %v529_v5  ;;  %v1677_v45 = vsel %vm315_vm0, %v501_v53, 0.0  ;;  %v1680_v46 = vsel %vm315_vm0, %v502_v37, 0.0 }
  0x4e   : > { %v1683_v3 = vsel %vm315_vm0, %v503_v58, 0.0  ;;  %v1686_v47 = vsel %vm315_vm0, %v504_v43, 0.0  ;;  %v1690_v13 = vsel %vm315_vm0, %v505_v60, 0.0  ;;  %v1693_v52 = vsel %vm315_vm0, %v506_v4, 0.0 }
  0x4f   : > { %v372_v38 = vadd.f32 %v1506_v50, %v370_v51  ;;  %v533_v36 = vadd.f32 %v532_v55, %v531_v39  ;;  %v1696_v53 = vsel %vm315_vm0, %v507_v57, 0.0  ;;  %v1699_v37 = vsel %vm315_vm0, %v508_v7, 0.0  ;;  %v1708_v50 = vld [vmem:[%s1119_s10 + $0xf8] sm:$0xff]  ;;  %v1970_v55 = vld [vmem:[#allocation39_spill] sm:$0xff] }
  0x50   : > { %v1702_v58 = vsel %vm315_vm0, %v509_v16, 0.0  ;;  %v1705_v43 = vsel %vm315_vm0, %v510_v19, 0.0  ;;  %v1712_v4 = vsel %vm315_vm0, %v511_v48, 0.0  ;;  %v1715_v57 = vsel %vm315_vm0, %v512_v11, 0.0  ;;  %v1973_v51 = vld [vmem:[#allocation41_spill] sm:$0xff] }
  0x51   : > { %v374_v60 = vadd.f32 %v1512_v23, %v372_v38  ;;  %v535_v33 = vadd.f32 %v534_v56, %v533_v36  ;;  %v377_v7 = vsel %vm315_vm0, %v1708_v50, 0.0  ;;  %v464_v16 = vmul.f32 %v1967_v34, %v1967_v34  ;;  %v1974_v38 = vld [vmem:[#allocation3_spill] sm:$0xff] }
  0x52   : > { %v538_v19 = vsel %vm315_vm0, %v1534_v15, 0.0  ;;  %v379_v48 = vsel %vm315_vm0, %v1724_v44, 0.0  ;;  %v465_v11 = vmul.f32 %v1969_v0, %v1969_v0  ;;  %v540_v10 = vsel %vm315_vm0, %v1536_v35, 0.0  ;;  %v1978_v0 = vld [vmem:[#allocation5_spill] sm:$0xff] }
  0x53   : > { %v376_v23 = vadd.f32 %v1968_v62, %v374_v60  ;;  %v537_v30 = vadd.f32 %v536_v63, %v535_v33  ;;  %v466_v56 = vmul.f32 %v1970_v55, %v1970_v55  ;;  %v542_v15 = vsel %vm315_vm0, %v464_v16, 0.0  ;;  %v1975_v33 = vld [vmem:[#allocation42_spill] sm:$0xff]  ;;  %v1976_v16 = vld [vmem:[#allocation4_spill] sm:$0xff] }
  0x54   : > { %v467_v63 = vmul.f32 %v1971_v42, %v1971_v42  ;;  %v544_v49 = vsel %vm315_vm0, %v465_v11, 0.0  ;;  %v468_v35 = vmul.f32 %v1973_v51, %v1973_v51 }
  0x55   : > { %v378_v40 = vadd.f32 %v377_v7, %v376_v23  ;;  %v539_v31 = vadd.f32 %v538_v19, %v537_v30  ;;  %v546_v39 = vsel %vm315_vm0, %v466_v56, 0.0  ;;  %v469_v7 = vmul.f32 %v1975_v33, %v1975_v33  ;;  %v1977_v23 = vld [vmem:[#allocation43_spill] sm:$0xff]  ;;  %v1980_v56 = vld [vmem:[#allocation6_spill] sm:$0xff] }
  0x56   : > { %v548_v34 = vsel %vm315_vm0, %v467_v63, 0.0  ;;  %v470_v30 = vmul.f32 %v1977_v23, %v1977_v23 }
  0x57   : > { %v380_v54 = vadd.f32 %v379_v48, %v378_v40  ;;  %v541_v29 = vadd.f32 %v540_v10, %v539_v31  ;;  %v550_v48 = vsel %vm315_vm0, %v468_v35, 0.0  ;;  %v1979_v40 = vld [vmem:[#allocation44_spill] sm:$0xff]  ;;  %v552_v55 = vsel %vm315_vm0, %v469_v7, 0.0 }
  0x58   : > { %v471_v31 = vmul.f32 %v1979_v40, %v1979_v40  ;;  %v554_v63 = vsel %vm315_vm0, %v470_v30, 0.0 }
  0x59   : > { %v382_v22 = vadd.f32 %v1972_v61, %v380_v54  ;;  %v543_v5 = vadd.f32 %v542_v15, %v541_v29  ;;  %v1981_v29 = vld [vmem:[#allocation45_spill] sm:$0xff] }
  0x5a   : > { %v472_v42 = vmul.f32 %v1981_v29, %v1981_v29  ;;  %v556_v35 = vsel %vm315_vm0, %v471_v31, 0.0 }
  0x5b   : > { %v384_v36 = vadd.f32 %v1974_v38, %v382_v22  ;;  %v545_v60 = vadd.f32 %v544_v49, %v543_v5  ;;  %v1982_v49 = vld [vmem:[#allocation7_spill] sm:$0xff]  ;;  %v1983_v5 = vld [vmem:[#allocation46_spill] sm:$0xff] }
  0x5c   : > { %v473_v51 = vmul.f32 %v1983_v5, %v1983_v5  ;;  %v558_v7 = vsel %vm315_vm0, %v472_v42, 0.0 }
  0x5d   : > { %v386_v19 = vadd.f32 %v1976_v16, %v384_v36  ;;  %v547_v62 = vadd.f32 %v546_v39, %v545_v60  ;;  %v1984_v39 = vld [vmem:[#allocation8_spill] sm:$0xff]  ;;  %v1985_v60 = vld [vmem:[#allocation47_spill] sm:$0xff] }
  0x5e   : > { %v474_v33 = vmul.f32 %v1985_v60, %v1985_v60  ;;  %v560_v30 = vsel %vm315_vm0, %v473_v51, 0.0 }
  0x5f   : > { %v388_v11 = vadd.f32 %v1978_v0, %v386_v19  ;;  %v549_v10 = vadd.f32 %v548_v34, %v547_v62  ;;  %v1986_v34 = vld [vmem:[#allocation9_spill] sm:$0xff]  ;;  %v1987_v62 = vld [vmem:[#allocation48_spill] sm:$0xff] }
  0x60   : > { %v475_v23 = vmul.f32 %v1987_v62, %v1987_v62  ;;  %v562_v31 = vsel %vm315_vm0, %v474_v33, 0.0 }
  0x61   : > { %v390_v15 = vadd.f32 %v1980_v56, %v388_v11  ;;  %v551_v54 = vadd.f32 %v550_v48, %v549_v10  ;;  %v1988_v48 = vld [vmem:[#allocation10_spill] sm:$0xff]  ;;  %v1989_v10 = vld [vmem:[#allocation49_spill] sm:$0xff] }
  0x62   : > { %v476_v40 = vmul.f32 %v1989_v10, %v1989_v10  ;;  %v564_v42 = vsel %vm315_vm0, %v475_v23, 0.0  ;;  %v1997_v23 = vld [vmem:[#allocation15_spill] sm:$0xff]  ;;  %v1998_v10 = vld [vmem:[#allocation16_spill] sm:$0xff] }
  0x63   : > { %v392_v61 = vadd.f32 %v1982_v49, %v390_v15  ;;  %v553_v22 = vadd.f32 %v552_v55, %v551_v54  ;;  %v1990_v55 = vld [vmem:[#allocation11_spill] sm:$0xff]  ;;  %v1991_v54 = vld [vmem:[#allocation50_spill] sm:$0xff] }
  0x64   : > { %v477_v29 = vmul.f32 %v1991_v54, %v1991_v54  ;;  %v566_v51 = vsel %vm315_vm0, %v476_v40, 0.0 }
  0x65   : > { %v394_v38 = vadd.f32 %v1984_v39, %v392_v61  ;;  %v555_v36 = vadd.f32 %v554_v63, %v553_v22  ;;  %v1992_v63 = vld [vmem:[#allocation12_spill] sm:$0xff] }
  0x66   : > { %v1993_v22 = vld [vmem:[#allocation52_spill] sm:$0xff]  ;;  %v568_v33 = vsel %vm315_vm0, %v477_v29, 0.0  ;;  %v2000_v29 = vld [vmem:[#allocation18_spill] sm:$0xff] }
  0x67   : > { %v396_v16 = vadd.f32 %v1986_v34, %v394_v38  ;;  %v557_v19 = vadd.f32 %v556_v35, %v555_v36  ;;  %v478_v5 = vmul.f32 %v1993_v22, %v1993_v22  ;;  %v1994_v35 = vld [vmem:[#allocation13_spill] sm:$0xff] }
  0x68   : > { %v1995_v36 = vld [vmem:[#allocation53_spill] sm:$0xff] }
  0x69   : > { %v398_v0 = vadd.f32 %v1988_v48, %v396_v16  ;;  %v559_v11 = vadd.f32 %v558_v7, %v557_v19  ;;  %v479_v60 = vmul.f32 %v1995_v36, %v1995_v36  ;;  %v1996_v7 = vld [vmem:[#allocation14_spill] sm:$0xff]  ;;  %v480_v19 = vmul.f32 %v1708_v50, %v1708_v50 }
  0x6a   : > { %v570_v62 = vsel %vm315_vm0, %v478_v5, 0.0  ;;  %v2002_v5 = vld [vmem:[#allocation20_spill] sm:$0xff]  ;;  %v2004_v36 = vld [vmem:[#allocation22_spill] sm:$0xff] }
  0x6b   : > { %v400_v56 = vadd.f32 %v1990_v55, %v398_v0  ;;  %v561_v15 = vadd.f32 %v560_v30, %v559_v11  ;;  %v481_v0 = vmul.f32 %v1724_v44, %v1724_v44  ;;  %v572_v11 = vsel %vm315_vm0, %v479_v60, 0.0 }
  0x6c   : > { %v574_v55 = vsel %vm315_vm0, %v480_v19, 0.0  ;;  %v2006_v19 = vld [vmem:[#allocation24_spill] sm:$0xff] }
  0x6d   : > { %v402_v49 = vadd.f32 %v1992_v63, %v400_v56  ;;  %v563_v61 = vadd.f32 %v562_v31, %v561_v15  ;;  %v1999_v56 = vld [vmem:[#allocation17_spill] sm:$0xff]  ;;  %v576_v50 = vsel %vm315_vm0, %v481_v0, 0.0 }
  0x6e   : > { %v2008_v0 = vld [vmem:[#allocation29_spill] sm:$0xff] }
  0x6f   : > { %v404_v39 = vadd.f32 %v1994_v35, %v402_v49  ;;  %v565_v38 = vadd.f32 %v564_v42, %v563_v61  ;;  %v2001_v49 = vld [vmem:[#allocation19_spill] sm:$0xff]  ;;  %v2003_v35 = vld [vmem:[#allocation21_spill] sm:$0xff] }
  0x71   : > { %v406_v34 = vadd.f32 %v1996_v7, %v404_v39  ;;  %v567_v16 = vadd.f32 %v566_v51, %v565_v38  ;;  %v2005_v7 = vld [vmem:[#allocation23_spill] sm:$0xff] }
  0x73   : > { %v408_v30 = vadd.f32 %v1997_v23, %v406_v34  ;;  %v569_v48 = vadd.f32 %v568_v33, %v567_v16 }
  0x75   : > { %v410_v40 = vadd.f32 %v1998_v10, %v408_v30  ;;  %v571_v31 = vadd.f32 %v570_v62, %v569_v48  ;;  %v2007_v30 = vld [vmem:[#allocation25_spill] sm:$0xff]  ;;  %v2009_v10 = vld [vmem:[#allocation30_spill] sm:$0xff] }
  0x77   : > { %v412_v15 = vadd.f32 %v1999_v56, %v410_v40  ;;  %v573_v54 = vadd.f32 %v572_v11, %v571_v31  ;;  %v2010_v31 = vld [vmem:[#allocation31_spill] sm:$0xff]  ;;  %v2011_v56 = vld [vmem:[#allocation33_spill] sm:$0xff] }
  0x79   : > { %v414_v42 = vadd.f32 %v2000_v29, %v412_v15  ;;  %v575_v63 = vadd.f32 %v574_v55, %v573_v54  ;;  %v2012_v54 = vld [vmem:[#allocation34_spill] sm:$0xff]  ;;  %v2013_v29 = vld [vmem:[#allocation35_spill] sm:$0xff] }
  0x7b   : > { %v416_v61 = vadd.f32 %v2001_v49, %v414_v42  ;;  %v577_v22 = vadd.f32 %v576_v50, %v575_v63  ;;  %v2014_v63 = vld [vmem:[#allocation36_spill] sm:$0xff] }
  0x7d   : > { %v418_v44 = vadd.f32 %v2002_v5, %v416_v61  ;;  %v579_v51 = vadd.f32 %v1617_v24, %v577_v22 }
  0x7f   : > { %v420_v39 = vadd.f32 %v2003_v35, %v418_v44  ;;  %v581_v38 = vadd.f32 %v1620_v59, %v579_v51 }
  0x81   : > { %v422_v60 = vadd.f32 %v2004_v36, %v420_v39  ;;  %v583_v33 = vadd.f32 %v1623_v2, %v581_v38 }
  0x83   : > { %v424_v34 = vadd.f32 %v2005_v7, %v422_v60  ;;  %v585_v16 = vadd.f32 %v1626_v6, %v583_v33 }
  0x85   : > { %v426_v62 = vadd.f32 %v2006_v19, %v424_v34  ;;  %v587_v23 = vadd.f32 %v1629_v1, %v585_v16 }
  0x87   : > { %v428_v48 = vadd.f32 %v2007_v30, %v426_v62  ;;  %v589_v24 = vadd.f32 %v1633_v9, %v587_v23 }
  0x89   : > { %v430_v11 = vadd.f32 %v2008_v0, %v428_v48  ;;  %v591_v59 = vadd.f32 %v1636_v12, %v589_v24 }
  0x8b   : > { %v432_v40 = vadd.f32 %v2009_v10, %v430_v11  ;;  %v593_v2 = vadd.f32 %v1639_v17, %v591_v59 }
  0x8d   : > { %v434_v55 = vadd.f32 %v2010_v31, %v432_v40  ;;  %v595_v6 = vadd.f32 %v1642_v18, %v593_v2 }
  0x8f   : > { %v436_v15 = vadd.f32 %v2011_v56, %v434_v55  ;;  %v597_v1 = vadd.f32 %v1645_v20, %v595_v6 }
  0x91   : > { %v438_v50 = vadd.f32 %v2012_v54, %v436_v15  ;;  %v599_v9 = vadd.f32 %v1648_v21, %v597_v1 }
  0x93   : > { %v440_v42 = vadd.f32 %v2013_v29, %v438_v50  ;;  %v601_v12 = vadd.f32 %v1652_v8, %v599_v9 }
  0x95   : > { %v442_v49 = vadd.f32 %v2014_v63, %v440_v42  ;;  %v603_v17 = vadd.f32 %v1655_v25, %v601_v12 }
  0x97   : > { %v605_v61 = vadd.f32 %v1658_v26, %v603_v17  ;;  %v443_v35 = vrot.slane %v442_v49, 4 }
  0x99   : > { %v607_v18 = vadd.f32 %v1661_v27, %v605_v61 }
  0x9b   : > { %v609_v22 = vadd.f32 %v1664_v28, %v607_v18 }
  0x9d   : > { %v611_v20 = vadd.f32 %v1667_v32, %v609_v22 }
  0x9f   : > { %v613_v5 = vadd.f32 %v1671_v14, %v611_v20  ;;  %v444_v14 = vadd.f32 %v443_v35, %v442_v49 }
  0xa1   : > { %v615_v21 = vadd.f32 %v1674_v41, %v613_v5  ;;  %v445_v39 = vrot.slane %v444_v14, 2 }
  0xa3   : > { %v617_v44 = vadd.f32 %v1677_v45, %v615_v21 }
  0xa5   : > { %v619_v8 = vadd.f32 %v1680_v46, %v617_v44 }
  0xa7   : > { %v621_v51 = vadd.f32 %v1683_v3, %v619_v8 }
  0xa9   : > { %v623_v25 = vadd.f32 %v1686_v47, %v621_v51  ;;  %v446_v47 = vadd.f32 %v445_v39, %v444_v14 }
  0xab   : > { %v625_v26 = vadd.f32 %v1690_v13, %v623_v25  ;;  %v447_v36 = vrot.slane %v446_v47, 1 }
  0xad   : > { %v627_v27 = vadd.f32 %v1693_v52, %v625_v26  ;;  %v448_v33 = vadd.f32 %v447_v36, %v446_v47 }
  0xaf   : > { %v629_v28 = vadd.f32 %v1696_v53, %v627_v27 }
  0xb1   : > { %v631_v32 = vadd.f32 %v1699_v37, %v629_v28 }
  0xb3   : > { %v633_v41 = vadd.f32 %v1702_v58, %v631_v32 }
  0xb5   : > { %v635_v45 = vadd.f32 %v1705_v43, %v633_v41 }
  0xb7   : > { %v637_v46 = vadd.f32 %v1712_v4, %v635_v45 }
  0xb9   : > { %v639_v3 = vadd.f32 %v1715_v57, %v637_v46 }
  0xbb   : > { %v640_v38 = vrot.slane %v639_v3, 4 }
  0xbd   : > { %v641_v13 = vadd.f32 %v640_v38, %v639_v3 }
  0xbf   : > { %v642_v52 = vrot.slane %v641_v13, 2 }
  0xc1   : > { %v643_v60 = vadd.f32 %v642_v52, %v641_v13  ;;  %651 = sbr.rel (%p938_p7) target bundleno = 201 (0xc9), region = 44 }
  0xc3   : > { %v644_v53 = vrot.slane %v643_v60, 1 }
  0xc5   : > { %v645_v37 = vadd.f32 %v644_v53, %v643_v60 }
  0xc7   : > { %v647_v7 = vsel %vm646_vm1, %v448_v33, %v645_v37 }
  0xc8   : > { %653 = vst.msk [vmem:[%s1114_s6] sm:$0x3] %vm652_vm2, %v647_v7 }
  0xc9 PF: > { %p939_p8 = scmp.eq.s32.totalorder %s1027_s18, 0 }
  0xca   : > { %vm660_vm3 = vcmask (!%p939_p8), 58368  }
  0xcb   : > { %657 = sbr.rel (%p939_p8) target bundleno = 211 (0xd3), region = 48 }
  0xcf   : > { %v658_v58 = vld [vmem:[%s1114_s6] sm:$0x3] (!%p939_p8) }
  0xd0   : > { %v659_v43 = vadd.f32 (!%p939_p8), %v658_v58, %v647_v7 }
  0xd2   : > { %661 = vst.msk [vmem:[%s1114_s6] sm:$0x3] %vm660_vm3, %v659_v43 }
  0xd3 PF: > { %p940_p9 = scmp.ne.s32.totalorder %s1027_s18, 1 }
  0xd4   : > { %v667_v4 = vld [vmem:[%s1884_s1] sm:$0xff] (!%p940_p9)  ;;  %v1045_v34 = vmov (!%p940_p9), 0.0   ;;  %vm1046_vm4 = vmmov (!%p940_p9), 0   ;;  %vm746_vm5 = vcmask (!%p940_p9), 1043456   ;;  %vm742_vm6 = vcmask (!%p940_p9), 31744  }
  0xd5   : > { %665 = sbr.rel (%p940_p9) target bundleno = 679 (0x2a7), region = 52  ;;  %950 = vmatprep.subr.mxu0 (!%p940_p9), %v1045_v34  ;;  %952 = vmatprep.mubr.msk.f32.mxu0 (!%p940_p9), %vm1046_vm4, %v1045_v34  ;;  %v741_v16 = vld [vmem:[%s1885_s2] sm:$0xf] (!%p940_p9)  ;;  %v1047_v10 = vmov (!%p940_p9), 1966171168   ;;  %v833_v2 = vlaneseq (!%p940_p9)  ;;  %vm857_vm7 = vcmask (!%p940_p9), 58368  }
  0xd6   : > { %951 = vmatpush3.msra.mxu0 (!%p940_p9), %v667_v4  ;;  %955 = vmatprep.subr.mxu1 (!%p940_p9), %v1045_v34  ;;  %v831_v40 = vunpack.c.l.s4 (!%p940_p9), %v1047_v10  ;;  %v828_v54 = vld [vmem:[%s1886_s3] sm:$0x1] (!%p940_p9) }
  0xd7   : > { %957 = vmatprep.mubr.msk.f32.mxu1 (!%p940_p9), %vm1046_vm4, %v1045_v34  ;;  %956 = vmatpush3.msk.msra.mxu1 (!%p940_p9), %vm746_vm5, %v741_v16  ;;  %v834_v55 = vshrl.u32 (!%p940_p9), %v833_v2, 7  ;;  %v847_v29 = vld [vmem:[%s1887_s4] sm:$0x1] (!%p940_p9) }
  0xd8   : > { %v832_v31 = vunpack.c.0.s8 (!%p940_p9), %v831_v40 }
  0xd9   : > { %v666_v57 = vld [vmem:[%s1114_s6] sm:$0x3] (!%p940_p9)  ;;  %v853_v12 = vsub.s32 (!%p940_p9), 0, %v834_v55 }
  0xda   : > { %953 = vmatmul.mubr.msk.f32.vlgmr.msra.gmra.mrb[0].mxu0 (!%p940_p9), %vm315_vm0, %v666_v57  ;;  %v835_v6 = vsub.s32 (!%p940_p9), %v832_v31, %v834_v55 }
 0x1ad   : > { %v737_v19 = vpop.f32.mrb[0].mxu0 }
 0x1ae   : > { %v954_v62 = vpop.f32.mrb[1].mxu0  ;;  %958 = vmatmul.mubr.msk.f32.vlgmr.msra.gmra.mrb[0].mxu1 %vm742_vm6, %v737_v19 }
 0x281   : > { %v816_v23 = vpop.f32.mrb[0].mxu1 }
 0x282   : > { %v820_v30 = vmul.f32 %v816_v23, %v816_v23  ;;  %v959_v48 = vpop.f32.mrb[1].mxu1 }
 0x284   : > { %v822_v24 = vrot.slane %v820_v30, 7 }
 0x286   : > { %v824_v0 = vsub.f32 %v816_v23, %v822_v24 }
 0x288   : > { %v825_v11 = vmax.f32 %v824_v0, 0.0 }
 0x28a   : > { %v826_v59 = vadd.f32 1e-06, %v825_v11 }
 0x28c   : > { %1003 = vrsqrt.f32 %v826_v59 }
 0x296   : > { %v1004_v56 = vpop.eup %1003 }
 0x297   : > { %v836_v15 = vrot.slane %v1004_v56, %v835_v6 }
 0x299   : > { %v837_v1 = vcombine.high %v836_v15, %v836_v15 }
 0x29b   : > { %v844_v50 = vrot.slane %v837_v1, %v835_v6 }
 0x29d   : > { %v846_v9 = vmul.f32 %v844_v50, %v828_v54 }
 0x29f   : > { %v848_v42 = vmul.f32 %v846_v9, %v816_v23 }
 0x2a1   : > { %v849_v63 = vsub.f32 %v847_v29, %v848_v42 }
 0x2a3   : > { %v854_v49 = vrot.slane %v849_v63, %v853_v12 }
 0x2a5   : > { %v856_v17 = vsel %vm646_vm1, %v846_v9, %v854_v49 }
 0x2a6   : > { %858 = vst.msk [vmem:[%s1114_s6] sm:$0x3] %vm857_vm7, %v856_v17 }
 0x2a7 PF: > { %s15_s22 = sadd.s32 1, %s1043_s22   ;;  %s2015_s18 = smov %s1035_s20 }
 0x2a8   : > { %p12_p10 = scmp.ge.s32.totalorder %s15_s22, 6   ;;  %s2016_s19 = smov %s1039_s21 }
 0x2a9   : > { %s2017_s20 = smov %s2020_s23  ;;  %s2018_s21 = smov %s2024_s24 }
 0x2aa   :  { %14 = sbr.rel (!%p12_p10) target bundleno = 3 (0x3), region = 82 }

// kernel: down_block_3d.10
= control target key start
LH: loop header
LB: loop body
LE: loop exit
PB: predicated region body
PF: predicated region fallthrough
CT: control target
= control target key end

     0   :  { %s3580_s12 = smov 0   ;;  %s3582_s13 = smov 0   ;;  %s4100_s0 = inlined_call_operand.vmem [shape: f32[8,328,8], index: 0, kind: input, shape index: {}]   ;;  %s4101_s1 = inlined_call_operand.vmem [shape: f32[9,8,16], index: 1, kind: input, shape index: {}]   ;;  %s4102_s2 = inlined_call_operand.vmem [shape: f32[8,1,16], index: 2, kind: input, shape index: {}]   ;;  %s4103_s3 = inlined_call_operand.vmem [shape: f32[8,288,16], index: 3, kind: output, shape index: {}]  }
   0x1   :  { %s3584_s14 = smov 0   ;;  %s3586_s15 = smov 0  }
   0x2   :  { %s3588_s16 = smov 0  }
   0x3 LB: > { %s22_s17 = sadd.s32 1, %s3550_s14  ;;  %s25_s18 = sadd.s32 1, %s3554_s15  ;;  %s3558_s16 = sphi %s3588_s16, %s13_s16   ;;  %s3554_s15 = sphi %s3586_s15, %s4107_s15   ;;  %s3550_s14 = sphi %s3584_s14, %s4106_s14   ;;  %s3546_s13 = sphi %s3582_s13, %s4105_s13   ;;  %s3542_s12 = sphi %s3580_s12, %s4104_s12  }
   0x4   : > { %p23_p0 = scmp.ge.s32.totalorder %s22_s17, 2  ;;  %p2580_p1 = scmp.ge.s32.totalorder %s3558_s16, 1 }
   0x5   : > { %p159_p2 = scmp.lt.s32.totalorder %s3558_s16, 17 }
   0x6   : > { %s4109_s17 = smov (%p23_p0, %s22_s17), 0  ;;  %s4111_s18 = smov (!%p23_p0, %s25_s18), %s3554_s15 }
   0x7   : > { %p160_p3 = pnand %p2580_p1, %p159_p2  ;;  %p27_p4 = scmp.ge.s32.totalorder %s4111_s18, 8 }
   0x8   : > { %v3615_v0 = vld [vmem:[%s4101_s1 + $0x20] sm:$0xff] (!%p160_p3)  ;;  %v2601_v1 = vld [vmem:[%s4101_s1 + $0x8] sm:$0xff] (!%p160_p3)  ;;  %p190_p5 = scmp.lt.s32.totalorder (!%p160_p3), %s3546_s13, 7  ;;  %s208_s27 = smul.u32 (!%p160_p3), 144, %s3542_s12  ;;  %vm251_vm0 = vcmask (!%p160_p3), 64512   ;;  %v2804_v10 = vld [vmem:[%s4101_s1 + $0x30] sm:$0xff] (!%p160_p3) }
   0x9   : > { %s4113_s18 = smov (%p27_p4, %s4111_s18), 0  ;;  %163 = sbr.rel (%p160_p3) target bundleno = 401 (0x191), region = 32 }
   0xa   : > { %v2767_v2 = vld [vmem:[%s4101_s1 + $0x28] sm:$0xff] (!%p160_p3)  ;;  %3187 = vmatprep.subr.mxu0 (!%p160_p3), %v3615_v0  ;;  %3071 = vmatprep.subr.mxu1 (!%p160_p3), %v2601_v1  ;;  %v228_v3 = vld [vmem:[%s4101_s1] sm:$0xff] (!%p160_p3)  ;;  %v3653_v11 = vld [vmem:[%s4101_s1 + $0x10] sm:$0xff] (!%p160_p3)  ;;  %s198_s23 = smul.u32 (!%p160_p3), 18, %s3542_s12  ;;  %vm2438_vm1 = vcmask (!%p160_p3), 130048  }
   0xb   : > { %3188 = vmatpush3.msra.mxu0 (!%p160_p3), %v3615_v0  ;;  %3072 = vmatpush3.msra.mxu1 (!%p160_p3), %v2601_v1  ;;  %v3699_v32 = vld [vmem:[%s4101_s1 + $0x38] sm:$0xff] (!%p160_p3) }
   0xc   : > { %3216 = vmatprep.subr.mxu0 (!%p160_p3), %v2767_v2  ;;  %3100 = vmatprep.subr.mxu1 (!%p160_p3), %v228_v3  ;;  %v3763_v49 = vld [vmem:[%s4101_s1 + $0x18] sm:$0xff] (!%p160_p3)  ;;  %p201_p6 = scmp.lt.s32.totalorder (!%p160_p3), %s198_s23, 35 }
  0x10   : > { %s4115_s13 = smov (!%p190_p5, %s3546_s13), 7  ;;  %s4117_s23 = smov (!%p201_p6, %s198_s23), 35 }
  0x11   : > { %s3478_s28 = smul.u32 328, %s4115_s13 }
  0x12   : > { %s3479_s24 = smul.u32 36, %s4115_s13 }
  0x13   : > { %s194_s4 = scalar_lea.vmem %s4100_s0, %s3478_s28  ;;  %s197_s28 = scalar_lea.vmem %s4102_s2, %s4115_s13 }
  0x14   : > { %s3635_s5 = scalar_lea.vmem %s194_s4, %s208_s27  ;;  %s204_s25 = sadd.s32 %s3479_s24, %s4117_s23 }
  0x15   : > { %v2583_v4 = vld [vmem:[%s3635_s5 + $0x1] sm:$0xff]  ;;  %v2712_v5 = vld [vmem:[%s3635_s5 + $0x13] sm:$0xff]  ;;  %v2584_v6 = vld [vmem:[%s3635_s5 + $0x9] sm:$0xff]  ;;  %s2582_s29 = sshll.u32 %s204_s25, 3 }
  0x16   : > { %3073 = vmatprep.mubr.msk.f32.mxu1 %vm251_vm0, %v2583_v4  ;;  %3189 = vmatprep.mubr.msk.f32.mxu0 %vm251_vm0, %v2712_v5  ;;  %v2713_v7 = vld [vmem:[%s3635_s5 + $0x1b] sm:$0xff]  ;;  %v2585_v8 = vld [vmem:[%s3635_s5 + $0x11] sm:$0xff]  ;;  %v2714_v9 = vld [vmem:[%s3635_s5 + $0x23] sm:$0xff]  ;;  %s4029_s4 = scalar_lea.vmem %s4103_s3, %s2582_s29 }
  0x17   : > { %3074 = vmatmul.mubr.msk.f32.vlgmr.msra.gmra.mrb[0].mxu1 %vm251_vm0, %v2584_v6  ;;  %3190 = vmatmul.mubr.msk.f32.vlgmr.msra.gmra.mrb[0].mxu0 %vm251_vm0, %v2713_v7  ;;  %v2586_v12 = vld [vmem:[%s3635_s5 + $0x19] sm:$0xff]  ;;  %v2715_v13 = vld [vmem:[%s3635_s5 + $0x2b] sm:$0xff]  ;;  %v2587_v14 = vld [vmem:[%s3635_s5 + $0x21] sm:$0xff] }
  0x18   : > { %3217 = vmatpush3.msra.mxu0 %v2767_v2  ;;  %3076 = vmatprep.mubr.msk.f32.mxu1 %vm251_vm0, %v2585_v8  ;;  %v2716_v15 = vld [vmem:[%s3635_s5 + $0x33] sm:$0xff]  ;;  %v2588_v16 = vld [vmem:[%s3635_s5 + $0x29] sm:$0xff]  ;;  %v2717_v17 = vld [vmem:[%s3635_s5 + $0x3b] sm:$0xff] }
  0x19   : > { %3192 = vmatprep.mubr.msk.f32.mxu0 %vm251_vm0, %v2714_v9  ;;  %3101 = vmatpush3.msra.mxu1 %v228_v3  ;;  %v2589_v18 = vld [vmem:[%s3635_s5 + $0x31] sm:$0xff]  ;;  %v2718_v19 = vld [vmem:[%s3635_s5 + $0x43] sm:$0xff]  ;;  %v2590_v20 = vld [vmem:[%s3635_s5 + $0x39] sm:$0xff] }
  0x1a   : > { %3245 = vmatprep.subr.mxu0 %v2804_v10  ;;  %3129 = vmatprep.subr.mxu1 %v3653_v11  ;;  %v2719_v21 = vld [vmem:[%s3635_s5 + $0x4b] sm:$0xff]  ;;  %v2591_v22 = vld [vmem:[%s3635_s5 + $0x41] sm:$0xff]  ;;  %v2720_v23 = vld [vmem:[%s3635_s5 + $0x53] sm:$0xff] }
  0x1b   : > { %3077 = vmatmul.mubr.msk.f32.gmra.mrb[2].mxu1 %vm251_vm0, %v2586_v12  ;;  %3193 = vmatmul.mubr.msk.f32.gmra.mrb[2].mxu0 %vm251_vm0, %v2715_v13  ;;  %v2592_v24 = vld [vmem:[%s3635_s5 + $0x49] sm:$0xff]  ;;  %v2721_v25 = vld [vmem:[%s3635_s5 + $0x5b] sm:$0xff]  ;;  %v2593_v26 = vld [vmem:[%s3635_s5 + $0x51] sm:$0xff] }
  0x1c   : > { %3079 = vmatprep.mubr.msk.f32.mxu1 %vm251_vm0, %v2587_v14  ;;  %3195 = vmatprep.mubr.msk.f32.mxu0 %vm251_vm0, %v2716_v15  ;;  %v2749_v27 = vld [vmem:[%s3635_s5 + $0x14] sm:$0xff]  ;;  %v2750_v29 = vld [vmem:[%s3635_s5 + $0x1c] sm:$0xff]  ;;  %v3694_v31 = vld [vmem:[%s3635_s5 + $0x24] sm:$0xff] }
  0x1d   : > { %v2594_v28 = vld [vmem:[%s3635_s5 + $0x59] sm:$0xff]  ;;  %v2595_v30 = vld [vmem:[%s3635_s5 + $0x61] sm:$0xff]  ;;  %v2596_v33 = vld [vmem:[%s3635_s5 + $0x69] sm:$0xff] }
  0x1e   : > { %v3706_v34 = vld [vmem:[%s3635_s5 + $0x2c] sm:$0xff]  ;;  %v3712_v36 = vld [vmem:[%s3635_s5 + $0x34] sm:$0xff]  ;;  %v3723_v38 = vld [vmem:[%s3635_s5 + $0x3c] sm:$0xff] }
  0x1f   : > { %3080 = vmatmul.mubr.msk.f32.gmra.mrb[4].mxu1 %vm251_vm0, %v2588_v16  ;;  %3196 = vmatmul.mubr.msk.f32.gmra.mrb[4].mxu0 %vm251_vm0, %v2717_v17  ;;  %v2597_v35 = vld [vmem:[%s3635_s5 + $0x71] sm:$0xff]  ;;  %v2598_v37 = vld [vmem:[%s3635_s5 + $0x79] sm:$0xff]  ;;  %v2599_v39 = vld [vmem:[%s3635_s5 + $0x81] sm:$0xff] }
  0x20   : > { %3082 = vmatprep.mubr.msk.f32.mxu1 %vm251_vm0, %v2589_v18  ;;  %3198 = vmatprep.mubr.msk.f32.mxu0 %vm251_vm0, %v2718_v19  ;;  %v3727_v40 = vld [vmem:[%s3635_s5 + $0x44] sm:$0xff]  ;;  %v3737_v42 = vld [vmem:[%s3635_s5 + $0x4c] sm:$0xff]  ;;  %v3741_v44 = vld [vmem:[%s3635_s5 + $0x54] sm:$0xff] }
  0x21   : > { %v2600_v41 = vld [vmem:[%s3635_s5 + $0x89] sm:$0xff]  ;;  %v210_v43 = vld [vmem:[%s3635_s5] sm:$0xff]  ;;  %v213_v50 = vld [vmem:[%s3635_s5 + $0x18] sm:$0xff] }
  0x22   : > { %v211_v45 = vld [vmem:[%s3635_s5 + $0x8] sm:$0xff]  ;;  %v3751_v46 = vld [vmem:[%s3635_s5 + $0x5c] sm:$0xff]  ;;  %v212_v47 = vld [vmem:[%s3635_s5 + $0x10] sm:$0xff] }
  0x23   : > { %3083 = vmatmul.mubr.msk.f32.gmra.mrb[6].mxu1 %vm251_vm0, %v2590_v20  ;;  %3199 = vmatmul.mubr.msk.f32.gmra.mrb[6].mxu0 %vm251_vm0, %v2719_v21  ;;  %v3755_v48 = vld [vmem:[%s3635_s5 + $0x64] sm:$0xff]  ;;  %v2760_v51 = vld [vmem:[%s3635_s5 + $0x6c] sm:$0xff]  ;;  %v2761_v53 = vld [vmem:[%s3635_s5 + $0x74] sm:$0xff] }
  0x24   : > { %3085 = vmatprep.mubr.msk.f32.mxu1 %vm251_vm0, %v2591_v22  ;;  %3201 = vmatprep.mubr.msk.f32.mxu0 %vm251_vm0, %v2720_v23  ;;  %v214_v52 = vld [vmem:[%s3635_s5 + $0x20] sm:$0xff]  ;;  %v215_v54 = vld [vmem:[%s3635_s5 + $0x28] sm:$0xff]  ;;  %v216_v56 = vld [vmem:[%s3635_s5 + $0x30] sm:$0xff] }
  0x25   : > { %v2762_v55 = vld [vmem:[%s3635_s5 + $0x7c] sm:$0xff]  ;;  %v2763_v57 = vld [vmem:[%s3635_s5 + $0x84] sm:$0xff]  ;;  %v2764_v59 = vld [vmem:[%s3635_s5 + $0x8c] sm:$0xff] }
  0x26   : > { %v217_v58 = vld [vmem:[%s3635_s5 + $0x38] sm:$0xff]  ;;  %v218_v60 = vld [vmem:[%s3635_s5 + $0x40] sm:$0xff]  ;;  %v219_v62 = vld [vmem:[%s3635_s5 + $0x48] sm:$0xff] }
  0x27   : > { %3086 = vmatmul.mubr.msk.f32.gmra.mrb[8].mxu1 %vm251_vm0, %v2592_v24  ;;  %3202 = vmatmul.mubr.msk.f32.gmra.mrb[8].mxu0 %vm251_vm0, %v2721_v25  ;;  %v2765_v61 = vld [vmem:[%s3635_s5 + $0x94] sm:$0xff]  ;;  %v2766_v63 = vld [vmem:[%s3635_s5 + $0x9c] sm:$0xff]  ;;  %v223_v5 = vld [vmem:[%s3635_s5 + $0x68] sm:$0xff] }
  0x28   : > { %3088 = vmatprep.mubr.msk.f32.mxu1 %vm251_vm0, %v2593_v26  ;;  %3218 = vmatprep.mubr.msk.f32.mxu0 %vm251_vm0, %v2749_v27  ;;  %v220_v1 = vld [vmem:[%s3635_s5 + $0x50] sm:$0xff]  ;;  %v221_v2 = vld [vmem:[%s3635_s5 + $0x58] sm:$0xff]  ;;  %v222_v3 = vld [vmem:[%s3635_s5 + $0x60] sm:$0xff] }
  0x29   : > { %v3807_v4 = vld [vmem:[%s4101_s1 + $0x40] sm:$0xff]  ;;  %v224_v6 = vld [vmem:[%s3635_s5 + $0x70] sm:$0xff]  ;;  %v225_v7 = vld [vmem:[%s3635_s5 + $0x78] sm:$0xff] }
  0x2a   : > { %v226_v8 = vld [vmem:[%s3635_s5 + $0x80] sm:$0xff]  ;;  %v227_v9 = vld [vmem:[%s3635_s5 + $0x88] sm:$0xff]  ;;  %v3843_v12 = vld [vmem:[%s3635_s5 + $0x12] sm:$0xff] }
  0x2b   : > { %3089 = vmatmul.mubr.msk.f32.gmra.mrb[10].mxu1 %vm251_vm0, %v2594_v28  ;;  %3219 = vmatmul.mubr.msk.f32.vlgmr.msra.gmra.mrb[0].mxu0 %vm251_vm0, %v2750_v29  ;;  %v3851_v13 = vld [vmem:[%s3635_s5 + $0x1a] sm:$0xff]  ;;  %v3855_v14 = vld [vmem:[%s3635_s5 + $0x22] sm:$0xff]  ;;  %v2643_v15 = vld [vmem:[%s3635_s5 + $0x2a] sm:$0xff] }
  0x2c   : > { %3246 = vmatpush3.msra.mxu0 %v2804_v10  ;;  %3091 = vmatprep.mubr.msk.f32.mxu1 %vm251_vm0, %v2595_v30  ;;  %v2638_v10 = vld [vmem:[%s3635_s5 + $0x2] sm:$0xff]  ;;  %v3866_v16 = vld [vmem:[%s3635_s5 + $0x32] sm:$0xff]  ;;  %v2645_v17 = vld [vmem:[%s3635_s5 + $0x3a] sm:$0xff] }
  0x2d   : > { %3221 = vmatprep.mubr.msk.f32.mxu0 %vm251_vm0, %v3694_v31  ;;  %3274 = vmatprep.subr.mxu0 %v3699_v32  ;;  %v3875_v18 = vld [vmem:[%s3635_s5 + $0x42] sm:$0xff]  ;;  %v2647_v20 = vld [vmem:[%s3635_s5 + $0x4a] sm:$0xff]  ;;  %v2648_v22 = vld [vmem:[%s3635_s5 + $0x52] sm:$0xff] }
  0x2e   : > { %v2802_v19 = vld [vmem:[%s3635_s5 + $0xa4] sm:$0xff]  ;;  %v2803_v21 = vld [vmem:[%s3635_s5 + $0xac] sm:$0xff]  ;;  %v2649_v24 = vld [vmem:[%s3635_s5 + $0x5a] sm:$0xff] }
  0x2f   : > { %3092 = vmatmul.mubr.msk.f32.gmra.mrb[12].mxu1 %vm251_vm0, %v2596_v33  ;;  %3222 = vmatmul.mubr.msk.f32.gmra.mrb[2].mxu0 %vm251_vm0, %v3706_v34  ;;  %v2823_v23 = vld [vmem:[%s3635_s5 + $0x25] sm:$0xff]  ;;  %v2824_v25 = vld [vmem:[%s3635_s5 + $0x2d] sm:$0xff]  ;;  %v2825_v27 = vld [vmem:[%s3635_s5 + $0x35] sm:$0xff] }
  0x30   : > { %3094 = vmatprep.mubr.msk.f32.mxu1 %vm251_vm0, %v2597_v35  ;;  %3224 = vmatprep.mubr.msk.f32.mxu0 %vm251_vm0, %v3712_v36  ;;  %v2650_v26 = vld [vmem:[%s3635_s5 + $0x62] sm:$0xff]  ;;  %v2651_v28 = vld [vmem:[%s3635_s5 + $0x6a] sm:$0xff]  ;;  %v2652_v30 = vld [vmem:[%s3635_s5 + $0x72] sm:$0xff] }
  0x31   : > { %v2826_v29 = vld [vmem:[%s3635_s5 + $0x3d] sm:$0xff]  ;;  %v2828_v33 = vld [vmem:[%s3635_s5 + $0x4d] sm:$0xff]  ;;  %v2829_v35 = vld [vmem:[%s3635_s5 + $0x55] sm:$0xff] }
  0x33   : > { %3095 = vmatmul.mubr.msk.f32.gmra.mrb[14].mxu1 %vm251_vm0, %v2598_v37  ;;  %3225 = vmatmul.mubr.msk.f32.gmra.mrb[4].mxu0 %vm251_vm0, %v3723_v38  ;;  %v2830_v37 = vld [vmem:[%s3635_s5 + $0x5d] sm:$0xff] }
  0x34   : > { %3097 = vmatprep.mubr.msk.f32.mxu1 %vm251_vm0, %v2599_v39  ;;  %3227 = vmatprep.mubr.msk.f32.mxu0 %vm251_vm0, %v3727_v40  ;;  %v2832_v39 = vld [vmem:[%s3635_s5 + $0x6d] sm:$0xff] }
  0x37   : > { %3098 = vmatmul.mubr.msk.f32.gmra.mrb[16].mxu1 %vm251_vm0, %v2600_v41  ;;  %3228 = vmatmul.mubr.msk.f32.gmra.mrb[6].mxu0 %vm251_vm0, %v3737_v42  ;;  %v2834_v41 = vld [vmem:[%s3635_s5 + $0x7d] sm:$0xff] }
  0x38   : > { %3102 = vmatprep.mubr.msk.f32.mxu1 %vm251_vm0, %v210_v43  ;;  %3230 = vmatprep.mubr.msk.f32.mxu0 %vm251_vm0, %v3741_v44  ;;  %v2836_v43 = vld [vmem:[%s3635_s5 + $0x8d] sm:$0xff] }
  0x3b   : > { %3103 = vmatmul.mubr.msk.f32.vlgmr.msra.gmra.mrb[0].mxu1 %vm251_vm0, %v211_v45  ;;  %3231 = vmatmul.mubr.msk.f32.gmra.mrb[8].mxu0 %vm251_vm0, %v3751_v46  ;;  %v2839_v45 = vld [vmem:[%s3635_s5 + $0xa5] sm:$0xff] }
  0x3c   : > { %3105 = vmatprep.mubr.msk.f32.mxu1 %vm251_vm0, %v212_v47  ;;  %3233 = vmatprep.mubr.msk.f32.mxu0 %vm251_vm0, %v3755_v48  ;;  %v2860_v47 = vld [vmem:[%s3635_s5 + $0x26] sm:$0xff] }
  0x3d   : > { %3130 = vmatpush3.msra.mxu1 %v3653_v11  ;;  %v2639_v11 = vld [vmem:[%s3635_s5 + $0xa] sm:$0xff] }
  0x3e   : > { %3158 = vmatprep.subr.mxu1 %v3763_v49 }
  0x3f   : > { %3106 = vmatmul.mubr.msk.f32.gmra.mrb[2].mxu1 %vm251_vm0, %v213_v50  ;;  %3234 = vmatmul.mubr.msk.f32.gmra.mrb[10].mxu0 %vm251_vm0, %v2760_v51  ;;  %v2863_v50 = vld [vmem:[%s3635_s5 + $0x3e] sm:$0xff] }
  0x40   : > { %3108 = vmatprep.mubr.msk.f32.mxu1 %vm251_vm0, %v214_v52  ;;  %3236 = vmatprep.mubr.msk.f32.mxu0 %vm251_vm0, %v2761_v53  ;;  %v2865_v52 = vld [vmem:[%s3635_s5 + $0x4e] sm:$0xff] }
  0x43   : > { %3109 = vmatmul.mubr.msk.f32.gmra.mrb[4].mxu1 %vm251_vm0, %v215_v54  ;;  %3237 = vmatmul.mubr.msk.f32.gmra.mrb[12].mxu0 %vm251_vm0, %v2762_v55  ;;  %v2866_v54 = vld [vmem:[%s3635_s5 + $0x56] sm:$0xff] }
  0x44   : > { %3111 = vmatprep.mubr.msk.f32.mxu1 %vm251_vm0, %v216_v56  ;;  %3239 = vmatprep.mubr.msk.f32.mxu0 %vm251_vm0, %v2763_v57  ;;  %v2867_v56 = vld [vmem:[%s3635_s5 + $0x5e] sm:$0xff] }
  0x47   : > { %3112 = vmatmul.mubr.msk.f32.gmra.mrb[6].mxu1 %vm251_vm0, %v217_v58  ;;  %3240 = vmatmul.mubr.msk.f32.gmra.mrb[14].mxu0 %vm251_vm0, %v2764_v59  ;;  %v2868_v58 = vld [vmem:[%s3635_s5 + $0x66] sm:$0xff] }
  0x48   : > { %3114 = vmatprep.mubr.msk.f32.mxu1 %vm251_vm0, %v218_v60  ;;  %3242 = vmatprep.mubr.msk.f32.mxu0 %vm251_vm0, %v2765_v61  ;;  %v2869_v60 = vld [vmem:[%s3635_s5 + $0x6e] sm:$0xff] }
  0x4b   : > { %3115 = vmatmul.mubr.msk.f32.gmra.mrb[8].mxu1 %vm251_vm0, %v219_v62  ;;  %3243 = vmatmul.mubr.msk.f32.gmra.mrb[16].mxu0 %vm251_vm0, %v2766_v63  ;;  %v2870_v62 = vld [vmem:[%s3635_s5 + $0x76] sm:$0xff] }
  0x4c   : > { %3117 = vmatprep.mubr.msk.f32.mxu1 %vm251_vm0, %v220_v1  ;;  %3247 = vmatprep.mubr.msk.f32.mxu0 %vm251_vm0, %v3694_v31  ;;  %v2827_v31 = vld [vmem:[%s3635_s5 + $0x45] sm:$0xff] }
  0x4d   : > { %v2871_v1 = vld [vmem:[%s3635_s5 + $0x7e] sm:$0xff] }
  0x4f   : > { %3118 = vmatmul.mubr.msk.f32.gmra.mrb[10].mxu1 %vm251_vm0, %v221_v2  ;;  %3248 = vmatmul.mubr.msk.f32.vlgmr.msra.gmra.mrb[0].mxu0 %vm251_vm0, %v3706_v34  ;;  %v2654_v34 = vld [vmem:[%s3635_s5 + $0x82] sm:$0xff] }
  0x50   : > { %3275 = vmatpush3.msra.mxu0 %v3699_v32  ;;  %3120 = vmatprep.mubr.msk.f32.mxu1 %vm251_vm0, %v222_v3  ;;  %v2653_v32 = vld [vmem:[%s3635_s5 + $0x7a] sm:$0xff]  ;;  %v2726_v2 = vld [vmem:[%s3635_s5 + $0x83] sm:$0xff] }
  0x51   : > { %3250 = vmatprep.mubr.msk.f32.mxu0 %vm251_vm0, %v3712_v36  ;;  %3303 = vmatprep.subr.mxu0 %v3807_v4  ;;  %v2655_v36 = vld [vmem:[%s3635_s5 + $0x8a] sm:$0xff] }
  0x52   : > { %v2872_v3 = vld [vmem:[%s3635_s5 + $0x86] sm:$0xff] }
  0x53   : > { %3121 = vmatmul.mubr.msk.f32.gmra.mrb[12].mxu1 %vm251_vm0, %v223_v5  ;;  %3251 = vmatmul.mubr.msk.f32.gmra.mrb[2].mxu0 %vm251_vm0, %v3723_v38  ;;  %v2831_v38 = vld [vmem:[%s3635_s5 + $0x65] sm:$0xff]  ;;  %v2873_v5 = vld [vmem:[%s3635_s5 + $0x8e] sm:$0xff] }
  0x54   : > { %3123 = vmatprep.mubr.msk.f32.mxu1 %vm251_vm0, %v224_v6  ;;  %3253 = vmatprep.mubr.msk.f32.mxu0 %vm251_vm0, %v3727_v40  ;;  %v2833_v40 = vld [vmem:[%s3635_s5 + $0x75] sm:$0xff] }
  0x55   : > { %v2728_v6 = vld [vmem:[%s3635_s5 + $0x93] sm:$0xff] }
  0x57   : > { %3124 = vmatmul.mubr.msk.f32.gmra.mrb[14].mxu1 %vm251_vm0, %v225_v7  ;;  %3254 = vmatmul.mubr.msk.f32.gmra.mrb[4].mxu0 %vm251_vm0, %v3737_v42  ;;  %v2835_v42 = vld [vmem:[%s3635_s5 + $0x85] sm:$0xff]  ;;  %v2874_v7 = vld [vmem:[%s3635_s5 + $0x96] sm:$0xff] }
  0x58   : > { %3126 = vmatprep.mubr.msk.f32.mxu1 %vm251_vm0, %v226_v8  ;;  %3256 = vmatprep.mubr.msk.f32.mxu0 %vm251_vm0, %v3741_v44  ;;  %v2837_v44 = vld [vmem:[%s3635_s5 + $0x95] sm:$0xff] }
  0x59   : > { %v2729_v8 = vld [vmem:[%s3635_s5 + $0x9b] sm:$0xff] }
  0x5b   : > { %3127 = vmatmul.mubr.msk.f32.gmra.mrb[16].mxu1 %vm251_vm0, %v227_v9  ;;  %3257 = vmatmul.mubr.msk.f32.gmra.mrb[6].mxu0 %vm251_vm0, %v3751_v46  ;;  %v2840_v46 = vld [vmem:[%s3635_s5 + $0xad] sm:$0xff]  ;;  %v2875_v9 = vld [vmem:[%s3635_s5 + $0x9e] sm:$0xff] }
  0x5c   : > { %3131 = vmatprep.mubr.msk.f32.mxu1 %vm251_vm0, %v2638_v10  ;;  %3259 = vmatprep.mubr.msk.f32.mxu0 %vm251_vm0, %v3755_v48  ;;  %v2861_v48 = vld [vmem:[%s3635_s5 + $0x2e] sm:$0xff]  ;;  %v2876_v10 = vld [vmem:[%s3635_s5 + $0xa6] sm:$0xff] }
  0x5f   : > { %3132 = vmatmul.mubr.msk.f32.vlgmr.msra.gmra.mrb[0].mxu1 %vm251_vm0, %v2639_v11  ;;  %3260 = vmatmul.mubr.msk.f32.gmra.mrb[8].mxu0 %vm251_vm0, %v2760_v51  ;;  %v2864_v51 = vld [vmem:[%s3635_s5 + $0x46] sm:$0xff]  ;;  %v2877_v11 = vld [vmem:[%s3635_s5 + $0xae] sm:$0xff] }
  0x60   : > { %3134 = vmatprep.mubr.msk.f32.mxu1 %vm251_vm0, %v3843_v12  ;;  %3262 = vmatprep.mubr.msk.f32.mxu0 %vm251_vm0, %v2761_v53  ;;  %v2691_v53 = vld [vmem:[%s3635_s5 + $0x92] sm:$0xff] }
  0x61   : > { %3159 = vmatpush3.msra.mxu1 %v3763_v49  ;;  %v2862_v49 = vld [vmem:[%s3635_s5 + $0x36] sm:$0xff] }
  0x62   : > { %3332 = vmatprep.subr.mxu1 %v3615_v0 }
  0x63   : > { %3135 = vmatmul.mubr.msk.f32.gmra.mrb[2].mxu1 %vm251_vm0, %v3851_v13  ;;  %3263 = vmatmul.mubr.msk.f32.gmra.mrb[10].mxu0 %vm251_vm0, %v2762_v55  ;;  %v2692_v55 = vld [vmem:[%s3635_s5 + $0x9a] sm:$0xff] }
  0x64   : > { %3137 = vmatprep.mubr.msk.f32.mxu1 %vm251_vm0, %v3855_v14  ;;  %3265 = vmatprep.mubr.msk.f32.mxu0 %vm251_vm0, %v2763_v57  ;;  %v2722_v57 = vld [vmem:[%s3635_s5 + $0x63] sm:$0xff] }
  0x67   : > { %3138 = vmatmul.mubr.msk.f32.gmra.mrb[4].mxu1 %vm251_vm0, %v2643_v15  ;;  %3266 = vmatmul.mubr.msk.f32.gmra.mrb[12].mxu0 %vm251_vm0, %v2764_v59  ;;  %v2723_v59 = vld [vmem:[%s3635_s5 + $0x6b] sm:$0xff] }
  0x68   : > { %3140 = vmatprep.mubr.msk.f32.mxu1 %vm251_vm0, %v3866_v16  ;;  %3268 = vmatprep.mubr.msk.f32.mxu0 %vm251_vm0, %v2765_v61  ;;  %v2724_v61 = vld [vmem:[%s3635_s5 + $0x73] sm:$0xff] }
  0x6b   : > { %3141 = vmatmul.mubr.msk.f32.gmra.mrb[6].mxu1 %vm251_vm0, %v2645_v17  ;;  %3269 = vmatmul.mubr.msk.f32.gmra.mrb[14].mxu0 %vm251_vm0, %v2766_v63  ;;  %v2725_v63 = vld [vmem:[%s3635_s5 + $0x7b] sm:$0xff] }
  0x6c   : > { %3143 = vmatprep.mubr.msk.f32.mxu1 %vm251_vm0, %v3875_v18  ;;  %3271 = vmatprep.mubr.msk.f32.mxu0 %vm251_vm0, %v2802_v19 }
  0x6f   : > { %3144 = vmatmul.mubr.msk.f32.gmra.mrb[8].mxu1 %vm251_vm0, %v2647_v20  ;;  %3272 = vmatmul.mubr.msk.f32.gmra.mrb[16].mxu0 %vm251_vm0, %v2803_v21 }
  0x70   : > { %3146 = vmatprep.mubr.msk.f32.mxu1 %vm251_vm0, %v2648_v22  ;;  %3276 = vmatprep.mubr.msk.f32.mxu0 %vm251_vm0, %v2823_v23  ;;  %v4024_v23 = vld [vmem:[%s197_s28] ss:$0 sm:$0xff] }
  0x73   : > { %3147 = vmatmul.mubr.msk.f32.gmra.mrb[10].mxu1 %vm251_vm0, %v2649_v24  ;;  %3277 = vmatmul.mubr.msk.f32.vlgmr.msra.gmra.mrb[0].mxu0 %vm251_vm0, %v2824_v25 }
  0x74   : > { %3304 = vmatpush3.msra.mxu0 %v3807_v4  ;;  %3149 = vmatprep.mubr.msk.f32.mxu1 %vm251_vm0, %v2650_v26  ;;  %v2727_v4 = vld [vmem:[%s3635_s5 + $0x8b] sm:$0xff] }
  0x75   : > { %3279 = vmatprep.mubr.msk.f32.mxu0 %vm251_vm0, %v2825_v27 }
  0x77   : > { %3150 = vmatmul.mubr.msk.f32.gmra.mrb[12].mxu1 %vm251_vm0, %v2651_v28  ;;  %3280 = vmatmul.mubr.msk.f32.gmra.mrb[2].mxu0 %vm251_vm0, %v2826_v29 }
  0x78   : > { %3152 = vmatprep.mubr.msk.f32.mxu1 %vm251_vm0, %v2652_v30  ;;  %3282 = vmatprep.mubr.msk.f32.mxu0 %vm251_vm0, %v2827_v31 }
  0x7b   : > { %3153 = vmatmul.mubr.msk.f32.gmra.mrb[14].mxu1 %vm251_vm0, %v2653_v32  ;;  %3283 = vmatmul.mubr.msk.f32.gmra.mrb[4].mxu0 %vm251_vm0, %v2828_v33 }
  0x7c   : > { %3155 = vmatprep.mubr.msk.f32.mxu1 %vm251_vm0, %v2654_v34  ;;  %3285 = vmatprep.mubr.msk.f32.mxu0 %vm251_vm0, %v2829_v35 }
  0x7f   : > { %3156 = vmatmul.mubr.msk.f32.gmra.mrb[16].mxu1 %vm251_vm0, %v2655_v36  ;;  %3286 = vmatmul.mubr.msk.f32.gmra.mrb[6].mxu0 %vm251_vm0, %v2830_v37 }
  0x80   : > { %3160 = vmatprep.mubr.msk.f32.mxu1 %vm251_vm0, %v3843_v12  ;;  %3288 = vmatprep.mubr.msk.f32.mxu0 %vm251_vm0, %v2831_v38 }
  0x83   : > { %3161 = vmatmul.mubr.msk.f32.vlgmr.msra.gmra.mrb[0].mxu1 %vm251_vm0, %v3851_v13  ;;  %3289 = vmatmul.mubr.msk.f32.gmra.mrb[8].mxu0 %vm251_vm0, %v2832_v39 }
  0x84   : > { %3163 = vmatprep.mubr.msk.f32.mxu1 %vm251_vm0, %v3855_v14  ;;  %3291 = vmatprep.mubr.msk.f32.mxu0 %vm251_vm0, %v2833_v40 }
  0x85   : > { %3333 = vmatpush3.msra.mxu1 %v3615_v0  ;;  %v2838_v0 = vld [vmem:[%s3635_s5 + $0x9d] sm:$0xff] }
  0x87   : > { %3164 = vmatmul.mubr.msk.f32.gmra.mrb[2].mxu1 %vm251_vm0, %v2643_v15  ;;  %3292 = vmatmul.mubr.msk.f32.gmra.mrb[10].mxu0 %vm251_vm0, %v2834_v41 }
  0x88   : > { %3166 = vmatprep.mubr.msk.f32.mxu1 %vm251_vm0, %v3866_v16  ;;  %3294 = vmatprep.mubr.msk.f32.mxu0 %vm251_vm0, %v2835_v42 }
  0x8b   : > { %3167 = vmatmul.mubr.msk.f32.gmra.mrb[4].mxu1 %vm251_vm0, %v2645_v17  ;;  %3295 = vmatmul.mubr.msk.f32.gmra.mrb[12].mxu0 %vm251_vm0, %v2836_v43 }
  0x8c   : > { %3169 = vmatprep.mubr.msk.f32.mxu1 %vm251_vm0, %v3875_v18  ;;  %3297 = vmatprep.mubr.msk.f32.mxu0 %vm251_vm0, %v2837_v44 }
  0x8f   : > { %3170 = vmatmul.mubr.msk.f32.gmra.mrb[6].mxu1 %vm251_vm0, %v2647_v20  ;;  %3298 = vmatmul.mubr.msk.f32.gmra.mrb[14].mxu0 %vm251_vm0, %v2838_v0 }
  0x90   : > { %3172 = vmatprep.mubr.msk.f32.mxu1 %vm251_vm0, %v2648_v22  ;;  %3300 = vmatprep.mubr.msk.f32.mxu0 %vm251_vm0, %v2839_v45 }
  0x93   : > { %3173 = vmatmul.mubr.msk.f32.gmra.mrb[8].mxu1 %vm251_vm0, %v2649_v24  ;;  %3301 = vmatmul.mubr.msk.f32.gmra.mrb[16].mxu0 %vm251_vm0, %v2840_v46 }
  0x94   : > { %3175 = vmatprep.mubr.msk.f32.mxu1 %vm251_vm0, %v2650_v26  ;;  %3305 = vmatprep.mubr.msk.f32.mxu0 %vm251_vm0, %v2860_v47 }
  0x97   : > { %3176 = vmatmul.mubr.msk.f32.gmra.mrb[10].mxu1 %vm251_vm0, %v2651_v28  ;;  %3306 = vmatmul.mubr.msk.f32.vlgmr.msra.gmra.mrb[0].mxu0 %vm251_vm0, %v2861_v48 }
  0x98   : > { %3178 = vmatprep.mubr.msk.f32.mxu1 %vm251_vm0, %v2652_v30  ;;  %3308 = vmatprep.mubr.msk.f32.mxu0 %vm251_vm0, %v2862_v49 }
  0x9b   : > { %3179 = vmatmul.mubr.msk.f32.gmra.mrb[12].mxu1 %vm251_vm0, %v2653_v32  ;;  %3309 = vmatmul.mubr.msk.f32.gmra.mrb[2].mxu0 %vm251_vm0, %v2863_v50 }
  0x9c   : > { %3181 = vmatprep.mubr.msk.f32.mxu1 %vm251_vm0, %v2654_v34  ;;  %3311 = vmatprep.mubr.msk.f32.mxu0 %vm251_vm0, %v2864_v51 }
  0x9f   : > { %3182 = vmatmul.mubr.msk.f32.gmra.mrb[14].mxu1 %vm251_vm0, %v2655_v36  ;;  %3312 = vmatmul.mubr.msk.f32.gmra.mrb[4].mxu0 %vm251_vm0, %v2865_v52 }
  0xa0   : > { %3184 = vmatprep.mubr.msk.f32.mxu1 %vm251_vm0, %v2691_v53  ;;  %3314 = vmatprep.mubr.msk.f32.mxu0 %vm251_vm0, %v2866_v54 }
  0xa3   : > { %3185 = vmatmul.mubr.msk.f32.gmra.mrb[16].mxu1 %vm251_vm0, %v2692_v55  ;;  %3315 = vmatmul.mubr.msk.f32.gmra.mrb[6].mxu0 %vm251_vm0, %v2867_v56 }
  0xa4   : > { %3204 = vmatprep.mubr.msk.f32.mxu1 %vm251_vm0, %v2722_v57  ;;  %3317 = vmatprep.mubr.msk.f32.mxu0 %vm251_vm0, %v2868_v58 }
  0xa7   : > { %3205 = vmatmul.mubr.msk.f32.vlgmr.msra.gmra.mrb[10].mxu1 %vm251_vm0, %v2723_v59  ;;  %3318 = vmatmul.mubr.msk.f32.gmra.mrb[8].mxu0 %vm251_vm0, %v2869_v60 }
  0xa8   : > { %3207 = vmatprep.mubr.msk.f32.mxu1 %vm251_vm0, %v2724_v61  ;;  %3320 = vmatprep.mubr.msk.f32.mxu0 %vm251_vm0, %v2870_v62 }
  0xab   : > { %3208 = vmatmul.mubr.msk.f32.gmra.mrb[12].mxu1 %vm251_vm0, %v2725_v63  ;;  %3321 = vmatmul.mubr.msk.f32.gmra.mrb[10].mxu0 %vm251_vm0, %v2871_v1 }
  0xac   : > { %3210 = vmatprep.mubr.msk.f32.mxu1 %vm251_vm0, %v2726_v2  ;;  %3323 = vmatprep.mubr.msk.f32.mxu0 %vm251_vm0, %v2872_v3 }
  0xaf   : > { %3211 = vmatmul.mubr.msk.f32.gmra.mrb[14].mxu1 %vm251_vm0, %v2727_v4  ;;  %3324 = vmatmul.mubr.msk.f32.gmra.mrb[12].mxu0 %vm251_vm0, %v2873_v5 }
  0xb0   : > { %3213 = vmatprep.mubr.msk.f32.mxu1 %vm251_vm0, %v2728_v6  ;;  %3326 = vmatprep.mubr.msk.f32.mxu0 %vm251_vm0, %v2874_v7 }
  0xb3   : > { %3214 = vmatmul.mubr.msk.f32.gmra.mrb[16].mxu1 %vm251_vm0, %v2729_v8  ;;  %3327 = vmatmul.mubr.msk.f32.gmra.mrb[14].mxu0 %vm251_vm0, %v2875_v9 }
  0xb4   : > { %3329 = vmatprep.mubr.msk.f32.mxu0 %vm251_vm0, %v2876_v10 }
  0xb7   : > { %3330 = vmatmul.mubr.msk.f32.gmra.mrb[16].mxu0 %vm251_vm0, %v2877_v11 }
 0x156   : > { %v3162_v12 = vpop.f32.mrb[0].mxu1 }
 0x157   : > { %v1061_v13 = vpop.f32.mrb[1].mxu1 }
 0x15a   : > { %v3165_v14 = vpop.f32.mrb[2].mxu1 }
 0x15b   : > { %v1071_v15 = vpop.f32.mrb[3].mxu1 }
 0x15e   : > { %v3168_v16 = vpop.f32.mrb[4].mxu1 }
 0x15f   : > { %v1081_v17 = vpop.f32.mrb[5].mxu1 }
 0x162   : > { %v3171_v18 = vpop.f32.mrb[6].mxu1 }
 0x163   : > { %v1091_v19 = vpop.f32.mrb[7].mxu1 }
 0x166   : > { %v3174_v20 = vpop.f32.mrb[8].mxu1 }
 0x167   : > { %v1101_v21 = vpop.f32.mrb[9].mxu1 }
 0x16a   : > { %v3307_v22 = vpop.f32.mrb[0].mxu0 }
 0x16b   : > { %v3334_v24 = vadd.f32 %v3307_v22, %v3162_v12  ;;  %v2306_v25 = vpop.f32.mrb[1].mxu0 }
 0x16c   : > { %v3335_v26 = vadd.f32 %v2306_v25, %v1061_v13 }
 0x16d   : > { %v2421_v27 = vadd.f32 %v3334_v24, %v4024_v23 }
 0x16e   : > { %v2420_v28 = vadd.f32 %v3335_v26, %v4024_v23  ;;  %v3310_v29 = vpop.f32.mrb[2].mxu0 }
 0x16f   : > { %2440 = vst.msk [vmem:[%s4029_s4 + $0x8] sm:$0xff] %vm2438_vm1, %v2421_v27  ;;  %v3336_v30 = vadd.f32 %v3310_v29, %v3165_v14  ;;  %v2316_v31 = vpop.f32.mrb[3].mxu0 }
 0x170   : > { %2439 = vst.msk [vmem:[%s4029_s4] sm:$0xff] %vm2438_vm1, %v2420_v28  ;;  %v3337_v32 = vadd.f32 %v2316_v31, %v1071_v15 }
 0x171   : > { %v2423_v33 = vadd.f32 %v3336_v30, %v4024_v23 }
 0x172   : > { %v2422_v34 = vadd.f32 %v3337_v32, %v4024_v23  ;;  %v3313_v35 = vpop.f32.mrb[4].mxu0 }
 0x173   : > { %2442 = vst.msk [vmem:[%s4029_s4 + $0x18] sm:$0xff] %vm2438_vm1, %v2423_v33  ;;  %v3338_v36 = vadd.f32 %v3313_v35, %v3168_v16  ;;  %v2326_v37 = vpop.f32.mrb[5].mxu0 }
 0x174   : > { %2441 = vst.msk [vmem:[%s4029_s4 + $0x10] sm:$0xff] %vm2438_vm1, %v2422_v34  ;;  %v3339_v38 = vadd.f32 %v2326_v37, %v1081_v17 }
 0x175   : > { %v2425_v39 = vadd.f32 %v3338_v36, %v4024_v23 }
 0x176   : > { %v2424_v40 = vadd.f32 %v3339_v38, %v4024_v23  ;;  %v3316_v41 = vpop.f32.mrb[6].mxu0 }
 0x177   : > { %2444 = vst.msk [vmem:[%s4029_s4 + $0x28] sm:$0xff] %vm2438_vm1, %v2425_v39  ;;  %v3340_v42 = vadd.f32 %v3316_v41, %v3171_v18  ;;  %v2336_v43 = vpop.f32.mrb[7].mxu0 }
 0x178   : > { %2443 = vst.msk [vmem:[%s4029_s4 + $0x20] sm:$0xff] %vm2438_vm1, %v2424_v40  ;;  %v3341_v44 = vadd.f32 %v2336_v43, %v1091_v19 }
 0x179   : > { %v2427_v0 = vadd.f32 %v3340_v42, %v4024_v23 }
 0x17a   : > { %v2426_v45 = vadd.f32 %v3341_v44, %v4024_v23  ;;  %v3206_v46 = vpop.f32.mrb[10].mxu1  ;;  %v3319_v47 = vpop.f32.mrb[8].mxu0 }
 0x17b   : > { %2446 = vst.msk [vmem:[%s4029_s4 + $0x38] sm:$0xff] %vm2438_vm1, %v2427_v0  ;;  %v3342_v48 = vadd.f32 %v3319_v47, %v3174_v20  ;;  %v1360_v49 = vpop.f32.mrb[11].mxu1  ;;  %v2346_v50 = vpop.f32.mrb[9].mxu0 }
 0x17c   : > { %2445 = vst.msk [vmem:[%s4029_s4 + $0x30] sm:$0xff] %vm2438_vm1, %v2426_v45  ;;  %v3343_v51 = vadd.f32 %v2346_v50, %v1101_v21 }
 0x17d   : > { %v2429_v52 = vadd.f32 %v3342_v48, %v4024_v23 }
 0x17e   : > { %v2428_v53 = vadd.f32 %v3343_v51, %v4024_v23  ;;  %v3209_v54 = vpop.f32.mrb[12].mxu1  ;;  %v3322_v55 = vpop.f32.mrb[10].mxu0 }
 0x17f   : > { %2448 = vst.msk [vmem:[%s4029_s4 + $0x48] sm:$0xff] %vm2438_vm1, %v2429_v52  ;;  %v3344_v56 = vadd.f32 %v3322_v55, %v3206_v46  ;;  %v1370_v57 = vpop.f32.mrb[13].mxu1  ;;  %v2356_v58 = vpop.f32.mrb[11].mxu0 }
 0x180   : > { %2447 = vst.msk [vmem:[%s4029_s4 + $0x40] sm:$0xff] %vm2438_vm1, %v2428_v53  ;;  %v3345_v59 = vadd.f32 %v2356_v58, %v1360_v49 }
 0x181   : > { %v2431_v60 = vadd.f32 %v3344_v56, %v4024_v23 }
 0x182   : > { %v2430_v61 = vadd.f32 %v3345_v59, %v4024_v23  ;;  %v3212_v62 = vpop.f32.mrb[14].mxu1  ;;  %v3325_v63 = vpop.f32.mrb[12].mxu0 }
 0x183   : > { %2450 = vst.msk [vmem:[%s4029_s4 + $0x58] sm:$0xff] %vm2438_vm1, %v2431_v60  ;;  %v3346_v1 = vadd.f32 %v3325_v63, %v3209_v54  ;;  %v1380_v2 = vpop.f32.mrb[15].mxu1  ;;  %v2366_v3 = vpop.f32.mrb[13].mxu0 }
 0x184   : > { %2449 = vst.msk [vmem:[%s4029_s4 + $0x50] sm:$0xff] %vm2438_vm1, %v2430_v61  ;;  %v3347_v4 = vadd.f32 %v2366_v3, %v1370_v57 }
 0x185   : > { %v2433_v5 = vadd.f32 %v3346_v1, %v4024_v23 }
 0x186   : > { %v2432_v6 = vadd.f32 %v3347_v4, %v4024_v23  ;;  %v3215_v7 = vpop.f32.mrb[16].mxu1  ;;  %v3328_v8 = vpop.f32.mrb[14].mxu0 }
 0x187   : > { %2452 = vst.msk [vmem:[%s4029_s4 + $0x68] sm:$0xff] %vm2438_vm1, %v2433_v5  ;;  %v3348_v9 = vadd.f32 %v3328_v8, %v3212_v62  ;;  %v1390_v10 = vpop.f32.mrb[17].mxu1  ;;  %v2376_v11 = vpop.f32.mrb[15].mxu0 }
 0x188   : > { %2451 = vst.msk [vmem:[%s4029_s4 + $0x60] sm:$0xff] %vm2438_vm1, %v2432_v6  ;;  %v3349_v12 = vadd.f32 %v2376_v11, %v1380_v2 }
 0x189   : > { %v2435_v13 = vadd.f32 %v3348_v9, %v4024_v23 }
 0x18a   : > { %v2434_v14 = vadd.f32 %v3349_v12, %v4024_v23  ;;  %v3331_v15 = vpop.f32.mrb[16].mxu0 }
 0x18b   : > { %2454 = vst.msk [vmem:[%s4029_s4 + $0x78] sm:$0xff] %vm2438_vm1, %v2435_v13  ;;  %v3350_v16 = vadd.f32 %v3331_v15, %v3215_v7  ;;  %v2386_v17 = vpop.f32.mrb[17].mxu0 }
 0x18c   : > { %2453 = vst.msk [vmem:[%s4029_s4 + $0x70] sm:$0xff] %vm2438_vm1, %v2434_v14  ;;  %v3351_v18 = vadd.f32 %v2386_v17, %v1390_v10 }
 0x18d   : > { %v2437_v19 = vadd.f32 %v3350_v16, %v4024_v23 }
 0x18e   : > { %v2436_v20 = vadd.f32 %v3351_v18, %v4024_v23 }
 0x18f   : > { %2456 = vst.msk [vmem:[%s4029_s4 + $0x88] sm:$0xff] %vm2438_vm1, %v2437_v19 }
 0x190   : > { %2455 = vst.msk [vmem:[%s4029_s4 + $0x80] sm:$0xff] %vm2438_vm1, %v2436_v20 }
 0x191 PF: > { %s13_s16 = sadd.s32 1, %s3558_s16   ;;  %s4104_s12 = smov %s3550_s14 }
 0x192   : > { %p10_p7 = scmp.ge.s32.totalorder %s13_s16, 18   ;;  %s4105_s13 = smov %s3554_s15 }
 0x193   : > { %s4106_s14 = smov %s4109_s17  ;;  %s4107_s15 = smov %s4113_s18 }
 0x194   :  { %12 = sbr.rel (!%p10_p7) target bundleno = 3 (0x3), region = 82 }

// kernel: down_block_3d.11
= control target key start
LH: loop header
LB: loop body
LE: loop exit
PB: predicated region body
PF: predicated region fallthrough
CT: control target
= control target key end

     0   :  { %s1087_s18 = smov 0   ;;  %s1089_s19 = smov 0   ;;  %s1895_s0 = inlined_call_operand.vmem [shape: f32[2,1024,16], index: 0, kind: input, shape index: {}]   ;;  %s1896_s1 = inlined_call_operand.vmem [shape: f32[16,4], index: 1, kind: input, shape index: {}]   ;;  %s1897_s2 = inlined_call_operand.vmem [shape: f32[4,16], index: 2, kind: input, shape index: {}]   ;;  %s1898_s3 = inlined_call_operand.vmem [shape: f32[1,16], index: 3, kind: input, shape index: {}]   ;;  %s1899_s4 = inlined_call_operand.vmem [shape: f32[1,16], index: 4, kind: input, shape index: {}]   ;;  %s1900_s5 = inlined_call_operand.vmem [shape: f32[2,2,16], index: 5, kind: output, shape index: {}]  }
   0x1   :  { %s1091_s20 = smov 0   ;;  %s1093_s21 = smov 0  }
   0x2   :  { %s1095_s22 = smov 0  }
   0x3 LB: > { %s24_s23 = sadd.s32 1, %s1043_s20  ;;  %s27_s24 = sadd.s32 1, %s1047_s21  ;;  %s1051_s22 = sphi %s1095_s22, %s15_s22   ;;  %s1047_s21 = sphi %s1093_s21, %s2030_s21   ;;  %s1043_s20 = sphi %s1091_s20, %s2029_s20   ;;  %s1039_s19 = sphi %s1089_s19, %s2028_s19   ;;  %s1035_s18 = sphi %s1087_s18, %s2027_s18  }
   0x4   : > { %p25_p0 = scmp.ge.s32.totalorder %s24_s23, 2  ;;  %p934_p1 = scmp.ge.s32.totalorder %s1051_s22, 1 }
   0x5   : > { %p206_p2 = scmp.lt.s32.totalorder %s1051_s22, 5 }
   0x6   : > { %s2032_s23 = smov (%p25_p0, %s24_s23), 0  ;;  %s2034_s24 = smov (!%p25_p0, %s27_s24), %s1047_s21 }
   0x7   : > { %p207_p3 = pnand %p934_p1, %p206_p2  ;;  %p29_p4 = scmp.ge.s32.totalorder %s2034_s24, 2 }
   0x9   : > { %s2036_s24 = smov (%p29_p4, %s2034_s24), 0  ;;  %210 = sbr.rel (%p207_p3) target bundleno = 679 (0x2a7), region = 40 }
  0x10   : > { %s935_s25 = sshll.u32 %s1035_s18, 6  ;;  %p238_p5 = scmp.lt.s32.totalorder %s1039_s19, 1  ;;  %vm315_vm0 = vcmask 130048   ;;  %vm646_vm1 = vcmask 1040384  }
  0x11   : > { %p240_p6 = scmp.lt.s32.totalorder %s935_s25, 127  ;;  %p939_p7 = scmp.ne.s32.totalorder %s1035_s18, 0 }
  0x12   : > { %s2038_s19 = smov (!%p238_p5, %s1039_s19), 1  ;;  %vm652_vm2 = vcmask (!%p939_p7), 123904  }
  0x13   : > { %s2040_s25 = smov (!%p240_p6, %s935_s25), 127  ;;  %s936_s26 = sshll.u32 %s2038_s19, 7 }
  0x14   : > { %s938_s27 = sshll.u32 %s2038_s19, 1  ;;  %s243_s28 = sadd.s32 %s936_s26, %s2040_s25 }
  0x15   : > { %s1123_s6 = scalar_lea.vmem %s1900_s5, %s938_s27  ;;  %s937_s7 = sshll.u32 %s243_s28, 3 }
  0x16   : > { %s1128_s10 = scalar_lea.vmem %s1895_s0, %s937_s7 }
  0x17   : > { %v1131_v0 = vld [vmem:[%s1128_s10] sm:$0xff]  ;;  %v1134_v1 = vld [vmem:[%s1128_s10 + $0x8] sm:$0xff]  ;;  %v1137_v2 = vld [vmem:[%s1128_s10 + $0x10] sm:$0xff] }
  0x18   : > { %v316_v3 = vsel %vm315_vm0, %v1131_v0, 0.0  ;;  %v317_v4 = vsel %vm315_vm0, %v1134_v1, 0.0  ;;  %v319_v5 = vsel %vm315_vm0, %v1137_v2, 0.0  ;;  %v1146_v6 = vld [vmem:[%s1128_s10 + $0x18] sm:$0xff]  ;;  %v1151_v9 = vld [vmem:[%s1128_s10 + $0x20] sm:$0xff]  ;;  %v1156_v12 = vld [vmem:[%s1128_s10 + $0x28] sm:$0xff] }
  0x19   : > { %v318_v7 = vadd.f32 %v317_v4, %v316_v3  ;;  %v321_v8 = vsel %vm315_vm0, %v1146_v6, 0.0  ;;  %v323_v11 = vsel %vm315_vm0, %v1151_v9, 0.0  ;;  %v325_v14 = vsel %vm315_vm0, %v1156_v12, 0.0  ;;  %v1161_v15 = vld [vmem:[%s1128_s10 + $0x30] sm:$0xff]  ;;  %v1164_v17 = vld [vmem:[%s1128_s10 + $0x38] sm:$0xff]  ;;  %v1167_v18 = vld [vmem:[%s1128_s10 + $0x40] sm:$0xff] }
  0x1a   : > { %v327_v19 = vsel %vm315_vm0, %v1161_v15, 0.0  ;;  %v1172_v20 = vld [vmem:[%s1128_s10 + $0x48] sm:$0xff]  ;;  %v1175_v21 = vld [vmem:[%s1128_s10 + $0x50] sm:$0xff]  ;;  %v1178_v22 = vld [vmem:[%s1128_s10 + $0x58] sm:$0xff]  ;;  %v329_v24 = vsel %vm315_vm0, %v1164_v17, 0.0  ;;  %v331_v25 = vsel %vm315_vm0, %v1167_v18, 0.0 }
  0x1b   : > { %v320_v10 = vadd.f32 %v319_v5, %v318_v7  ;;  %v1185_v26 = vld [vmem:[%s1128_s10 + $0x108] sm:$0xff]  ;;  %v1188_v27 = vld [vmem:[%s1128_s10 + $0x110] sm:$0xff]  ;;  %v1191_v28 = vld [vmem:[%s1128_s10 + $0x118] sm:$0xff]  ;;  %v333_v29 = vsel %vm315_vm0, %v1172_v20, 0.0  ;;  %v335_v30 = vsel %vm315_vm0, %v1175_v21, 0.0  ;;  %v1199_v31 = vsel %vm315_vm0, %v1178_v22, 0.0 }
  0x1c   : > { %v1202_v32 = vld [vmem:[%s1128_s10 + $0x120] sm:$0xff]  ;;  %v1205_v33 = vld [vmem:[%s1128_s10 + $0x128] sm:$0xff]  ;;  %v1208_v34 = vld [vmem:[%s1128_s10 + $0x130] sm:$0xff]  ;;  %v1212_v36 = vsel %vm315_vm0, %v1185_v26, 0.0  ;;  %v1216_v37 = vsel %vm315_vm0, %v1188_v27, 0.0  ;;  %v1220_v38 = vsel %vm315_vm0, %v1191_v28, 0.0 }
  0x1d   : > { %v322_v13 = vadd.f32 %v321_v8, %v320_v10  ;;  %1921 = vst [vmem:[#allocation2_spill] sm:$0xff] %v1212_v36  ;;  %1922 = vst [vmem:[#allocation3_spill] sm:$0xff] %v1216_v37  ;;  %v1223_v39 = vld [vmem:[%s1128_s10 + $0x138] sm:$0xff]  ;;  %v1226_v40 = vld [vmem:[%s1128_s10 + $0x140] sm:$0xff]  ;;  %v1233_v42 = vsel %vm315_vm0, %v1202_v32, 0.0  ;;  %v1237_v43 = vsel %vm315_vm0, %v1205_v33, 0.0  ;;  %v451_v36 = vmul.f32 %v1137_v2, %v1137_v2 }
  0x1e   : > { %1923 = vst [vmem:[#allocation4_spill] sm:$0xff] %v1220_v38  ;;  %v1229_v41 = vld [vmem:[%s1128_s10 + $0x148] sm:$0xff]  ;;  %1924 = vst [vmem:[#allocation5_spill] sm:$0xff] %v1233_v42  ;;  %v1241_v44 = vsel %vm315_vm0, %v1208_v34, 0.0  ;;  %v1244_v45 = vld [vmem:[%s1128_s10 + $0x150] sm:$0xff]  ;;  %v1254_v49 = vsel %vm315_vm0, %v1223_v39, 0.0 }
  0x1f   : > { %v324_v16 = vadd.f32 %v323_v11, %v322_v13  ;;  %1925 = vst [vmem:[#allocation6_spill] sm:$0xff] %v1237_v43  ;;  %1926 = vst [vmem:[#allocation7_spill] sm:$0xff] %v1241_v44  ;;  %v1247_v46 = vld [vmem:[%s1128_s10 + $0x158] sm:$0xff]  ;;  %v1250_v47 = vld [vmem:[%s1128_s10 + $0x160] sm:$0xff]  ;;  %v1258_v50 = vsel %vm315_vm0, %v1226_v40, 0.0  ;;  %v1262_v51 = vsel %vm315_vm0, %v1229_v41, 0.0 }
  0x20   : > { %1927 = vst [vmem:[#allocation8_spill] sm:$0xff] %v1254_v49  ;;  %1928 = vst [vmem:[#allocation9_spill] sm:$0xff] %v1258_v50  ;;  %v1265_v52 = vld [vmem:[%s1128_s10 + $0x168] sm:$0xff]  ;;  %v1268_v53 = vld [vmem:[%s1128_s10 + $0x170] sm:$0xff]  ;;  %v1275_v55 = vsel %vm315_vm0, %v1244_v45, 0.0  ;;  %v1279_v56 = vsel %vm315_vm0, %v1247_v46, 0.0 }
  0x21   : > { %v326_v23 = vadd.f32 %v325_v14, %v324_v16  ;;  %1929 = vst [vmem:[#allocation10_spill] sm:$0xff] %v1262_v51  ;;  %v1271_v54 = vld [vmem:[%s1128_s10 + $0x178] sm:$0xff]  ;;  %1930 = vst [vmem:[#allocation11_spill] sm:$0xff] %v1275_v55  ;;  %v1283_v57 = vsel %vm315_vm0, %v1250_v47, 0.0  ;;  %v1286_v58 = vld [vmem:[%s1128_s10 + $0x180] sm:$0xff]  ;;  %v1296_v62 = vsel %vm315_vm0, %v1265_v52, 0.0 }
  0x22   : > { %1931 = vst [vmem:[#allocation12_spill] sm:$0xff] %v1279_v56  ;;  %1932 = vst [vmem:[#allocation13_spill] sm:$0xff] %v1283_v57  ;;  %v1289_v59 = vld [vmem:[%s1128_s10 + $0x188] sm:$0xff]  ;;  %v1292_v60 = vld [vmem:[%s1128_s10 + $0x190] sm:$0xff]  ;;  %v1300_v63 = vsel %vm315_vm0, %v1268_v53, 0.0  ;;  %v1304_v3 = vsel %vm315_vm0, %v1271_v54, 0.0 }
  0x23   : > { %v328_v35 = vadd.f32 %v327_v19, %v326_v23  ;;  %1933 = vst [vmem:[#allocation14_spill] sm:$0xff] %v1296_v62  ;;  %1934 = vst [vmem:[#allocation15_spill] sm:$0xff] %v1300_v63  ;;  %v1307_v4 = vld [vmem:[%s1128_s10 + $0x198] sm:$0xff]  ;;  %v1310_v5 = vld [vmem:[%s1128_s10 + $0x1a0] sm:$0xff]  ;;  %v1317_v8 = vsel %vm315_vm0, %v1286_v58, 0.0  ;;  %v1321_v10 = vsel %vm315_vm0, %v1289_v59, 0.0 }
  0x24   : > { %1935 = vst [vmem:[#allocation16_spill] sm:$0xff] %v1304_v3  ;;  %v1313_v7 = vld [vmem:[%s1128_s10 + $0x1a8] sm:$0xff]  ;;  %1936 = vst [vmem:[#allocation17_spill] sm:$0xff] %v1317_v8  ;;  %v1325_v11 = vsel %vm315_vm0, %v1292_v60, 0.0  ;;  %v1328_v13 = vld [vmem:[%s1128_s10 + $0x60] sm:$0xff] }
  0x25   : > { %v330_v48 = vadd.f32 %v329_v24, %v328_v35  ;;  %1937 = vst [vmem:[#allocation18_spill] sm:$0xff] %v1321_v10  ;;  %1938 = vst [vmem:[#allocation19_spill] sm:$0xff] %v1325_v11  ;;  %v1331_v14 = vld [vmem:[%s1128_s10 + $0x1b0] sm:$0xff]  ;;  %v1334_v16 = vld [vmem:[%s1128_s10 + $0x1b8] sm:$0xff]  ;;  %v1341_v24 = vsel %vm315_vm0, %v1307_v4, 0.0  ;;  %v1349_v35 = vsel %vm315_vm0, %v1313_v7, 0.0 }
  0x26   : > { %v1337_v19 = vld [vmem:[%s1128_s10 + $0x1c0] sm:$0xff]  ;;  %1939 = vst [vmem:[#allocation20_spill] sm:$0xff] %v1341_v24  ;;  %1941 = vst [vmem:[#allocation22_spill] sm:$0xff] %v1349_v35  ;;  %v1355_v11 = vld [vmem:[%s1128_s10 + $0x1d0] sm:$0xff]  ;;  %v339_v62 = vsel %vm315_vm0, %v1328_v13, 0.0 }
  0x27   : > { %v332_v61 = vadd.f32 %v331_v25, %v330_v48  ;;  %v1345_v25 = vsel %vm315_vm0, %v1310_v5, 0.0  ;;  %v1352_v48 = vld [vmem:[%s1128_s10 + $0x1c8] sm:$0xff]  ;;  %v1358_v10 = vld [vmem:[%s1128_s10 + $0x1d8] sm:$0xff]  ;;  %v1373_v35 = vld [vmem:[%s1128_s10 + $0x1e0] sm:$0xff] }
  0x28   : > { %1940 = vst [vmem:[#allocation21_spill] sm:$0xff] %v1345_v25  ;;  %v1370_v25 = vsel %vm315_vm0, %v1337_v19, 0.0  ;;  %1945 = vst [vmem:[#allocation26_spill] sm:$0xff] %v1373_v35  ;;  %v1376_v24 = vld [vmem:[%s1128_s10 + $0x1e8] sm:$0xff]  ;;  %v1379_v8 = vld [vmem:[%s1128_s10 + $0x1f0] sm:$0xff] }
  0x29   : > { %v334_v23 = vadd.f32 %v333_v29, %v332_v61  ;;  %v1362_v29 = vsel %vm315_vm0, %v1331_v14, 0.0  ;;  %v1366_v61 = vsel %vm315_vm0, %v1334_v16, 0.0  ;;  %1944 = vst [vmem:[#allocation25_spill] sm:$0xff] %v1370_v25  ;;  %1946 = vst [vmem:[#allocation27_spill] sm:$0xff] %v1376_v24  ;;  %v1391_v25 = vsel %vm315_vm0, %v1358_v10, 0.0  ;;  %v1394_v63 = vld [vmem:[%s1128_s10 + $0x1f8] sm:$0xff] }
  0x2a   : > { %1942 = vst [vmem:[#allocation23_spill] sm:$0xff] %v1362_v29  ;;  %1943 = vst [vmem:[#allocation24_spill] sm:$0xff] %v1366_v61  ;;  %v1383_v29 = vsel %vm315_vm0, %v1352_v48, 0.0  ;;  %v1387_v61 = vsel %vm315_vm0, %v1355_v11, 0.0  ;;  %v1414_v57 = vsel %vm315_vm0, %v1394_v63, 0.0  ;;  %v1422_v51 = vld [vmem:[%s1128_s10 + $0x80] sm:$0xff] }
  0x2b   : > { %1947 = vst [vmem:[#allocation28_spill] sm:$0xff] %v1379_v8  ;;  %v336_v3 = vadd.f32 %v335_v30, %v334_v23  ;;  %1948 = vst [vmem:[#allocation29_spill] sm:$0xff] %v1383_v29  ;;  %v1400_v30 = vsel %vm315_vm0, %v1373_v35, 0.0  ;;  %v1404_v23 = vsel %vm315_vm0, %v1376_v24, 0.0  ;;  %v1425_v50 = vld [vmem:[%s1128_s10 + $0x88] sm:$0xff]  ;;  %v347_v43 = vsel %vm315_vm0, %v1422_v51, 0.0 }
  0x2c   : > { %1949 = vst [vmem:[#allocation30_spill] sm:$0xff] %v1387_v61  ;;  %1950 = vst [vmem:[#allocation31_spill] sm:$0xff] %v1391_v25  ;;  %v1408_v61 = vsel %vm315_vm0, %v1379_v8, 0.0  ;;  %v264_v25 = vld [vmem:[%s1128_s10 + $0x68] sm:$0xff]  ;;  %v1451_v42 = vld [vmem:[%s1128_s10 + $0xb0] sm:$0xff] }
  0x2d   : > { %1951 = vst [vmem:[#allocation32_spill] sm:$0xff] %v1394_v63  ;;  %1952 = vst [vmem:[#allocation33_spill] sm:$0xff] %v1400_v30  ;;  %v338_v29 = vadd.f32 %v1199_v31, %v336_v3  ;;  %v341_v56 = vsel %vm315_vm0, %v264_v25, 0.0  ;;  %v265_v30 = vld [vmem:[%s1128_s10 + $0x70] sm:$0xff]  ;;  %v449_v31 = vmul.f32 %v1131_v0, %v1131_v0  ;;  %v450_v3 = vmul.f32 %v1134_v1, %v1134_v1  ;;  %v1448_v1 = vld [vmem:[%s1128_s10 + $0xa8] sm:$0xff] }
  0x2e   : > { %1953 = vst [vmem:[#allocation34_spill] sm:$0xff] %v1404_v23  ;;  %1954 = vst [vmem:[#allocation35_spill] sm:$0xff] %v1408_v61  ;;  %v1419_v23 = vld [vmem:[%s1128_s10 + $0x78] sm:$0xff]  ;;  %v343_v61 = vsel %vm315_vm0, %v265_v30, 0.0  ;;  %v349_v0 = vsel %vm315_vm0, %v1425_v50, 0.0  ;;  %v1485_v2 = vld [vmem:[%s1128_s10 + $0xe0] sm:$0xff] }
  0x2f   : > { %1955 = vst [vmem:[#allocation36_spill] sm:$0xff] %v1414_v57  ;;  %v340_v55 = vadd.f32 %v339_v62, %v338_v29  ;;  %1956 = vst [vmem:[#allocation37_spill] sm:$0xff] %v1419_v23  ;;  %v1433_v57 = vld [vmem:[%s1128_s10 + $0x90] sm:$0xff]  ;;  %v1436_v62 = vld [vmem:[%s1128_s10 + $0x98] sm:$0xff]  ;;  %v345_v44 = vsel %vm315_vm0, %v1419_v23, 0.0 }
  0x30   : > { %1957 = vst [vmem:[#allocation38_spill] sm:$0xff] %v1422_v51  ;;  %1958 = vst [vmem:[#allocation39_spill] sm:$0xff] %v1425_v50  ;;  %v1439_v29 = vld [vmem:[%s1128_s10 + $0xa0] sm:$0xff]  ;;  %v1454_v38 = vld [vmem:[%s1128_s10 + $0xb8] sm:$0xff] }
  0x31   : > { %1959 = vst [vmem:[#allocation40_spill] sm:$0xff] %v1433_v57  ;;  %1960 = vst [vmem:[#allocation41_spill] sm:$0xff] %v1436_v62  ;;  %v342_v49 = vadd.f32 %v341_v56, %v340_v55  ;;  %v351_v55 = vsel %vm315_vm0, %v1433_v57, 0.0  ;;  %v353_v56 = vsel %vm315_vm0, %v1436_v62, 0.0  ;;  %v355_v37 = vsel %vm315_vm0, %v1439_v29, 0.0  ;;  %v1465_v50 = vld [vmem:[%s1128_s10 + $0xc0] sm:$0xff] }
  0x32   : > { %1961 = vst [vmem:[#allocation42_spill] sm:$0xff] %v1439_v29  ;;  %1962 = vst [vmem:[#allocation43_spill] sm:$0xff] %v1448_v1  ;;  %v1468_v51 = vld [vmem:[%s1128_s10 + $0xc8] sm:$0xff]  ;;  %v1471_v23 = vld [vmem:[%s1128_s10 + $0xd0] sm:$0xff]  ;;  %v357_v57 = vsel %vm315_vm0, %v1448_v1, 0.0  ;;  %v1477_v62 = vsel %vm315_vm0, %v1451_v42, 0.0  ;;  %v452_v29 = vmul.f32 %v1146_v6, %v1146_v6 }
  0x33   : > { %1963 = vst [vmem:[#allocation44_spill] sm:$0xff] %v1451_v42  ;;  %1964 = vst [vmem:[#allocation45_spill] sm:$0xff] %v1454_v38  ;;  %v344_v63 = vadd.f32 %v343_v61, %v342_v49  ;;  %v1482_v8 = vld [vmem:[%s1128_s10 + $0xd8] sm:$0xff]  ;;  %v1489_v24 = vsel %vm315_vm0, %v1454_v38, 0.0  ;;  %v1493_v49 = vsel %vm315_vm0, %v1465_v50, 0.0  ;;  %v1497_v61 = vsel %vm315_vm0, %v1468_v51, 0.0 }
  0x34   : > { %1965 = vst [vmem:[#allocation46_spill] sm:$0xff] %v1465_v50  ;;  %1966 = vst [vmem:[#allocation47_spill] sm:$0xff] %v1468_v51  ;;  %v1501_v42 = vsel %vm315_vm0, %v1471_v23, 0.0  ;;  %v1504_v6 = vld [vmem:[%s1128_s10 + $0xe8] sm:$0xff]  ;;  %v1507_v1 = vld [vmem:[%s1128_s10 + $0xf0] sm:$0xff]  ;;  %v1511_v38 = vsel %vm315_vm0, %v1482_v8, 0.0  ;;  %v453_v51 = vmul.f32 %v1151_v9, %v1151_v9  ;;  %v457_v9 = vmul.f32 %v1167_v18, %v1167_v18 }
  0x35   : > { %1967 = vst [vmem:[#allocation48_spill] sm:$0xff] %v1471_v23  ;;  %1968 = vst [vmem:[#allocation49_spill] sm:$0xff] %v1482_v8  ;;  %v346_v35 = vadd.f32 %v345_v44, %v344_v63  ;;  %v1515_v50 = vsel %vm315_vm0, %v1485_v2, 0.0  ;;  %v1521_v23 = vsel %vm315_vm0, %v1504_v6, 0.0  ;;  %v454_v44 = vmul.f32 %v1156_v12, %v1156_v12 }
  0x36   : > { %1969 = vst [vmem:[#allocation50_spill] sm:$0xff] %v1485_v2  ;;  %1970 = vst [vmem:[#allocation51_spill] sm:$0xff] %v1501_v42  ;;  %v1525_v42 = vsel %vm315_vm0, %v1507_v1, 0.0  ;;  %v455_v63 = vmul.f32 %v1161_v15, %v1161_v15  ;;  %v456_v2 = vmul.f32 %v1164_v17, %v1164_v17  ;;  %v461_v12 = vmul.f32 %v1328_v13, %v1328_v13 }
  0x37   : > { %1971 = vst [vmem:[#allocation52_spill] sm:$0xff] %v1504_v6  ;;  %1972 = vst [vmem:[#allocation53_spill] sm:$0xff] %v1507_v1  ;;  %v348_v8 = vadd.f32 %v347_v43, %v346_v35  ;;  %v458_v6 = vmul.f32 %v1172_v20, %v1172_v20  ;;  %v459_v1 = vmul.f32 %v1175_v21, %v1175_v21 }
  0x38   : > { %1973 = vst [vmem:[#allocation54_spill] sm:$0xff] %v1525_v42  ;;  %v460_v42 = vmul.f32 %v1178_v22, %v1178_v22  ;;  %v1543_v15 = vmul.f32 %v264_v25, %v264_v25  ;;  %v1545_v35 = vmul.f32 %v265_v30, %v265_v30  ;;  %v482_v17 = vmul.f32 %v1185_v26, %v1185_v26 }
  0x39   : > { %v350_v43 = vadd.f32 %v349_v0, %v348_v8  ;;  %v483_v18 = vmul.f32 %v1188_v27, %v1188_v27  ;;  %v484_v20 = vmul.f32 %v1191_v28, %v1191_v28  ;;  %v485_v21 = vmul.f32 %v1202_v32, %v1202_v32 }
  0x3a   : > { %v486_v22 = vmul.f32 %v1205_v33, %v1205_v33  ;;  %v487_v8 = vmul.f32 %v1208_v34, %v1208_v34  ;;  %v488_v25 = vmul.f32 %v1223_v39, %v1223_v39  ;;  %v489_v26 = vmul.f32 %v1226_v40, %v1226_v40 }
  0x3b   : > { %v352_v13 = vadd.f32 %v351_v55, %v350_v43  ;;  %v490_v27 = vmul.f32 %v1229_v41, %v1229_v41  ;;  %v491_v28 = vmul.f32 %v1244_v45, %v1244_v45  ;;  %v492_v32 = vmul.f32 %v1247_v46, %v1247_v46 }
  0x3c   : > { %v513_v33 = vsel %vm315_vm0, %v449_v31, 0.0  ;;  %v514_v34 = vsel %vm315_vm0, %v450_v3, 0.0  ;;  %v493_v39 = vmul.f32 %v1250_v47, %v1250_v47  ;;  %v516_v40 = vsel %vm315_vm0, %v451_v36, 0.0 }
  0x3d   : > { %v354_v30 = vadd.f32 %v353_v56, %v352_v13  ;;  %v515_v0 = vadd.f32 %v514_v34, %v513_v33  ;;  %v494_v41 = vmul.f32 %v1265_v52, %v1265_v52  ;;  %v495_v45 = vmul.f32 %v1268_v53, %v1268_v53  ;;  %v1974_v13 = vld [vmem:[#allocation26_spill] sm:$0xff]  ;;  %v1975_v33 = vld [vmem:[#allocation27_spill] sm:$0xff]  ;;  %v1976_v34 = vld [vmem:[#allocation28_spill] sm:$0xff] }
  0x3e   : > { %v496_v46 = vmul.f32 %v1271_v54, %v1271_v54  ;;  %v518_v31 = vsel %vm315_vm0, %v452_v29, 0.0  ;;  %v497_v3 = vmul.f32 %v1286_v58, %v1286_v58  ;;  %v498_v47 = vmul.f32 %v1289_v59, %v1289_v59 }
  0x3f   : > { %v356_v55 = vadd.f32 %v355_v37, %v354_v30  ;;  %v517_v56 = vadd.f32 %v516_v40, %v515_v0  ;;  %v499_v36 = vmul.f32 %v1292_v60, %v1292_v60  ;;  %v500_v52 = vmul.f32 %v1307_v4, %v1307_v4  ;;  %v1977_v30 = vld [vmem:[#allocation32_spill] sm:$0xff] }
  0x40   : > { %v501_v53 = vmul.f32 %v1310_v5, %v1310_v5  ;;  %v520_v54 = vsel %vm315_vm0, %v453_v51, 0.0  ;;  %v502_v37 = vmul.f32 %v1313_v7, %v1313_v7  ;;  %v503_v58 = vmul.f32 %v1331_v14, %v1331_v14 }
  0x41   : > { %v358_v29 = vadd.f32 %v357_v57, %v356_v55  ;;  %v519_v59 = vadd.f32 %v518_v31, %v517_v56  ;;  %v504_v43 = vmul.f32 %v1334_v16, %v1334_v16  ;;  %v505_v60 = vmul.f32 %v1337_v19, %v1337_v19 }
  0x42   : > { %v506_v4 = vmul.f32 %v1352_v48, %v1352_v48  ;;  %v522_v5 = vsel %vm315_vm0, %v454_v44, 0.0  ;;  %v507_v57 = vmul.f32 %v1355_v11, %v1355_v11  ;;  %v508_v7 = vmul.f32 %v1358_v10, %v1358_v10 }
  0x43   : > { %v360_v51 = vadd.f32 %v1477_v62, %v358_v29  ;;  %v521_v14 = vadd.f32 %v520_v54, %v519_v59  ;;  %v509_v16 = vmul.f32 %v1974_v13, %v1974_v13  ;;  %v510_v19 = vmul.f32 %v1975_v33, %v1975_v33 }
  0x44   : > { %v511_v48 = vmul.f32 %v1976_v34, %v1976_v34  ;;  %v524_v44 = vsel %vm315_vm0, %v455_v63, 0.0  ;;  %v512_v11 = vmul.f32 %v1977_v30, %v1977_v30  ;;  %v526_v10 = vsel %vm315_vm0, %v456_v2, 0.0  ;;  %v1979_v34 = vld [vmem:[#allocation37_spill] sm:$0xff] }
  0x45   : > { %v362_v62 = vadd.f32 %v1489_v24, %v360_v51  ;;  %v523_v0 = vadd.f32 %v522_v5, %v521_v14  ;;  %v528_v40 = vsel %vm315_vm0, %v457_v9, 0.0  ;;  %v530_v31 = vsel %vm315_vm0, %v458_v6, 0.0 }
  0x46   : > { %v532_v55 = vsel %vm315_vm0, %v459_v1, 0.0  ;;  %v534_v56 = vsel %vm315_vm0, %v460_v42, 0.0  ;;  %v536_v63 = vsel %vm315_vm0, %v461_v12, 0.0  ;;  %v1626_v24 = vsel %vm315_vm0, %v482_v17, 0.0 }
  0x47   : > { %v364_v54 = vadd.f32 %v1493_v49, %v362_v62  ;;  %v525_v29 = vadd.f32 %v524_v44, %v523_v0  ;;  %v1629_v59 = vsel %vm315_vm0, %v483_v18, 0.0  ;;  %v1632_v2 = vsel %vm315_vm0, %v484_v20, 0.0  ;;  %v1733_v44 = vld [vmem:[%s1128_s10 + $0x100] sm:$0xff] }
  0x48   : > { %v1635_v6 = vsel %vm315_vm0, %v485_v21, 0.0  ;;  %v1638_v1 = vsel %vm315_vm0, %v486_v22, 0.0  ;;  %v1642_v9 = vsel %vm315_vm0, %v487_v8, 0.0  ;;  %v1645_v12 = vsel %vm315_vm0, %v488_v25, 0.0  ;;  %v1980_v62 = vld [vmem:[#allocation54_spill] sm:$0xff] }
  0x49   : > { %v366_v42 = vadd.f32 %v1497_v61, %v364_v54  ;;  %v527_v49 = vadd.f32 %v526_v10, %v525_v29  ;;  %v1648_v17 = vsel %vm315_vm0, %v489_v26, 0.0  ;;  %v1651_v18 = vsel %vm315_vm0, %v490_v27, 0.0  ;;  %v1978_v61 = vld [vmem:[#allocation51_spill] sm:$0xff]  ;;  %v1981_v0 = vld [vmem:[#allocation38_spill] sm:$0xff] }
  0x4a   : > { %v1654_v20 = vsel %vm315_vm0, %v491_v28, 0.0  ;;  %v1657_v21 = vsel %vm315_vm0, %v492_v32, 0.0  ;;  %v1661_v8 = vsel %vm315_vm0, %v493_v39, 0.0  ;;  %v1664_v25 = vsel %vm315_vm0, %v494_v41, 0.0 }
  0x4b   : > { %v368_v22 = vadd.f32 %v1978_v61, %v366_v42  ;;  %v529_v5 = vadd.f32 %v528_v40, %v527_v49  ;;  %v1667_v26 = vsel %vm315_vm0, %v495_v45, 0.0  ;;  %v1670_v27 = vsel %vm315_vm0, %v496_v46, 0.0  ;;  %v1983_v42 = vld [vmem:[#allocation40_spill] sm:$0xff]  ;;  %v1984_v61 = vld [vmem:[#allocation2_spill] sm:$0xff] }
  0x4c   : > { %v1673_v28 = vsel %vm315_vm0, %v497_v3, 0.0  ;;  %v1676_v32 = vsel %vm315_vm0, %v498_v47, 0.0  ;;  %v1680_v14 = vsel %vm315_vm0, %v499_v36, 0.0  ;;  %v1683_v41 = vsel %vm315_vm0, %v500_v52, 0.0 }
  0x4d   : > { %v370_v51 = vadd.f32 %v1511_v38, %v368_v22  ;;  %v531_v39 = vadd.f32 %v530_v31, %v529_v5  ;;  %v1686_v45 = vsel %vm315_vm0, %v501_v53, 0.0  ;;  %v1689_v46 = vsel %vm315_vm0, %v502_v37, 0.0 }
  0x4e   : > { %v1692_v3 = vsel %vm315_vm0, %v503_v58, 0.0  ;;  %v1695_v47 = vsel %vm315_vm0, %v504_v43, 0.0  ;;  %v1699_v13 = vsel %vm315_vm0, %v505_v60, 0.0  ;;  %v1702_v52 = vsel %vm315_vm0, %v506_v4, 0.0 }
  0x4f   : > { %v372_v38 = vadd.f32 %v1515_v50, %v370_v51  ;;  %v533_v36 = vadd.f32 %v532_v55, %v531_v39  ;;  %v1705_v53 = vsel %vm315_vm0, %v507_v57, 0.0  ;;  %v1708_v37 = vsel %vm315_vm0, %v508_v7, 0.0  ;;  %v1717_v50 = vld [vmem:[%s1128_s10 + $0xf8] sm:$0xff]  ;;  %v1982_v55 = vld [vmem:[#allocation39_spill] sm:$0xff] }
  0x50   : > { %v1711_v58 = vsel %vm315_vm0, %v509_v16, 0.0  ;;  %v1714_v43 = vsel %vm315_vm0, %v510_v19, 0.0  ;;  %v1721_v4 = vsel %vm315_vm0, %v511_v48, 0.0  ;;  %v1724_v57 = vsel %vm315_vm0, %v512_v11, 0.0  ;;  %v1985_v51 = vld [vmem:[#allocation41_spill] sm:$0xff] }
  0x51   : > { %v374_v60 = vadd.f32 %v1521_v23, %v372_v38  ;;  %v535_v33 = vadd.f32 %v534_v56, %v533_v36  ;;  %v377_v7 = vsel %vm315_vm0, %v1717_v50, 0.0  ;;  %v464_v16 = vmul.f32 %v1979_v34, %v1979_v34  ;;  %v1986_v38 = vld [vmem:[#allocation3_spill] sm:$0xff] }
  0x52   : > { %v538_v19 = vsel %vm315_vm0, %v1543_v15, 0.0  ;;  %v379_v48 = vsel %vm315_vm0, %v1733_v44, 0.0  ;;  %v465_v11 = vmul.f32 %v1981_v0, %v1981_v0  ;;  %v540_v10 = vsel %vm315_vm0, %v1545_v35, 0.0  ;;  %v1990_v0 = vld [vmem:[#allocation5_spill] sm:$0xff] }
  0x53   : > { %v376_v23 = vadd.f32 %v1980_v62, %v374_v60  ;;  %v537_v30 = vadd.f32 %v536_v63, %v535_v33  ;;  %v466_v56 = vmul.f32 %v1982_v55, %v1982_v55  ;;  %v542_v15 = vsel %vm315_vm0, %v464_v16, 0.0  ;;  %v1987_v33 = vld [vmem:[#allocation42_spill] sm:$0xff]  ;;  %v1988_v16 = vld [vmem:[#allocation4_spill] sm:$0xff] }
  0x54   : > { %v467_v63 = vmul.f32 %v1983_v42, %v1983_v42  ;;  %v544_v49 = vsel %vm315_vm0, %v465_v11, 0.0  ;;  %v468_v35 = vmul.f32 %v1985_v51, %v1985_v51 }
  0x55   : > { %v378_v40 = vadd.f32 %v377_v7, %v376_v23  ;;  %v539_v31 = vadd.f32 %v538_v19, %v537_v30  ;;  %v546_v39 = vsel %vm315_vm0, %v466_v56, 0.0  ;;  %v469_v7 = vmul.f32 %v1987_v33, %v1987_v33  ;;  %v1989_v23 = vld [vmem:[#allocation43_spill] sm:$0xff]  ;;  %v1992_v56 = vld [vmem:[#allocation6_spill] sm:$0xff] }
  0x56   : > { %v548_v34 = vsel %vm315_vm0, %v467_v63, 0.0  ;;  %v470_v30 = vmul.f32 %v1989_v23, %v1989_v23 }
  0x57   : > { %v380_v54 = vadd.f32 %v379_v48, %v378_v40  ;;  %v541_v29 = vadd.f32 %v540_v10, %v539_v31  ;;  %v550_v48 = vsel %vm315_vm0, %v468_v35, 0.0  ;;  %v1991_v40 = vld [vmem:[#allocation44_spill] sm:$0xff]  ;;  %v552_v55 = vsel %vm315_vm0, %v469_v7, 0.0 }
  0x58   : > { %v471_v31 = vmul.f32 %v1991_v40, %v1991_v40  ;;  %v554_v63 = vsel %vm315_vm0, %v470_v30, 0.0 }
  0x59   : > { %v382_v22 = vadd.f32 %v1984_v61, %v380_v54  ;;  %v543_v5 = vadd.f32 %v542_v15, %v541_v29  ;;  %v1993_v29 = vld [vmem:[#allocation45_spill] sm:$0xff] }
  0x5a   : > { %v472_v42 = vmul.f32 %v1993_v29, %v1993_v29  ;;  %v556_v35 = vsel %vm315_vm0, %v471_v31, 0.0 }
  0x5b   : > { %v384_v36 = vadd.f32 %v1986_v38, %v382_v22  ;;  %v545_v60 = vadd.f32 %v544_v49, %v543_v5  ;;  %v1994_v49 = vld [vmem:[#allocation7_spill] sm:$0xff]  ;;  %v1995_v5 = vld [vmem:[#allocation46_spill] sm:$0xff] }
  0x5c   : > { %v473_v51 = vmul.f32 %v1995_v5, %v1995_v5  ;;  %v558_v7 = vsel %vm315_vm0, %v472_v42, 0.0 }
  0x5d   : > { %v386_v19 = vadd.f32 %v1988_v16, %v384_v36  ;;  %v547_v62 = vadd.f32 %v546_v39, %v545_v60  ;;  %v1996_v39 = vld [vmem:[#allocation8_spill] sm:$0xff]  ;;  %v1997_v60 = vld [vmem:[#allocation47_spill] sm:$0xff] }
  0x5e   : > { %v474_v33 = vmul.f32 %v1997_v60, %v1997_v60  ;;  %v560_v30 = vsel %vm315_vm0, %v473_v51, 0.0 }
  0x5f   : > { %v388_v11 = vadd.f32 %v1990_v0, %v386_v19  ;;  %v549_v10 = vadd.f32 %v548_v34, %v547_v62  ;;  %v1998_v34 = vld [vmem:[#allocation9_spill] sm:$0xff]  ;;  %v1999_v62 = vld [vmem:[#allocation48_spill] sm:$0xff] }
  0x60   : > { %v475_v23 = vmul.f32 %v1999_v62, %v1999_v62  ;;  %v562_v31 = vsel %vm315_vm0, %v474_v33, 0.0 }
  0x61   : > { %v390_v15 = vadd.f32 %v1992_v56, %v388_v11  ;;  %v551_v54 = vadd.f32 %v550_v48, %v549_v10  ;;  %v2000_v48 = vld [vmem:[#allocation10_spill] sm:$0xff]  ;;  %v2001_v10 = vld [vmem:[#allocation49_spill] sm:$0xff] }
  0x62   : > { %v476_v40 = vmul.f32 %v2001_v10, %v2001_v10  ;;  %v564_v42 = vsel %vm315_vm0, %v475_v23, 0.0  ;;  %v2009_v23 = vld [vmem:[#allocation15_spill] sm:$0xff]  ;;  %v2010_v10 = vld [vmem:[#allocation16_spill] sm:$0xff] }
  0x63   : > { %v392_v61 = vadd.f32 %v1994_v49, %v390_v15  ;;  %v553_v22 = vadd.f32 %v552_v55, %v551_v54  ;;  %v2002_v55 = vld [vmem:[#allocation11_spill] sm:$0xff]  ;;  %v2003_v54 = vld [vmem:[#allocation50_spill] sm:$0xff] }
  0x64   : > { %v477_v29 = vmul.f32 %v2003_v54, %v2003_v54  ;;  %v566_v51 = vsel %vm315_vm0, %v476_v40, 0.0 }
  0x65   : > { %v394_v38 = vadd.f32 %v1996_v39, %v392_v61  ;;  %v555_v36 = vadd.f32 %v554_v63, %v553_v22  ;;  %v2004_v63 = vld [vmem:[#allocation12_spill] sm:$0xff] }
  0x66   : > { %v2005_v22 = vld [vmem:[#allocation52_spill] sm:$0xff]  ;;  %v568_v33 = vsel %vm315_vm0, %v477_v29, 0.0  ;;  %v2012_v29 = vld [vmem:[#allocation18_spill] sm:$0xff] }
  0x67   : > { %v396_v16 = vadd.f32 %v1998_v34, %v394_v38  ;;  %v557_v19 = vadd.f32 %v556_v35, %v555_v36  ;;  %v478_v5 = vmul.f32 %v2005_v22, %v2005_v22  ;;  %v2006_v35 = vld [vmem:[#allocation13_spill] sm:$0xff] }
  0x68   : > { %v2007_v36 = vld [vmem:[#allocation53_spill] sm:$0xff] }
  0x69   : > { %v398_v0 = vadd.f32 %v2000_v48, %v396_v16  ;;  %v559_v11 = vadd.f32 %v558_v7, %v557_v19  ;;  %v479_v60 = vmul.f32 %v2007_v36, %v2007_v36  ;;  %v2008_v7 = vld [vmem:[#allocation14_spill] sm:$0xff]  ;;  %v480_v19 = vmul.f32 %v1717_v50, %v1717_v50 }
  0x6a   : > { %v570_v62 = vsel %vm315_vm0, %v478_v5, 0.0  ;;  %v2014_v5 = vld [vmem:[#allocation20_spill] sm:$0xff]  ;;  %v2016_v36 = vld [vmem:[#allocation22_spill] sm:$0xff] }
  0x6b   : > { %v400_v56 = vadd.f32 %v2002_v55, %v398_v0  ;;  %v561_v15 = vadd.f32 %v560_v30, %v559_v11  ;;  %v481_v0 = vmul.f32 %v1733_v44, %v1733_v44  ;;  %v572_v11 = vsel %vm315_vm0, %v479_v60, 0.0 }
  0x6c   : > { %v574_v55 = vsel %vm315_vm0, %v480_v19, 0.0  ;;  %v2018_v19 = vld [vmem:[#allocation24_spill] sm:$0xff] }
  0x6d   : > { %v402_v49 = vadd.f32 %v2004_v63, %v400_v56  ;;  %v563_v61 = vadd.f32 %v562_v31, %v561_v15  ;;  %v2011_v56 = vld [vmem:[#allocation17_spill] sm:$0xff]  ;;  %v576_v50 = vsel %vm315_vm0, %v481_v0, 0.0 }
  0x6e   : > { %v2020_v0 = vld [vmem:[#allocation29_spill] sm:$0xff] }
  0x6f   : > { %v404_v39 = vadd.f32 %v2006_v35, %v402_v49  ;;  %v565_v38 = vadd.f32 %v564_v42, %v563_v61  ;;  %v2013_v49 = vld [vmem:[#allocation19_spill] sm:$0xff]  ;;  %v2015_v35 = vld [vmem:[#allocation21_spill] sm:$0xff] }
  0x71   : > { %v406_v34 = vadd.f32 %v2008_v7, %v404_v39  ;;  %v567_v16 = vadd.f32 %v566_v51, %v565_v38  ;;  %v2017_v7 = vld [vmem:[#allocation23_spill] sm:$0xff] }
  0x73   : > { %v408_v30 = vadd.f32 %v2009_v23, %v406_v34  ;;  %v569_v48 = vadd.f32 %v568_v33, %v567_v16 }
  0x75   : > { %v410_v40 = vadd.f32 %v2010_v10, %v408_v30  ;;  %v571_v31 = vadd.f32 %v570_v62, %v569_v48  ;;  %v2019_v30 = vld [vmem:[#allocation25_spill] sm:$0xff]  ;;  %v2021_v10 = vld [vmem:[#allocation30_spill] sm:$0xff] }
  0x77   : > { %v412_v15 = vadd.f32 %v2011_v56, %v410_v40  ;;  %v573_v54 = vadd.f32 %v572_v11, %v571_v31  ;;  %v2022_v31 = vld [vmem:[#allocation31_spill] sm:$0xff]  ;;  %v2023_v56 = vld [vmem:[#allocation33_spill] sm:$0xff] }
  0x79   : > { %v414_v42 = vadd.f32 %v2012_v29, %v412_v15  ;;  %v575_v63 = vadd.f32 %v574_v55, %v573_v54  ;;  %v2024_v54 = vld [vmem:[#allocation34_spill] sm:$0xff]  ;;  %v2025_v29 = vld [vmem:[#allocation35_spill] sm:$0xff] }
  0x7b   : > { %v416_v61 = vadd.f32 %v2013_v49, %v414_v42  ;;  %v577_v22 = vadd.f32 %v576_v50, %v575_v63  ;;  %v2026_v63 = vld [vmem:[#allocation36_spill] sm:$0xff] }
  0x7d   : > { %v418_v44 = vadd.f32 %v2014_v5, %v416_v61  ;;  %v579_v51 = vadd.f32 %v1626_v24, %v577_v22 }
  0x7f   : > { %v420_v39 = vadd.f32 %v2015_v35, %v418_v44  ;;  %v581_v38 = vadd.f32 %v1629_v59, %v579_v51 }
  0x81   : > { %v422_v60 = vadd.f32 %v2016_v36, %v420_v39  ;;  %v583_v33 = vadd.f32 %v1632_v2, %v581_v38 }
  0x83   : > { %v424_v34 = vadd.f32 %v2017_v7, %v422_v60  ;;  %v585_v16 = vadd.f32 %v1635_v6, %v583_v33 }
  0x85   : > { %v426_v62 = vadd.f32 %v2018_v19, %v424_v34  ;;  %v587_v23 = vadd.f32 %v1638_v1, %v585_v16 }
  0x87   : > { %v428_v48 = vadd.f32 %v2019_v30, %v426_v62  ;;  %v589_v24 = vadd.f32 %v1642_v9, %v587_v23 }
  0x89   : > { %v430_v11 = vadd.f32 %v2020_v0, %v428_v48  ;;  %v591_v59 = vadd.f32 %v1645_v12, %v589_v24 }
  0x8b   : > { %v432_v40 = vadd.f32 %v2021_v10, %v430_v11  ;;  %v593_v2 = vadd.f32 %v1648_v17, %v591_v59 }
  0x8d   : > { %v434_v55 = vadd.f32 %v2022_v31, %v432_v40  ;;  %v595_v6 = vadd.f32 %v1651_v18, %v593_v2 }
  0x8f   : > { %v436_v15 = vadd.f32 %v2023_v56, %v434_v55  ;;  %v597_v1 = vadd.f32 %v1654_v20, %v595_v6 }
  0x91   : > { %v438_v50 = vadd.f32 %v2024_v54, %v436_v15  ;;  %v599_v9 = vadd.f32 %v1657_v21, %v597_v1 }
  0x93   : > { %v440_v42 = vadd.f32 %v2025_v29, %v438_v50  ;;  %v601_v12 = vadd.f32 %v1661_v8, %v599_v9 }
  0x95   : > { %v442_v49 = vadd.f32 %v2026_v63, %v440_v42  ;;  %v603_v17 = vadd.f32 %v1664_v25, %v601_v12 }
  0x97   : > { %v605_v61 = vadd.f32 %v1667_v26, %v603_v17  ;;  %v443_v35 = vrot.slane %v442_v49, 4 }
  0x99   : > { %v607_v18 = vadd.f32 %v1670_v27, %v605_v61 }
  0x9b   : > { %v609_v22 = vadd.f32 %v1673_v28, %v607_v18 }
  0x9d   : > { %v611_v20 = vadd.f32 %v1676_v32, %v609_v22 }
  0x9f   : > { %v613_v5 = vadd.f32 %v1680_v14, %v611_v20  ;;  %v444_v14 = vadd.f32 %v443_v35, %v442_v49 }
  0xa1   : > { %v615_v21 = vadd.f32 %v1683_v41, %v613_v5  ;;  %v445_v39 = vrot.slane %v444_v14, 2 }
  0xa3   : > { %v617_v44 = vadd.f32 %v1686_v45, %v615_v21 }
  0xa5   : > { %v619_v8 = vadd.f32 %v1689_v46, %v617_v44 }
  0xa7   : > { %v621_v51 = vadd.f32 %v1692_v3, %v619_v8 }
  0xa9   : > { %v623_v25 = vadd.f32 %v1695_v47, %v621_v51  ;;  %v446_v47 = vadd.f32 %v445_v39, %v444_v14 }
  0xab   : > { %v625_v26 = vadd.f32 %v1699_v13, %v623_v25  ;;  %v447_v36 = vrot.slane %v446_v47, 1 }
  0xad   : > { %v627_v27 = vadd.f32 %v1702_v52, %v625_v26  ;;  %v448_v33 = vadd.f32 %v447_v36, %v446_v47 }
  0xaf   : > { %v629_v28 = vadd.f32 %v1705_v53, %v627_v27 }
  0xb1   : > { %v631_v32 = vadd.f32 %v1708_v37, %v629_v28 }
  0xb3   : > { %v633_v41 = vadd.f32 %v1711_v58, %v631_v32 }
  0xb5   : > { %v635_v45 = vadd.f32 %v1714_v43, %v633_v41 }
  0xb7   : > { %v637_v46 = vadd.f32 %v1721_v4, %v635_v45 }
  0xb9   : > { %v639_v3 = vadd.f32 %v1724_v57, %v637_v46 }
  0xbb   : > { %v640_v38 = vrot.slane %v639_v3, 4 }
  0xbd   : > { %v641_v13 = vadd.f32 %v640_v38, %v639_v3 }
  0xbf   : > { %v642_v52 = vrot.slane %v641_v13, 2 }
  0xc1   : > { %v643_v60 = vadd.f32 %v642_v52, %v641_v13  ;;  %651 = sbr.rel (%p939_p7) target bundleno = 201 (0xc9), region = 44 }
  0xc3   : > { %v644_v53 = vrot.slane %v643_v60, 1 }
  0xc5   : > { %v645_v37 = vadd.f32 %v644_v53, %v643_v60 }
  0xc7   : > { %v647_v7 = vsel %vm646_vm1, %v448_v33, %v645_v37 }
  0xc8   : > { %653 = vst.msk [vmem:[%s1123_s6] sm:$0x3] %vm652_vm2, %v647_v7 }
  0xc9 PF: > { %p940_p8 = scmp.eq.s32.totalorder %s1035_s18, 0 }
  0xca   : > { %vm660_vm3 = vcmask (!%p940_p8), 123904  }
  0xcb   : > { %657 = sbr.rel (%p940_p8) target bundleno = 211 (0xd3), region = 48 }
  0xcf   : > { %v658_v58 = vld [vmem:[%s1123_s6] sm:$0x3] (!%p940_p8) }
  0xd0   : > { %v659_v43 = vadd.f32 (!%p940_p8), %v658_v58, %v647_v7 }
  0xd2   : > { %661 = vst.msk [vmem:[%s1123_s6] sm:$0x3] %vm660_vm3, %v659_v43 }
  0xd3 PF: > { %p941_p9 = scmp.ne.s32.totalorder %s1035_s18, 1 }
  0xd4   : > { %v667_v4 = vld [vmem:[%s1896_s1] sm:$0xff] (!%p941_p9)  ;;  %v668_v57 = vld [vmem:[%s1896_s1 + $0x8] sm:$0xff] (!%p941_p9)  ;;  %v1053_v34 = vmov (!%p941_p9), 0.0|0.0   ;;  %vm1054_vm4 = vmmov (!%p941_p9), 0   ;;  %v1055_v19 = vmov (!%p941_p9), 0.0   ;;  %vm747_vm5 = vcmask (!%p941_p9), 1043456  }
  0xd5   : > { %665 = sbr.rel (%p941_p9) target bundleno = 679 (0x2a7), region = 52  ;;  %964 = vmatprep.subr.bf16.mxu0 (!%p941_p9), %v1053_v34  ;;  %v965_v16 = vpack.c.bf16 (!%p941_p9), %v668_v57, %v667_v4  ;;  %956 = vmatprep.mubr.msk.f32.mxu0 (!%p941_p9), %vm1054_vm4, %v1055_v19  ;;  %v742_v23 = vld [vmem:[%s1897_s2] sm:$0xf] (!%p941_p9)  ;;  %vm743_vm6 = vcmask (!%p941_p9), 31744   ;;  %v1056_v31 = vmov (!%p941_p9), 1966171168   ;;  %v834_v6 = vlaneseq (!%p941_p9) }
  0xd6   : > { %959 = vmatprep.subr.mxu1 (!%p941_p9), %v1055_v19  ;;  %961 = vmatprep.mubr.msk.f32.mxu1 (!%p941_p9), %vm1054_vm4, %v1055_v19  ;;  %v832_v55 = vunpack.c.l.s4 (!%p941_p9), %v1056_v31  ;;  %v829_v29 = vld [vmem:[%s1898_s3] sm:$0x1] (!%p941_p9)  ;;  %vm858_vm7 = vcmask (!%p941_p9), 123904  }
  0xd7   : > { %966 = vmatpush3.bf16.msra.mxu0 (!%p941_p9), %v965_v16  ;;  %960 = vmatpush3.msk.msra.mxu1 (!%p941_p9), %vm747_vm5, %v742_v23  ;;  %v835_v15 = vshrl.u32 (!%p941_p9), %v834_v6, 7  ;;  %v848_v63 = vld [vmem:[%s1899_s4] sm:$0x1] (!%p941_p9) }
  0xd8   : > { %v833_v56 = vunpack.c.0.s8 (!%p941_p9), %v832_v55 }
  0xd9   : > { %v666_v62 = vld [vmem:[%s1123_s6] sm:$0x3] (!%p941_p9)  ;;  %v854_v17 = vsub.s32 (!%p941_p9), 0, %v835_v15 }
  0xda   : > { %957 = vmatmul.mubr.msk.f32.vlgmr.msra.gmra.mrb[0].mxu0 (!%p941_p9), %vm315_vm0, %v666_v62  ;;  %v836_v1 = vsub.s32 (!%p941_p9), %v833_v56, %v835_v15 }
 0x1ad   : > { %v738_v30 = vpop.f32.mrb[0].mxu0 }
 0x1ae   : > { %v958_v48 = vpop.f32.mrb[1].mxu0  ;;  %962 = vmatmul.mubr.msk.f32.vlgmr.msra.gmra.mrb[0].mxu1 %vm743_vm6, %v738_v30 }
 0x281   : > { %v817_v24 = vpop.f32.mrb[0].mxu1 }
 0x282   : > { %v821_v0 = vmul.f32 %v817_v24, %v817_v24  ;;  %v963_v11 = vpop.f32.mrb[1].mxu1 }
 0x284   : > { %v823_v59 = vrot.slane %v821_v0, 7 }
 0x286   : > { %v825_v10 = vsub.f32 %v817_v24, %v823_v59 }
 0x288   : > { %v826_v40 = vmax.f32 %v825_v10, 0.0 }
 0x28a   : > { %v827_v2 = vadd.f32 1e-06, %v826_v40 }
 0x28c   : > { %1011 = vrsqrt.f32 %v827_v2 }
 0x296   : > { %v1012_v54 = vpop.eup %1011 }
 0x297   : > { %v837_v50 = vrot.slane %v1012_v54, %v836_v1 }
 0x299   : > { %v838_v9 = vcombine.high %v837_v50, %v837_v50 }
 0x29b   : > { %v845_v42 = vrot.slane %v838_v9, %v836_v1 }
 0x29d   : > { %v847_v12 = vmul.f32 %v845_v42, %v829_v29 }
 0x29f   : > { %v849_v49 = vmul.f32 %v847_v12, %v817_v24 }
 0x2a1   : > { %v850_v61 = vsub.f32 %v848_v63, %v849_v49 }
 0x2a3   : > { %v855_v18 = vrot.slane %v850_v61, %v854_v17 }
 0x2a5   : > { %v857_v22 = vsel %vm646_vm1, %v847_v12, %v855_v18 }
 0x2a6   : > { %859 = vst.msk [vmem:[%s1123_s6] sm:$0x3] %vm858_vm7, %v857_v22 }
 0x2a7 PF: > { %s15_s22 = sadd.s32 1, %s1051_s22   ;;  %s2027_s18 = smov %s1043_s20 }
 0x2a8   : > { %p12_p10 = scmp.ge.s32.totalorder %s15_s22, 6   ;;  %s2028_s19 = smov %s1047_s21 }
 0x2a9   : > { %s2029_s20 = smov %s2032_s23  ;;  %s2030_s21 = smov %s2036_s24 }
 0x2aa   :  { %14 = sbr.rel (!%p12_p10) target bundleno = 3 (0x3), region = 82 }

// kernel: down_block_3d.12
= control target key start
LH: loop header
LB: loop body
LE: loop exit
PB: predicated region body
PF: predicated region fallthrough
CT: control target
= control target key end

     0   :  { %s4125_s18 = smov 0   ;;  %s4127_s19 = smov 0   ;;  %s4761_s0 = inlined_call_operand.vmem [shape: f32[8,328,16], index: 0, kind: input, shape index: {}]   ;;  %s4762_s1 = inlined_call_operand.vmem [shape: f32[9,16,16], index: 1, kind: input, shape index: {}]   ;;  %s4763_s2 = inlined_call_operand.vmem [shape: f32[8,1,16], index: 2, kind: input, shape index: {}]   ;;  %s4764_s3 = inlined_call_operand.vmem [shape: f32[8,288,8], index: 3, kind: input, shape index: {}]   ;;  %s4765_s4 = inlined_call_operand.vmem [shape: f32[8,16], index: 4, kind: input, shape index: {}]   ;;  %s4766_s5 = inlined_call_operand.vmem [shape: f32[8,288,16], index: 5, kind: output, shape index: {}]  }
   0x1   :  { %s4129_s20 = smov 0   ;;  %s4131_s21 = smov 0  }
   0x2   :  { %s4133_s22 = smov 0  }
   0x3 LB: > { %s24_s23 = sadd.s32 1, %s4085_s20  ;;  %s27_s24 = sadd.s32 1, %s4089_s21  ;;  %s4093_s22 = sphi %s4133_s22, %s15_s22   ;;  %s4089_s21 = sphi %s4131_s21, %s4770_s21   ;;  %s4085_s20 = sphi %s4129_s20, %s4769_s20   ;;  %s4081_s19 = sphi %s4127_s19, %s4768_s19   ;;  %s4077_s18 = sphi %s4125_s18, %s4767_s18  }
   0x4   : > { %p25_p0 = scmp.ge.s32.totalorder %s24_s23, 2  ;;  %p2943_p1 = scmp.ge.s32.totalorder %s4093_s22, 1 }
   0x5   : > { %p226_p2 = scmp.lt.s32.totalorder %s4093_s22, 17 }
   0x6   : > { %s4772_s23 = smov (%p25_p0, %s24_s23), 0  ;;  %s4774_s24 = smov (!%p25_p0, %s27_s24), %s4089_s21 }
   0x7   : > { %p227_p3 = pnand %p2943_p1, %p226_p2  ;;  %p29_p4 = scmp.ge.s32.totalorder %s4774_s24, 8 }
   0x8   : > { %v2965_v0 = vld [vmem:[%s4762_s1 + $0x10] sm:$0xff] (!%p227_p3)  ;;  %v2966_v1 = vld [vmem:[%s4762_s1 + $0x18] sm:$0xff] (!%p227_p3)  ;;  %p270_p5 = scmp.lt.s32.totalorder (!%p227_p3), %s4081_s19, 7  ;;  %v318_v5 = vld [vmem:[%s4762_s1] sm:$0xff] (!%p227_p3)  ;;  %s298_s16 = smul.u32 (!%p227_p3), 144, %s4077_s18  ;;  %vm343_vm0 = vcmask (!%p227_p3), 130048  }
   0x9   : > { %s4776_s24 = smov (%p29_p4, %s4774_s24), 0  ;;  %230 = sbr.rel (%p227_p3) target bundleno = 417 (0x1a1), region = 40 }
   0xa   : > { %v3135_v2 = vld [vmem:[%s4762_s1 + $0x50] sm:$0xff] (!%p227_p3)  ;;  %v3797_v3 = vpack.c.bf16 (!%p227_p3), %v2966_v1, %v2965_v0  ;;  %v3136_v4 = vld [vmem:[%s4762_s1 + $0x58] sm:$0xff] (!%p227_p3)  ;;  %v319_v6 = vld [vmem:[%s4762_s1 + $0x8] sm:$0xff] (!%p227_p3)  ;;  %s278_s8 = smul.u32 (!%p227_p3), 18, %s4077_s18  ;;  %vm2556_vm1 = vcmask (!%p227_p3), 64512  }
   0xb   : > { %v3817_v7 = vpack.c.bf16 (!%p227_p3), %v3136_v4, %v3135_v2  ;;  %v3801_v8 = vpack.c.bf16 (!%p227_p3), %v319_v6, %v318_v5  ;;  %v3173_v9 = vld [vmem:[%s4762_s1 + $0x60] sm:$0xff] (!%p227_p3)  ;;  %v3174_v10 = vld [vmem:[%s4762_s1 + $0x68] sm:$0xff] (!%p227_p3)  ;;  %v3211_v14 = vld [vmem:[%s4762_s1 + $0x70] sm:$0xff] (!%p227_p3) }
   0xc   : > { %3798 = vmatprep.subr.bf16.mxu1 (!%p227_p3), %v3797_v3  ;;  %v3821_v11 = vpack.c.bf16 (!%p227_p3), %v3174_v10, %v3173_v9  ;;  %v3021_v12 = vld [vmem:[%s4762_s1 + $0x20] sm:$0xff] (!%p227_p3)  ;;  %v3022_v13 = vld [vmem:[%s4762_s1 + $0x28] sm:$0xff] (!%p227_p3)  ;;  %v3212_v15 = vld [vmem:[%s4762_s1 + $0x78] sm:$0xff] (!%p227_p3)  ;;  %p281_p6 = scmp.lt.s32.totalorder (!%p227_p3), %s278_s8, 35 }
   0xd   : > { %3800 = vmatpush3.bf16.msra.mxu1 (!%p227_p3), %v3797_v3  ;;  %3818 = vmatprep.subr.bf16.mxu0 (!%p227_p3), %v3817_v7  ;;  %v4212_v22 = vpack.c.bf16 (!%p227_p3), %v3022_v13, %v3021_v12  ;;  %v4214_v23 = vpack.c.bf16 (!%p227_p3), %v3212_v15, %v3211_v14  ;;  %v3059_v55 = vld [vmem:[%s4762_s1 + $0x30] sm:$0xff] (!%p227_p3)  ;;  %v3060_v56 = vld [vmem:[%s4762_s1 + $0x38] sm:$0xff] (!%p227_p3)  ;;  %v3249_v57 = vld [vmem:[%s4762_s1 + $0x80] sm:$0xff] (!%p227_p3) }
   0xe   : > { %3820 = vmatpush3.bf16.msra.mxu0 (!%p227_p3), %v3817_v7  ;;  %3802 = vmatprep.subr.bf16.mxu1 (!%p227_p3), %v3801_v8  ;;  %v3250_v58 = vld [vmem:[%s4762_s1 + $0x88] sm:$0xff] (!%p227_p3)  ;;  %v4343_v61 = vpack.c.bf16 (!%p227_p3), %v3060_v56, %v3059_v55 }
   0xf   : > { %3822 = vmatprep.subr.bf16.mxu0 (!%p227_p3), %v3821_v11  ;;  %v4345_v62 = vpack.c.bf16 (!%p227_p3), %v3250_v58, %v3249_v57 }
  0x10   : > { %s4778_s19 = smov (!%p270_p5, %s4081_s19), 7  ;;  %s4780_s8 = smov (!%p281_p6, %s278_s8), 35 }
  0x11   : > { %s4013_s17 = smul.u32 328, %s4778_s19 }
  0x12   : > { %s4014_s18 = smul.u32 36, %s4778_s19 }
  0x13   : > { %s274_s29 = scalar_lea.vmem %s4761_s0, %s4013_s17  ;;  %s277_s17 = scalar_lea.vmem %s4763_s2, %s4778_s19 }
  0x14   : > { %s4200_s11 = scalar_lea.vmem %s274_s29, %s298_s16  ;;  %s4581_s9 = sadd.s32 %s4014_s18, %s4780_s8 }
  0x15   : > { %v2947_v16 = vld [vmem:[%s4200_s11 + $0x1] sm:$0xff]  ;;  %v3117_v17 = vld [vmem:[%s4200_s11 + $0x14] sm:$0xff]  ;;  %v2948_v18 = vld [vmem:[%s4200_s11 + $0x9] sm:$0xff]  ;;  %s2945_s10 = sshll.u32 %s4581_s9, 3 }
  0x16   : > { %3493 = vmatprep.mubr.msk.f32.mxu1 %vm343_vm0, %v2947_v16  ;;  %3648 = vmatprep.mubr.msk.f32.mxu0 %vm343_vm0, %v3117_v17  ;;  %v3118_v19 = vld [vmem:[%s4200_s11 + $0x1c] sm:$0xff]  ;;  %v2949_v20 = vld [vmem:[%s4200_s11 + $0x11] sm:$0xff]  ;;  %v4210_v21 = vld [vmem:[%s4200_s11 + $0x24] sm:$0xff]  ;;  %s4597_s14 = scalar_lea.vmem %s4764_s3, %s2945_s10  ;;  %s4691_s26 = scalar_lea.vmem %s4766_s5, %s2945_s10 }
  0x17   : > { %3494 = vmatmul.mubr.msk.f32.vlgmr.msra.gmra.mrb[0].mxu1 %vm343_vm0, %v2948_v18  ;;  %3649 = vmatmul.mubr.msk.f32.vlgmr.msra.gmra.mrb[0].mxu0 %vm343_vm0, %v3118_v19  ;;  %v2950_v24 = vld [vmem:[%s4200_s11 + $0x19] sm:$0xff]  ;;  %v4220_v25 = vld [vmem:[%s4200_s11 + $0x2c] sm:$0xff]  ;;  %v2951_v26 = vld [vmem:[%s4200_s11 + $0x21] sm:$0xff] }
  0x18   : > { %3804 = vmatpush3.bf16.msra.mxu1 %v3801_v8  ;;  %3824 = vmatpush3.bf16.msra.mxu0 %v3821_v11  ;;  %v4227_v27 = vld [vmem:[%s4200_s11 + $0x34] sm:$0xff]  ;;  %v2952_v28 = vld [vmem:[%s4200_s11 + $0x29] sm:$0xff]  ;;  %v4239_v29 = vld [vmem:[%s4200_s11 + $0x3c] sm:$0xff] }
  0x19   : > { %3496 = vmatprep.mubr.msk.f32.mxu1 %vm343_vm0, %v2949_v20  ;;  %3651 = vmatprep.mubr.msk.f32.mxu0 %vm343_vm0, %v4210_v21  ;;  %v2953_v30 = vld [vmem:[%s4200_s11 + $0x31] sm:$0xff]  ;;  %v4243_v31 = vld [vmem:[%s4200_s11 + $0x44] sm:$0xff]  ;;  %v2954_v32 = vld [vmem:[%s4200_s11 + $0x39] sm:$0xff] }
  0x1a   : > { %3806 = vmatprep.subr.bf16.mxu1 %v4212_v22  ;;  %3826 = vmatprep.subr.bf16.mxu0 %v4214_v23  ;;  %v4253_v33 = vld [vmem:[%s4200_s11 + $0x4c] sm:$0xff]  ;;  %v2955_v34 = vld [vmem:[%s4200_s11 + $0x41] sm:$0xff]  ;;  %v4257_v35 = vld [vmem:[%s4200_s11 + $0x54] sm:$0xff] }
  0x1b   : > { %3497 = vmatmul.mubr.msk.f32.gmra.mrb[2].mxu1 %vm343_vm0, %v2950_v24  ;;  %3652 = vmatmul.mubr.msk.f32.gmra.mrb[2].mxu0 %vm343_vm0, %v4220_v25  ;;  %v2956_v36 = vld [vmem:[%s4200_s11 + $0x49] sm:$0xff]  ;;  %v4267_v37 = vld [vmem:[%s4200_s11 + $0x5c] sm:$0xff]  ;;  %v2957_v38 = vld [vmem:[%s4200_s11 + $0x51] sm:$0xff] }
  0x1c   : > { %3499 = vmatprep.mubr.msk.f32.mxu1 %vm343_vm0, %v2951_v26  ;;  %3654 = vmatprep.mubr.msk.f32.mxu0 %vm343_vm0, %v4227_v27  ;;  %v4271_v39 = vld [vmem:[%s4200_s11 + $0x64] sm:$0xff]  ;;  %v2958_v40 = vld [vmem:[%s4200_s11 + $0x59] sm:$0xff]  ;;  %v4281_v41 = vld [vmem:[%s4200_s11 + $0x6c] sm:$0xff] }
  0x1d   : > { %v2959_v42 = vld [vmem:[%s4200_s11 + $0x61] sm:$0xff]  ;;  %v4285_v43 = vld [vmem:[%s4200_s11 + $0x74] sm:$0xff]  ;;  %v2960_v44 = vld [vmem:[%s4200_s11 + $0x69] sm:$0xff] }
  0x1e   : > { %v4295_v45 = vld [vmem:[%s4200_s11 + $0x7c] sm:$0xff]  ;;  %v2961_v46 = vld [vmem:[%s4200_s11 + $0x71] sm:$0xff]  ;;  %v4299_v47 = vld [vmem:[%s4200_s11 + $0x84] sm:$0xff] }
  0x1f   : > { %3500 = vmatmul.mubr.msk.f32.gmra.mrb[4].mxu1 %vm343_vm0, %v2952_v28  ;;  %3655 = vmatmul.mubr.msk.f32.gmra.mrb[4].mxu0 %vm343_vm0, %v4239_v29  ;;  %v2962_v48 = vld [vmem:[%s4200_s11 + $0x79] sm:$0xff]  ;;  %v4309_v49 = vld [vmem:[%s4200_s11 + $0x8c] sm:$0xff]  ;;  %v2963_v50 = vld [vmem:[%s4200_s11 + $0x81] sm:$0xff] }
  0x20   : > { %3502 = vmatprep.mubr.msk.f32.mxu1 %vm343_vm0, %v2953_v30  ;;  %3657 = vmatprep.mubr.msk.f32.mxu0 %vm343_vm0, %v4243_v31  ;;  %v4313_v51 = vld [vmem:[%s4200_s11 + $0x94] sm:$0xff]  ;;  %v2964_v52 = vld [vmem:[%s4200_s11 + $0x89] sm:$0xff]  ;;  %v3134_v53 = vld [vmem:[%s4200_s11 + $0x9c] sm:$0xff] }
  0x21   : > { %v300_v54 = vld [vmem:[%s4200_s11] sm:$0xff]  ;;  %v301_v59 = vld [vmem:[%s4200_s11 + $0x8] sm:$0xff]  ;;  %v302_v60 = vld [vmem:[%s4200_s11 + $0x10] sm:$0xff] }
  0x22   : > { %v303_v63 = vld [vmem:[%s4200_s11 + $0x18] sm:$0xff]  ;;  %v304_v0 = vld [vmem:[%s4200_s11 + $0x20] sm:$0xff]  ;;  %v305_v1 = vld [vmem:[%s4200_s11 + $0x28] sm:$0xff] }
  0x23   : > { %3503 = vmatmul.mubr.msk.f32.gmra.mrb[6].mxu1 %vm343_vm0, %v2954_v32  ;;  %3658 = vmatmul.mubr.msk.f32.gmra.mrb[6].mxu0 %vm343_vm0, %v4253_v33  ;;  %v306_v2 = vld [vmem:[%s4200_s11 + $0x30] sm:$0xff]  ;;  %v307_v3 = vld [vmem:[%s4200_s11 + $0x38] sm:$0xff]  ;;  %v308_v4 = vld [vmem:[%s4200_s11 + $0x40] sm:$0xff] }
  0x24   : > { %3505 = vmatprep.mubr.msk.f32.mxu1 %vm343_vm0, %v2955_v34  ;;  %3660 = vmatprep.mubr.msk.f32.mxu0 %vm343_vm0, %v4257_v35  ;;  %v309_v5 = vld [vmem:[%s4200_s11 + $0x48] sm:$0xff]  ;;  %v310_v6 = vld [vmem:[%s4200_s11 + $0x50] sm:$0xff]  ;;  %v311_v7 = vld [vmem:[%s4200_s11 + $0x58] sm:$0xff] }
  0x25   : > { %v312_v8 = vld [vmem:[%s4200_s11 + $0x60] sm:$0xff]  ;;  %v313_v9 = vld [vmem:[%s4200_s11 + $0x68] sm:$0xff]  ;;  %v314_v10 = vld [vmem:[%s4200_s11 + $0x70] sm:$0xff] }
  0x26   : > { %v315_v11 = vld [vmem:[%s4200_s11 + $0x78] sm:$0xff]  ;;  %v316_v12 = vld [vmem:[%s4200_s11 + $0x80] sm:$0xff]  ;;  %v317_v14 = vld [vmem:[%s4200_s11 + $0x88] sm:$0xff] }
  0x27   : > { %3506 = vmatmul.mubr.msk.f32.gmra.mrb[8].mxu1 %vm343_vm0, %v2956_v36  ;;  %3661 = vmatmul.mubr.msk.f32.gmra.mrb[8].mxu0 %vm343_vm0, %v4267_v37  ;;  %v3171_v13 = vld [vmem:[%s4200_s11 + $0xa4] sm:$0xff]  ;;  %v3172_v15 = vld [vmem:[%s4200_s11 + $0xac] sm:$0xff]  ;;  %v4444_v26 = vld [vmem:[%s4200_s11 + $0x1a] sm:$0xff] }
  0x28   : > { %3508 = vmatprep.mubr.msk.f32.mxu1 %vm343_vm0, %v2957_v38  ;;  %3663 = vmatprep.mubr.msk.f32.mxu0 %vm343_vm0, %v4271_v39  ;;  %v3003_v16 = vld [vmem:[%s4200_s11 + $0x2] sm:$0xff]  ;;  %v3004_v20 = vld [vmem:[%s4200_s11 + $0xa] sm:$0xff]  ;;  %v4467_v32 = vld [vmem:[%s4200_s11 + $0x32] sm:$0xff] }
  0x29   : > { %v3193_v17 = vld [vmem:[%s4200_s11 + $0x25] sm:$0xff]  ;;  %v4477_v34 = vld [vmem:[%s4200_s11 + $0x3a] sm:$0xff]  ;;  %v3210_v55 = vld [vmem:[%s4200_s11 + $0xad] sm:$0xff] }
  0x2a   : > { %v3097_v18 = vld [vmem:[%s4762_s1 + $0x40] sm:$0xff]  ;;  %v3098_v19 = vld [vmem:[%s4762_s1 + $0x48] sm:$0xff]  ;;  %v3233_v58 = vld [vmem:[%s4200_s11 + $0x36] sm:$0xff] }
  0x2b   : > { %3509 = vmatmul.mubr.msk.f32.gmra.mrb[10].mxu1 %vm343_vm0, %v2958_v40  ;;  %3664 = vmatmul.mubr.msk.f32.gmra.mrb[10].mxu0 %vm343_vm0, %v4281_v41  ;;  %v4432_v24 = vpack.c.bf16 %v3098_v19, %v3097_v18  ;;  %v4451_v28 = vld [vmem:[%s4200_s11 + $0x22] sm:$0xff]  ;;  %v4463_v30 = vld [vmem:[%s4200_s11 + $0x2a] sm:$0xff]  ;;  %v4493_v40 = vld [vmem:[%s4200_s11 + $0x52] sm:$0xff] }
  0x2c   : > { %3511 = vmatprep.mubr.msk.f32.mxu1 %vm343_vm0, %v2959_v42  ;;  %3666 = vmatprep.mubr.msk.f32.mxu0 %vm343_vm0, %v4285_v43  ;;  %v4481_v36 = vld [vmem:[%s4200_s11 + $0x42] sm:$0xff]  ;;  %v3012_v38 = vld [vmem:[%s4200_s11 + $0x4a] sm:$0xff]  ;;  %v3014_v42 = vld [vmem:[%s4200_s11 + $0x5a] sm:$0xff] }
  0x2d   : > { %v3231_v56 = vld [vmem:[%s4200_s11 + $0x26] sm:$0xff]  ;;  %v3232_v57 = vld [vmem:[%s4200_s11 + $0x2e] sm:$0xff]  ;;  %v2540_v19 = vld [vmem:[%s4597_s14 + $0x18] sm:$0xff] }
  0x2e   : > { %v3082_v18 = vld [vmem:[%s4200_s11 + $0x2b] sm:$0xff] }
  0x2f   : > { %3512 = vmatmul.mubr.msk.f32.gmra.mrb[12].mxu1 %vm343_vm0, %v2960_v44  ;;  %3667 = vmatmul.mubr.msk.f32.gmra.mrb[12].mxu0 %vm343_vm0, %v4295_v45  ;;  %v3015_v44 = vld [vmem:[%s4200_s11 + $0x62] sm:$0xff] }
  0x30   : > { %3514 = vmatprep.mubr.msk.f32.mxu1 %vm343_vm0, %v2961_v46  ;;  %3669 = vmatprep.mubr.msk.f32.mxu0 %vm343_vm0, %v4299_v47  ;;  %v3016_v46 = vld [vmem:[%s4200_s11 + $0x6a] sm:$0xff] }
  0x33   : > { %3515 = vmatmul.mubr.msk.f32.gmra.mrb[14].mxu1 %vm343_vm0, %v2962_v48  ;;  %3670 = vmatmul.mubr.msk.f32.gmra.mrb[14].mxu0 %vm343_vm0, %v4309_v49  ;;  %v3017_v48 = vld [vmem:[%s4200_s11 + $0x72] sm:$0xff] }
  0x34   : > { %3517 = vmatprep.mubr.msk.f32.mxu1 %vm343_vm0, %v2963_v50  ;;  %3672 = vmatprep.mubr.msk.f32.mxu0 %vm343_vm0, %v4313_v51  ;;  %v3018_v50 = vld [vmem:[%s4200_s11 + $0x7a] sm:$0xff] }
  0x37   : > { %3518 = vmatmul.mubr.msk.f32.gmra.mrb[16].mxu1 %vm343_vm0, %v2964_v52  ;;  %3673 = vmatmul.mubr.msk.f32.gmra.mrb[16].mxu0 %vm343_vm0, %v3134_v53  ;;  %v3019_v52 = vld [vmem:[%s4200_s11 + $0x82] sm:$0xff] }
  0x38   : > { %3524 = vmatprep.mubr.msk.f32.mxu1 %vm343_vm0, %v300_v54  ;;  %3679 = vmatprep.mubr.msk.f32.mxu0 %vm343_vm0, %v4210_v21  ;;  %v3194_v21 = vld [vmem:[%s4200_s11 + $0x2d] sm:$0xff] }
  0x39   : > { %v3020_v54 = vld [vmem:[%s4200_s11 + $0x8a] sm:$0xff] }
  0x3b   : > { %3525 = vmatmul.mubr.msk.f32.vlgmr.msra.gmra.mrb[0].mxu1 %vm343_vm0, %v301_v59  ;;  %3680 = vmatmul.mubr.msk.f32.vlgmr.msra.gmra.mrb[0].mxu0 %vm343_vm0, %v4220_v25  ;;  %v4439_v25 = vld [vmem:[%s4765_s4] sm:$0xff] }
  0x3c   : > { %3808 = vmatpush3.bf16.msra.mxu1 %v4212_v22  ;;  %3828 = vmatpush3.bf16.msra.mxu0 %v4214_v23  ;;  %v4429_v22 = vld [vmem:[%s4200_s11 + $0x12] sm:$0xff]  ;;  %v3234_v59 = vld [vmem:[%s4200_s11 + $0x3e] sm:$0xff] }
  0x3d   : > { %3527 = vmatprep.mubr.msk.f32.mxu1 %vm343_vm0, %v302_v60  ;;  %3682 = vmatprep.mubr.msk.f32.mxu0 %vm343_vm0, %v4227_v27  ;;  %v3195_v23 = vld [vmem:[%s4200_s11 + $0x35] sm:$0xff]  ;;  %v3196_v27 = vld [vmem:[%s4200_s11 + $0x3d] sm:$0xff]  ;;  %v3235_v60 = vld [vmem:[%s4200_s11 + $0x46] sm:$0xff] }
  0x3e   : > { %3810 = vmatprep.subr.bf16.mxu1 %v4343_v61  ;;  %3830 = vmatprep.subr.bf16.mxu0 %v4345_v62 }
  0x3f   : > { %3528 = vmatmul.mubr.msk.f32.gmra.mrb[2].mxu1 %vm343_vm0, %v303_v63  ;;  %3683 = vmatmul.mubr.msk.f32.gmra.mrb[2].mxu0 %vm343_vm0, %v4239_v29  ;;  %v3197_v29 = vld [vmem:[%s4200_s11 + $0x45] sm:$0xff] }
  0x40   : > { %3530 = vmatprep.mubr.msk.f32.mxu1 %vm343_vm0, %v304_v0  ;;  %3685 = vmatprep.mubr.msk.f32.mxu0 %vm343_vm0, %v4243_v31  ;;  %v3198_v31 = vld [vmem:[%s4200_s11 + $0x4d] sm:$0xff]  ;;  %v3238_v63 = vld [vmem:[%s4200_s11 + $0x5e] sm:$0xff] }
  0x41   : > { %v3239_v0 = vld [vmem:[%s4200_s11 + $0x66] sm:$0xff] }
  0x43   : > { %3531 = vmatmul.mubr.msk.f32.gmra.mrb[4].mxu1 %vm343_vm0, %v305_v1  ;;  %3686 = vmatmul.mubr.msk.f32.gmra.mrb[4].mxu0 %vm343_vm0, %v4253_v33  ;;  %v3199_v33 = vld [vmem:[%s4200_s11 + $0x55] sm:$0xff] }
  0x44   : > { %3533 = vmatprep.mubr.msk.f32.mxu1 %vm343_vm0, %v306_v2  ;;  %3688 = vmatprep.mubr.msk.f32.mxu0 %vm343_vm0, %v4257_v35  ;;  %v3200_v35 = vld [vmem:[%s4200_s11 + $0x5d] sm:$0xff]  ;;  %v3240_v1 = vld [vmem:[%s4200_s11 + $0x6e] sm:$0xff] }
  0x45   : > { %v3241_v2 = vld [vmem:[%s4200_s11 + $0x76] sm:$0xff] }
  0x47   : > { %3534 = vmatmul.mubr.msk.f32.gmra.mrb[6].mxu1 %vm343_vm0, %v307_v3  ;;  %3689 = vmatmul.mubr.msk.f32.gmra.mrb[6].mxu0 %vm343_vm0, %v4267_v37  ;;  %v3201_v37 = vld [vmem:[%s4200_s11 + $0x65] sm:$0xff] }
  0x48   : > { %3536 = vmatprep.mubr.msk.f32.mxu1 %vm343_vm0, %v308_v4  ;;  %3691 = vmatprep.mubr.msk.f32.mxu0 %vm343_vm0, %v4271_v39  ;;  %v3202_v39 = vld [vmem:[%s4200_s11 + $0x6d] sm:$0xff]  ;;  %v3242_v3 = vld [vmem:[%s4200_s11 + $0x7e] sm:$0xff] }
  0x49   : > { %v3243_v4 = vld [vmem:[%s4200_s11 + $0x86] sm:$0xff] }
  0x4b   : > { %3537 = vmatmul.mubr.msk.f32.gmra.mrb[8].mxu1 %vm343_vm0, %v309_v5  ;;  %3692 = vmatmul.mubr.msk.f32.gmra.mrb[8].mxu0 %vm343_vm0, %v4281_v41  ;;  %v3203_v41 = vld [vmem:[%s4200_s11 + $0x75] sm:$0xff] }
  0x4c   : > { %3539 = vmatprep.mubr.msk.f32.mxu1 %vm343_vm0, %v310_v6  ;;  %3694 = vmatprep.mubr.msk.f32.mxu0 %vm343_vm0, %v4285_v43  ;;  %v3204_v43 = vld [vmem:[%s4200_s11 + $0x7d] sm:$0xff]  ;;  %v3244_v5 = vld [vmem:[%s4200_s11 + $0x8e] sm:$0xff] }
  0x4d   : > { %v3245_v6 = vld [vmem:[%s4200_s11 + $0x96] sm:$0xff] }
  0x4f   : > { %3540 = vmatmul.mubr.msk.f32.gmra.mrb[10].mxu1 %vm343_vm0, %v311_v7  ;;  %3695 = vmatmul.mubr.msk.f32.gmra.mrb[10].mxu0 %vm343_vm0, %v4295_v45  ;;  %v3205_v45 = vld [vmem:[%s4200_s11 + $0x85] sm:$0xff] }
  0x50   : > { %3542 = vmatprep.mubr.msk.f32.mxu1 %vm343_vm0, %v312_v8  ;;  %3697 = vmatprep.mubr.msk.f32.mxu0 %vm343_vm0, %v4299_v47  ;;  %v3206_v47 = vld [vmem:[%s4200_s11 + $0x8d] sm:$0xff]  ;;  %v3246_v7 = vld [vmem:[%s4200_s11 + $0x9e] sm:$0xff] }
  0x51   : > { %v3057_v8 = vld [vmem:[%s4200_s11 + $0x92] sm:$0xff] }
  0x53   : > { %3543 = vmatmul.mubr.msk.f32.gmra.mrb[12].mxu1 %vm343_vm0, %v313_v9  ;;  %3698 = vmatmul.mubr.msk.f32.gmra.mrb[12].mxu0 %vm343_vm0, %v4309_v49  ;;  %v3207_v49 = vld [vmem:[%s4200_s11 + $0x95] sm:$0xff]  ;;  %v3247_v9 = vld [vmem:[%s4200_s11 + $0xa6] sm:$0xff] }
  0x54   : > { %3545 = vmatprep.mubr.msk.f32.mxu1 %vm343_vm0, %v314_v10  ;;  %3700 = vmatprep.mubr.msk.f32.mxu0 %vm343_vm0, %v4313_v51  ;;  %v3208_v51 = vld [vmem:[%s4200_s11 + $0x9d] sm:$0xff] }
  0x55   : > { %v3058_v10 = vld [vmem:[%s4200_s11 + $0x9a] sm:$0xff] }
  0x57   : > { %3546 = vmatmul.mubr.msk.f32.gmra.mrb[14].mxu1 %vm343_vm0, %v315_v11  ;;  %3701 = vmatmul.mubr.msk.f32.gmra.mrb[14].mxu0 %vm343_vm0, %v3134_v53  ;;  %v3209_v53 = vld [vmem:[%s4200_s11 + $0xa5] sm:$0xff]  ;;  %v3248_v11 = vld [vmem:[%s4200_s11 + $0xae] sm:$0xff] }
  0x58   : > { %3548 = vmatprep.mubr.msk.f32.mxu1 %vm343_vm0, %v316_v12  ;;  %3703 = vmatprep.mubr.msk.f32.mxu0 %vm343_vm0, %v3171_v13  ;;  %v3079_v12 = vld [vmem:[%s4200_s11 + $0x13] sm:$0xff]  ;;  %v2537_v13 = vld [vmem:[%s4597_s14] sm:$0xff] }
  0x5b   : > { %3549 = vmatmul.mubr.msk.f32.gmra.mrb[16].mxu1 %vm343_vm0, %v317_v14  ;;  %3704 = vmatmul.mubr.msk.f32.gmra.mrb[16].mxu0 %vm343_vm0, %v3172_v15  ;;  %v3080_v14 = vld [vmem:[%s4200_s11 + $0x1b] sm:$0xff]  ;;  %v2538_v15 = vld [vmem:[%s4597_s14 + $0x8] sm:$0xff] }
  0x5c   : > { %3555 = vmatprep.mubr.msk.f32.mxu1 %vm343_vm0, %v3003_v16  ;;  %3710 = vmatprep.mubr.msk.f32.mxu0 %vm343_vm0, %v3193_v17  ;;  %v3081_v16 = vld [vmem:[%s4200_s11 + $0x23] sm:$0xff]  ;;  %v2539_v17 = vld [vmem:[%s4597_s14 + $0x10] sm:$0xff] }
  0x5f   : > { %3556 = vmatmul.mubr.msk.f32.vlgmr.msra.gmra.mrb[0].mxu1 %vm343_vm0, %v3004_v20  ;;  %3711 = vmatmul.mubr.msk.f32.vlgmr.msra.gmra.mrb[0].mxu0 %vm343_vm0, %v3194_v21  ;;  %v3083_v20 = vld [vmem:[%s4200_s11 + $0x33] sm:$0xff]  ;;  %v2541_v21 = vld [vmem:[%s4597_s14 + $0x20] sm:$0xff] }
  0x60   : > { %3812 = vmatpush3.bf16.msra.mxu1 %v4343_v61  ;;  %3832 = vmatpush3.bf16.msra.mxu0 %v4345_v62  ;;  %v3236_v61 = vld [vmem:[%s4200_s11 + $0x4e] sm:$0xff]  ;;  %v3237_v62 = vld [vmem:[%s4200_s11 + $0x56] sm:$0xff] }
  0x61   : > { %3558 = vmatprep.mubr.msk.f32.mxu1 %vm343_vm0, %v4429_v22  ;;  %3713 = vmatprep.mubr.msk.f32.mxu0 %vm343_vm0, %v3195_v23  ;;  %v2542_v23 = vld [vmem:[%s4597_s14 + $0x28] sm:$0xff] }
  0x62   : > { %3814 = vmatprep.subr.bf16.mxu1 %v4432_v24  ;;  %3768 = vmatprep.subr.mxu0 %v4439_v25 }
  0x63   : > { %3559 = vmatmul.mubr.msk.f32.gmra.mrb[2].mxu1 %vm343_vm0, %v4444_v26  ;;  %3714 = vmatmul.mubr.msk.f32.gmra.mrb[2].mxu0 %vm343_vm0, %v3196_v27  ;;  %v2544_v27 = vld [vmem:[%s4597_s14 + $0x38] sm:$0xff] }
  0x64   : > { %3561 = vmatprep.mubr.msk.f32.mxu1 %vm343_vm0, %v4451_v28  ;;  %3716 = vmatprep.mubr.msk.f32.mxu0 %vm343_vm0, %v3197_v29  ;;  %v2545_v29 = vld [vmem:[%s4597_s14 + $0x40] sm:$0xff] }
  0x67   : > { %3562 = vmatmul.mubr.msk.f32.gmra.mrb[4].mxu1 %vm343_vm0, %v4463_v30  ;;  %3717 = vmatmul.mubr.msk.f32.gmra.mrb[4].mxu0 %vm343_vm0, %v3198_v31  ;;  %v2546_v31 = vld [vmem:[%s4597_s14 + $0x48] sm:$0xff] }
  0x68   : > { %3564 = vmatprep.mubr.msk.f32.mxu1 %vm343_vm0, %v4467_v32  ;;  %3719 = vmatprep.mubr.msk.f32.mxu0 %vm343_vm0, %v3199_v33  ;;  %v2547_v33 = vld [vmem:[%s4597_s14 + $0x50] sm:$0xff] }
  0x6b   : > { %3565 = vmatmul.mubr.msk.f32.gmra.mrb[6].mxu1 %vm343_vm0, %v4477_v34  ;;  %3720 = vmatmul.mubr.msk.f32.gmra.mrb[6].mxu0 %vm343_vm0, %v3200_v35  ;;  %v2548_v35 = vld [vmem:[%s4597_s14 + $0x58] sm:$0xff] }
  0x6c   : > { %3567 = vmatprep.mubr.msk.f32.mxu1 %vm343_vm0, %v4481_v36  ;;  %3722 = vmatprep.mubr.msk.f32.mxu0 %vm343_vm0, %v3201_v37  ;;  %v2549_v37 = vld [vmem:[%s4597_s14 + $0x60] sm:$0xff] }
  0x6f   : > { %3568 = vmatmul.mubr.msk.f32.gmra.mrb[8].mxu1 %vm343_vm0, %v3012_v38  ;;  %3723 = vmatmul.mubr.msk.f32.gmra.mrb[8].mxu0 %vm343_vm0, %v3202_v39  ;;  %v2550_v39 = vld [vmem:[%s4597_s14 + $0x68] sm:$0xff] }
  0x70   : > { %3570 = vmatprep.mubr.msk.f32.mxu1 %vm343_vm0, %v4493_v40  ;;  %3725 = vmatprep.mubr.msk.f32.mxu0 %vm343_vm0, %v3203_v41  ;;  %v2551_v41 = vld [vmem:[%s4597_s14 + $0x70] sm:$0xff] }
  0x73   : > { %3571 = vmatmul.mubr.msk.f32.gmra.mrb[10].mxu1 %vm343_vm0, %v3014_v42  ;;  %3726 = vmatmul.mubr.msk.f32.gmra.mrb[10].mxu0 %vm343_vm0, %v3204_v43  ;;  %v2552_v43 = vld [vmem:[%s4597_s14 + $0x78] sm:$0xff] }
  0x74   : > { %3573 = vmatprep.mubr.msk.f32.mxu1 %vm343_vm0, %v3015_v44  ;;  %3728 = vmatprep.mubr.msk.f32.mxu0 %vm343_vm0, %v3205_v45  ;;  %v2553_v45 = vld [vmem:[%s4597_s14 + $0x80] sm:$0xff] }
  0x77   : > { %3574 = vmatmul.mubr.msk.f32.gmra.mrb[12].mxu1 %vm343_vm0, %v3016_v46  ;;  %3729 = vmatmul.mubr.msk.f32.gmra.mrb[12].mxu0 %vm343_vm0, %v3206_v47  ;;  %v2554_v47 = vld [vmem:[%s4597_s14 + $0x88] sm:$0xff] }
  0x78   : > { %3576 = vmatprep.mubr.msk.f32.mxu1 %vm343_vm0, %v3017_v48  ;;  %3731 = vmatprep.mubr.msk.f32.mxu0 %vm343_vm0, %v3207_v49 }
  0x7b   : > { %3577 = vmatmul.mubr.msk.f32.gmra.mrb[14].mxu1 %vm343_vm0, %v3018_v50  ;;  %3732 = vmatmul.mubr.msk.f32.gmra.mrb[14].mxu0 %vm343_vm0, %v3208_v51 }
  0x7c   : > { %3579 = vmatprep.mubr.msk.f32.mxu1 %vm343_vm0, %v3019_v52  ;;  %3734 = vmatprep.mubr.msk.f32.mxu0 %vm343_vm0, %v3209_v53 }
  0x7f   : > { %3580 = vmatmul.mubr.msk.f32.gmra.mrb[16].mxu1 %vm343_vm0, %v3020_v54  ;;  %3735 = vmatmul.mubr.msk.f32.gmra.mrb[16].mxu0 %vm343_vm0, %v3210_v55 }
  0x80   : > { %3586 = vmatprep.mubr.msk.f32.mxu1 %vm343_vm0, %v4429_v22  ;;  %3741 = vmatprep.mubr.msk.f32.mxu0 %vm343_vm0, %v3231_v56  ;;  %v3084_v22 = vld [vmem:[%s4200_s11 + $0x3b] sm:$0xff] }
  0x83   : > { %3587 = vmatmul.mubr.msk.f32.vlgmr.msra.gmra.mrb[0].mxu1 %vm343_vm0, %v4444_v26  ;;  %3742 = vmatmul.mubr.msk.f32.vlgmr.msra.gmra.mrb[0].mxu0 %vm343_vm0, %v3232_v57  ;;  %v3086_v26 = vld [vmem:[%s4200_s11 + $0x4b] sm:$0xff] }
  0x84   : > { %3816 = vmatpush3.bf16.msra.mxu1 %v4432_v24  ;;  %3769 = vmatpush3.msra.mxu0 %v4439_v25  ;;  %v3085_v24 = vld [vmem:[%s4200_s11 + $0x43] sm:$0xff]  ;;  %v2543_v25 = vld [vmem:[%s4597_s14 + $0x30] sm:$0xff] }
  0x85   : > { %3589 = vmatprep.mubr.msk.f32.mxu1 %vm343_vm0, %v4451_v28  ;;  %3744 = vmatprep.mubr.msk.f32.mxu0 %vm343_vm0, %v3233_v58  ;;  %v3087_v28 = vld [vmem:[%s4200_s11 + $0x53] sm:$0xff] }
  0x87   : > { %3590 = vmatmul.mubr.msk.f32.gmra.mrb[2].mxu1 %vm343_vm0, %v4463_v30  ;;  %3745 = vmatmul.mubr.msk.f32.gmra.mrb[2].mxu0 %vm343_vm0, %v3234_v59  ;;  %v3088_v30 = vld [vmem:[%s4200_s11 + $0x5b] sm:$0xff] }
  0x88   : > { %3592 = vmatprep.mubr.msk.f32.mxu1 %vm343_vm0, %v4467_v32  ;;  %3747 = vmatprep.mubr.msk.f32.mxu0 %vm343_vm0, %v3235_v60  ;;  %v3089_v32 = vld [vmem:[%s4200_s11 + $0x63] sm:$0xff] }
  0x8b   : > { %3593 = vmatmul.mubr.msk.f32.gmra.mrb[4].mxu1 %vm343_vm0, %v4477_v34  ;;  %3748 = vmatmul.mubr.msk.f32.gmra.mrb[4].mxu0 %vm343_vm0, %v3236_v61  ;;  %v3090_v34 = vld [vmem:[%s4200_s11 + $0x6b] sm:$0xff] }
  0x8c   : > { %3595 = vmatprep.mubr.msk.f32.mxu1 %vm343_vm0, %v4481_v36  ;;  %3750 = vmatprep.mubr.msk.f32.mxu0 %vm343_vm0, %v3237_v62  ;;  %v3091_v36 = vld [vmem:[%s4200_s11 + $0x73] sm:$0xff] }
  0x8f   : > { %3596 = vmatmul.mubr.msk.f32.gmra.mrb[6].mxu1 %vm343_vm0, %v3012_v38  ;;  %3751 = vmatmul.mubr.msk.f32.gmra.mrb[6].mxu0 %vm343_vm0, %v3238_v63  ;;  %v3092_v38 = vld [vmem:[%s4200_s11 + $0x7b] sm:$0xff] }
  0x90   : > { %3598 = vmatprep.mubr.msk.f32.mxu1 %vm343_vm0, %v4493_v40  ;;  %3753 = vmatprep.mubr.msk.f32.mxu0 %vm343_vm0, %v3239_v0  ;;  %v3093_v40 = vld [vmem:[%s4200_s11 + $0x83] sm:$0xff] }
  0x93   : > { %3599 = vmatmul.mubr.msk.f32.gmra.mrb[8].mxu1 %vm343_vm0, %v3014_v42  ;;  %3754 = vmatmul.mubr.msk.f32.gmra.mrb[8].mxu0 %vm343_vm0, %v3240_v1  ;;  %v3094_v42 = vld [vmem:[%s4200_s11 + $0x8b] sm:$0xff] }
  0x94   : > { %3601 = vmatprep.mubr.msk.f32.mxu1 %vm343_vm0, %v3015_v44  ;;  %3756 = vmatprep.mubr.msk.f32.mxu0 %vm343_vm0, %v3241_v2  ;;  %v3095_v44 = vld [vmem:[%s4200_s11 + $0x93] sm:$0xff] }
  0x97   : > { %3602 = vmatmul.mubr.msk.f32.gmra.mrb[10].mxu1 %vm343_vm0, %v3016_v46  ;;  %3757 = vmatmul.mubr.msk.f32.gmra.mrb[10].mxu0 %vm343_vm0, %v3242_v3  ;;  %v3096_v46 = vld [vmem:[%s4200_s11 + $0x9b] sm:$0xff] }
  0x98   : > { %3604 = vmatprep.mubr.msk.f32.mxu1 %vm343_vm0, %v3017_v48  ;;  %3759 = vmatprep.mubr.msk.f32.mxu0 %vm343_vm0, %v3243_v4  ;;  %v4683_v48 = vld [vmem:[%s277_s17] ss:$0 sm:$0xff] }
  0x9b   : > { %3605 = vmatmul.mubr.msk.f32.gmra.mrb[12].mxu1 %vm343_vm0, %v3018_v50  ;;  %3760 = vmatmul.mubr.msk.f32.gmra.mrb[12].mxu0 %vm343_vm0, %v3244_v5 }
  0x9c   : > { %3607 = vmatprep.mubr.msk.f32.mxu1 %vm343_vm0, %v3019_v52  ;;  %3762 = vmatprep.mubr.msk.f32.mxu0 %vm343_vm0, %v3245_v6 }
  0x9f   : > { %3608 = vmatmul.mubr.msk.f32.gmra.mrb[14].mxu1 %vm343_vm0, %v3020_v54  ;;  %3763 = vmatmul.mubr.msk.f32.gmra.mrb[14].mxu0 %vm343_vm0, %v3246_v7 }
  0xa0   : > { %3610 = vmatprep.mubr.msk.f32.mxu1 %vm343_vm0, %v3057_v8  ;;  %3765 = vmatprep.mubr.msk.f32.mxu0 %vm343_vm0, %v3247_v9 }
  0xa3   : > { %3611 = vmatmul.mubr.msk.f32.gmra.mrb[16].mxu1 %vm343_vm0, %v3058_v10  ;;  %3766 = vmatmul.mubr.msk.f32.gmra.mrb[16].mxu0 %vm343_vm0, %v3248_v11 }
  0xa4   : > { %3617 = vmatprep.mubr.msk.f32.mxu1 %vm343_vm0, %v3079_v12  ;;  %3770 = vmatprep.mubr.msk.f32.mxu0 %vm2556_vm1, %v2537_v13 }
  0xa7   : > { %3618 = vmatmul.mubr.msk.f32.vlgmr.msra.gmra.mrb[0].mxu1 %vm343_vm0, %v3080_v14  ;;  %3771 = vmatmul.mubr.msk.f32.vlgmr.msra.gmra.mrb[0].mxu0 %vm2556_vm1, %v2538_v15 }
  0xa8   : > { %3620 = vmatprep.mubr.msk.f32.mxu1 %vm343_vm0, %v3081_v16  ;;  %3773 = vmatprep.mubr.msk.f32.mxu0 %vm2556_vm1, %v2539_v17 }
  0xab   : > { %3621 = vmatmul.mubr.msk.f32.gmra.mrb[2].mxu1 %vm343_vm0, %v3082_v18  ;;  %3774 = vmatmul.mubr.msk.f32.gmra.mrb[2].mxu0 %vm2556_vm1, %v2540_v19 }
  0xac   : > { %3623 = vmatprep.mubr.msk.f32.mxu1 %vm343_vm0, %v3083_v20  ;;  %3776 = vmatprep.mubr.msk.f32.mxu0 %vm2556_vm1, %v2541_v21 }
  0xaf   : > { %3624 = vmatmul.mubr.msk.f32.gmra.mrb[4].mxu1 %vm343_vm0, %v3084_v22  ;;  %3777 = vmatmul.mubr.msk.f32.gmra.mrb[4].mxu0 %vm2556_vm1, %v2542_v23 }
  0xb0   : > { %3626 = vmatprep.mubr.msk.f32.mxu1 %vm343_vm0, %v3085_v24  ;;  %3779 = vmatprep.mubr.msk.f32.mxu0 %vm2556_vm1, %v2543_v25 }
  0xb3   : > { %3627 = vmatmul.mubr.msk.f32.gmra.mrb[6].mxu1 %vm343_vm0, %v3086_v26  ;;  %3780 = vmatmul.mubr.msk.f32.gmra.mrb[6].mxu0 %vm2556_vm1, %v2544_v27 }
  0xb4   : > { %3629 = vmatprep.mubr.msk.f32.mxu1 %vm343_vm0, %v3087_v28  ;;  %3782 = vmatprep.mubr.msk.f32.mxu0 %vm2556_vm1, %v2545_v29 }
  0xb7   : > { %3630 = vmatmul.mubr.msk.f32.gmra.mrb[8].mxu1 %vm343_vm0, %v3088_v30  ;;  %3783 = vmatmul.mubr.msk.f32.gmra.mrb[8].mxu0 %vm2556_vm1, %v2546_v31 }
  0xb8   : > { %3632 = vmatprep.mubr.msk.f32.mxu1 %vm343_vm0, %v3089_v32  ;;  %3785 = vmatprep.mubr.msk.f32.mxu0 %vm2556_vm1, %v2547_v33 }
  0xbb   : > { %3633 = vmatmul.mubr.msk.f32.gmra.mrb[10].mxu1 %vm343_vm0, %v3090_v34  ;;  %3786 = vmatmul.mubr.msk.f32.gmra.mrb[10].mxu0 %vm2556_vm1, %v2548_v35 }
  0xbc   : > { %3635 = vmatprep.mubr.msk.f32.mxu1 %vm343_vm0, %v3091_v36  ;;  %3788 = vmatprep.mubr.msk.f32.mxu0 %vm2556_vm1, %v2549_v37 }
  0xbf   : > { %3636 = vmatmul.mubr.msk.f32.gmra.mrb[12].mxu1 %vm343_vm0, %v3092_v38  ;;  %3789 = vmatmul.mubr.msk.f32.gmra.mrb[12].mxu0 %vm2556_vm1, %v2550_v39 }
  0xc0   : > { %3638 = vmatprep.mubr.msk.f32.mxu1 %vm343_vm0, %v3093_v40  ;;  %3791 = vmatprep.mubr.msk.f32.mxu0 %vm2556_vm1, %v2551_v41 }
  0xc3   : > { %3639 = vmatmul.mubr.msk.f32.gmra.mrb[14].mxu1 %vm343_vm0, %v3094_v42  ;;  %3792 = vmatmul.mubr.msk.f32.gmra.mrb[14].mxu0 %vm2556_vm1, %v2552_v43 }
  0xc4   : > { %3641 = vmatprep.mubr.msk.f32.mxu1 %vm343_vm0, %v3095_v44  ;;  %3794 = vmatprep.mubr.msk.f32.mxu0 %vm2556_vm1, %v2553_v45 }
  0xc7   : > { %3642 = vmatmul.mubr.msk.f32.gmra.mrb[16].mxu1 %vm343_vm0, %v3096_v46  ;;  %3795 = vmatmul.mubr.msk.f32.gmra.mrb[16].mxu0 %vm2556_vm1, %v2554_v47 }
 0x17a   : > { %v3619_v49 = vpop.f32.mrb[0].mxu1  ;;  %v3772_v50 = vpop.f32.mrb[0].mxu0 }
 0x17b   : > { %v3833_v51 = vadd.f32 %v3619_v49, %v4683_v48  ;;  %v1405_v52 = vpop.f32.mrb[1].mxu1  ;;  %v2677_v53 = vpop.f32.mrb[1].mxu0 }
 0x17c   : > { %v3835_v54 = vadd.f32 %v4683_v48, %v1405_v52 }
 0x17d   : > { %v3834_v55 = vadd.f32 %v3833_v51, %v3772_v50 }
 0x17e   : > { %v3836_v56 = vadd.f32 %v3835_v54, %v2677_v53  ;;  %v3622_v57 = vpop.f32.mrb[2].mxu1  ;;  %v3775_v58 = vpop.f32.mrb[2].mxu0 }
 0x17f   : > { %2785 = vst.msk [vmem:[%s4691_s26 + $0x8] sm:$0xff] %vm343_vm0, %v3834_v55  ;;  %v3837_v59 = vadd.f32 %v3622_v57, %v4683_v48  ;;  %v1415_v60 = vpop.f32.mrb[3].mxu1  ;;  %v2687_v61 = vpop.f32.mrb[3].mxu0 }
 0x180   : > { %2784 = vst.msk [vmem:[%s4691_s26] sm:$0xff] %vm343_vm0, %v3836_v56  ;;  %v3839_v62 = vadd.f32 %v4683_v48, %v1415_v60 }
 0x181   : > { %v3838_v63 = vadd.f32 %v3837_v59, %v3775_v58 }
 0x182   : > { %v3840_v0 = vadd.f32 %v3839_v62, %v2687_v61  ;;  %v3625_v1 = vpop.f32.mrb[4].mxu1  ;;  %v3778_v2 = vpop.f32.mrb[4].mxu0 }
 0x183   : > { %2787 = vst.msk [vmem:[%s4691_s26 + $0x18] sm:$0xff] %vm343_vm0, %v3838_v63  ;;  %v3841_v3 = vadd.f32 %v3625_v1, %v4683_v48  ;;  %v1425_v4 = vpop.f32.mrb[5].mxu1  ;;  %v2697_v5 = vpop.f32.mrb[5].mxu0 }
 0x184   : > { %2786 = vst.msk [vmem:[%s4691_s26 + $0x10] sm:$0xff] %vm343_vm0, %v3840_v0  ;;  %v3843_v6 = vadd.f32 %v4683_v48, %v1425_v4 }
 0x185   : > { %v3842_v7 = vadd.f32 %v3841_v3, %v3778_v2 }
 0x186   : > { %v3844_v8 = vadd.f32 %v3843_v6, %v2697_v5  ;;  %v3628_v9 = vpop.f32.mrb[6].mxu1  ;;  %v3781_v10 = vpop.f32.mrb[6].mxu0 }
 0x187   : > { %2789 = vst.msk [vmem:[%s4691_s26 + $0x28] sm:$0xff] %vm343_vm0, %v3842_v7  ;;  %v3845_v11 = vadd.f32 %v3628_v9, %v4683_v48  ;;  %v1435_v12 = vpop.f32.mrb[7].mxu1  ;;  %v2707_v13 = vpop.f32.mrb[7].mxu0 }
 0x188   : > { %2788 = vst.msk [vmem:[%s4691_s26 + $0x20] sm:$0xff] %vm343_vm0, %v3844_v8  ;;  %v3847_v14 = vadd.f32 %v4683_v48, %v1435_v12 }
 0x189   : > { %v3846_v15 = vadd.f32 %v3845_v11, %v3781_v10 }
 0x18a   : > { %v3848_v16 = vadd.f32 %v3847_v14, %v2707_v13  ;;  %v3631_v17 = vpop.f32.mrb[8].mxu1  ;;  %v3784_v18 = vpop.f32.mrb[8].mxu0 }
 0x18b   : > { %2791 = vst.msk [vmem:[%s4691_s26 + $0x38] sm:$0xff] %vm343_vm0, %v3846_v15  ;;  %v3849_v19 = vadd.f32 %v3631_v17, %v4683_v48  ;;  %v1445_v20 = vpop.f32.mrb[9].mxu1  ;;  %v2717_v21 = vpop.f32.mrb[9].mxu0 }
 0x18c   : > { %2790 = vst.msk [vmem:[%s4691_s26 + $0x30] sm:$0xff] %vm343_vm0, %v3848_v16  ;;  %v3851_v22 = vadd.f32 %v4683_v48, %v1445_v20 }
 0x18d   : > { %v3850_v23 = vadd.f32 %v3849_v19, %v3784_v18 }
 0x18e   : > { %v3852_v24 = vadd.f32 %v3851_v22, %v2717_v21  ;;  %v3634_v25 = vpop.f32.mrb[10].mxu1  ;;  %v3787_v26 = vpop.f32.mrb[10].mxu0 }
 0x18f   : > { %2793 = vst.msk [vmem:[%s4691_s26 + $0x48] sm:$0xff] %vm343_vm0, %v3850_v23  ;;  %v3853_v27 = vadd.f32 %v3634_v25, %v4683_v48  ;;  %v1455_v28 = vpop.f32.mrb[11].mxu1  ;;  %v2727_v29 = vpop.f32.mrb[11].mxu0 }
 0x190   : > { %2792 = vst.msk [vmem:[%s4691_s26 + $0x40] sm:$0xff] %vm343_vm0, %v3852_v24  ;;  %v3855_v30 = vadd.f32 %v4683_v48, %v1455_v28 }
 0x191   : > { %v3854_v31 = vadd.f32 %v3853_v27, %v3787_v26 }
 0x192   : > { %v3856_v32 = vadd.f32 %v3855_v30, %v2727_v29  ;;  %v3637_v33 = vpop.f32.mrb[12].mxu1  ;;  %v3790_v34 = vpop.f32.mrb[12].mxu0 }
 0x193   : > { %2795 = vst.msk [vmem:[%s4691_s26 + $0x58] sm:$0xff] %vm343_vm0, %v3854_v31  ;;  %v3857_v35 = vadd.f32 %v3637_v33, %v4683_v48  ;;  %v1465_v36 = vpop.f32.mrb[13].mxu1  ;;  %v2737_v37 = vpop.f32.mrb[13].mxu0 }
 0x194   : > { %2794 = vst.msk [vmem:[%s4691_s26 + $0x50] sm:$0xff] %vm343_vm0, %v3856_v32  ;;  %v3859_v38 = vadd.f32 %v4683_v48, %v1465_v36 }
 0x195   : > { %v3858_v39 = vadd.f32 %v3857_v35, %v3790_v34 }
 0x196   : > { %v3860_v40 = vadd.f32 %v3859_v38, %v2737_v37  ;;  %v3640_v41 = vpop.f32.mrb[14].mxu1  ;;  %v3793_v42 = vpop.f32.mrb[14].mxu0 }
 0x197   : > { %2797 = vst.msk [vmem:[%s4691_s26 + $0x68] sm:$0xff] %vm343_vm0, %v3858_v39  ;;  %v3861_v43 = vadd.f32 %v3640_v41, %v4683_v48  ;;  %v1475_v44 = vpop.f32.mrb[15].mxu1  ;;  %v2747_v45 = vpop.f32.mrb[15].mxu0 }
 0x198   : > { %2796 = vst.msk [vmem:[%s4691_s26 + $0x60] sm:$0xff] %vm343_vm0, %v3860_v40  ;;  %v3863_v46 = vadd.f32 %v4683_v48, %v1475_v44 }
 0x199   : > { %v3862_v47 = vadd.f32 %v3861_v43, %v3793_v42 }
 0x19a   : > { %v3864_v49 = vadd.f32 %v3863_v46, %v2747_v45  ;;  %v3643_v50 = vpop.f32.mrb[16].mxu1  ;;  %v3796_v51 = vpop.f32.mrb[16].mxu0 }
 0x19b   : > { %2799 = vst.msk [vmem:[%s4691_s26 + $0x78] sm:$0xff] %vm343_vm0, %v3862_v47  ;;  %v3865_v52 = vadd.f32 %v3643_v50, %v4683_v48  ;;  %v1485_v53 = vpop.f32.mrb[17].mxu1  ;;  %v2757_v54 = vpop.f32.mrb[17].mxu0 }
 0x19c   : > { %2798 = vst.msk [vmem:[%s4691_s26 + $0x70] sm:$0xff] %vm343_vm0, %v3864_v49  ;;  %v3867_v55 = vadd.f32 %v4683_v48, %v1485_v53 }
 0x19d   : > { %v3866_v56 = vadd.f32 %v3865_v52, %v3796_v51 }
 0x19e   : > { %v3868_v57 = vadd.f32 %v3867_v55, %v2757_v54 }
 0x19f   : > { %2801 = vst.msk [vmem:[%s4691_s26 + $0x88] sm:$0xff] %vm343_vm0, %v3866_v56 }
 0x1a0   : > { %2800 = vst.msk [vmem:[%s4691_s26 + $0x80] sm:$0xff] %vm343_vm0, %v3868_v57 }
 0x1a1 PF: > { %s15_s22 = sadd.s32 1, %s4093_s22   ;;  %s4767_s18 = smov %s4085_s20 }
 0x1a2   : > { %p12_p7 = scmp.ge.s32.totalorder %s15_s22, 18   ;;  %s4768_s19 = smov %s4089_s21 }
 0x1a3   : > { %s4769_s20 = smov %s4772_s23  ;;  %s4770_s21 = smov %s4776_s24 }
 0x1a4   :  { %14 = sbr.rel (!%p12_p7) target bundleno = 3 (0x3), region = 93 }

// kernel: down_block_3d.14
= control target key start
LH: loop header
LB: loop body
LE: loop exit
PB: predicated region body
PF: predicated region fallthrough
CT: control target
= control target key end

     0   :  { %s3659_s12 = smov 0   ;;  %s3661_s13 = smov 0   ;;  %s4214_s0 = inlined_call_operand.vmem [shape: f32[8,328,16], index: 0, kind: input, shape index: {}]   ;;  %s4215_s1 = inlined_call_operand.vmem [shape: f32[9,16,16], index: 1, kind: input, shape index: {}]   ;;  %s4216_s2 = inlined_call_operand.vmem [shape: f32[8,1,16], index: 2, kind: input, shape index: {}]   ;;  %s4217_s3 = inlined_call_operand.vmem [shape: f32[8,288,16], index: 3, kind: output, shape index: {}]  }
   0x1   :  { %s3663_s14 = smov 0   ;;  %s3665_s15 = smov 0  }
   0x2   :  { %s3667_s16 = smov 0  }
   0x3 LB: > { %s22_s17 = sadd.s32 1, %s3629_s14  ;;  %s25_s18 = sadd.s32 1, %s3633_s15  ;;  %s3637_s16 = sphi %s3667_s16, %s13_s16   ;;  %s3633_s15 = sphi %s3665_s15, %s4221_s15   ;;  %s3629_s14 = sphi %s3663_s14, %s4220_s14   ;;  %s3625_s13 = sphi %s3661_s13, %s4219_s13   ;;  %s3621_s12 = sphi %s3659_s12, %s4218_s12  }
   0x4   : > { %p23_p0 = scmp.ge.s32.totalorder %s22_s17, 2  ;;  %p2588_p1 = scmp.ge.s32.totalorder %s3637_s16, 1 }
   0x5   : > { %p159_p2 = scmp.lt.s32.totalorder %s3637_s16, 17 }
   0x6   : > { %s4223_s17 = smov (%p23_p0, %s22_s17), 0  ;;  %s4225_s18 = smov (!%p23_p0, %s25_s18), %s3633_s15 }
   0x7   : > { %p160_p3 = pnand %p2588_p1, %p159_p2  ;;  %p27_p4 = scmp.ge.s32.totalorder %s4225_s18, 8 }
   0x8   : > { %v2741_v0 = vld [vmem:[%s4215_s1 + $0x40] sm:$0xff] (!%p160_p3)  ;;  %v2742_v1 = vld [vmem:[%s4215_s1 + $0x48] sm:$0xff] (!%p160_p3)  ;;  %v2609_v2 = vld [vmem:[%s4215_s1 + $0x10] sm:$0xff] (!%p160_p3)  ;;  %p190_p5 = scmp.lt.s32.totalorder (!%p160_p3), %s3625_s13, 7  ;;  %s208_s8 = smul.u32 (!%p160_p3), 144, %s3621_s12  ;;  %vm253_vm0 = vcmask (!%p160_p3), 130048  }
   0x9   : > { %s4227_s18 = smov (%p27_p4, %s4225_s18), 0  ;;  %163 = sbr.rel (%p160_p3) target bundleno = 401 (0x191), region = 32 }
   0xa   : > { %v3700_v3 = vpack.c.bf16 (!%p160_p3), %v2742_v1, %v2741_v0  ;;  %v2610_v4 = vld [vmem:[%s4215_s1 + $0x18] sm:$0xff] (!%p160_p3)  ;;  %v2779_v5 = vld [vmem:[%s4215_s1 + $0x50] sm:$0xff] (!%p160_p3)  ;;  %v228_v9 = vld [vmem:[%s4215_s1] sm:$0xff] (!%p160_p3) }
   0xb   : > { %v2780_v6 = vld [vmem:[%s4215_s1 + $0x58] sm:$0xff] (!%p160_p3)  ;;  %v3375_v7 = vpack.c.bf16 (!%p160_p3), %v2610_v4, %v2609_v2  ;;  %v229_v10 = vld [vmem:[%s4215_s1 + $0x8] sm:$0xff] (!%p160_p3)  ;;  %v2817_v12 = vld [vmem:[%s4215_s1 + $0x60] sm:$0xff] (!%p160_p3) }
   0xc   : > { %v3395_v8 = vpack.c.bf16 (!%p160_p3), %v2780_v6, %v2779_v5  ;;  %3392 = vmatprep.subr.bf16.mxu0 (!%p160_p3), %v3700_v3  ;;  %v3379_v11 = vpack.c.bf16 (!%p160_p3), %v229_v10, %v228_v9  ;;  %v2818_v13 = vld [vmem:[%s4215_s1 + $0x68] sm:$0xff] (!%p160_p3)  ;;  %v2665_v14 = vld [vmem:[%s4215_s1 + $0x20] sm:$0xff] (!%p160_p3)  ;;  %v2855_v40 = vld [vmem:[%s4215_s1 + $0x70] sm:$0xff] (!%p160_p3) }
   0xd   : > { %3376 = vmatprep.subr.bf16.mxu1 (!%p160_p3), %v3375_v7  ;;  %3394 = vmatpush3.bf16.msra.mxu0 (!%p160_p3), %v3700_v3  ;;  %v2666_v15 = vld [vmem:[%s4215_s1 + $0x28] sm:$0xff] (!%p160_p3)  ;;  %v3399_v22 = vpack.c.bf16 (!%p160_p3), %v2818_v13, %v2817_v12  ;;  %v2856_v41 = vld [vmem:[%s4215_s1 + $0x78] sm:$0xff] (!%p160_p3)  ;;  %v2703_v59 = vld [vmem:[%s4215_s1 + $0x30] sm:$0xff] (!%p160_p3) }
   0xe   : > { %3378 = vmatpush3.bf16.msra.mxu1 (!%p160_p3), %v3375_v7  ;;  %3396 = vmatprep.subr.bf16.mxu0 (!%p160_p3), %v3395_v8  ;;  %v3748_v23 = vpack.c.bf16 (!%p160_p3), %v2666_v15, %v2665_v14  ;;  %v3796_v45 = vpack.c.bf16 (!%p160_p3), %v2856_v41, %v2855_v40  ;;  %v2704_v60 = vld [vmem:[%s4215_s1 + $0x38] sm:$0xff] (!%p160_p3) }
   0xf   : > { %3380 = vmatprep.subr.bf16.mxu1 (!%p160_p3), %v3379_v11  ;;  %v3863_v1 = vpack.c.bf16 (!%p160_p3), %v2704_v60, %v2703_v59 }
  0x10   : > { %s4229_s13 = smov (!%p190_p5, %s3625_s13), 7 }
  0x11   : > { %s3557_s9 = smul.u32 328, %s4229_s13  ;;  %s197_s26 = scalar_lea.vmem %s4216_s2, %s4229_s13 }
  0x12   : > { %s3558_s22 = smul.u32 36, %s4229_s13 }
  0x13   : > { %s194_s21 = scalar_lea.vmem %s4214_s0, %s3557_s9 }
  0x14   : > { %s3738_s28 = scalar_lea.vmem %s194_s21, %s208_s8  ;;  %s198_s21 = smul.u32 18, %s3621_s12 }
  0x15   : > { %v2591_v16 = vld [vmem:[%s3738_s28 + $0x1] sm:$0xff]  ;;  %v2723_v17 = vld [vmem:[%s3738_s28 + $0x13] sm:$0xff]  ;;  %v2592_v18 = vld [vmem:[%s3738_s28 + $0x9] sm:$0xff] }
  0x16   : > { %3100 = vmatprep.mubr.msk.f32.mxu1 %vm253_vm0, %v2591_v16  ;;  %3224 = vmatprep.mubr.msk.f32.mxu0 %vm253_vm0, %v2723_v17  ;;  %v2724_v19 = vld [vmem:[%s3738_s28 + $0x1b] sm:$0xff]  ;;  %v2593_v20 = vld [vmem:[%s3738_s28 + $0x11] sm:$0xff]  ;;  %v2725_v21 = vld [vmem:[%s3738_s28 + $0x23] sm:$0xff]  ;;  %p201_p6 = scmp.lt.s32.totalorder %s198_s21, 35 }
  0x17   : > { %3101 = vmatmul.mubr.msk.f32.vlgmr.msra.gmra.mrb[0].mxu1 %vm253_vm0, %v2592_v18  ;;  %3225 = vmatmul.mubr.msk.f32.vlgmr.msra.gmra.mrb[0].mxu0 %vm253_vm0, %v2724_v19  ;;  %v2594_v24 = vld [vmem:[%s3738_s28 + $0x19] sm:$0xff]  ;;  %v2726_v25 = vld [vmem:[%s3738_s28 + $0x2b] sm:$0xff]  ;;  %v2595_v26 = vld [vmem:[%s3738_s28 + $0x21] sm:$0xff] }
  0x18   : > { %3398 = vmatpush3.bf16.msra.mxu0 %v3395_v8  ;;  %3103 = vmatprep.mubr.msk.f32.mxu1 %vm253_vm0, %v2593_v20  ;;  %v2727_v27 = vld [vmem:[%s3738_s28 + $0x33] sm:$0xff]  ;;  %v2596_v28 = vld [vmem:[%s3738_s28 + $0x29] sm:$0xff]  ;;  %v2728_v29 = vld [vmem:[%s3738_s28 + $0x3b] sm:$0xff]  ;;  %s4231_s21 = smov (!%p201_p6, %s198_s21), 35 }
  0x19   : > { %3227 = vmatprep.mubr.msk.f32.mxu0 %vm253_vm0, %v2725_v21  ;;  %3382 = vmatpush3.bf16.msra.mxu1 %v3379_v11  ;;  %v2597_v30 = vld [vmem:[%s3738_s28 + $0x31] sm:$0xff]  ;;  %v2729_v31 = vld [vmem:[%s3738_s28 + $0x43] sm:$0xff]  ;;  %v2598_v32 = vld [vmem:[%s3738_s28 + $0x39] sm:$0xff]  ;;  %s204_s23 = sadd.s32 %s3558_s22, %s4231_s21 }
  0x1a   : > { %3400 = vmatprep.subr.bf16.mxu0 %v3399_v22  ;;  %3384 = vmatprep.subr.bf16.mxu1 %v3748_v23  ;;  %v2730_v33 = vld [vmem:[%s3738_s28 + $0x4b] sm:$0xff]  ;;  %v2599_v34 = vld [vmem:[%s3738_s28 + $0x41] sm:$0xff]  ;;  %v2731_v35 = vld [vmem:[%s3738_s28 + $0x53] sm:$0xff]  ;;  %s2590_s27 = sshll.u32 %s204_s23, 3 }
  0x1b   : > { %3104 = vmatmul.mubr.msk.f32.gmra.mrb[2].mxu1 %vm253_vm0, %v2594_v24  ;;  %3228 = vmatmul.mubr.msk.f32.gmra.mrb[2].mxu0 %vm253_vm0, %v2726_v25  ;;  %v2600_v36 = vld [vmem:[%s3738_s28 + $0x49] sm:$0xff]  ;;  %v2732_v37 = vld [vmem:[%s3738_s28 + $0x5b] sm:$0xff]  ;;  %v2601_v38 = vld [vmem:[%s3738_s28 + $0x51] sm:$0xff]  ;;  %s4143_s29 = scalar_lea.vmem %s4217_s3, %s2590_s27 }
  0x1c   : > { %3106 = vmatprep.mubr.msk.f32.mxu1 %vm253_vm0, %v2595_v26  ;;  %3230 = vmatprep.mubr.msk.f32.mxu0 %vm253_vm0, %v2727_v27  ;;  %v2761_v39 = vld [vmem:[%s3738_s28 + $0x14] sm:$0xff]  ;;  %v2762_v43 = vld [vmem:[%s3738_s28 + $0x1c] sm:$0xff]  ;;  %v3799_v46 = vld [vmem:[%s3738_s28 + $0x24] sm:$0xff] }
  0x1d   : > { %v2602_v42 = vld [vmem:[%s3738_s28 + $0x59] sm:$0xff]  ;;  %v2603_v44 = vld [vmem:[%s3738_s28 + $0x61] sm:$0xff]  ;;  %v2604_v47 = vld [vmem:[%s3738_s28 + $0x69] sm:$0xff] }
  0x1e   : > { %v3806_v48 = vld [vmem:[%s3738_s28 + $0x2c] sm:$0xff]  ;;  %v3812_v50 = vld [vmem:[%s3738_s28 + $0x34] sm:$0xff]  ;;  %v3823_v52 = vld [vmem:[%s3738_s28 + $0x3c] sm:$0xff] }
  0x1f   : > { %3107 = vmatmul.mubr.msk.f32.gmra.mrb[4].mxu1 %vm253_vm0, %v2596_v28  ;;  %3231 = vmatmul.mubr.msk.f32.gmra.mrb[4].mxu0 %vm253_vm0, %v2728_v29  ;;  %v2605_v49 = vld [vmem:[%s3738_s28 + $0x71] sm:$0xff]  ;;  %v2606_v51 = vld [vmem:[%s3738_s28 + $0x79] sm:$0xff]  ;;  %v2607_v53 = vld [vmem:[%s3738_s28 + $0x81] sm:$0xff] }
  0x20   : > { %3109 = vmatprep.mubr.msk.f32.mxu1 %vm253_vm0, %v2597_v30  ;;  %3233 = vmatprep.mubr.msk.f32.mxu0 %vm253_vm0, %v2729_v31  ;;  %v3827_v54 = vld [vmem:[%s3738_s28 + $0x44] sm:$0xff]  ;;  %v3837_v56 = vld [vmem:[%s3738_s28 + $0x4c] sm:$0xff]  ;;  %v3841_v58 = vld [vmem:[%s3738_s28 + $0x54] sm:$0xff] }
  0x21   : > { %v2608_v55 = vld [vmem:[%s3738_s28 + $0x89] sm:$0xff]  ;;  %v210_v57 = vld [vmem:[%s3738_s28] sm:$0xff]  ;;  %v213_v2 = vld [vmem:[%s3738_s28 + $0x18] sm:$0xff] }
  0x22   : > { %v211_v61 = vld [vmem:[%s3738_s28 + $0x8] sm:$0xff]  ;;  %v3857_v62 = vld [vmem:[%s3738_s28 + $0x5c] sm:$0xff]  ;;  %v212_v63 = vld [vmem:[%s3738_s28 + $0x10] sm:$0xff] }
  0x23   : > { %3110 = vmatmul.mubr.msk.f32.gmra.mrb[6].mxu1 %vm253_vm0, %v2598_v32  ;;  %3234 = vmatmul.mubr.msk.f32.gmra.mrb[6].mxu0 %vm253_vm0, %v2730_v33  ;;  %v3861_v0 = vld [vmem:[%s3738_s28 + $0x64] sm:$0xff]  ;;  %v3873_v4 = vld [vmem:[%s3738_s28 + $0x6c] sm:$0xff]  ;;  %v3878_v6 = vld [vmem:[%s3738_s28 + $0x74] sm:$0xff] }
  0x24   : > { %3112 = vmatprep.mubr.msk.f32.mxu1 %vm253_vm0, %v2599_v34  ;;  %3236 = vmatprep.mubr.msk.f32.mxu0 %vm253_vm0, %v2731_v35  ;;  %v214_v5 = vld [vmem:[%s3738_s28 + $0x20] sm:$0xff]  ;;  %v215_v7 = vld [vmem:[%s3738_s28 + $0x28] sm:$0xff]  ;;  %v216_v9 = vld [vmem:[%s3738_s28 + $0x30] sm:$0xff] }
  0x25   : > { %v2774_v8 = vld [vmem:[%s3738_s28 + $0x7c] sm:$0xff]  ;;  %v2775_v10 = vld [vmem:[%s3738_s28 + $0x84] sm:$0xff]  ;;  %v2776_v12 = vld [vmem:[%s3738_s28 + $0x8c] sm:$0xff] }
  0x26   : > { %v217_v11 = vld [vmem:[%s3738_s28 + $0x38] sm:$0xff]  ;;  %v218_v13 = vld [vmem:[%s3738_s28 + $0x40] sm:$0xff]  ;;  %v219_v15 = vld [vmem:[%s3738_s28 + $0x48] sm:$0xff] }
  0x27   : > { %3113 = vmatmul.mubr.msk.f32.gmra.mrb[8].mxu1 %vm253_vm0, %v2600_v36  ;;  %3237 = vmatmul.mubr.msk.f32.gmra.mrb[8].mxu0 %vm253_vm0, %v2732_v37  ;;  %v2777_v14 = vld [vmem:[%s3738_s28 + $0x94] sm:$0xff]  ;;  %v2778_v16 = vld [vmem:[%s3738_s28 + $0x9c] sm:$0xff]  ;;  %v2894_v19 = vld [vmem:[%s4215_s1 + $0x88] sm:$0xff] }
  0x28   : > { %3115 = vmatprep.mubr.msk.f32.mxu1 %vm253_vm0, %v2601_v38  ;;  %3255 = vmatprep.mubr.msk.f32.mxu0 %vm253_vm0, %v2761_v39  ;;  %v220_v17 = vld [vmem:[%s3738_s28 + $0x50] sm:$0xff]  ;;  %v2893_v18 = vld [vmem:[%s4215_s1 + $0x80] sm:$0xff]  ;;  %v221_v20 = vld [vmem:[%s3738_s28 + $0x58] sm:$0xff] }
  0x29   : > { %v222_v21 = vld [vmem:[%s3738_s28 + $0x60] sm:$0xff]  ;;  %v224_v24 = vld [vmem:[%s3738_s28 + $0x70] sm:$0xff]  ;;  %v225_v25 = vld [vmem:[%s3738_s28 + $0x78] sm:$0xff] }
  0x2a   : > { %v226_v26 = vld [vmem:[%s3738_s28 + $0x80] sm:$0xff]  ;;  %v227_v27 = vld [vmem:[%s3738_s28 + $0x88] sm:$0xff]  ;;  %v3955_v30 = vld [vmem:[%s3738_s28 + $0x12] sm:$0xff] }
  0x2b   : > { %3116 = vmatmul.mubr.msk.f32.gmra.mrb[10].mxu1 %vm253_vm0, %v2602_v42  ;;  %3256 = vmatmul.mubr.msk.f32.vlgmr.msra.gmra.mrb[0].mxu0 %vm253_vm0, %v2762_v43  ;;  %v2647_v28 = vld [vmem:[%s3738_s28 + $0x2] sm:$0xff]  ;;  %v2648_v29 = vld [vmem:[%s3738_s28 + $0xa] sm:$0xff]  ;;  %v3965_v31 = vld [vmem:[%s3738_s28 + $0x1a] sm:$0xff] }
  0x2c   : > { %3402 = vmatpush3.bf16.msra.mxu0 %v3399_v22  ;;  %3118 = vmatprep.mubr.msk.f32.mxu1 %vm253_vm0, %v2603_v44  ;;  %v3919_v22 = vpack.c.bf16 %v2894_v19, %v2893_v18  ;;  %v3969_v32 = vld [vmem:[%s3738_s28 + $0x22] sm:$0xff]  ;;  %v2652_v33 = vld [vmem:[%s3738_s28 + $0x2a] sm:$0xff]  ;;  %v3980_v34 = vld [vmem:[%s3738_s28 + $0x32] sm:$0xff] }
  0x2d   : > { %3258 = vmatprep.mubr.msk.f32.mxu0 %vm253_vm0, %v3799_v46  ;;  %3404 = vmatprep.subr.bf16.mxu0 %v3796_v45  ;;  %v2654_v35 = vld [vmem:[%s3738_s28 + $0x3a] sm:$0xff]  ;;  %v3989_v36 = vld [vmem:[%s3738_s28 + $0x42] sm:$0xff]  ;;  %v2656_v38 = vld [vmem:[%s3738_s28 + $0x4a] sm:$0xff] }
  0x2e   : > { %v2815_v37 = vld [vmem:[%s3738_s28 + $0xa4] sm:$0xff]  ;;  %v2816_v39 = vld [vmem:[%s3738_s28 + $0xac] sm:$0xff]  ;;  %v2658_v42 = vld [vmem:[%s3738_s28 + $0x5a] sm:$0xff] }
  0x2f   : > { %3119 = vmatmul.mubr.msk.f32.gmra.mrb[12].mxu1 %vm253_vm0, %v2604_v47  ;;  %3259 = vmatmul.mubr.msk.f32.gmra.mrb[2].mxu0 %vm253_vm0, %v3806_v48  ;;  %v2657_v40 = vld [vmem:[%s3738_s28 + $0x52] sm:$0xff]  ;;  %v2837_v41 = vld [vmem:[%s3738_s28 + $0x25] sm:$0xff]  ;;  %v2840_v47 = vld [vmem:[%s3738_s28 + $0x3d] sm:$0xff] }
  0x30   : > { %3121 = vmatprep.mubr.msk.f32.mxu1 %vm253_vm0, %v2605_v49  ;;  %3261 = vmatprep.mubr.msk.f32.mxu0 %vm253_vm0, %v3812_v50  ;;  %v2838_v43 = vld [vmem:[%s3738_s28 + $0x2d] sm:$0xff]  ;;  %v2659_v44 = vld [vmem:[%s3738_s28 + $0x62] sm:$0xff] }
  0x31   : > { %v2841_v49 = vld [vmem:[%s3738_s28 + $0x45] sm:$0xff]  ;;  %v2848_v59 = vld [vmem:[%s3738_s28 + $0x7d] sm:$0xff] }
  0x32   : > { %v2849_v60 = vld [vmem:[%s3738_s28 + $0x85] sm:$0xff]  ;;  %v2736_v18 = vld [vmem:[%s3738_s28 + $0x7b] sm:$0xff] }
  0x33   : > { %3122 = vmatmul.mubr.msk.f32.gmra.mrb[14].mxu1 %vm253_vm0, %v2606_v51  ;;  %3262 = vmatmul.mubr.msk.f32.gmra.mrb[4].mxu0 %vm253_vm0, %v3823_v52  ;;  %v2842_v51 = vld [vmem:[%s3738_s28 + $0x4d] sm:$0xff]  ;;  %v2886_v19 = vld [vmem:[%s3738_s28 + $0x7e] sm:$0xff] }
  0x34   : > { %3124 = vmatprep.mubr.msk.f32.mxu1 %vm253_vm0, %v2607_v53  ;;  %3264 = vmatprep.mubr.msk.f32.mxu0 %vm253_vm0, %v3827_v54  ;;  %v2843_v53 = vld [vmem:[%s3738_s28 + $0x55] sm:$0xff] }
  0x37   : > { %3125 = vmatmul.mubr.msk.f32.gmra.mrb[16].mxu1 %vm253_vm0, %v2608_v55  ;;  %3265 = vmatmul.mubr.msk.f32.gmra.mrb[6].mxu0 %vm253_vm0, %v3837_v56  ;;  %v2844_v55 = vld [vmem:[%s3738_s28 + $0x5d] sm:$0xff] }
  0x38   : > { %3131 = vmatprep.mubr.msk.f32.mxu1 %vm253_vm0, %v210_v57  ;;  %3267 = vmatprep.mubr.msk.f32.mxu0 %vm253_vm0, %v3841_v58  ;;  %v2846_v57 = vld [vmem:[%s3738_s28 + $0x6d] sm:$0xff] }
  0x3b   : > { %3132 = vmatmul.mubr.msk.f32.vlgmr.msra.gmra.mrb[0].mxu1 %vm253_vm0, %v211_v61  ;;  %3268 = vmatmul.mubr.msk.f32.gmra.mrb[8].mxu0 %vm253_vm0, %v3857_v62  ;;  %v2850_v61 = vld [vmem:[%s3738_s28 + $0x8d] sm:$0xff] }
  0x3c   : > { %3134 = vmatprep.mubr.msk.f32.mxu1 %vm253_vm0, %v212_v63  ;;  %3270 = vmatprep.mubr.msk.f32.mxu0 %vm253_vm0, %v3861_v0  ;;  %v2853_v63 = vld [vmem:[%s3738_s28 + $0xa5] sm:$0xff] }
  0x3d   : > { %3386 = vmatpush3.bf16.msra.mxu1 %v3748_v23  ;;  %v223_v23 = vld [vmem:[%s3738_s28 + $0x68] sm:$0xff] }
  0x3e   : > { %3388 = vmatprep.subr.bf16.mxu1 %v3863_v1 }
  0x3f   : > { %3135 = vmatmul.mubr.msk.f32.gmra.mrb[2].mxu1 %vm253_vm0, %v213_v2  ;;  %3271 = vmatmul.mubr.msk.f32.gmra.mrb[10].mxu0 %vm253_vm0, %v3873_v4  ;;  %v2876_v2 = vld [vmem:[%s3738_s28 + $0x2e] sm:$0xff] }
  0x40   : > { %3137 = vmatprep.mubr.msk.f32.mxu1 %vm253_vm0, %v214_v5  ;;  %3273 = vmatprep.mubr.msk.f32.mxu0 %vm253_vm0, %v3878_v6  ;;  %v2878_v5 = vld [vmem:[%s3738_s28 + $0x3e] sm:$0xff] }
  0x43   : > { %3138 = vmatmul.mubr.msk.f32.gmra.mrb[4].mxu1 %vm253_vm0, %v215_v7  ;;  %3274 = vmatmul.mubr.msk.f32.gmra.mrb[12].mxu0 %vm253_vm0, %v2774_v8  ;;  %v2880_v7 = vld [vmem:[%s3738_s28 + $0x4e] sm:$0xff] }
  0x44   : > { %3140 = vmatprep.mubr.msk.f32.mxu1 %vm253_vm0, %v216_v9  ;;  %3276 = vmatprep.mubr.msk.f32.mxu0 %vm253_vm0, %v2775_v10  ;;  %v2881_v9 = vld [vmem:[%s3738_s28 + $0x56] sm:$0xff] }
  0x47   : > { %3141 = vmatmul.mubr.msk.f32.gmra.mrb[6].mxu1 %vm253_vm0, %v217_v11  ;;  %3277 = vmatmul.mubr.msk.f32.gmra.mrb[14].mxu0 %vm253_vm0, %v2776_v12  ;;  %v2882_v11 = vld [vmem:[%s3738_s28 + $0x5e] sm:$0xff] }
  0x48   : > { %3143 = vmatprep.mubr.msk.f32.mxu1 %vm253_vm0, %v218_v13  ;;  %3279 = vmatprep.mubr.msk.f32.mxu0 %vm253_vm0, %v2777_v14  ;;  %v2883_v13 = vld [vmem:[%s3738_s28 + $0x66] sm:$0xff] }
  0x4b   : > { %3144 = vmatmul.mubr.msk.f32.gmra.mrb[8].mxu1 %vm253_vm0, %v219_v15  ;;  %3280 = vmatmul.mubr.msk.f32.gmra.mrb[16].mxu0 %vm253_vm0, %v2778_v16  ;;  %v2884_v15 = vld [vmem:[%s3738_s28 + $0x6e] sm:$0xff] }
  0x4c   : > { %3146 = vmatprep.mubr.msk.f32.mxu1 %vm253_vm0, %v220_v17  ;;  %3286 = vmatprep.mubr.msk.f32.mxu0 %vm253_vm0, %v3799_v46  ;;  %v2660_v46 = vld [vmem:[%s3738_s28 + $0x6a] sm:$0xff]  ;;  %v2885_v17 = vld [vmem:[%s3738_s28 + $0x76] sm:$0xff] }
  0x4f   : > { %3147 = vmatmul.mubr.msk.f32.gmra.mrb[10].mxu1 %vm253_vm0, %v221_v20  ;;  %3287 = vmatmul.mubr.msk.f32.vlgmr.msra.gmra.mrb[0].mxu0 %vm253_vm0, %v3806_v48  ;;  %v2661_v48 = vld [vmem:[%s3738_s28 + $0x72] sm:$0xff]  ;;  %v2737_v20 = vld [vmem:[%s3738_s28 + $0x83] sm:$0xff] }
  0x50   : > { %3406 = vmatpush3.bf16.msra.mxu0 %v3796_v45  ;;  %3149 = vmatprep.mubr.msk.f32.mxu1 %vm253_vm0, %v222_v21  ;;  %v2839_v45 = vld [vmem:[%s3738_s28 + $0x35] sm:$0xff]  ;;  %v2887_v21 = vld [vmem:[%s3738_s28 + $0x86] sm:$0xff] }
  0x51   : > { %3289 = vmatprep.mubr.msk.f32.mxu0 %vm253_vm0, %v3812_v50  ;;  %3408 = vmatprep.subr.bf16.mxu0 %v3919_v22  ;;  %v2662_v50 = vld [vmem:[%s3738_s28 + $0x7a] sm:$0xff] }
  0x53   : > { %3150 = vmatmul.mubr.msk.f32.gmra.mrb[12].mxu1 %vm253_vm0, %v223_v23  ;;  %3290 = vmatmul.mubr.msk.f32.gmra.mrb[2].mxu0 %vm253_vm0, %v3823_v52  ;;  %v2663_v52 = vld [vmem:[%s3738_s28 + $0x82] sm:$0xff]  ;;  %v2888_v23 = vld [vmem:[%s3738_s28 + $0x8e] sm:$0xff] }
  0x54   : > { %3152 = vmatprep.mubr.msk.f32.mxu1 %vm253_vm0, %v224_v24  ;;  %3292 = vmatprep.mubr.msk.f32.mxu0 %vm253_vm0, %v3827_v54  ;;  %v2664_v54 = vld [vmem:[%s3738_s28 + $0x8a] sm:$0xff]  ;;  %v2739_v24 = vld [vmem:[%s3738_s28 + $0x93] sm:$0xff] }
  0x57   : > { %3153 = vmatmul.mubr.msk.f32.gmra.mrb[14].mxu1 %vm253_vm0, %v225_v25  ;;  %3293 = vmatmul.mubr.msk.f32.gmra.mrb[4].mxu0 %vm253_vm0, %v3837_v56  ;;  %v2845_v56 = vld [vmem:[%s3738_s28 + $0x65] sm:$0xff]  ;;  %v2889_v25 = vld [vmem:[%s3738_s28 + $0x96] sm:$0xff] }
  0x58   : > { %3155 = vmatprep.mubr.msk.f32.mxu1 %vm253_vm0, %v226_v26  ;;  %3295 = vmatprep.mubr.msk.f32.mxu0 %vm253_vm0, %v3841_v58  ;;  %v2847_v58 = vld [vmem:[%s3738_s28 + $0x75] sm:$0xff] }
  0x59   : > { %v2740_v26 = vld [vmem:[%s3738_s28 + $0x9b] sm:$0xff] }
  0x5b   : > { %3156 = vmatmul.mubr.msk.f32.gmra.mrb[16].mxu1 %vm253_vm0, %v227_v27  ;;  %3296 = vmatmul.mubr.msk.f32.gmra.mrb[6].mxu0 %vm253_vm0, %v3857_v62  ;;  %v2851_v62 = vld [vmem:[%s3738_s28 + $0x95] sm:$0xff]  ;;  %v2890_v27 = vld [vmem:[%s3738_s28 + $0x9e] sm:$0xff] }
  0x5c   : > { %3162 = vmatprep.mubr.msk.f32.mxu1 %vm253_vm0, %v2647_v28  ;;  %3298 = vmatprep.mubr.msk.f32.mxu0 %vm253_vm0, %v3861_v0  ;;  %v2854_v0 = vld [vmem:[%s3738_s28 + $0xad] sm:$0xff] }
  0x5d   : > { %v2891_v28 = vld [vmem:[%s3738_s28 + $0xa6] sm:$0xff] }
  0x5f   : > { %3163 = vmatmul.mubr.msk.f32.vlgmr.msra.gmra.mrb[0].mxu1 %vm253_vm0, %v2648_v29  ;;  %3299 = vmatmul.mubr.msk.f32.gmra.mrb[8].mxu0 %vm253_vm0, %v3873_v4  ;;  %v2877_v4 = vld [vmem:[%s3738_s28 + $0x36] sm:$0xff]  ;;  %v2892_v29 = vld [vmem:[%s3738_s28 + $0xae] sm:$0xff] }
  0x60   : > { %3165 = vmatprep.mubr.msk.f32.mxu1 %vm253_vm0, %v3955_v30  ;;  %3301 = vmatprep.mubr.msk.f32.mxu0 %vm253_vm0, %v3878_v6  ;;  %v2879_v6 = vld [vmem:[%s3738_s28 + $0x46] sm:$0xff] }
  0x61   : > { %3390 = vmatpush3.bf16.msra.mxu1 %v3863_v1  ;;  %v2875_v1 = vld [vmem:[%s3738_s28 + $0x26] sm:$0xff] }
  0x62   : > { %3411 = vmatprep.subr.bf16.mxu1 %v3700_v3 }
  0x63   : > { %3166 = vmatmul.mubr.msk.f32.gmra.mrb[2].mxu1 %vm253_vm0, %v3965_v31  ;;  %3302 = vmatmul.mubr.msk.f32.gmra.mrb[10].mxu0 %vm253_vm0, %v2774_v8  ;;  %v2701_v8 = vld [vmem:[%s3738_s28 + $0x92] sm:$0xff] }
  0x64   : > { %3168 = vmatprep.mubr.msk.f32.mxu1 %vm253_vm0, %v3969_v32  ;;  %3304 = vmatprep.mubr.msk.f32.mxu0 %vm253_vm0, %v2775_v10  ;;  %v2702_v10 = vld [vmem:[%s3738_s28 + $0x9a] sm:$0xff] }
  0x67   : > { %3169 = vmatmul.mubr.msk.f32.gmra.mrb[4].mxu1 %vm253_vm0, %v2652_v33  ;;  %3305 = vmatmul.mubr.msk.f32.gmra.mrb[12].mxu0 %vm253_vm0, %v2776_v12  ;;  %v2733_v12 = vld [vmem:[%s3738_s28 + $0x63] sm:$0xff] }
  0x68   : > { %3171 = vmatprep.mubr.msk.f32.mxu1 %vm253_vm0, %v3980_v34  ;;  %3307 = vmatprep.mubr.msk.f32.mxu0 %vm253_vm0, %v2777_v14  ;;  %v2734_v14 = vld [vmem:[%s3738_s28 + $0x6b] sm:$0xff] }
  0x6b   : > { %3172 = vmatmul.mubr.msk.f32.gmra.mrb[6].mxu1 %vm253_vm0, %v2654_v35  ;;  %3308 = vmatmul.mubr.msk.f32.gmra.mrb[14].mxu0 %vm253_vm0, %v2778_v16  ;;  %v2735_v16 = vld [vmem:[%s3738_s28 + $0x73] sm:$0xff] }
  0x6c   : > { %3174 = vmatprep.mubr.msk.f32.mxu1 %vm253_vm0, %v3989_v36  ;;  %3310 = vmatprep.mubr.msk.f32.mxu0 %vm253_vm0, %v2815_v37 }
  0x6f   : > { %3175 = vmatmul.mubr.msk.f32.gmra.mrb[8].mxu1 %vm253_vm0, %v2656_v38  ;;  %3311 = vmatmul.mubr.msk.f32.gmra.mrb[16].mxu0 %vm253_vm0, %v2816_v39 }
  0x70   : > { %3177 = vmatprep.mubr.msk.f32.mxu1 %vm253_vm0, %v2657_v40  ;;  %3317 = vmatprep.mubr.msk.f32.mxu0 %vm253_vm0, %v2837_v41  ;;  %v4138_v41 = vld [vmem:[%s197_s26] ss:$0 sm:$0xff] }
  0x73   : > { %3178 = vmatmul.mubr.msk.f32.gmra.mrb[10].mxu1 %vm253_vm0, %v2658_v42  ;;  %3318 = vmatmul.mubr.msk.f32.vlgmr.msra.gmra.mrb[0].mxu0 %vm253_vm0, %v2838_v43 }
  0x74   : > { %3410 = vmatpush3.bf16.msra.mxu0 %v3919_v22  ;;  %3180 = vmatprep.mubr.msk.f32.mxu1 %vm253_vm0, %v2659_v44  ;;  %v2738_v22 = vld [vmem:[%s3738_s28 + $0x8b] sm:$0xff] }
  0x75   : > { %3320 = vmatprep.mubr.msk.f32.mxu0 %vm253_vm0, %v2839_v45 }
  0x77   : > { %3181 = vmatmul.mubr.msk.f32.gmra.mrb[12].mxu1 %vm253_vm0, %v2660_v46  ;;  %3321 = vmatmul.mubr.msk.f32.gmra.mrb[2].mxu0 %vm253_vm0, %v2840_v47 }
  0x78   : > { %3183 = vmatprep.mubr.msk.f32.mxu1 %vm253_vm0, %v2661_v48  ;;  %3323 = vmatprep.mubr.msk.f32.mxu0 %vm253_vm0, %v2841_v49 }
  0x7b   : > { %3184 = vmatmul.mubr.msk.f32.gmra.mrb[14].mxu1 %vm253_vm0, %v2662_v50  ;;  %3324 = vmatmul.mubr.msk.f32.gmra.mrb[4].mxu0 %vm253_vm0, %v2842_v51 }
  0x7c   : > { %3186 = vmatprep.mubr.msk.f32.mxu1 %vm253_vm0, %v2663_v52  ;;  %3326 = vmatprep.mubr.msk.f32.mxu0 %vm253_vm0, %v2843_v53 }
  0x7f   : > { %3187 = vmatmul.mubr.msk.f32.gmra.mrb[16].mxu1 %vm253_vm0, %v2664_v54  ;;  %3327 = vmatmul.mubr.msk.f32.gmra.mrb[6].mxu0 %vm253_vm0, %v2844_v55 }
  0x80   : > { %3193 = vmatprep.mubr.msk.f32.mxu1 %vm253_vm0, %v3955_v30  ;;  %3329 = vmatprep.mubr.msk.f32.mxu0 %vm253_vm0, %v2845_v56 }
  0x83   : > { %3194 = vmatmul.mubr.msk.f32.vlgmr.msra.gmra.mrb[0].mxu1 %vm253_vm0, %v3965_v31  ;;  %3330 = vmatmul.mubr.msk.f32.gmra.mrb[8].mxu0 %vm253_vm0, %v2846_v57 }
  0x84   : > { %3196 = vmatprep.mubr.msk.f32.mxu1 %vm253_vm0, %v3969_v32  ;;  %3332 = vmatprep.mubr.msk.f32.mxu0 %vm253_vm0, %v2847_v58 }
  0x85   : > { %3412 = vmatpush3.bf16.msra.mxu1 %v3700_v3  ;;  %v2852_v3 = vld [vmem:[%s3738_s28 + $0x9d] sm:$0xff] }
  0x87   : > { %3197 = vmatmul.mubr.msk.f32.gmra.mrb[2].mxu1 %vm253_vm0, %v2652_v33  ;;  %3333 = vmatmul.mubr.msk.f32.gmra.mrb[10].mxu0 %vm253_vm0, %v2848_v59 }
  0x88   : > { %3199 = vmatprep.mubr.msk.f32.mxu1 %vm253_vm0, %v3980_v34  ;;  %3335 = vmatprep.mubr.msk.f32.mxu0 %vm253_vm0, %v2849_v60 }
  0x8b   : > { %3200 = vmatmul.mubr.msk.f32.gmra.mrb[4].mxu1 %vm253_vm0, %v2654_v35  ;;  %3336 = vmatmul.mubr.msk.f32.gmra.mrb[12].mxu0 %vm253_vm0, %v2850_v61 }
  0x8c   : > { %3202 = vmatprep.mubr.msk.f32.mxu1 %vm253_vm0, %v3989_v36  ;;  %3338 = vmatprep.mubr.msk.f32.mxu0 %vm253_vm0, %v2851_v62 }
  0x8f   : > { %3203 = vmatmul.mubr.msk.f32.gmra.mrb[6].mxu1 %vm253_vm0, %v2656_v38  ;;  %3339 = vmatmul.mubr.msk.f32.gmra.mrb[14].mxu0 %vm253_vm0, %v2852_v3 }
  0x90   : > { %3205 = vmatprep.mubr.msk.f32.mxu1 %vm253_vm0, %v2657_v40  ;;  %3341 = vmatprep.mubr.msk.f32.mxu0 %vm253_vm0, %v2853_v63 }
  0x93   : > { %3206 = vmatmul.mubr.msk.f32.gmra.mrb[8].mxu1 %vm253_vm0, %v2658_v42  ;;  %3342 = vmatmul.mubr.msk.f32.gmra.mrb[16].mxu0 %vm253_vm0, %v2854_v0 }
  0x94   : > { %3208 = vmatprep.mubr.msk.f32.mxu1 %vm253_vm0, %v2659_v44  ;;  %3348 = vmatprep.mubr.msk.f32.mxu0 %vm253_vm0, %v2875_v1 }
  0x97   : > { %3209 = vmatmul.mubr.msk.f32.gmra.mrb[10].mxu1 %vm253_vm0, %v2660_v46  ;;  %3349 = vmatmul.mubr.msk.f32.vlgmr.msra.gmra.mrb[0].mxu0 %vm253_vm0, %v2876_v2 }
  0x98   : > { %3211 = vmatprep.mubr.msk.f32.mxu1 %vm253_vm0, %v2661_v48  ;;  %3351 = vmatprep.mubr.msk.f32.mxu0 %vm253_vm0, %v2877_v4 }
  0x9b   : > { %3212 = vmatmul.mubr.msk.f32.gmra.mrb[12].mxu1 %vm253_vm0, %v2662_v50  ;;  %3352 = vmatmul.mubr.msk.f32.gmra.mrb[2].mxu0 %vm253_vm0, %v2878_v5 }
  0x9c   : > { %3214 = vmatprep.mubr.msk.f32.mxu1 %vm253_vm0, %v2663_v52  ;;  %3354 = vmatprep.mubr.msk.f32.mxu0 %vm253_vm0, %v2879_v6 }
  0x9f   : > { %3215 = vmatmul.mubr.msk.f32.gmra.mrb[14].mxu1 %vm253_vm0, %v2664_v54  ;;  %3355 = vmatmul.mubr.msk.f32.gmra.mrb[4].mxu0 %vm253_vm0, %v2880_v7 }
  0xa0   : > { %3217 = vmatprep.mubr.msk.f32.mxu1 %vm253_vm0, %v2701_v8  ;;  %3357 = vmatprep.mubr.msk.f32.mxu0 %vm253_vm0, %v2881_v9 }
  0xa3   : > { %3218 = vmatmul.mubr.msk.f32.gmra.mrb[16].mxu1 %vm253_vm0, %v2702_v10  ;;  %3358 = vmatmul.mubr.msk.f32.gmra.mrb[6].mxu0 %vm253_vm0, %v2882_v11 }
  0xa4   : > { %3239 = vmatprep.mubr.msk.f32.mxu1 %vm253_vm0, %v2733_v12  ;;  %3360 = vmatprep.mubr.msk.f32.mxu0 %vm253_vm0, %v2883_v13 }
  0xa7   : > { %3240 = vmatmul.mubr.msk.f32.vlgmr.msra.gmra.mrb[10].mxu1 %vm253_vm0, %v2734_v14  ;;  %3361 = vmatmul.mubr.msk.f32.gmra.mrb[8].mxu0 %vm253_vm0, %v2884_v15 }
  0xa8   : > { %3242 = vmatprep.mubr.msk.f32.mxu1 %vm253_vm0, %v2735_v16  ;;  %3363 = vmatprep.mubr.msk.f32.mxu0 %vm253_vm0, %v2885_v17 }
  0xab   : > { %3243 = vmatmul.mubr.msk.f32.gmra.mrb[12].mxu1 %vm253_vm0, %v2736_v18  ;;  %3364 = vmatmul.mubr.msk.f32.gmra.mrb[10].mxu0 %vm253_vm0, %v2886_v19 }
  0xac   : > { %3245 = vmatprep.mubr.msk.f32.mxu1 %vm253_vm0, %v2737_v20  ;;  %3366 = vmatprep.mubr.msk.f32.mxu0 %vm253_vm0, %v2887_v21 }
  0xaf   : > { %3246 = vmatmul.mubr.msk.f32.gmra.mrb[14].mxu1 %vm253_vm0, %v2738_v22  ;;  %3367 = vmatmul.mubr.msk.f32.gmra.mrb[12].mxu0 %vm253_vm0, %v2888_v23 }
  0xb0   : > { %3248 = vmatprep.mubr.msk.f32.mxu1 %vm253_vm0, %v2739_v24  ;;  %3369 = vmatprep.mubr.msk.f32.mxu0 %vm253_vm0, %v2889_v25 }
  0xb3   : > { %3249 = vmatmul.mubr.msk.f32.gmra.mrb[16].mxu1 %vm253_vm0, %v2740_v26  ;;  %3370 = vmatmul.mubr.msk.f32.gmra.mrb[14].mxu0 %vm253_vm0, %v2890_v27 }
  0xb4   : > { %3372 = vmatprep.mubr.msk.f32.mxu0 %vm253_vm0, %v2891_v28 }
  0xb7   : > { %3373 = vmatmul.mubr.msk.f32.gmra.mrb[16].mxu0 %vm253_vm0, %v2892_v29 }
 0x156   : > { %v3195_v30 = vpop.f32.mrb[0].mxu1 }
 0x157   : > { %v1065_v31 = vpop.f32.mrb[1].mxu1 }
 0x15a   : > { %v3198_v32 = vpop.f32.mrb[2].mxu1 }
 0x15b   : > { %v1075_v33 = vpop.f32.mrb[3].mxu1 }
 0x15e   : > { %v3201_v34 = vpop.f32.mrb[4].mxu1 }
 0x15f   : > { %v1085_v35 = vpop.f32.mrb[5].mxu1 }
 0x162   : > { %v3204_v36 = vpop.f32.mrb[6].mxu1 }
 0x163   : > { %v1095_v37 = vpop.f32.mrb[7].mxu1 }
 0x166   : > { %v3207_v38 = vpop.f32.mrb[8].mxu1 }
 0x167   : > { %v1105_v39 = vpop.f32.mrb[9].mxu1 }
 0x16a   : > { %v3350_v40 = vpop.f32.mrb[0].mxu0 }
 0x16b   : > { %v3413_v42 = vadd.f32 %v3350_v40, %v3195_v30  ;;  %v2315_v43 = vpop.f32.mrb[1].mxu0 }
 0x16c   : > { %v3414_v44 = vadd.f32 %v2315_v43, %v1065_v31 }
 0x16d   : > { %v2430_v45 = vadd.f32 %v3413_v42, %v4138_v41 }
 0x16e   : > { %v2429_v46 = vadd.f32 %v3414_v44, %v4138_v41  ;;  %v3353_v47 = vpop.f32.mrb[2].mxu0 }
 0x16f   : > { %2448 = vst.msk [vmem:[%s4143_s29 + $0x8] sm:$0xff] %vm253_vm0, %v2430_v45  ;;  %v3415_v48 = vadd.f32 %v3353_v47, %v3198_v32  ;;  %v2325_v49 = vpop.f32.mrb[3].mxu0 }
 0x170   : > { %2447 = vst.msk [vmem:[%s4143_s29] sm:$0xff] %vm253_vm0, %v2429_v46  ;;  %v3416_v50 = vadd.f32 %v2325_v49, %v1075_v33 }
 0x171   : > { %v2432_v51 = vadd.f32 %v3415_v48, %v4138_v41 }
 0x172   : > { %v2431_v52 = vadd.f32 %v3416_v50, %v4138_v41  ;;  %v3356_v53 = vpop.f32.mrb[4].mxu0 }
 0x173   : > { %2450 = vst.msk [vmem:[%s4143_s29 + $0x18] sm:$0xff] %vm253_vm0, %v2432_v51  ;;  %v3417_v54 = vadd.f32 %v3356_v53, %v3201_v34  ;;  %v2335_v55 = vpop.f32.mrb[5].mxu0 }
 0x174   : > { %2449 = vst.msk [vmem:[%s4143_s29 + $0x10] sm:$0xff] %vm253_vm0, %v2431_v52  ;;  %v3418_v56 = vadd.f32 %v2335_v55, %v1085_v35 }
 0x175   : > { %v2434_v57 = vadd.f32 %v3417_v54, %v4138_v41 }
 0x176   : > { %v2433_v58 = vadd.f32 %v3418_v56, %v4138_v41  ;;  %v3359_v59 = vpop.f32.mrb[6].mxu0 }
 0x177   : > { %2452 = vst.msk [vmem:[%s4143_s29 + $0x28] sm:$0xff] %vm253_vm0, %v2434_v57  ;;  %v3419_v60 = vadd.f32 %v3359_v59, %v3204_v36  ;;  %v2345_v61 = vpop.f32.mrb[7].mxu0 }
 0x178   : > { %2451 = vst.msk [vmem:[%s4143_s29 + $0x20] sm:$0xff] %vm253_vm0, %v2433_v58  ;;  %v3420_v62 = vadd.f32 %v2345_v61, %v1095_v37 }
 0x179   : > { %v2436_v3 = vadd.f32 %v3419_v60, %v4138_v41 }
 0x17a   : > { %v2435_v63 = vadd.f32 %v3420_v62, %v4138_v41  ;;  %v3241_v0 = vpop.f32.mrb[10].mxu1  ;;  %v3362_v1 = vpop.f32.mrb[8].mxu0 }
 0x17b   : > { %2454 = vst.msk [vmem:[%s4143_s29 + $0x38] sm:$0xff] %vm253_vm0, %v2436_v3  ;;  %v3421_v2 = vadd.f32 %v3362_v1, %v3207_v38  ;;  %v1365_v4 = vpop.f32.mrb[11].mxu1  ;;  %v2355_v5 = vpop.f32.mrb[9].mxu0 }
 0x17c   : > { %2453 = vst.msk [vmem:[%s4143_s29 + $0x30] sm:$0xff] %vm253_vm0, %v2435_v63  ;;  %v3422_v6 = vadd.f32 %v2355_v5, %v1105_v39 }
 0x17d   : > { %v2438_v7 = vadd.f32 %v3421_v2, %v4138_v41 }
 0x17e   : > { %v2437_v8 = vadd.f32 %v3422_v6, %v4138_v41  ;;  %v3244_v9 = vpop.f32.mrb[12].mxu1  ;;  %v3365_v10 = vpop.f32.mrb[10].mxu0 }
 0x17f   : > { %2456 = vst.msk [vmem:[%s4143_s29 + $0x48] sm:$0xff] %vm253_vm0, %v2438_v7  ;;  %v3423_v11 = vadd.f32 %v3365_v10, %v3241_v0  ;;  %v1375_v12 = vpop.f32.mrb[13].mxu1  ;;  %v2365_v13 = vpop.f32.mrb[11].mxu0 }
 0x180   : > { %2455 = vst.msk [vmem:[%s4143_s29 + $0x40] sm:$0xff] %vm253_vm0, %v2437_v8  ;;  %v3424_v14 = vadd.f32 %v2365_v13, %v1365_v4 }
 0x181   : > { %v2440_v15 = vadd.f32 %v3423_v11, %v4138_v41 }
 0x182   : > { %v2439_v16 = vadd.f32 %v3424_v14, %v4138_v41  ;;  %v3247_v17 = vpop.f32.mrb[14].mxu1  ;;  %v3368_v18 = vpop.f32.mrb[12].mxu0 }
 0x183   : > { %2458 = vst.msk [vmem:[%s4143_s29 + $0x58] sm:$0xff] %vm253_vm0, %v2440_v15  ;;  %v3425_v19 = vadd.f32 %v3368_v18, %v3244_v9  ;;  %v1385_v20 = vpop.f32.mrb[15].mxu1  ;;  %v2375_v21 = vpop.f32.mrb[13].mxu0 }
 0x184   : > { %2457 = vst.msk [vmem:[%s4143_s29 + $0x50] sm:$0xff] %vm253_vm0, %v2439_v16  ;;  %v3426_v22 = vadd.f32 %v2375_v21, %v1375_v12 }
 0x185   : > { %v2442_v23 = vadd.f32 %v3425_v19, %v4138_v41 }
 0x186   : > { %v2441_v24 = vadd.f32 %v3426_v22, %v4138_v41  ;;  %v3250_v25 = vpop.f32.mrb[16].mxu1  ;;  %v3371_v26 = vpop.f32.mrb[14].mxu0 }
 0x187   : > { %2460 = vst.msk [vmem:[%s4143_s29 + $0x68] sm:$0xff] %vm253_vm0, %v2442_v23  ;;  %v3427_v27 = vadd.f32 %v3371_v26, %v3247_v17  ;;  %v1395_v28 = vpop.f32.mrb[17].mxu1  ;;  %v2385_v29 = vpop.f32.mrb[15].mxu0 }
 0x188   : > { %2459 = vst.msk [vmem:[%s4143_s29 + $0x60] sm:$0xff] %vm253_vm0, %v2441_v24  ;;  %v3428_v30 = vadd.f32 %v2385_v29, %v1385_v20 }
 0x189   : > { %v2444_v31 = vadd.f32 %v3427_v27, %v4138_v41 }
 0x18a   : > { %v2443_v32 = vadd.f32 %v3428_v30, %v4138_v41  ;;  %v3374_v33 = vpop.f32.mrb[16].mxu0 }
 0x18b   : > { %2462 = vst.msk [vmem:[%s4143_s29 + $0x78] sm:$0xff] %vm253_vm0, %v2444_v31  ;;  %v3429_v34 = vadd.f32 %v3374_v33, %v3250_v25  ;;  %v2395_v35 = vpop.f32.mrb[17].mxu0 }
 0x18c   : > { %2461 = vst.msk [vmem:[%s4143_s29 + $0x70] sm:$0xff] %vm253_vm0, %v2443_v32  ;;  %v3430_v36 = vadd.f32 %v2395_v35, %v1395_v28 }
 0x18d   : > { %v2446_v37 = vadd.f32 %v3429_v34, %v4138_v41 }
 0x18e   : > { %v2445_v38 = vadd.f32 %v3430_v36, %v4138_v41 }
 0x18f   : > { %2464 = vst.msk [vmem:[%s4143_s29 + $0x88] sm:$0xff] %vm253_vm0, %v2446_v37 }
 0x190   : > { %2463 = vst.msk [vmem:[%s4143_s29 + $0x80] sm:$0xff] %vm253_vm0, %v2445_v38 }
 0x191 PF: > { %s13_s16 = sadd.s32 1, %s3637_s16   ;;  %s4218_s12 = smov %s3629_s14 }
 0x192   : > { %p10_p7 = scmp.ge.s32.totalorder %s13_s16, 18   ;;  %s4219_s13 = smov %s3633_s15 }
 0x193   : > { %s4220_s14 = smov %s4223_s17  ;;  %s4221_s15 = smov %s4227_s18 }
 0x194   :  { %12 = sbr.rel (!%p10_p7) target bundleno = 3 (0x3), region = 82 }

// kernel: down_block_3d.16
= control target key start
LH: loop header
LB: loop body
LE: loop exit
PB: predicated region body
PF: predicated region fallthrough
CT: control target
= control target key end

     0   :  { %s3782_s15 = smov 0   ;;  %s3784_s16 = smov 0   ;;  %s4360_s0 = inlined_call_operand.vmem [shape: f32[8,328,16], index: 0, kind: input, shape index: {}]   ;;  %s4361_s1 = inlined_call_operand.vmem [shape: f32[9,16,16], index: 1, kind: input, shape index: {}]   ;;  %s4362_s2 = inlined_call_operand.vmem [shape: f32[8,1,16], index: 2, kind: input, shape index: {}]   ;;  %s4363_s3 = inlined_call_operand.vmem [shape: f32[8,288,16], index: 3, kind: input, shape index: {}]   ;;  %s4364_s4 = inlined_call_operand.vmem [shape: f32[8,288,16], index: 4, kind: output, shape index: {}]  }
   0x1   :  { %s3786_s17 = smov 0   ;;  %s3788_s18 = smov 0  }
   0x2   :  { %s3790_s19 = smov 0  }
   0x3 LB: > { %s23_s20 = sadd.s32 1, %s3747_s17  ;;  %s26_s21 = sadd.s32 1, %s3751_s18  ;;  %s3755_s19 = sphi %s3790_s19, %s14_s19   ;;  %s3751_s18 = sphi %s3788_s18, %s4368_s18   ;;  %s3747_s17 = sphi %s3786_s17, %s4367_s17   ;;  %s3743_s16 = sphi %s3784_s16, %s4366_s16   ;;  %s3739_s15 = sphi %s3782_s15, %s4365_s15  }
   0x4   : > { %p24_p0 = scmp.ge.s32.totalorder %s23_s20, 2  ;;  %p2705_p1 = scmp.ge.s32.totalorder %s3755_s19, 1 }
   0x5   : > { %p201_p2 = scmp.lt.s32.totalorder %s3755_s19, 17 }
   0x6   : > { %s4370_s20 = smov (%p24_p0, %s23_s20), 0  ;;  %s4372_s21 = smov (!%p24_p0, %s26_s21), %s3751_s18 }
   0x7   : > { %p202_p3 = pnand %p2705_p1, %p201_p2  ;;  %p28_p4 = scmp.ge.s32.totalorder %s4372_s21, 8 }
   0x8   : > { %v2859_v0 = vld [vmem:[%s4361_s1 + $0x40] sm:$0xff] (!%p202_p3)  ;;  %v2860_v1 = vld [vmem:[%s4361_s1 + $0x48] sm:$0xff] (!%p202_p3)  ;;  %v2727_v2 = vld [vmem:[%s4361_s1 + $0x10] sm:$0xff] (!%p202_p3)  ;;  %p243_p5 = scmp.lt.s32.totalorder (!%p202_p3), %s3743_s16, 7  ;;  %s271_s12 = smul.u32 (!%p202_p3), 144, %s3739_s15  ;;  %vm316_vm0 = vcmask (!%p202_p3), 130048  }
   0x9   : > { %s4374_s21 = smov (%p28_p4, %s4372_s21), 0  ;;  %205 = sbr.rel (%p202_p3) target bundleno = 403 (0x193), region = 36 }
   0xa   : > { %v3823_v3 = vpack.c.bf16 (!%p202_p3), %v2860_v1, %v2859_v0  ;;  %v2728_v4 = vld [vmem:[%s4361_s1 + $0x18] sm:$0xff] (!%p202_p3)  ;;  %v2897_v5 = vld [vmem:[%s4361_s1 + $0x50] sm:$0xff] (!%p202_p3)  ;;  %v291_v9 = vld [vmem:[%s4361_s1] sm:$0xff] (!%p202_p3)  ;;  %s251_s26 = smul.u32 (!%p202_p3), 18, %s3739_s15 }
   0xb   : > { %v2898_v6 = vld [vmem:[%s4361_s1 + $0x58] sm:$0xff] (!%p202_p3)  ;;  %v3493_v7 = vpack.c.bf16 (!%p202_p3), %v2728_v4, %v2727_v2  ;;  %v292_v10 = vld [vmem:[%s4361_s1 + $0x8] sm:$0xff] (!%p202_p3)  ;;  %v2935_v12 = vld [vmem:[%s4361_s1 + $0x60] sm:$0xff] (!%p202_p3) }
   0xc   : > { %v3513_v8 = vpack.c.bf16 (!%p202_p3), %v2898_v6, %v2897_v5  ;;  %3510 = vmatprep.subr.bf16.mxu0 (!%p202_p3), %v3823_v3  ;;  %v3497_v11 = vpack.c.bf16 (!%p202_p3), %v292_v10, %v291_v9  ;;  %v2936_v13 = vld [vmem:[%s4361_s1 + $0x68] sm:$0xff] (!%p202_p3)  ;;  %v2783_v14 = vld [vmem:[%s4361_s1 + $0x20] sm:$0xff] (!%p202_p3)  ;;  %v2973_v40 = vld [vmem:[%s4361_s1 + $0x70] sm:$0xff] (!%p202_p3)  ;;  %p254_p6 = scmp.lt.s32.totalorder (!%p202_p3), %s251_s26, 35 }
   0xd   : > { %3494 = vmatprep.subr.bf16.mxu1 (!%p202_p3), %v3493_v7  ;;  %3512 = vmatpush3.bf16.msra.mxu0 (!%p202_p3), %v3823_v3  ;;  %v2784_v15 = vld [vmem:[%s4361_s1 + $0x28] sm:$0xff] (!%p202_p3)  ;;  %v3517_v22 = vpack.c.bf16 (!%p202_p3), %v2936_v13, %v2935_v12  ;;  %v2974_v41 = vld [vmem:[%s4361_s1 + $0x78] sm:$0xff] (!%p202_p3)  ;;  %v2821_v59 = vld [vmem:[%s4361_s1 + $0x30] sm:$0xff] (!%p202_p3) }
   0xe   : > { %3496 = vmatpush3.bf16.msra.mxu1 (!%p202_p3), %v3493_v7  ;;  %3514 = vmatprep.subr.bf16.mxu0 (!%p202_p3), %v3513_v8  ;;  %v3871_v23 = vpack.c.bf16 (!%p202_p3), %v2784_v15, %v2783_v14  ;;  %v3919_v45 = vpack.c.bf16 (!%p202_p3), %v2974_v41, %v2973_v40  ;;  %v2822_v60 = vld [vmem:[%s4361_s1 + $0x38] sm:$0xff] (!%p202_p3) }
   0xf   : > { %3498 = vmatprep.subr.bf16.mxu1 (!%p202_p3), %v3497_v11  ;;  %v3986_v1 = vpack.c.bf16 (!%p202_p3), %v2822_v60, %v2821_v59 }
  0x10   : > { %s4376_s16 = smov (!%p243_p5, %s3743_s16), 7  ;;  %s4378_s26 = smov (!%p254_p6, %s251_s26), 35 }
  0x11   : > { %s3675_s13 = smul.u32 328, %s4376_s16 }
  0x12   : > { %s3676_s27 = smul.u32 36, %s4376_s16 }
  0x13   : > { %s247_s25 = scalar_lea.vmem %s4360_s0, %s3675_s13 }
  0x14   : > { %s3861_s6 = scalar_lea.vmem %s247_s25, %s271_s12  ;;  %s257_s28 = sadd.s32 %s3676_s27, %s4378_s26 }
  0x15   : > { %v2709_v16 = vld [vmem:[%s3861_s6 + $0x1] sm:$0xff]  ;;  %v2841_v17 = vld [vmem:[%s3861_s6 + $0x13] sm:$0xff]  ;;  %v2710_v18 = vld [vmem:[%s3861_s6 + $0x9] sm:$0xff]  ;;  %s2707_s29 = sshll.u32 %s257_s28, 3 }
  0x16   : > { %3218 = vmatprep.mubr.msk.f32.mxu1 %vm316_vm0, %v2709_v16  ;;  %3342 = vmatprep.mubr.msk.f32.mxu0 %vm316_vm0, %v2841_v17  ;;  %v2842_v19 = vld [vmem:[%s3861_s6 + $0x1b] sm:$0xff]  ;;  %v2711_v20 = vld [vmem:[%s3861_s6 + $0x11] sm:$0xff]  ;;  %v2843_v21 = vld [vmem:[%s3861_s6 + $0x23] sm:$0xff]  ;;  %s4264_s15 = scalar_lea.vmem %s4363_s3, %s2707_s29  ;;  %s4274_s10 = scalar_lea.vmem %s4364_s4, %s2707_s29 }
  0x17   : > { %3219 = vmatmul.mubr.msk.f32.vlgmr.msra.gmra.mrb[0].mxu1 %vm316_vm0, %v2710_v18  ;;  %3343 = vmatmul.mubr.msk.f32.vlgmr.msra.gmra.mrb[0].mxu0 %vm316_vm0, %v2842_v19  ;;  %v2712_v24 = vld [vmem:[%s3861_s6 + $0x19] sm:$0xff]  ;;  %v2844_v25 = vld [vmem:[%s3861_s6 + $0x2b] sm:$0xff]  ;;  %v2713_v26 = vld [vmem:[%s3861_s6 + $0x21] sm:$0xff] }
  0x18   : > { %3516 = vmatpush3.bf16.msra.mxu0 %v3513_v8  ;;  %3221 = vmatprep.mubr.msk.f32.mxu1 %vm316_vm0, %v2711_v20  ;;  %v2845_v27 = vld [vmem:[%s3861_s6 + $0x33] sm:$0xff]  ;;  %v2714_v28 = vld [vmem:[%s3861_s6 + $0x29] sm:$0xff]  ;;  %v2846_v29 = vld [vmem:[%s3861_s6 + $0x3b] sm:$0xff] }
  0x19   : > { %3345 = vmatprep.mubr.msk.f32.mxu0 %vm316_vm0, %v2843_v21  ;;  %3500 = vmatpush3.bf16.msra.mxu1 %v3497_v11  ;;  %v2715_v30 = vld [vmem:[%s3861_s6 + $0x31] sm:$0xff]  ;;  %v2847_v31 = vld [vmem:[%s3861_s6 + $0x43] sm:$0xff]  ;;  %v2716_v32 = vld [vmem:[%s3861_s6 + $0x39] sm:$0xff] }
  0x1a   : > { %3518 = vmatprep.subr.bf16.mxu0 %v3517_v22  ;;  %3502 = vmatprep.subr.bf16.mxu1 %v3871_v23  ;;  %v2848_v33 = vld [vmem:[%s3861_s6 + $0x4b] sm:$0xff]  ;;  %v2717_v34 = vld [vmem:[%s3861_s6 + $0x41] sm:$0xff]  ;;  %v2849_v35 = vld [vmem:[%s3861_s6 + $0x53] sm:$0xff] }
  0x1b   : > { %3222 = vmatmul.mubr.msk.f32.gmra.mrb[2].mxu1 %vm316_vm0, %v2712_v24  ;;  %3346 = vmatmul.mubr.msk.f32.gmra.mrb[2].mxu0 %vm316_vm0, %v2844_v25  ;;  %v2718_v36 = vld [vmem:[%s3861_s6 + $0x49] sm:$0xff]  ;;  %v2850_v37 = vld [vmem:[%s3861_s6 + $0x5b] sm:$0xff]  ;;  %v2719_v38 = vld [vmem:[%s3861_s6 + $0x51] sm:$0xff] }
  0x1c   : > { %3224 = vmatprep.mubr.msk.f32.mxu1 %vm316_vm0, %v2713_v26  ;;  %3348 = vmatprep.mubr.msk.f32.mxu0 %vm316_vm0, %v2845_v27  ;;  %v2879_v39 = vld [vmem:[%s3861_s6 + $0x14] sm:$0xff]  ;;  %v2880_v43 = vld [vmem:[%s3861_s6 + $0x1c] sm:$0xff]  ;;  %v3922_v46 = vld [vmem:[%s3861_s6 + $0x24] sm:$0xff] }
  0x1d   : > { %v2720_v42 = vld [vmem:[%s3861_s6 + $0x59] sm:$0xff]  ;;  %v2721_v44 = vld [vmem:[%s3861_s6 + $0x61] sm:$0xff]  ;;  %v2722_v47 = vld [vmem:[%s3861_s6 + $0x69] sm:$0xff] }
  0x1e   : > { %v3929_v48 = vld [vmem:[%s3861_s6 + $0x2c] sm:$0xff]  ;;  %v3935_v50 = vld [vmem:[%s3861_s6 + $0x34] sm:$0xff]  ;;  %v3946_v52 = vld [vmem:[%s3861_s6 + $0x3c] sm:$0xff] }
  0x1f   : > { %3225 = vmatmul.mubr.msk.f32.gmra.mrb[4].mxu1 %vm316_vm0, %v2714_v28  ;;  %3349 = vmatmul.mubr.msk.f32.gmra.mrb[4].mxu0 %vm316_vm0, %v2846_v29  ;;  %v2723_v49 = vld [vmem:[%s3861_s6 + $0x71] sm:$0xff]  ;;  %v2724_v51 = vld [vmem:[%s3861_s6 + $0x79] sm:$0xff]  ;;  %v2725_v53 = vld [vmem:[%s3861_s6 + $0x81] sm:$0xff] }
  0x20   : > { %3227 = vmatprep.mubr.msk.f32.mxu1 %vm316_vm0, %v2715_v30  ;;  %3351 = vmatprep.mubr.msk.f32.mxu0 %vm316_vm0, %v2847_v31  ;;  %v3950_v54 = vld [vmem:[%s3861_s6 + $0x44] sm:$0xff]  ;;  %v3960_v56 = vld [vmem:[%s3861_s6 + $0x4c] sm:$0xff]  ;;  %v3964_v58 = vld [vmem:[%s3861_s6 + $0x54] sm:$0xff] }
  0x21   : > { %v2726_v55 = vld [vmem:[%s3861_s6 + $0x89] sm:$0xff]  ;;  %v273_v57 = vld [vmem:[%s3861_s6] sm:$0xff]  ;;  %v276_v2 = vld [vmem:[%s3861_s6 + $0x18] sm:$0xff] }
  0x22   : > { %v274_v61 = vld [vmem:[%s3861_s6 + $0x8] sm:$0xff]  ;;  %v3980_v62 = vld [vmem:[%s3861_s6 + $0x5c] sm:$0xff]  ;;  %v275_v63 = vld [vmem:[%s3861_s6 + $0x10] sm:$0xff] }
  0x23   : > { %3228 = vmatmul.mubr.msk.f32.gmra.mrb[6].mxu1 %vm316_vm0, %v2716_v32  ;;  %3352 = vmatmul.mubr.msk.f32.gmra.mrb[6].mxu0 %vm316_vm0, %v2848_v33  ;;  %v3984_v0 = vld [vmem:[%s3861_s6 + $0x64] sm:$0xff]  ;;  %v3996_v4 = vld [vmem:[%s3861_s6 + $0x6c] sm:$0xff]  ;;  %v4001_v6 = vld [vmem:[%s3861_s6 + $0x74] sm:$0xff] }
  0x24   : > { %3230 = vmatprep.mubr.msk.f32.mxu1 %vm316_vm0, %v2717_v34  ;;  %3354 = vmatprep.mubr.msk.f32.mxu0 %vm316_vm0, %v2849_v35  ;;  %v277_v5 = vld [vmem:[%s3861_s6 + $0x20] sm:$0xff]  ;;  %v278_v7 = vld [vmem:[%s3861_s6 + $0x28] sm:$0xff]  ;;  %v279_v9 = vld [vmem:[%s3861_s6 + $0x30] sm:$0xff] }
  0x25   : > { %v2892_v8 = vld [vmem:[%s3861_s6 + $0x7c] sm:$0xff]  ;;  %v2893_v10 = vld [vmem:[%s3861_s6 + $0x84] sm:$0xff]  ;;  %v2894_v12 = vld [vmem:[%s3861_s6 + $0x8c] sm:$0xff] }
  0x26   : > { %v280_v11 = vld [vmem:[%s3861_s6 + $0x38] sm:$0xff]  ;;  %v281_v13 = vld [vmem:[%s3861_s6 + $0x40] sm:$0xff]  ;;  %v282_v15 = vld [vmem:[%s3861_s6 + $0x48] sm:$0xff] }
  0x27   : > { %3231 = vmatmul.mubr.msk.f32.gmra.mrb[8].mxu1 %vm316_vm0, %v2718_v36  ;;  %3355 = vmatmul.mubr.msk.f32.gmra.mrb[8].mxu0 %vm316_vm0, %v2850_v37  ;;  %v2895_v14 = vld [vmem:[%s3861_s6 + $0x94] sm:$0xff]  ;;  %v2896_v16 = vld [vmem:[%s3861_s6 + $0x9c] sm:$0xff]  ;;  %v3012_v19 = vld [vmem:[%s4361_s1 + $0x88] sm:$0xff] }
  0x28   : > { %3233 = vmatprep.mubr.msk.f32.mxu1 %vm316_vm0, %v2719_v38  ;;  %3373 = vmatprep.mubr.msk.f32.mxu0 %vm316_vm0, %v2879_v39  ;;  %v283_v17 = vld [vmem:[%s3861_s6 + $0x50] sm:$0xff]  ;;  %v3011_v18 = vld [vmem:[%s4361_s1 + $0x80] sm:$0xff]  ;;  %v284_v20 = vld [vmem:[%s3861_s6 + $0x58] sm:$0xff] }
  0x29   : > { %v285_v21 = vld [vmem:[%s3861_s6 + $0x60] sm:$0xff]  ;;  %v287_v24 = vld [vmem:[%s3861_s6 + $0x70] sm:$0xff]  ;;  %v288_v25 = vld [vmem:[%s3861_s6 + $0x78] sm:$0xff] }
  0x2a   : > { %v289_v26 = vld [vmem:[%s3861_s6 + $0x80] sm:$0xff]  ;;  %v290_v27 = vld [vmem:[%s3861_s6 + $0x88] sm:$0xff]  ;;  %v4078_v30 = vld [vmem:[%s3861_s6 + $0x12] sm:$0xff] }
  0x2b   : > { %3234 = vmatmul.mubr.msk.f32.gmra.mrb[10].mxu1 %vm316_vm0, %v2720_v42  ;;  %3374 = vmatmul.mubr.msk.f32.vlgmr.msra.gmra.mrb[0].mxu0 %vm316_vm0, %v2880_v43  ;;  %v2765_v28 = vld [vmem:[%s3861_s6 + $0x2] sm:$0xff]  ;;  %v2766_v29 = vld [vmem:[%s3861_s6 + $0xa] sm:$0xff]  ;;  %v4088_v31 = vld [vmem:[%s3861_s6 + $0x1a] sm:$0xff] }
  0x2c   : > { %3520 = vmatpush3.bf16.msra.mxu0 %v3517_v22  ;;  %3236 = vmatprep.mubr.msk.f32.mxu1 %vm316_vm0, %v2721_v44  ;;  %v4042_v22 = vpack.c.bf16 %v3012_v19, %v3011_v18  ;;  %v4092_v32 = vld [vmem:[%s3861_s6 + $0x22] sm:$0xff]  ;;  %v2770_v33 = vld [vmem:[%s3861_s6 + $0x2a] sm:$0xff]  ;;  %v4103_v34 = vld [vmem:[%s3861_s6 + $0x32] sm:$0xff] }
  0x2d   : > { %3376 = vmatprep.mubr.msk.f32.mxu0 %vm316_vm0, %v3922_v46  ;;  %3522 = vmatprep.subr.bf16.mxu0 %v3919_v45  ;;  %v2772_v35 = vld [vmem:[%s3861_s6 + $0x3a] sm:$0xff]  ;;  %v4112_v36 = vld [vmem:[%s3861_s6 + $0x42] sm:$0xff]  ;;  %v2774_v38 = vld [vmem:[%s3861_s6 + $0x4a] sm:$0xff] }
  0x2e   : > { %v2933_v37 = vld [vmem:[%s3861_s6 + $0xa4] sm:$0xff]  ;;  %v2934_v39 = vld [vmem:[%s3861_s6 + $0xac] sm:$0xff]  ;;  %v2776_v42 = vld [vmem:[%s3861_s6 + $0x5a] sm:$0xff] }
  0x2f   : > { %3237 = vmatmul.mubr.msk.f32.gmra.mrb[12].mxu1 %vm316_vm0, %v2722_v47  ;;  %3377 = vmatmul.mubr.msk.f32.gmra.mrb[2].mxu0 %vm316_vm0, %v3929_v48  ;;  %v2775_v40 = vld [vmem:[%s3861_s6 + $0x52] sm:$0xff]  ;;  %v2955_v41 = vld [vmem:[%s3861_s6 + $0x25] sm:$0xff]  ;;  %v2958_v47 = vld [vmem:[%s3861_s6 + $0x3d] sm:$0xff] }
  0x30   : > { %3239 = vmatprep.mubr.msk.f32.mxu1 %vm316_vm0, %v2723_v49  ;;  %3379 = vmatprep.mubr.msk.f32.mxu0 %vm316_vm0, %v3935_v50  ;;  %v2956_v43 = vld [vmem:[%s3861_s6 + $0x2d] sm:$0xff]  ;;  %v2777_v44 = vld [vmem:[%s3861_s6 + $0x62] sm:$0xff] }
  0x31   : > { %v2959_v49 = vld [vmem:[%s3861_s6 + $0x45] sm:$0xff]  ;;  %v2966_v59 = vld [vmem:[%s3861_s6 + $0x7d] sm:$0xff] }
  0x32   : > { %v2967_v60 = vld [vmem:[%s3861_s6 + $0x85] sm:$0xff]  ;;  %v2854_v18 = vld [vmem:[%s3861_s6 + $0x7b] sm:$0xff] }
  0x33   : > { %3240 = vmatmul.mubr.msk.f32.gmra.mrb[14].mxu1 %vm316_vm0, %v2724_v51  ;;  %3380 = vmatmul.mubr.msk.f32.gmra.mrb[4].mxu0 %vm316_vm0, %v3946_v52  ;;  %v2960_v51 = vld [vmem:[%s3861_s6 + $0x4d] sm:$0xff]  ;;  %v3004_v19 = vld [vmem:[%s3861_s6 + $0x7e] sm:$0xff] }
  0x34   : > { %3242 = vmatprep.mubr.msk.f32.mxu1 %vm316_vm0, %v2725_v53  ;;  %3382 = vmatprep.mubr.msk.f32.mxu0 %vm316_vm0, %v3950_v54  ;;  %v2961_v53 = vld [vmem:[%s3861_s6 + $0x55] sm:$0xff] }
  0x37   : > { %3243 = vmatmul.mubr.msk.f32.gmra.mrb[16].mxu1 %vm316_vm0, %v2726_v55  ;;  %3383 = vmatmul.mubr.msk.f32.gmra.mrb[6].mxu0 %vm316_vm0, %v3960_v56  ;;  %v2962_v55 = vld [vmem:[%s3861_s6 + $0x5d] sm:$0xff] }
  0x38   : > { %3249 = vmatprep.mubr.msk.f32.mxu1 %vm316_vm0, %v273_v57  ;;  %3385 = vmatprep.mubr.msk.f32.mxu0 %vm316_vm0, %v3964_v58  ;;  %v2964_v57 = vld [vmem:[%s3861_s6 + $0x6d] sm:$0xff] }
  0x3b   : > { %3250 = vmatmul.mubr.msk.f32.vlgmr.msra.gmra.mrb[0].mxu1 %vm316_vm0, %v274_v61  ;;  %3386 = vmatmul.mubr.msk.f32.gmra.mrb[8].mxu0 %vm316_vm0, %v3980_v62  ;;  %v2968_v61 = vld [vmem:[%s3861_s6 + $0x8d] sm:$0xff] }
  0x3c   : > { %3252 = vmatprep.mubr.msk.f32.mxu1 %vm316_vm0, %v275_v63  ;;  %3388 = vmatprep.mubr.msk.f32.mxu0 %vm316_vm0, %v3984_v0  ;;  %v2971_v63 = vld [vmem:[%s3861_s6 + $0xa5] sm:$0xff] }
  0x3d   : > { %3504 = vmatpush3.bf16.msra.mxu1 %v3871_v23  ;;  %v286_v23 = vld [vmem:[%s3861_s6 + $0x68] sm:$0xff] }
  0x3e   : > { %3506 = vmatprep.subr.bf16.mxu1 %v3986_v1 }
  0x3f   : > { %3253 = vmatmul.mubr.msk.f32.gmra.mrb[2].mxu1 %vm316_vm0, %v276_v2  ;;  %3389 = vmatmul.mubr.msk.f32.gmra.mrb[10].mxu0 %vm316_vm0, %v3996_v4  ;;  %v2994_v2 = vld [vmem:[%s3861_s6 + $0x2e] sm:$0xff] }
  0x40   : > { %3255 = vmatprep.mubr.msk.f32.mxu1 %vm316_vm0, %v277_v5  ;;  %3391 = vmatprep.mubr.msk.f32.mxu0 %vm316_vm0, %v4001_v6  ;;  %v2996_v5 = vld [vmem:[%s3861_s6 + $0x3e] sm:$0xff] }
  0x43   : > { %3256 = vmatmul.mubr.msk.f32.gmra.mrb[4].mxu1 %vm316_vm0, %v278_v7  ;;  %3392 = vmatmul.mubr.msk.f32.gmra.mrb[12].mxu0 %vm316_vm0, %v2892_v8  ;;  %v2998_v7 = vld [vmem:[%s3861_s6 + $0x4e] sm:$0xff] }
  0x44   : > { %3258 = vmatprep.mubr.msk.f32.mxu1 %vm316_vm0, %v279_v9  ;;  %3394 = vmatprep.mubr.msk.f32.mxu0 %vm316_vm0, %v2893_v10  ;;  %v2999_v9 = vld [vmem:[%s3861_s6 + $0x56] sm:$0xff] }
  0x47   : > { %3259 = vmatmul.mubr.msk.f32.gmra.mrb[6].mxu1 %vm316_vm0, %v280_v11  ;;  %3395 = vmatmul.mubr.msk.f32.gmra.mrb[14].mxu0 %vm316_vm0, %v2894_v12  ;;  %v3000_v11 = vld [vmem:[%s3861_s6 + $0x5e] sm:$0xff] }
  0x48   : > { %3261 = vmatprep.mubr.msk.f32.mxu1 %vm316_vm0, %v281_v13  ;;  %3397 = vmatprep.mubr.msk.f32.mxu0 %vm316_vm0, %v2895_v14  ;;  %v3001_v13 = vld [vmem:[%s3861_s6 + $0x66] sm:$0xff] }
  0x4b   : > { %3262 = vmatmul.mubr.msk.f32.gmra.mrb[8].mxu1 %vm316_vm0, %v282_v15  ;;  %3398 = vmatmul.mubr.msk.f32.gmra.mrb[16].mxu0 %vm316_vm0, %v2896_v16  ;;  %v3002_v15 = vld [vmem:[%s3861_s6 + $0x6e] sm:$0xff] }
  0x4c   : > { %3264 = vmatprep.mubr.msk.f32.mxu1 %vm316_vm0, %v283_v17  ;;  %3404 = vmatprep.mubr.msk.f32.mxu0 %vm316_vm0, %v3922_v46  ;;  %v2778_v46 = vld [vmem:[%s3861_s6 + $0x6a] sm:$0xff]  ;;  %v3003_v17 = vld [vmem:[%s3861_s6 + $0x76] sm:$0xff] }
  0x4f   : > { %3265 = vmatmul.mubr.msk.f32.gmra.mrb[10].mxu1 %vm316_vm0, %v284_v20  ;;  %3405 = vmatmul.mubr.msk.f32.vlgmr.msra.gmra.mrb[0].mxu0 %vm316_vm0, %v3929_v48  ;;  %v2779_v48 = vld [vmem:[%s3861_s6 + $0x72] sm:$0xff]  ;;  %v2855_v20 = vld [vmem:[%s3861_s6 + $0x83] sm:$0xff] }
  0x50   : > { %3524 = vmatpush3.bf16.msra.mxu0 %v3919_v45  ;;  %3267 = vmatprep.mubr.msk.f32.mxu1 %vm316_vm0, %v285_v21  ;;  %v2957_v45 = vld [vmem:[%s3861_s6 + $0x35] sm:$0xff]  ;;  %v3005_v21 = vld [vmem:[%s3861_s6 + $0x86] sm:$0xff] }
  0x51   : > { %3407 = vmatprep.mubr.msk.f32.mxu0 %vm316_vm0, %v3935_v50  ;;  %3526 = vmatprep.subr.bf16.mxu0 %v4042_v22  ;;  %v2780_v50 = vld [vmem:[%s3861_s6 + $0x7a] sm:$0xff] }
  0x53   : > { %3268 = vmatmul.mubr.msk.f32.gmra.mrb[12].mxu1 %vm316_vm0, %v286_v23  ;;  %3408 = vmatmul.mubr.msk.f32.gmra.mrb[2].mxu0 %vm316_vm0, %v3946_v52  ;;  %v2781_v52 = vld [vmem:[%s3861_s6 + $0x82] sm:$0xff]  ;;  %v3006_v23 = vld [vmem:[%s3861_s6 + $0x8e] sm:$0xff] }
  0x54   : > { %3270 = vmatprep.mubr.msk.f32.mxu1 %vm316_vm0, %v287_v24  ;;  %3410 = vmatprep.mubr.msk.f32.mxu0 %vm316_vm0, %v3950_v54  ;;  %v2782_v54 = vld [vmem:[%s3861_s6 + $0x8a] sm:$0xff]  ;;  %v2857_v24 = vld [vmem:[%s3861_s6 + $0x93] sm:$0xff] }
  0x57   : > { %3271 = vmatmul.mubr.msk.f32.gmra.mrb[14].mxu1 %vm316_vm0, %v288_v25  ;;  %3411 = vmatmul.mubr.msk.f32.gmra.mrb[4].mxu0 %vm316_vm0, %v3960_v56  ;;  %v2963_v56 = vld [vmem:[%s3861_s6 + $0x65] sm:$0xff]  ;;  %v3007_v25 = vld [vmem:[%s3861_s6 + $0x96] sm:$0xff] }
  0x58   : > { %3273 = vmatprep.mubr.msk.f32.mxu1 %vm316_vm0, %v289_v26  ;;  %3413 = vmatprep.mubr.msk.f32.mxu0 %vm316_vm0, %v3964_v58  ;;  %v2965_v58 = vld [vmem:[%s3861_s6 + $0x75] sm:$0xff] }
  0x59   : > { %v2858_v26 = vld [vmem:[%s3861_s6 + $0x9b] sm:$0xff] }
  0x5b   : > { %3274 = vmatmul.mubr.msk.f32.gmra.mrb[16].mxu1 %vm316_vm0, %v290_v27  ;;  %3414 = vmatmul.mubr.msk.f32.gmra.mrb[6].mxu0 %vm316_vm0, %v3980_v62  ;;  %v2969_v62 = vld [vmem:[%s3861_s6 + $0x95] sm:$0xff]  ;;  %v3008_v27 = vld [vmem:[%s3861_s6 + $0x9e] sm:$0xff] }
  0x5c   : > { %3280 = vmatprep.mubr.msk.f32.mxu1 %vm316_vm0, %v2765_v28  ;;  %3416 = vmatprep.mubr.msk.f32.mxu0 %vm316_vm0, %v3984_v0  ;;  %v2972_v0 = vld [vmem:[%s3861_s6 + $0xad] sm:$0xff] }
  0x5d   : > { %v3009_v28 = vld [vmem:[%s3861_s6 + $0xa6] sm:$0xff] }
  0x5f   : > { %3281 = vmatmul.mubr.msk.f32.vlgmr.msra.gmra.mrb[0].mxu1 %vm316_vm0, %v2766_v29  ;;  %3417 = vmatmul.mubr.msk.f32.gmra.mrb[8].mxu0 %vm316_vm0, %v3996_v4  ;;  %v2995_v4 = vld [vmem:[%s3861_s6 + $0x36] sm:$0xff]  ;;  %v3010_v29 = vld [vmem:[%s3861_s6 + $0xae] sm:$0xff] }
  0x60   : > { %3283 = vmatprep.mubr.msk.f32.mxu1 %vm316_vm0, %v4078_v30  ;;  %3419 = vmatprep.mubr.msk.f32.mxu0 %vm316_vm0, %v4001_v6  ;;  %v2997_v6 = vld [vmem:[%s3861_s6 + $0x46] sm:$0xff] }
  0x61   : > { %3508 = vmatpush3.bf16.msra.mxu1 %v3986_v1  ;;  %v2993_v1 = vld [vmem:[%s3861_s6 + $0x26] sm:$0xff] }
  0x62   : > { %3529 = vmatprep.subr.bf16.mxu1 %v3823_v3 }
  0x63   : > { %3284 = vmatmul.mubr.msk.f32.gmra.mrb[2].mxu1 %vm316_vm0, %v4088_v31  ;;  %3420 = vmatmul.mubr.msk.f32.gmra.mrb[10].mxu0 %vm316_vm0, %v2892_v8  ;;  %v2819_v8 = vld [vmem:[%s3861_s6 + $0x92] sm:$0xff] }
  0x64   : > { %3286 = vmatprep.mubr.msk.f32.mxu1 %vm316_vm0, %v4092_v32  ;;  %3422 = vmatprep.mubr.msk.f32.mxu0 %vm316_vm0, %v2893_v10  ;;  %v2820_v10 = vld [vmem:[%s3861_s6 + $0x9a] sm:$0xff] }
  0x67   : > { %3287 = vmatmul.mubr.msk.f32.gmra.mrb[4].mxu1 %vm316_vm0, %v2770_v33  ;;  %3423 = vmatmul.mubr.msk.f32.gmra.mrb[12].mxu0 %vm316_vm0, %v2894_v12  ;;  %v2851_v12 = vld [vmem:[%s3861_s6 + $0x63] sm:$0xff] }
  0x68   : > { %3289 = vmatprep.mubr.msk.f32.mxu1 %vm316_vm0, %v4103_v34  ;;  %3425 = vmatprep.mubr.msk.f32.mxu0 %vm316_vm0, %v2895_v14  ;;  %v2852_v14 = vld [vmem:[%s3861_s6 + $0x6b] sm:$0xff] }
  0x6b   : > { %3290 = vmatmul.mubr.msk.f32.gmra.mrb[6].mxu1 %vm316_vm0, %v2772_v35  ;;  %3426 = vmatmul.mubr.msk.f32.gmra.mrb[14].mxu0 %vm316_vm0, %v2896_v16  ;;  %v2853_v16 = vld [vmem:[%s3861_s6 + $0x73] sm:$0xff] }
  0x6c   : > { %3292 = vmatprep.mubr.msk.f32.mxu1 %vm316_vm0, %v4112_v36  ;;  %3428 = vmatprep.mubr.msk.f32.mxu0 %vm316_vm0, %v2933_v37 }
  0x6f   : > { %3293 = vmatmul.mubr.msk.f32.gmra.mrb[8].mxu1 %vm316_vm0, %v2774_v38  ;;  %3429 = vmatmul.mubr.msk.f32.gmra.mrb[16].mxu0 %vm316_vm0, %v2934_v39 }
  0x70   : > { %3295 = vmatprep.mubr.msk.f32.mxu1 %vm316_vm0, %v2775_v40  ;;  %3435 = vmatprep.mubr.msk.f32.mxu0 %vm316_vm0, %v2955_v41 }
  0x73   : > { %3296 = vmatmul.mubr.msk.f32.gmra.mrb[10].mxu1 %vm316_vm0, %v2776_v42  ;;  %3436 = vmatmul.mubr.msk.f32.vlgmr.msra.gmra.mrb[0].mxu0 %vm316_vm0, %v2956_v43 }
  0x74   : > { %3528 = vmatpush3.bf16.msra.mxu0 %v4042_v22  ;;  %3298 = vmatprep.mubr.msk.f32.mxu1 %vm316_vm0, %v2777_v44  ;;  %v2856_v22 = vld [vmem:[%s3861_s6 + $0x8b] sm:$0xff] }
  0x75   : > { %3438 = vmatprep.mubr.msk.f32.mxu0 %vm316_vm0, %v2957_v45 }
  0x77   : > { %3299 = vmatmul.mubr.msk.f32.gmra.mrb[12].mxu1 %vm316_vm0, %v2778_v46  ;;  %3439 = vmatmul.mubr.msk.f32.gmra.mrb[2].mxu0 %vm316_vm0, %v2958_v47  ;;  %v2510_v47 = vld [vmem:[%s4264_s15] sm:$0xff] }
  0x78   : > { %3301 = vmatprep.mubr.msk.f32.mxu1 %vm316_vm0, %v2779_v48  ;;  %3441 = vmatprep.mubr.msk.f32.mxu0 %vm316_vm0, %v2959_v49 }
  0x7b   : > { %3302 = vmatmul.mubr.msk.f32.gmra.mrb[14].mxu1 %vm316_vm0, %v2780_v50  ;;  %3442 = vmatmul.mubr.msk.f32.gmra.mrb[4].mxu0 %vm316_vm0, %v2960_v51 }
  0x7c   : > { %3304 = vmatprep.mubr.msk.f32.mxu1 %vm316_vm0, %v2781_v52  ;;  %3444 = vmatprep.mubr.msk.f32.mxu0 %vm316_vm0, %v2961_v53 }
  0x7f   : > { %3305 = vmatmul.mubr.msk.f32.gmra.mrb[16].mxu1 %vm316_vm0, %v2782_v54  ;;  %3445 = vmatmul.mubr.msk.f32.gmra.mrb[6].mxu0 %vm316_vm0, %v2962_v55 }
  0x80   : > { %3311 = vmatprep.mubr.msk.f32.mxu1 %vm316_vm0, %v4078_v30  ;;  %3447 = vmatprep.mubr.msk.f32.mxu0 %vm316_vm0, %v2963_v56 }
  0x83   : > { %3312 = vmatmul.mubr.msk.f32.vlgmr.msra.gmra.mrb[0].mxu1 %vm316_vm0, %v4088_v31  ;;  %3448 = vmatmul.mubr.msk.f32.gmra.mrb[8].mxu0 %vm316_vm0, %v2964_v57  ;;  %v2512_v57 = vld [vmem:[%s4264_s15 + $0x10] sm:$0xff] }
  0x84   : > { %3314 = vmatprep.mubr.msk.f32.mxu1 %vm316_vm0, %v4092_v32  ;;  %3450 = vmatprep.mubr.msk.f32.mxu0 %vm316_vm0, %v2965_v58 }
  0x85   : > { %3530 = vmatpush3.bf16.msra.mxu1 %v3823_v3  ;;  %v2970_v3 = vld [vmem:[%s3861_s6 + $0x9d] sm:$0xff]  ;;  %s250_s6 = scalar_lea.vmem %s4362_s2, %s4376_s16 }
  0x86   : > { %v4266_v41 = vld [vmem:[%s250_s6] ss:$0 sm:$0xff] }
  0x87   : > { %3315 = vmatmul.mubr.msk.f32.gmra.mrb[2].mxu1 %vm316_vm0, %v2770_v33  ;;  %3451 = vmatmul.mubr.msk.f32.gmra.mrb[10].mxu0 %vm316_vm0, %v2966_v59 }
  0x88   : > { %3317 = vmatprep.mubr.msk.f32.mxu1 %vm316_vm0, %v4103_v34  ;;  %3453 = vmatprep.mubr.msk.f32.mxu0 %vm316_vm0, %v2967_v60 }
  0x8b   : > { %3318 = vmatmul.mubr.msk.f32.gmra.mrb[4].mxu1 %vm316_vm0, %v2772_v35  ;;  %3454 = vmatmul.mubr.msk.f32.gmra.mrb[12].mxu0 %vm316_vm0, %v2968_v61 }
  0x8c   : > { %3320 = vmatprep.mubr.msk.f32.mxu1 %vm316_vm0, %v4112_v36  ;;  %3456 = vmatprep.mubr.msk.f32.mxu0 %vm316_vm0, %v2969_v62 }
  0x8f   : > { %3321 = vmatmul.mubr.msk.f32.gmra.mrb[6].mxu1 %vm316_vm0, %v2774_v38  ;;  %3457 = vmatmul.mubr.msk.f32.gmra.mrb[14].mxu0 %vm316_vm0, %v2970_v3 }
  0x90   : > { %3323 = vmatprep.mubr.msk.f32.mxu1 %vm316_vm0, %v2775_v40  ;;  %3459 = vmatprep.mubr.msk.f32.mxu0 %vm316_vm0, %v2971_v63  ;;  %v2515_v63 = vld [vmem:[%s4264_s15 + $0x28] sm:$0xff] }
  0x93   : > { %3324 = vmatmul.mubr.msk.f32.gmra.mrb[8].mxu1 %vm316_vm0, %v2776_v42  ;;  %3460 = vmatmul.mubr.msk.f32.gmra.mrb[16].mxu0 %vm316_vm0, %v2972_v0 }
  0x94   : > { %3326 = vmatprep.mubr.msk.f32.mxu1 %vm316_vm0, %v2777_v44  ;;  %3466 = vmatprep.mubr.msk.f32.mxu0 %vm316_vm0, %v2993_v1  ;;  %v2511_v44 = vld [vmem:[%s4264_s15 + $0x8] sm:$0xff] }
  0x97   : > { %3327 = vmatmul.mubr.msk.f32.gmra.mrb[10].mxu1 %vm316_vm0, %v2778_v46  ;;  %3467 = vmatmul.mubr.msk.f32.vlgmr.msra.gmra.mrb[0].mxu0 %vm316_vm0, %v2994_v2  ;;  %v2514_v2 = vld [vmem:[%s4264_s15 + $0x20] sm:$0xff] }
  0x98   : > { %3329 = vmatprep.mubr.msk.f32.mxu1 %vm316_vm0, %v2779_v48  ;;  %3469 = vmatprep.mubr.msk.f32.mxu0 %vm316_vm0, %v2995_v4 }
  0x9b   : > { %3330 = vmatmul.mubr.msk.f32.gmra.mrb[12].mxu1 %vm316_vm0, %v2780_v50  ;;  %3470 = vmatmul.mubr.msk.f32.gmra.mrb[2].mxu0 %vm316_vm0, %v2996_v5 }
  0x9c   : > { %3332 = vmatprep.mubr.msk.f32.mxu1 %vm316_vm0, %v2781_v52  ;;  %3472 = vmatprep.mubr.msk.f32.mxu0 %vm316_vm0, %v2997_v6 }
  0x9f   : > { %3333 = vmatmul.mubr.msk.f32.gmra.mrb[14].mxu1 %vm316_vm0, %v2782_v54  ;;  %3473 = vmatmul.mubr.msk.f32.gmra.mrb[4].mxu0 %vm316_vm0, %v2998_v7  ;;  %v2513_v54 = vld [vmem:[%s4264_s15 + $0x18] sm:$0xff] }
  0xa0   : > { %3335 = vmatprep.mubr.msk.f32.mxu1 %vm316_vm0, %v2819_v8  ;;  %3475 = vmatprep.mubr.msk.f32.mxu0 %vm316_vm0, %v2999_v9 }
  0xa3   : > { %3336 = vmatmul.mubr.msk.f32.gmra.mrb[16].mxu1 %vm316_vm0, %v2820_v10  ;;  %3476 = vmatmul.mubr.msk.f32.gmra.mrb[6].mxu0 %vm316_vm0, %v3000_v11  ;;  %v2517_v10 = vld [vmem:[%s4264_s15 + $0x38] sm:$0xff] }
  0xa4   : > { %3357 = vmatprep.mubr.msk.f32.mxu1 %vm316_vm0, %v2851_v12  ;;  %3478 = vmatprep.mubr.msk.f32.mxu0 %vm316_vm0, %v3001_v13  ;;  %v2516_v13 = vld [vmem:[%s4264_s15 + $0x30] sm:$0xff] }
  0xa7   : > { %3358 = vmatmul.mubr.msk.f32.vlgmr.msra.gmra.mrb[10].mxu1 %vm316_vm0, %v2852_v14  ;;  %3479 = vmatmul.mubr.msk.f32.gmra.mrb[8].mxu0 %vm316_vm0, %v3002_v15 }
  0xa8   : > { %3360 = vmatprep.mubr.msk.f32.mxu1 %vm316_vm0, %v2853_v16  ;;  %3481 = vmatprep.mubr.msk.f32.mxu0 %vm316_vm0, %v3003_v17 }
  0xab   : > { %3361 = vmatmul.mubr.msk.f32.gmra.mrb[12].mxu1 %vm316_vm0, %v2854_v18  ;;  %3482 = vmatmul.mubr.msk.f32.gmra.mrb[10].mxu0 %vm316_vm0, %v3004_v19 }
  0xac   : > { %3363 = vmatprep.mubr.msk.f32.mxu1 %vm316_vm0, %v2855_v20  ;;  %3484 = vmatprep.mubr.msk.f32.mxu0 %vm316_vm0, %v3005_v21 }
  0xaf   : > { %3364 = vmatmul.mubr.msk.f32.gmra.mrb[14].mxu1 %vm316_vm0, %v2856_v22  ;;  %3485 = vmatmul.mubr.msk.f32.gmra.mrb[12].mxu0 %vm316_vm0, %v3006_v23  ;;  %v2519_v22 = vld [vmem:[%s4264_s15 + $0x48] sm:$0xff] }
  0xb0   : > { %3366 = vmatprep.mubr.msk.f32.mxu1 %vm316_vm0, %v2857_v24  ;;  %3487 = vmatprep.mubr.msk.f32.mxu0 %vm316_vm0, %v3007_v25  ;;  %v2518_v25 = vld [vmem:[%s4264_s15 + $0x40] sm:$0xff] }
  0xb3   : > { %3367 = vmatmul.mubr.msk.f32.gmra.mrb[16].mxu1 %vm316_vm0, %v2858_v26  ;;  %3488 = vmatmul.mubr.msk.f32.gmra.mrb[14].mxu0 %vm316_vm0, %v3008_v27 }
  0xb4   : > { %3490 = vmatprep.mubr.msk.f32.mxu0 %vm316_vm0, %v3009_v28 }
  0xb7   : > { %3491 = vmatmul.mubr.msk.f32.gmra.mrb[16].mxu0 %vm316_vm0, %v3010_v29 }
 0x156   : > { %v3313_v30 = vpop.f32.mrb[0].mxu1 }
 0x157   : > { %v1128_v31 = vpop.f32.mrb[1].mxu1 }
 0x15a   : > { %v3316_v32 = vpop.f32.mrb[2].mxu1 }
 0x15b   : > { %v1138_v33 = vpop.f32.mrb[3].mxu1 }
 0x15e   : > { %v3319_v34 = vpop.f32.mrb[4].mxu1 }
 0x15f   : > { %v1148_v35 = vpop.f32.mrb[5].mxu1 }
 0x162   : > { %v3322_v36 = vpop.f32.mrb[6].mxu1 }
 0x163   : > { %v1158_v37 = vpop.f32.mrb[7].mxu1 }
 0x166   : > { %v3325_v38 = vpop.f32.mrb[8].mxu1 }
 0x167   : > { %v1168_v39 = vpop.f32.mrb[9].mxu1 }
 0x16a   : > { %v3468_v40 = vpop.f32.mrb[0].mxu0 }
 0x16b   : > { %v3531_v42 = vadd.f32 %v3468_v40, %v3313_v30  ;;  %v2378_v43 = vpop.f32.mrb[1].mxu0 }
 0x16c   : > { %v3532_v45 = vadd.f32 %v2378_v43, %v1128_v31 }
 0x16d   : > { %v2493_v46 = vadd.f32 %v3531_v42, %v4266_v41 }
 0x16e   : > { %v2492_v48 = vadd.f32 %v3532_v45, %v4266_v41  ;;  %v3471_v49 = vpop.f32.mrb[2].mxu0 }
 0x16f   : > { %v2529_v50 = vadd.f32 %v2511_v44, %v2493_v46  ;;  %v3533_v51 = vadd.f32 %v3471_v49, %v3316_v32  ;;  %v2388_v52 = vpop.f32.mrb[3].mxu0 }
 0x170   : > { %v2528_v53 = vadd.f32 %v2510_v47, %v2492_v48  ;;  %v3534_v55 = vadd.f32 %v2388_v52, %v1138_v33  ;;  %v2523_v47 = vld [vmem:[%s4264_s15 + $0x68] sm:$0xff] }
 0x171   : > { %2547 = vst.msk [vmem:[%s4274_s10 + $0x8] sm:$0xff] %vm316_vm0, %v2529_v50  ;;  %v2495_v56 = vadd.f32 %v3533_v51, %v4266_v41  ;;  %v2522_v50 = vld [vmem:[%s4264_s15 + $0x60] sm:$0xff] }
 0x172   : > { %2546 = vst.msk [vmem:[%s4274_s10] sm:$0xff] %vm316_vm0, %v2528_v53  ;;  %v2494_v58 = vadd.f32 %v3534_v55, %v4266_v41  ;;  %v3474_v59 = vpop.f32.mrb[4].mxu0 }
 0x173   : > { %v2531_v60 = vadd.f32 %v2513_v54, %v2495_v56  ;;  %v3535_v61 = vadd.f32 %v3474_v59, %v3319_v34  ;;  %v2398_v62 = vpop.f32.mrb[5].mxu0  ;;  %v2521_v34 = vld [vmem:[%s4264_s15 + $0x58] sm:$0xff] }
 0x174   : > { %v2530_v3 = vadd.f32 %v2512_v57, %v2494_v58  ;;  %v3536_v0 = vadd.f32 %v2398_v62, %v1148_v35  ;;  %v2525_v59 = vld [vmem:[%s4264_s15 + $0x78] sm:$0xff]  ;;  %v2524_v62 = vld [vmem:[%s4264_s15 + $0x70] sm:$0xff] }
 0x175   : > { %2549 = vst.msk [vmem:[%s4274_s10 + $0x18] sm:$0xff] %vm316_vm0, %v2531_v60  ;;  %v2497_v1 = vadd.f32 %v3535_v61, %v4266_v41 }
 0x176   : > { %2548 = vst.msk [vmem:[%s4274_s10 + $0x10] sm:$0xff] %vm316_vm0, %v2530_v3  ;;  %v2496_v4 = vadd.f32 %v3536_v0, %v4266_v41  ;;  %v3477_v5 = vpop.f32.mrb[6].mxu0 }
 0x177   : > { %v2533_v6 = vadd.f32 %v2515_v63, %v2497_v1  ;;  %v3537_v7 = vadd.f32 %v3477_v5, %v3322_v36  ;;  %v2408_v8 = vpop.f32.mrb[7].mxu0  ;;  %v2527_v5 = vld [vmem:[%s4264_s15 + $0x88] sm:$0xff] }
 0x178   : > { %v2532_v9 = vadd.f32 %v2514_v2, %v2496_v4  ;;  %v3538_v11 = vadd.f32 %v2408_v8, %v1158_v37  ;;  %v2520_v37 = vld [vmem:[%s4264_s15 + $0x50] sm:$0xff]  ;;  %v2526_v8 = vld [vmem:[%s4264_s15 + $0x80] sm:$0xff] }
 0x179   : > { %2551 = vst.msk [vmem:[%s4274_s10 + $0x28] sm:$0xff] %vm316_vm0, %v2533_v6  ;;  %v2499_v12 = vadd.f32 %v3537_v7, %v4266_v41 }
 0x17a   : > { %2550 = vst.msk [vmem:[%s4274_s10 + $0x20] sm:$0xff] %vm316_vm0, %v2532_v9  ;;  %v2498_v14 = vadd.f32 %v3538_v11, %v4266_v41  ;;  %v3359_v15 = vpop.f32.mrb[10].mxu1  ;;  %v3480_v16 = vpop.f32.mrb[8].mxu0 }
 0x17b   : > { %v2535_v17 = vadd.f32 %v2517_v10, %v2499_v12  ;;  %v3539_v18 = vadd.f32 %v3480_v16, %v3325_v38  ;;  %v1428_v19 = vpop.f32.mrb[11].mxu1  ;;  %v2418_v20 = vpop.f32.mrb[9].mxu0 }
 0x17c   : > { %v2534_v21 = vadd.f32 %v2516_v13, %v2498_v14  ;;  %v3540_v23 = vadd.f32 %v2418_v20, %v1168_v39 }
 0x17d   : > { %2553 = vst.msk [vmem:[%s4274_s10 + $0x38] sm:$0xff] %vm316_vm0, %v2535_v17  ;;  %v2501_v24 = vadd.f32 %v3539_v18, %v4266_v41 }
 0x17e   : > { %2552 = vst.msk [vmem:[%s4274_s10 + $0x30] sm:$0xff] %vm316_vm0, %v2534_v21  ;;  %v2500_v26 = vadd.f32 %v3540_v23, %v4266_v41  ;;  %v3362_v27 = vpop.f32.mrb[12].mxu1  ;;  %v3483_v28 = vpop.f32.mrb[10].mxu0 }
 0x17f   : > { %v2537_v29 = vadd.f32 %v2519_v22, %v2501_v24  ;;  %v3541_v30 = vadd.f32 %v3483_v28, %v3359_v15  ;;  %v1438_v31 = vpop.f32.mrb[13].mxu1  ;;  %v2428_v32 = vpop.f32.mrb[11].mxu0 }
 0x180   : > { %v2536_v33 = vadd.f32 %v2518_v25, %v2500_v26  ;;  %v3542_v35 = vadd.f32 %v2428_v32, %v1428_v19 }
 0x181   : > { %2555 = vst.msk [vmem:[%s4274_s10 + $0x48] sm:$0xff] %vm316_vm0, %v2537_v29  ;;  %v2503_v36 = vadd.f32 %v3541_v30, %v4266_v41 }
 0x182   : > { %2554 = vst.msk [vmem:[%s4274_s10 + $0x40] sm:$0xff] %vm316_vm0, %v2536_v33  ;;  %v2502_v38 = vadd.f32 %v3542_v35, %v4266_v41  ;;  %v3365_v39 = vpop.f32.mrb[14].mxu1  ;;  %v3486_v40 = vpop.f32.mrb[12].mxu0 }
 0x183   : > { %v2539_v42 = vadd.f32 %v2521_v34, %v2503_v36  ;;  %v3543_v43 = vadd.f32 %v3486_v40, %v3362_v27  ;;  %v1448_v44 = vpop.f32.mrb[15].mxu1  ;;  %v2438_v45 = vpop.f32.mrb[13].mxu0 }
 0x184   : > { %v2538_v46 = vadd.f32 %v2520_v37, %v2502_v38  ;;  %v3544_v48 = vadd.f32 %v2438_v45, %v1438_v31 }
 0x185   : > { %2557 = vst.msk [vmem:[%s4274_s10 + $0x58] sm:$0xff] %vm316_vm0, %v2539_v42  ;;  %v2505_v49 = vadd.f32 %v3543_v43, %v4266_v41 }
 0x186   : > { %2556 = vst.msk [vmem:[%s4274_s10 + $0x50] sm:$0xff] %vm316_vm0, %v2538_v46  ;;  %v2504_v51 = vadd.f32 %v3544_v48, %v4266_v41  ;;  %v3368_v52 = vpop.f32.mrb[16].mxu1  ;;  %v3489_v53 = vpop.f32.mrb[14].mxu0 }
 0x187   : > { %v2541_v54 = vadd.f32 %v2523_v47, %v2505_v49  ;;  %v3545_v55 = vadd.f32 %v3489_v53, %v3365_v39  ;;  %v1458_v56 = vpop.f32.mrb[17].mxu1  ;;  %v2448_v57 = vpop.f32.mrb[15].mxu0 }
 0x188   : > { %v2540_v58 = vadd.f32 %v2522_v50, %v2504_v51  ;;  %v3546_v60 = vadd.f32 %v2448_v57, %v1448_v44 }
 0x189   : > { %2559 = vst.msk [vmem:[%s4274_s10 + $0x68] sm:$0xff] %vm316_vm0, %v2541_v54  ;;  %v2507_v61 = vadd.f32 %v3545_v55, %v4266_v41 }
 0x18a   : > { %2558 = vst.msk [vmem:[%s4274_s10 + $0x60] sm:$0xff] %vm316_vm0, %v2540_v58  ;;  %v2506_v3 = vadd.f32 %v3546_v60, %v4266_v41  ;;  %v3492_v63 = vpop.f32.mrb[16].mxu0 }
 0x18b   : > { %v2543_v0 = vadd.f32 %v2525_v59, %v2507_v61  ;;  %v3547_v1 = vadd.f32 %v3492_v63, %v3368_v52  ;;  %v2458_v2 = vpop.f32.mrb[17].mxu0 }
 0x18c   : > { %v2542_v4 = vadd.f32 %v2524_v62, %v2506_v3  ;;  %v3548_v6 = vadd.f32 %v2458_v2, %v1458_v56 }
 0x18d   : > { %2561 = vst.msk [vmem:[%s4274_s10 + $0x78] sm:$0xff] %vm316_vm0, %v2543_v0  ;;  %v2509_v7 = vadd.f32 %v3547_v1, %v4266_v41 }
 0x18e   : > { %2560 = vst.msk [vmem:[%s4274_s10 + $0x70] sm:$0xff] %vm316_vm0, %v2542_v4  ;;  %v2508_v9 = vadd.f32 %v3548_v6, %v4266_v41 }
 0x18f   : > { %v2545_v10 = vadd.f32 %v2527_v5, %v2509_v7 }
 0x190   : > { %v2544_v11 = vadd.f32 %v2526_v8, %v2508_v9 }
 0x191   : > { %2563 = vst.msk [vmem:[%s4274_s10 + $0x88] sm:$0xff] %vm316_vm0, %v2545_v10 }
 0x192   : > { %2562 = vst.msk [vmem:[%s4274_s10 + $0x80] sm:$0xff] %vm316_vm0, %v2544_v11 }
 0x193 PF: > { %s14_s19 = sadd.s32 1, %s3755_s19   ;;  %s4365_s15 = smov %s3747_s17 }
 0x194   : > { %p11_p7 = scmp.ge.s32.totalorder %s14_s19, 18   ;;  %s4366_s16 = smov %s3751_s18 }
 0x195   : > { %s4367_s17 = smov %s4370_s20  ;;  %s4368_s18 = smov %s4374_s21 }
 0x196   :  { %13 = sbr.rel (!%p11_p7) target bundleno = 3 (0x3), region = 89 }

// kernel: down_block_3d.17
= control target key start
LH: loop header
LB: loop body
LE: loop exit
PB: predicated region body
PF: predicated region fallthrough
CT: control target
= control target key end

     0   :  { %s2433_s12 = smov 0   ;;  %s2435_s13 = smov 0   ;;  %s2925_s0 = inlined_call_operand.vmem [shape: f32[8,328,16], index: 0, kind: input, shape index: {}]   ;;  %s2926_s1 = inlined_call_operand.vmem [shape: f32[9,16,16], index: 1, kind: input, shape index: {}]   ;;  %s2927_s2 = inlined_call_operand.vmem [shape: f32[8,1,16], index: 2, kind: input, shape index: {}]   ;;  %s2928_s3 = inlined_call_operand.vmem [shape: f32[8,72,16], index: 3, kind: output, shape index: {}]  }
   0x1   :  { %s2437_s14 = smov 0  }
   0x2 LB: > { %s25_s15 = sadd.s32 1, %s2404_s13  ;;  %p1775_p0 = scmp.ge.s32.totalorder %s2408_s14, 1  ;;  %s2408_s14 = sphi %s2437_s14, %s13_s14   ;;  %s2404_s13 = sphi %s2435_s13, %s2930_s13   ;;  %s2400_s12 = sphi %s2433_s12, %s2929_s12  }
   0x3   : > { %p27_p1 = scmp.ge.s32.totalorder %s25_s15, 8  ;;  %p159_p2 = scmp.lt.s32.totalorder %s2408_s14, 9 }
   0x5   : > { %s2932_s15 = smov (%p27_p1, %s25_s15), 0  ;;  %p160_p3 = pnand %p1775_p0, %p159_p2 }
   0x6   : > { %v1787_v0 = vld [vmem:[%s2926_s1 + $0x10] sm:$0xff] (!%p160_p3)  ;;  %v1788_v1 = vld [vmem:[%s2926_s1 + $0x18] sm:$0xff] (!%p160_p3)  ;;  %p190_p4 = scmp.lt.s32.totalorder (!%p160_p3), %s2400_s12, 7  ;;  %v2410_v2 = vmov (!%p160_p3), 0.0|0.0   ;;  %v1816_v4 = vld [vmem:[%s2926_s1 + $0x20] sm:$0xff] (!%p160_p3)  ;;  %vm2411_vm0 = vmmov (!%p160_p3), 0  }
   0x7   : > { %163 = sbr.rel (%p160_p3) target bundleno = 396 (0x18c), region = 32  ;;  %2328 = vmatprep.subr.bf16.mxu0 (!%p160_p3), %v2410_v2  ;;  %2355 = vmatprep.subr.bf16.mxu1 (!%p160_p3), %v2410_v2  ;;  %v2329_v3 = vpack.c.bf16 (!%p160_p3), %v1788_v1, %v1787_v0  ;;  %v2412_v5 = vmov (!%p160_p3), 0.0   ;;  %v1817_v6 = vld [vmem:[%s2926_s1 + $0x28] sm:$0xff] (!%p160_p3)  ;;  %v219_v7 = vld [vmem:[%s2926_s1] sm:$0xff] (!%p160_p3)  ;;  %vm235_vm1 = vcmask (!%p160_p3), 130048   ;;  %v1836_v19 = vld [vmem:[%s2926_s1 + $0x30] sm:$0xff] (!%p160_p3) }
   0x8   : > { %2053 = vmatprep.mubr.msk.f32.mxu0 (!%p160_p3), %vm2411_vm0, %v2412_v5  ;;  %2068 = vmatprep.mubr.msk.f32.mxu1 (!%p160_p3), %vm2411_vm0, %v2412_v5  ;;  %v220_v8 = vld [vmem:[%s2926_s1 + $0x8] sm:$0xff] (!%p160_p3)  ;;  %v2335_v9 = vpack.c.bf16 (!%p160_p3), %v1817_v6, %v1816_v4  ;;  %v1837_v20 = vld [vmem:[%s2926_s1 + $0x38] sm:$0xff] (!%p160_p3)  ;;  %v1856_v24 = vld [vmem:[%s2926_s1 + $0x40] sm:$0xff] (!%p160_p3) }
   0x9   : > { %2330 = vmatpush3.bf16.msra.mxu0 (!%p160_p3), %v2329_v3  ;;  %2356 = vmatpush3.bf16.msra.mxu1 (!%p160_p3), %v2329_v3  ;;  %v2332_v10 = vpack.c.bf16 (!%p160_p3), %v220_v8, %v219_v7  ;;  %v2338_v23 = vpack.c.bf16 (!%p160_p3), %v1837_v20, %v1836_v19  ;;  %v1857_v25 = vld [vmem:[%s2926_s1 + $0x48] sm:$0xff] (!%p160_p3)  ;;  %v1876_v43 = vld [vmem:[%s2926_s1 + $0x50] sm:$0xff] (!%p160_p3)  ;;  %v1877_v44 = vld [vmem:[%s2926_s1 + $0x58] sm:$0xff] (!%p160_p3) }
   0xa   : > { %2334 = vmatprep.subr.bf16.mxu0 (!%p160_p3), %v2410_v2  ;;  %2331 = vmatprep.subr.bf16.mxu1 (!%p160_p3), %v2410_v2  ;;  %v2341_v28 = vpack.c.bf16 (!%p160_p3), %v1857_v25, %v1856_v24  ;;  %v2344_v47 = vpack.c.bf16 (!%p160_p3), %v1877_v44, %v1876_v43  ;;  %v1896_v48 = vld [vmem:[%s2926_s1 + $0x60] sm:$0xff] (!%p160_p3)  ;;  %v1897_v49 = vld [vmem:[%s2926_s1 + $0x68] sm:$0xff] (!%p160_p3)  ;;  %v1916_v3 = vld [vmem:[%s2926_s1 + $0x70] sm:$0xff] (!%p160_p3) }
   0xb   : > { %v2347_v52 = vpack.c.bf16 (!%p160_p3), %v1897_v49, %v1896_v48  ;;  %v1917_v4 = vld [vmem:[%s2926_s1 + $0x78] sm:$0xff] (!%p160_p3) }
   0xc   : > { %v2350_v8 = vpack.c.bf16 (!%p160_p3), %v1917_v4, %v1916_v3 }
   0xe   : > { %s2934_s12 = smov (!%p190_p4, %s2400_s12), 7 }
   0xf   : > { %s2357_s28 = smul.u32 328, %s2934_s12  ;;  %s197_s8 = scalar_lea.vmem %s2927_s2, %s2934_s12 }
  0x10   : > { %s2358_s9 = smul.u32 72, %s2934_s12 }
  0x11   : > { %s2483_s4 = scalar_lea.vmem %s2925_s0, %s2357_s28 }
  0x12   : > { %v1778_v11 = vld [vmem:[%s2483_s4 + $0x51] sm:$0xff]  ;;  %v1783_v12 = vld [vmem:[%s2483_s4 + $0x79] sm:$0xff]  ;;  %v1784_v14 = vld [vmem:[%s2483_s4 + $0x81] sm:$0xff]  ;;  %s2885_s16 = scalar_lea.vmem %s2928_s3, %s2358_s9 }
  0x13   : > { %2054 = vmatmul.mubr.msk.f32.vlgmr.msra.gmra.mrb[0].mxu0 %vm235_vm1, %v1778_v11  ;;  %2069 = vmatmul.mubr.msk.f32.vlgmr.msra.gmra.mrb[0].mxu1 %vm235_vm1, %v1783_v12  ;;  %v1779_v13 = vld [vmem:[%s2483_s4 + $0x59] sm:$0xff]  ;;  %v1780_v15 = vld [vmem:[%s2483_s4 + $0x61] sm:$0xff]  ;;  %v1785_v16 = vld [vmem:[%s2483_s4 + $0x89] sm:$0xff] }
  0x14   : > { %2336 = vmatpush3.bf16.msra.mxu0 %v2335_v9  ;;  %2333 = vmatpush3.bf16.msra.mxu1 %v2332_v10  ;;  %v1781_v17 = vld [vmem:[%s2483_s4 + $0x69] sm:$0xff]  ;;  %v1786_v18 = vld [vmem:[%s2483_s4 + $0x91] sm:$0xff]  ;;  %v210_v22 = vld [vmem:[%s2483_s4] sm:$0xff] }
  0x15   : > { %2056 = vmatprep.mubr.msk.f32.mxu0 %vm2411_vm0, %v2412_v5  ;;  %2071 = vmatprep.mubr.msk.f32.mxu1 %vm2411_vm0, %v2412_v5  ;;  %v1782_v21 = vld [vmem:[%s2483_s4 + $0x71] sm:$0xff]  ;;  %v211_v26 = vld [vmem:[%s2483_s4 + $0x8] sm:$0xff]  ;;  %v214_v33 = vld [vmem:[%s2483_s4 + $0x20] sm:$0xff] }
  0x16   : > { %2337 = vmatprep.subr.bf16.mxu1 %v2410_v2  ;;  %2340 = vmatprep.subr.bf16.mxu0 %v2410_v2  ;;  %v1807_v27 = vld [vmem:[%s2483_s4 + $0x1] sm:$0xff]  ;;  %v212_v29 = vld [vmem:[%s2483_s4 + $0x10] sm:$0xff]  ;;  %v213_v31 = vld [vmem:[%s2483_s4 + $0x18] sm:$0xff] }
  0x17   : > { %2057 = vmatmul.mubr.msk.f32.gmra.mrb[2].mxu0 %vm235_vm1, %v1779_v13  ;;  %2072 = vmatmul.mubr.msk.f32.gmra.mrb[2].mxu1 %vm235_vm1, %v1784_v14  ;;  %v2548_v30 = vld [vmem:[%s2483_s4 + $0x9] sm:$0xff]  ;;  %v2562_v32 = vld [vmem:[%s2483_s4 + $0x11] sm:$0xff]  ;;  %v2573_v34 = vld [vmem:[%s2483_s4 + $0x19] sm:$0xff] }
  0x18   : > { %2059 = vmatprep.mubr.msk.f32.mxu0 %vm2411_vm0, %v2412_v5  ;;  %2074 = vmatprep.mubr.msk.f32.mxu1 %vm2411_vm0, %v2412_v5  ;;  %v215_v35 = vld [vmem:[%s2483_s4 + $0x28] sm:$0xff]  ;;  %v216_v37 = vld [vmem:[%s2483_s4 + $0x30] sm:$0xff]  ;;  %v217_v39 = vld [vmem:[%s2483_s4 + $0x38] sm:$0xff] }
  0x19   : > { %v2584_v36 = vld [vmem:[%s2483_s4 + $0x21] sm:$0xff]  ;;  %v2595_v38 = vld [vmem:[%s2483_s4 + $0x29] sm:$0xff]  ;;  %v2606_v40 = vld [vmem:[%s2483_s4 + $0x31] sm:$0xff] }
  0x1a   : > { %v218_v41 = vld [vmem:[%s2483_s4 + $0x40] sm:$0xff]  ;;  %v1828_v50 = vld [vmem:[%s2483_s4 + $0xaa] sm:$0xff]  ;;  %v1847_v51 = vld [vmem:[%s2483_s4 + $0xf3] sm:$0xff] }
  0x1b   : > { %2060 = vmatmul.mubr.msk.f32.gmra.mrb[4].mxu0 %vm235_vm1, %v1780_v15  ;;  %2075 = vmatmul.mubr.msk.f32.gmra.mrb[4].mxu1 %vm235_vm1, %v1785_v16  ;;  %v2617_v42 = vld [vmem:[%s2483_s4 + $0x39] sm:$0xff]  ;;  %v2633_v45 = vld [vmem:[%s2483_s4 + $0x41] sm:$0xff]  ;;  %v1850_v58 = vld [vmem:[%s2483_s4 + $0x10b] sm:$0xff] }
  0x1c   : > { %2062 = vmatprep.mubr.msk.f32.mxu0 %vm2411_vm0, %v2412_v5  ;;  %2077 = vmatprep.mubr.msk.f32.mxu1 %vm2411_vm0, %v2412_v5  ;;  %v1827_v46 = vld [vmem:[%s2483_s4 + $0xa2] sm:$0xff]  ;;  %v1829_v53 = vld [vmem:[%s2483_s4 + $0xb2] sm:$0xff]  ;;  %v1830_v55 = vld [vmem:[%s2483_s4 + $0xba] sm:$0xff] }
  0x1d   : > { %v1848_v54 = vld [vmem:[%s2483_s4 + $0xfb] sm:$0xff]  ;;  %v1849_v56 = vld [vmem:[%s2483_s4 + $0x103] sm:$0xff]  ;;  %v1851_v60 = vld [vmem:[%s2483_s4 + $0x113] sm:$0xff] }
  0x1e   : > { %v1831_v57 = vld [vmem:[%s2483_s4 + $0xc2] sm:$0xff]  ;;  %v1832_v59 = vld [vmem:[%s2483_s4 + $0xca] sm:$0xff]  ;;  %v1833_v61 = vld [vmem:[%s2483_s4 + $0xd2] sm:$0xff] }
  0x1f   : > { %2063 = vmatmul.mubr.msk.f32.gmra.mrb[6].mxu0 %vm235_vm1, %v1781_v17  ;;  %2078 = vmatmul.mubr.msk.f32.gmra.mrb[6].mxu1 %vm235_vm1, %v1786_v18  ;;  %v1852_v62 = vld [vmem:[%s2483_s4 + $0x11b] sm:$0xff]  ;;  %v1853_v0 = vld [vmem:[%s2483_s4 + $0x123] sm:$0xff]  ;;  %v1855_v6 = vld [vmem:[%s2483_s4 + $0x133] sm:$0xff] }
  0x20   : > { %2065 = vmatprep.mubr.msk.f32.mxu0 %vm2411_vm0, %v2412_v5  ;;  %2084 = vmatprep.mubr.msk.f32.mxu1 %vm2411_vm0, %v2412_v5  ;;  %v1834_v63 = vld [vmem:[%s2483_s4 + $0xda] sm:$0xff]  ;;  %v1835_v1 = vld [vmem:[%s2483_s4 + $0xe2] sm:$0xff]  ;;  %v1868_v11 = vld [vmem:[%s2483_s4 + $0xab] sm:$0xff] }
  0x21   : > { %v1867_v7 = vld [vmem:[%s2483_s4 + $0xa3] sm:$0xff]  ;;  %v1869_v13 = vld [vmem:[%s2483_s4 + $0xb3] sm:$0xff]  ;;  %v1870_v14 = vld [vmem:[%s2483_s4 + $0xbb] sm:$0xff] }
  0x22   : > { %v1936_v9 = vld [vmem:[%s2926_s1 + $0x80] sm:$0xff]  ;;  %v1937_v10 = vld [vmem:[%s2926_s1 + $0x88] sm:$0xff]  ;;  %v1873_v17 = vld [vmem:[%s2483_s4 + $0xd3] sm:$0xff] }
  0x23   : > { %2066 = vmatmul.mubr.msk.f32.gmra.mrb[8].mxu0 %vm235_vm1, %v1782_v21  ;;  %2085 = vmatmul.mubr.msk.f32.vlgmr.msra.gmra.mrb[8].mxu1 %vm235_vm1, %v210_v22  ;;  %v2353_v12 = vpack.c.bf16 %v1937_v10, %v1936_v9  ;;  %v1871_v15 = vld [vmem:[%s2483_s4 + $0xc3] sm:$0xff]  ;;  %v1872_v16 = vld [vmem:[%s2483_s4 + $0xcb] sm:$0xff]  ;;  %v1874_v18 = vld [vmem:[%s2483_s4 + $0xdb] sm:$0xff] }
  0x24   : > { %2339 = vmatpush3.bf16.msra.mxu1 %v2338_v23  ;;  %2087 = vmatprep.mubr.msk.f32.mxu1 %vm2411_vm0, %v2412_v5  ;;  %v1875_v19 = vld [vmem:[%s2483_s4 + $0xe3] sm:$0xff]  ;;  %v1907_v21 = vld [vmem:[%s2483_s4 + $0x5a] sm:$0xff]  ;;  %v1928_v25 = vld [vmem:[%s2483_s4 + $0x12] sm:$0xff] }
  0x25   : > { %2115 = vmatprep.mubr.msk.f32.mxu0 %vm2411_vm0, %v2412_v5  ;;  %2343 = vmatprep.subr.bf16.mxu1 %v2410_v2  ;;  %v1895_v20 = vld [vmem:[%s2483_s4 + $0x49] sm:$0xff] }
  0x26   : > { %v1908_v22 = vld [vmem:[%s2483_s4 + $0x62] sm:$0xff]  ;;  %v1927_v23 = vld [vmem:[%s2483_s4 + $0xa] sm:$0xff] }
  0x27   : > { %2088 = vmatmul.mubr.msk.f32.gmra.mrb[10].mxu1 %vm235_vm1, %v211_v26  ;;  %2116 = vmatmul.mubr.msk.f32.vlgmr.msra.gmra.mrb[10].mxu0 %vm235_vm1, %v1807_v27  ;;  %v1909_v24 = vld [vmem:[%s2483_s4 + $0x6a] sm:$0xff]  ;;  %v1910_v26 = vld [vmem:[%s2483_s4 + $0x72] sm:$0xff]  ;;  %v1929_v27 = vld [vmem:[%s2483_s4 + $0x1a] sm:$0xff] }
  0x28   : > { %2342 = vmatpush3.bf16.msra.mxu0 %v2341_v28  ;;  %2090 = vmatprep.mubr.msk.f32.mxu1 %vm2411_vm0, %v2412_v5  ;;  %v1911_v28 = vld [vmem:[%s2483_s4 + $0x7a] sm:$0xff] }
  0x29   : > { %2118 = vmatprep.mubr.msk.f32.mxu0 %vm2411_vm0, %v2412_v5  ;;  %2346 = vmatprep.subr.bf16.mxu0 %v2410_v2 }
  0x2b   : > { %2091 = vmatmul.mubr.msk.f32.gmra.mrb[12].mxu1 %vm235_vm1, %v212_v29  ;;  %2119 = vmatmul.mubr.msk.f32.gmra.mrb[12].mxu0 %vm235_vm1, %v2548_v30  ;;  %v1930_v29 = vld [vmem:[%s2483_s4 + $0x22] sm:$0xff] }
  0x2c   : > { %2093 = vmatprep.mubr.msk.f32.mxu1 %vm2411_vm0, %v2412_v5  ;;  %2121 = vmatprep.mubr.msk.f32.mxu0 %vm2411_vm0, %v2412_v5 }
  0x2f   : > { %2094 = vmatmul.mubr.msk.f32.gmra.mrb[14].mxu1 %vm235_vm1, %v213_v31  ;;  %2122 = vmatmul.mubr.msk.f32.gmra.mrb[14].mxu0 %vm235_vm1, %v2562_v32  ;;  %v1931_v31 = vld [vmem:[%s2483_s4 + $0x2a] sm:$0xff] }
  0x30   : > { %2096 = vmatprep.mubr.msk.f32.mxu1 %vm2411_vm0, %v2412_v5  ;;  %2124 = vmatprep.mubr.msk.f32.mxu0 %vm2411_vm0, %v2412_v5 }
  0x33   : > { %2097 = vmatmul.mubr.msk.f32.gmra.mrb[16].mxu1 %vm235_vm1, %v214_v33  ;;  %2125 = vmatmul.mubr.msk.f32.gmra.mrb[16].mxu0 %vm235_vm1, %v2573_v34  ;;  %v1932_v33 = vld [vmem:[%s2483_s4 + $0x32] sm:$0xff] }
  0x34   : > { %2099 = vmatprep.mubr.msk.f32.mxu1 %vm2411_vm0, %v2412_v5  ;;  %2127 = vmatprep.mubr.msk.f32.mxu0 %vm2411_vm0, %v2412_v5 }
  0x37   : > { %2100 = vmatmul.mubr.msk.f32.gmra.mrb[18].mxu1 %vm235_vm1, %v215_v35  ;;  %2128 = vmatmul.mubr.msk.f32.gmra.mrb[18].mxu0 %vm235_vm1, %v2584_v36  ;;  %v1933_v35 = vld [vmem:[%s2483_s4 + $0x3a] sm:$0xff] }
  0x38   : > { %2102 = vmatprep.mubr.msk.f32.mxu1 %vm2411_vm0, %v2412_v5  ;;  %2130 = vmatprep.mubr.msk.f32.mxu0 %vm2411_vm0, %v2412_v5 }
  0x3b   : > { %2103 = vmatmul.mubr.msk.f32.gmra.mrb[20].mxu1 %vm235_vm1, %v216_v37  ;;  %2131 = vmatmul.mubr.msk.f32.gmra.mrb[20].mxu0 %vm235_vm1, %v2595_v38  ;;  %v1934_v37 = vld [vmem:[%s2483_s4 + $0x42] sm:$0xff] }
  0x3c   : > { %2105 = vmatprep.mubr.msk.f32.mxu1 %vm2411_vm0, %v2412_v5  ;;  %2133 = vmatprep.mubr.msk.f32.mxu0 %vm2411_vm0, %v2412_v5 }
  0x3f   : > { %2106 = vmatmul.mubr.msk.f32.gmra.mrb[22].mxu1 %vm235_vm1, %v217_v39  ;;  %2134 = vmatmul.mubr.msk.f32.gmra.mrb[22].mxu0 %vm235_vm1, %v2606_v40 }
  0x40   : > { %2108 = vmatprep.mubr.msk.f32.mxu1 %vm2411_vm0, %v2412_v5  ;;  %2136 = vmatprep.mubr.msk.f32.mxu0 %vm2411_vm0, %v2412_v5 }
  0x43   : > { %2109 = vmatmul.mubr.msk.f32.gmra.mrb[24].mxu1 %vm235_vm1, %v218_v41  ;;  %2137 = vmatmul.mubr.msk.f32.gmra.mrb[24].mxu0 %vm235_vm1, %v2617_v42 }
  0x44   : > { %2139 = vmatprep.mubr.msk.f32.mxu0 %vm2411_vm0, %v2412_v5  ;;  %2146 = vmatprep.mubr.msk.f32.mxu1 %vm2411_vm0, %v2412_v5 }
  0x47   : > { %2140 = vmatmul.mubr.msk.f32.gmra.mrb[26].mxu0 %vm235_vm1, %v2633_v45  ;;  %2147 = vmatmul.mubr.msk.f32.vlgmr.msra.gmra.mrb[26].mxu1 %vm235_vm1, %v1827_v46 }
  0x48   : > { %2345 = vmatpush3.bf16.msra.mxu1 %v2344_v47  ;;  %2149 = vmatprep.mubr.msk.f32.mxu1 %vm2411_vm0, %v2412_v5 }
  0x49   : > { %2177 = vmatprep.mubr.msk.f32.mxu0 %vm2411_vm0, %v2412_v5  ;;  %2349 = vmatprep.subr.bf16.mxu1 %v2410_v2 }
  0x4b   : > { %2150 = vmatmul.mubr.msk.f32.gmra.mrb[28].mxu1 %vm235_vm1, %v1828_v50  ;;  %2178 = vmatmul.mubr.msk.f32.vlgmr.msra.gmra.mrb[28].mxu0 %vm235_vm1, %v1847_v51 }
  0x4c   : > { %2348 = vmatpush3.bf16.msra.mxu0 %v2347_v52  ;;  %2152 = vmatprep.mubr.msk.f32.mxu1 %vm2411_vm0, %v2412_v5 }
  0x4d   : > { %2180 = vmatprep.mubr.msk.f32.mxu0 %vm2411_vm0, %v2412_v5  ;;  %2352 = vmatprep.subr.bf16.mxu0 %v2410_v2  ;;  %v1854_v2 = vld [vmem:[%s2483_s4 + $0x12b] sm:$0xff] }
  0x4f   : > { %2153 = vmatmul.mubr.msk.f32.gmra.mrb[30].mxu1 %vm235_vm1, %v1829_v53  ;;  %2181 = vmatmul.mubr.msk.f32.gmra.mrb[30].mxu0 %vm235_vm1, %v1848_v54 }
  0x50   : > { %2155 = vmatprep.mubr.msk.f32.mxu1 %vm2411_vm0, %v2412_v5  ;;  %2183 = vmatprep.mubr.msk.f32.mxu0 %vm2411_vm0, %v2412_v5 }
  0x53   : > { %2156 = vmatmul.mubr.msk.f32.gmra.mrb[32].mxu1 %vm235_vm1, %v1830_v55  ;;  %2184 = vmatmul.mubr.msk.f32.gmra.mrb[32].mxu0 %vm235_vm1, %v1849_v56 }
  0x54   : > { %2158 = vmatprep.mubr.msk.f32.mxu1 %vm2411_vm0, %v2412_v5  ;;  %2186 = vmatprep.mubr.msk.f32.mxu0 %vm2411_vm0, %v2412_v5 }
  0x57   : > { %2159 = vmatmul.mubr.msk.f32.gmra.mrb[34].mxu1 %vm235_vm1, %v1831_v57  ;;  %2187 = vmatmul.mubr.msk.f32.gmra.mrb[34].mxu0 %vm235_vm1, %v1850_v58 }
  0x58   : > { %2161 = vmatprep.mubr.msk.f32.mxu1 %vm2411_vm0, %v2412_v5  ;;  %2189 = vmatprep.mubr.msk.f32.mxu0 %vm2411_vm0, %v2412_v5 }
  0x5b   : > { %2162 = vmatmul.mubr.msk.f32.gmra.mrb[36].mxu1 %vm235_vm1, %v1832_v59  ;;  %2190 = vmatmul.mubr.msk.f32.gmra.mrb[36].mxu0 %vm235_vm1, %v1851_v60 }
  0x5c   : > { %2164 = vmatprep.mubr.msk.f32.mxu1 %vm2411_vm0, %v2412_v5  ;;  %2192 = vmatprep.mubr.msk.f32.mxu0 %vm2411_vm0, %v2412_v5 }
  0x5f   : > { %2165 = vmatmul.mubr.msk.f32.gmra.mrb[38].mxu1 %vm235_vm1, %v1833_v61  ;;  %2193 = vmatmul.mubr.msk.f32.gmra.mrb[38].mxu0 %vm235_vm1, %v1852_v62 }
  0x60   : > { %2167 = vmatprep.mubr.msk.f32.mxu1 %vm2411_vm0, %v2412_v5  ;;  %2195 = vmatprep.mubr.msk.f32.mxu0 %vm2411_vm0, %v2412_v5 }
  0x63   : > { %2168 = vmatmul.mubr.msk.f32.gmra.mrb[40].mxu1 %vm235_vm1, %v1834_v63  ;;  %2196 = vmatmul.mubr.msk.f32.gmra.mrb[40].mxu0 %vm235_vm1, %v1853_v0 }
  0x64   : > { %2170 = vmatprep.mubr.msk.f32.mxu1 %vm2411_vm0, %v2412_v5  ;;  %2198 = vmatprep.mubr.msk.f32.mxu0 %vm2411_vm0, %v2412_v5 }
  0x67   : > { %2171 = vmatmul.mubr.msk.f32.gmra.mrb[42].mxu1 %vm235_vm1, %v1835_v1  ;;  %2199 = vmatmul.mubr.msk.f32.gmra.mrb[42].mxu0 %vm235_vm1, %v1854_v2 }
  0x68   : > { %2201 = vmatprep.mubr.msk.f32.mxu0 %vm2411_vm0, %v2412_v5  ;;  %2208 = vmatprep.mubr.msk.f32.mxu1 %vm2411_vm0, %v2412_v5 }
  0x6b   : > { %2202 = vmatmul.mubr.msk.f32.gmra.mrb[44].mxu0 %vm235_vm1, %v1855_v6  ;;  %2209 = vmatmul.mubr.msk.f32.vlgmr.msra.gmra.mrb[44].mxu1 %vm235_vm1, %v1867_v7 }
  0x6c   : > { %2351 = vmatpush3.bf16.msra.mxu1 %v2350_v8  ;;  %2211 = vmatprep.mubr.msk.f32.mxu1 %vm2411_vm0, %v2412_v5 }
  0x6d   : > { %2239 = vmatprep.mubr.msk.f32.mxu0 %vm2411_vm0, %v2412_v5 }
  0x6f   : > { %2212 = vmatmul.mubr.msk.f32.gmra.mrb[46].mxu1 %vm235_vm1, %v1868_v11  ;;  %2240 = vmatmul.mubr.msk.f32.vlgmr.msra.gmra.mrb[46].mxu0 %vm235_vm1, %v2548_v30  ;;  %v1912_v30 = vld [vmem:[%s2483_s4 + $0x82] sm:$0xff] }
  0x70   : > { %2354 = vmatpush3.bf16.msra.mxu0 %v2353_v12  ;;  %2214 = vmatprep.mubr.msk.f32.mxu1 %vm2411_vm0, %v2412_v5 }
  0x71   : > { %2242 = vmatprep.mubr.msk.f32.mxu0 %vm2411_vm0, %v2412_v5 }
  0x73   : > { %2215 = vmatmul.mubr.msk.f32.gmra.mrb[48].mxu1 %vm235_vm1, %v1869_v13  ;;  %2243 = vmatmul.mubr.msk.f32.gmra.mrb[48].mxu0 %vm235_vm1, %v2562_v32  ;;  %v1913_v32 = vld [vmem:[%s2483_s4 + $0x8a] sm:$0xff] }
  0x74   : > { %2217 = vmatprep.mubr.msk.f32.mxu1 %vm2411_vm0, %v2412_v5  ;;  %2245 = vmatprep.mubr.msk.f32.mxu0 %vm2411_vm0, %v2412_v5 }
  0x77   : > { %2218 = vmatmul.mubr.msk.f32.gmra.mrb[50].mxu1 %vm235_vm1, %v1870_v14  ;;  %2246 = vmatmul.mubr.msk.f32.gmra.mrb[50].mxu0 %vm235_vm1, %v2573_v34  ;;  %v1914_v34 = vld [vmem:[%s2483_s4 + $0x92] sm:$0xff] }
  0x78   : > { %2220 = vmatprep.mubr.msk.f32.mxu1 %vm2411_vm0, %v2412_v5  ;;  %2248 = vmatprep.mubr.msk.f32.mxu0 %vm2411_vm0, %v2412_v5 }
  0x7b   : > { %2221 = vmatmul.mubr.msk.f32.gmra.mrb[52].mxu1 %vm235_vm1, %v1871_v15  ;;  %2249 = vmatmul.mubr.msk.f32.gmra.mrb[52].mxu0 %vm235_vm1, %v2584_v36  ;;  %v1915_v36 = vld [vmem:[%s2483_s4 + $0x9a] sm:$0xff] }
  0x7c   : > { %2223 = vmatprep.mubr.msk.f32.mxu1 %vm2411_vm0, %v2412_v5  ;;  %2251 = vmatprep.mubr.msk.f32.mxu0 %vm2411_vm0, %v2412_v5 }
  0x7f   : > { %2224 = vmatmul.mubr.msk.f32.gmra.mrb[54].mxu1 %vm235_vm1, %v1872_v16  ;;  %2252 = vmatmul.mubr.msk.f32.gmra.mrb[54].mxu0 %vm235_vm1, %v2595_v38  ;;  %v1935_v38 = vld [vmem:[%s2483_s4 + $0x4a] sm:$0xff] }
  0x80   : > { %2226 = vmatprep.mubr.msk.f32.mxu1 %vm2411_vm0, %v2412_v5  ;;  %2254 = vmatprep.mubr.msk.f32.mxu0 %vm2411_vm0, %v2412_v5 }
  0x83   : > { %2227 = vmatmul.mubr.msk.f32.gmra.mrb[56].mxu1 %vm235_vm1, %v1873_v17  ;;  %2255 = vmatmul.mubr.msk.f32.gmra.mrb[56].mxu0 %vm235_vm1, %v2606_v40 }
  0x84   : > { %2229 = vmatprep.mubr.msk.f32.mxu1 %vm2411_vm0, %v2412_v5  ;;  %2257 = vmatprep.mubr.msk.f32.mxu0 %vm2411_vm0, %v2412_v5 }
  0x87   : > { %2230 = vmatmul.mubr.msk.f32.gmra.mrb[58].mxu1 %vm235_vm1, %v1874_v18  ;;  %2258 = vmatmul.mubr.msk.f32.gmra.mrb[58].mxu0 %vm235_vm1, %v2617_v42 }
  0x88   : > { %2232 = vmatprep.mubr.msk.f32.mxu1 %vm2411_vm0, %v2412_v5  ;;  %2260 = vmatprep.mubr.msk.f32.mxu0 %vm2411_vm0, %v2412_v5 }
  0x8b   : > { %2233 = vmatmul.mubr.msk.f32.gmra.mrb[60].mxu1 %vm235_vm1, %v1875_v19  ;;  %2261 = vmatmul.mubr.msk.f32.gmra.mrb[60].mxu0 %vm235_vm1, %v2633_v45 }
  0x8c   : > { %2263 = vmatprep.mubr.msk.f32.mxu0 %vm2411_vm0, %v2412_v5  ;;  %2270 = vmatprep.mubr.msk.f32.mxu1 %vm2411_vm0, %v2412_v5 }
  0x8f   : > { %2264 = vmatmul.mubr.msk.f32.gmra.mrb[62].mxu0 %vm235_vm1, %v1895_v20  ;;  %2271 = vmatmul.mubr.msk.f32.vlgmr.msra.gmra.mrb[62].mxu1 %vm235_vm1, %v1907_v21 }
  0x90   : > { %2273 = vmatprep.mubr.msk.f32.mxu1 %vm2411_vm0, %v2412_v5  ;;  %2301 = vmatprep.mubr.msk.f32.mxu0 %vm2411_vm0, %v2412_v5 }
  0x93   : > { %2274 = vmatmul.mubr.msk.f32.gmra.mrb[64].mxu1 %vm235_vm1, %v1908_v22  ;;  %2302 = vmatmul.mubr.msk.f32.vlgmr.msra.gmra.mrb[64].mxu0 %vm235_vm1, %v1927_v23 }
  0x94   : > { %2276 = vmatprep.mubr.msk.f32.mxu1 %vm2411_vm0, %v2412_v5  ;;  %2304 = vmatprep.mubr.msk.f32.mxu0 %vm2411_vm0, %v2412_v5 }
  0x97   : > { %2277 = vmatmul.mubr.msk.f32.gmra.mrb[66].mxu1 %vm235_vm1, %v1909_v24  ;;  %2305 = vmatmul.mubr.msk.f32.gmra.mrb[66].mxu0 %vm235_vm1, %v1928_v25 }
  0x98   : > { %2279 = vmatprep.mubr.msk.f32.mxu1 %vm2411_vm0, %v2412_v5  ;;  %2307 = vmatprep.mubr.msk.f32.mxu0 %vm2411_vm0, %v2412_v5 }
  0x9b   : > { %2280 = vmatmul.mubr.msk.f32.gmra.mrb[68].mxu1 %vm235_vm1, %v1910_v26  ;;  %2308 = vmatmul.mubr.msk.f32.gmra.mrb[68].mxu0 %vm235_vm1, %v1929_v27 }
  0x9c   : > { %2282 = vmatprep.mubr.msk.f32.mxu1 %vm2411_vm0, %v2412_v5  ;;  %2310 = vmatprep.mubr.msk.f32.mxu0 %vm2411_vm0, %v2412_v5 }
  0x9f   : > { %2283 = vmatmul.mubr.msk.f32.gmra.mrb[70].mxu1 %vm235_vm1, %v1911_v28  ;;  %2311 = vmatmul.mubr.msk.f32.gmra.mrb[70].mxu0 %vm235_vm1, %v1930_v29 }
  0xa0   : > { %2285 = vmatprep.mubr.msk.f32.mxu1 %vm2411_vm0, %v2412_v5  ;;  %2313 = vmatprep.mubr.msk.f32.mxu0 %vm2411_vm0, %v2412_v5 }
  0xa3   : > { %2286 = vmatmul.mubr.msk.f32.gmra.mrb[72].mxu1 %vm235_vm1, %v1912_v30  ;;  %2314 = vmatmul.mubr.msk.f32.gmra.mrb[72].mxu0 %vm235_vm1, %v1931_v31 }
  0xa4   : > { %2288 = vmatprep.mubr.msk.f32.mxu1 %vm2411_vm0, %v2412_v5  ;;  %2316 = vmatprep.mubr.msk.f32.mxu0 %vm2411_vm0, %v2412_v5 }
  0xa7   : > { %2289 = vmatmul.mubr.msk.f32.gmra.mrb[74].mxu1 %vm235_vm1, %v1913_v32  ;;  %2317 = vmatmul.mubr.msk.f32.gmra.mrb[74].mxu0 %vm235_vm1, %v1932_v33 }
  0xa8   : > { %2291 = vmatprep.mubr.msk.f32.mxu1 %vm2411_vm0, %v2412_v5  ;;  %2319 = vmatprep.mubr.msk.f32.mxu0 %vm2411_vm0, %v2412_v5 }
  0xab   : > { %2292 = vmatmul.mubr.msk.f32.gmra.mrb[76].mxu1 %vm235_vm1, %v1914_v34  ;;  %2320 = vmatmul.mubr.msk.f32.gmra.mrb[76].mxu0 %vm235_vm1, %v1933_v35 }
  0xac   : > { %2294 = vmatprep.mubr.msk.f32.mxu1 %vm2411_vm0, %v2412_v5  ;;  %2322 = vmatprep.mubr.msk.f32.mxu0 %vm2411_vm0, %v2412_v5 }
  0xaf   : > { %2295 = vmatmul.mubr.msk.f32.gmra.mrb[78].mxu1 %vm235_vm1, %v1915_v36  ;;  %2323 = vmatmul.mubr.msk.f32.gmra.mrb[78].mxu0 %vm235_vm1, %v1934_v37 }
  0xb0   : > { %2325 = vmatprep.mubr.msk.f32.mxu0 %vm2411_vm0, %v2412_v5 }
  0xb3   : > { %2326 = vmatmul.mubr.msk.f32.gmra.mrb[80].mxu0 %vm235_vm1, %v1935_v38 }
  0xe6   : > { %v329_v39 = vpop.f32.mrb[0].mxu0  ;;  %v354_v40 = vpop.f32.mrb[0].mxu1 }
  0xe7   : > { %v2055_v41 = vpop.f32.mrb[1].mxu0  ;;  %v2070_v42 = vpop.f32.mrb[1].mxu1 }
  0xea   : > { %v334_v43 = vpop.f32.mrb[2].mxu0  ;;  %v359_v44 = vpop.f32.mrb[2].mxu1 }
  0xeb   : > { %v2058_v45 = vpop.f32.mrb[3].mxu0  ;;  %v2073_v46 = vpop.f32.mrb[3].mxu1 }
  0xee   : > { %v339_v47 = vpop.f32.mrb[4].mxu0  ;;  %v364_v48 = vpop.f32.mrb[4].mxu1 }
  0xef   : > { %v2061_v49 = vpop.f32.mrb[5].mxu0  ;;  %v2076_v50 = vpop.f32.mrb[5].mxu1 }
  0xf2   : > { %v344_v51 = vpop.f32.mrb[6].mxu0  ;;  %v369_v52 = vpop.f32.mrb[6].mxu1 }
  0xf3   : > { %v2064_v53 = vpop.f32.mrb[7].mxu0  ;;  %v2079_v54 = vpop.f32.mrb[7].mxu1 }
  0xf6   : > { %v349_v5 = vpop.f32.mrb[8].mxu0  ;;  %v466_v55 = vpop.f32.mrb[8].mxu1 }
  0xf7   : > { %v467_v56 = vadd.f32 %v466_v55, %v329_v39  ;;  %v2067_v57 = vpop.f32.mrb[9].mxu0  ;;  %v2086_v58 = vpop.f32.mrb[9].mxu1 }
  0xfa   : > { %v471_v59 = vpop.f32.mrb[10].mxu1  ;;  %v617_v60 = vpop.f32.mrb[10].mxu0 }
  0xfb   : > { %v472_v61 = vadd.f32 %v471_v59, %v334_v43  ;;  %v661_v62 = vadd.f32 %v617_v60, %v467_v56  ;;  %v2117_v63 = vpop.f32.mrb[11].mxu0  ;;  %v2089_v0 = vpop.f32.mrb[11].mxu1 }
  0xfe   : > { %v476_v1 = vpop.f32.mrb[12].mxu1  ;;  %v622_v2 = vpop.f32.mrb[12].mxu0 }
  0xff   : > { %v477_v3 = vadd.f32 %v476_v1, %v339_v47  ;;  %v662_v4 = vadd.f32 %v622_v2, %v472_v61  ;;  %v2120_v6 = vpop.f32.mrb[13].mxu0  ;;  %v2092_v7 = vpop.f32.mrb[13].mxu1 }
 0x102   : > { %v481_v8 = vpop.f32.mrb[14].mxu1  ;;  %v627_v9 = vpop.f32.mrb[14].mxu0 }
 0x103   : > { %v482_v10 = vadd.f32 %v481_v8, %v344_v51  ;;  %v663_v11 = vadd.f32 %v627_v9, %v477_v3  ;;  %v2123_v12 = vpop.f32.mrb[15].mxu0  ;;  %v2095_v13 = vpop.f32.mrb[15].mxu1 }
 0x106   : > { %v486_v14 = vpop.f32.mrb[16].mxu1  ;;  %v632_v15 = vpop.f32.mrb[16].mxu0 }
 0x107   : > { %v487_v16 = vadd.f32 %v486_v14, %v349_v5  ;;  %v664_v17 = vadd.f32 %v632_v15, %v482_v10  ;;  %v2126_v18 = vpop.f32.mrb[17].mxu0  ;;  %v2098_v19 = vpop.f32.mrb[17].mxu1 }
 0x10a   : > { %v491_v20 = vpop.f32.mrb[18].mxu1  ;;  %v637_v21 = vpop.f32.mrb[18].mxu0 }
 0x10b   : > { %v492_v22 = vadd.f32 %v491_v20, %v354_v40  ;;  %v665_v23 = vadd.f32 %v637_v21, %v487_v16  ;;  %v2129_v24 = vpop.f32.mrb[19].mxu0  ;;  %v2101_v25 = vpop.f32.mrb[19].mxu1 }
 0x10e   : > { %v496_v26 = vpop.f32.mrb[20].mxu1  ;;  %v642_v27 = vpop.f32.mrb[20].mxu0 }
 0x10f   : > { %v497_v28 = vadd.f32 %v496_v26, %v359_v44  ;;  %v666_v29 = vadd.f32 %v642_v27, %v492_v22  ;;  %v2132_v30 = vpop.f32.mrb[21].mxu0  ;;  %v2104_v31 = vpop.f32.mrb[21].mxu1 }
 0x112   : > { %v501_v32 = vpop.f32.mrb[22].mxu1  ;;  %v647_v33 = vpop.f32.mrb[22].mxu0 }
 0x113   : > { %v502_v34 = vadd.f32 %v501_v32, %v364_v48  ;;  %v667_v35 = vadd.f32 %v647_v33, %v497_v28  ;;  %v2135_v36 = vpop.f32.mrb[23].mxu0  ;;  %v2107_v37 = vpop.f32.mrb[23].mxu1 }
 0x116   : > { %v506_v38 = vpop.f32.mrb[24].mxu1  ;;  %v652_v39 = vpop.f32.mrb[24].mxu0 }
 0x117   : > { %v507_v41 = vadd.f32 %v506_v38, %v369_v52  ;;  %v668_v42 = vadd.f32 %v652_v39, %v502_v34  ;;  %v2138_v40 = vpop.f32.mrb[25].mxu0  ;;  %v2110_v43 = vpop.f32.mrb[25].mxu1 }
 0x11a   : > { %v657_v45 = vpop.f32.mrb[26].mxu0  ;;  %v777_v46 = vpop.f32.mrb[26].mxu1 }
 0x11b   : > { %v669_v47 = vadd.f32 %v657_v45, %v507_v41  ;;  %v821_v49 = vadd.f32 %v777_v46, %v661_v62  ;;  %v2141_v44 = vpop.f32.mrb[27].mxu0  ;;  %v2148_v50 = vpop.f32.mrb[27].mxu1 }
 0x11e   : > { %v782_v51 = vpop.f32.mrb[28].mxu1  ;;  %v937_v53 = vpop.f32.mrb[28].mxu0 }
 0x11f   : > { %v822_v54 = vadd.f32 %v782_v51, %v662_v4  ;;  %v981_v5 = vadd.f32 %v937_v53, %v821_v49  ;;  %v2179_v48 = vpop.f32.mrb[29].mxu0  ;;  %v2151_v55 = vpop.f32.mrb[29].mxu1 }
 0x122   : > { %v787_v56 = vpop.f32.mrb[30].mxu1  ;;  %v942_v57 = vpop.f32.mrb[30].mxu0 }
 0x123   : > { %v823_v58 = vadd.f32 %v787_v56, %v663_v11  ;;  %v982_v59 = vadd.f32 %v942_v57, %v822_v54  ;;  %v2182_v52 = vpop.f32.mrb[31].mxu0  ;;  %v2154_v60 = vpop.f32.mrb[31].mxu1 }
 0x126   : > { %v792_v61 = vpop.f32.mrb[32].mxu1  ;;  %v947_v63 = vpop.f32.mrb[32].mxu0 }
 0x127   : > { %v824_v0 = vadd.f32 %v792_v61, %v664_v17  ;;  %v983_v1 = vadd.f32 %v947_v63, %v823_v58  ;;  %v2185_v2 = vpop.f32.mrb[33].mxu0  ;;  %v2157_v62 = vpop.f32.mrb[33].mxu1 }
 0x12a   : > { %v797_v3 = vpop.f32.mrb[34].mxu1  ;;  %v952_v6 = vpop.f32.mrb[34].mxu0 }
 0x12b   : > { %v825_v7 = vadd.f32 %v797_v3, %v665_v23  ;;  %v984_v8 = vadd.f32 %v952_v6, %v824_v0  ;;  %v2188_v4 = vpop.f32.mrb[35].mxu0  ;;  %v2160_v9 = vpop.f32.mrb[35].mxu1 }
 0x12e   : > { %v802_v10 = vpop.f32.mrb[36].mxu1  ;;  %v957_v12 = vpop.f32.mrb[36].mxu0 }
 0x12f   : > { %v826_v13 = vadd.f32 %v802_v10, %v666_v29  ;;  %v985_v14 = vadd.f32 %v957_v12, %v825_v7  ;;  %v2191_v11 = vpop.f32.mrb[37].mxu0  ;;  %v2163_v15 = vpop.f32.mrb[37].mxu1 }
 0x132   : > { %v807_v16 = vpop.f32.mrb[38].mxu1  ;;  %v962_v18 = vpop.f32.mrb[38].mxu0 }
 0x133   : > { %v827_v19 = vadd.f32 %v807_v16, %v667_v35  ;;  %v986_v20 = vadd.f32 %v962_v18, %v826_v13  ;;  %v2194_v17 = vpop.f32.mrb[39].mxu0  ;;  %v2166_v21 = vpop.f32.mrb[39].mxu1 }
 0x136   : > { %v812_v22 = vpop.f32.mrb[40].mxu1  ;;  %v967_v24 = vpop.f32.mrb[40].mxu0 }
 0x137   : > { %v828_v25 = vadd.f32 %v812_v22, %v668_v42  ;;  %v987_v26 = vadd.f32 %v967_v24, %v827_v19  ;;  %v2197_v23 = vpop.f32.mrb[41].mxu0  ;;  %v2169_v27 = vpop.f32.mrb[41].mxu1 }
 0x13a   : > { %v817_v28 = vpop.f32.mrb[42].mxu1  ;;  %v972_v30 = vpop.f32.mrb[42].mxu0 }
 0x13b   : > { %v829_v31 = vadd.f32 %v817_v28, %v669_v47  ;;  %v988_v32 = vadd.f32 %v972_v30, %v828_v25  ;;  %v2200_v29 = vpop.f32.mrb[43].mxu0  ;;  %v2172_v33 = vpop.f32.mrb[43].mxu1 }
 0x13c   : > { %v2880_v29 = vld [vmem:[%s197_s8] ss:$0 sm:$0xff] }
 0x13e   : > { %v977_v34 = vpop.f32.mrb[44].mxu0  ;;  %v1097_v36 = vpop.f32.mrb[44].mxu1 }
 0x13f   : > { %v989_v37 = vadd.f32 %v977_v34, %v829_v31  ;;  %v1141_v38 = vadd.f32 %v1097_v36, %v981_v5  ;;  %v2203_v35 = vpop.f32.mrb[45].mxu0  ;;  %v2210_v39 = vpop.f32.mrb[45].mxu1 }
 0x142   : > { %v1102_v41 = vpop.f32.mrb[46].mxu1  ;;  %v1257_v40 = vpop.f32.mrb[46].mxu0 }
 0x143   : > { %v1142_v43 = vadd.f32 %v1102_v41, %v982_v59  ;;  %v1301_v45 = vadd.f32 %v1257_v40, %v1141_v38  ;;  %v2241_v42 = vpop.f32.mrb[47].mxu0  ;;  %v2213_v46 = vpop.f32.mrb[47].mxu1 }
 0x146   : > { %v1107_v49 = vpop.f32.mrb[48].mxu1  ;;  %v1262_v44 = vpop.f32.mrb[48].mxu0 }
 0x147   : > { %v1143_v50 = vadd.f32 %v1107_v49, %v983_v1  ;;  %v1302_v51 = vadd.f32 %v1262_v44, %v1142_v43  ;;  %v2244_v47 = vpop.f32.mrb[49].mxu0  ;;  %v2216_v53 = vpop.f32.mrb[49].mxu1 }
 0x14a   : > { %v1112_v54 = vpop.f32.mrb[50].mxu1  ;;  %v1267_v48 = vpop.f32.mrb[50].mxu0 }
 0x14b   : > { %v1144_v55 = vadd.f32 %v1112_v54, %v984_v8  ;;  %v1303_v56 = vadd.f32 %v1267_v48, %v1143_v50  ;;  %v2247_v57 = vpop.f32.mrb[51].mxu0  ;;  %v2219_v5 = vpop.f32.mrb[51].mxu1 }
 0x14e   : > { %v1117_v58 = vpop.f32.mrb[52].mxu1  ;;  %v1272_v52 = vpop.f32.mrb[52].mxu0 }
 0x14f   : > { %v1145_v60 = vadd.f32 %v1117_v58, %v985_v14  ;;  %v1304_v61 = vadd.f32 %v1272_v52, %v1144_v55  ;;  %v2250_v59 = vpop.f32.mrb[53].mxu0  ;;  %v2222_v63 = vpop.f32.mrb[53].mxu1 }
 0x152   : > { %v1122_v0 = vpop.f32.mrb[54].mxu1  ;;  %v1277_v2 = vpop.f32.mrb[54].mxu0 }
 0x153   : > { %v1146_v62 = vadd.f32 %v1122_v0, %v986_v20  ;;  %v1305_v3 = vadd.f32 %v1277_v2, %v1145_v60  ;;  %v2253_v1 = vpop.f32.mrb[55].mxu0  ;;  %v2225_v6 = vpop.f32.mrb[55].mxu1 }
 0x156   : > { %v1127_v7 = vpop.f32.mrb[56].mxu1  ;;  %v1282_v4 = vpop.f32.mrb[56].mxu0 }
 0x157   : > { %v1147_v9 = vadd.f32 %v1127_v7, %v987_v26  ;;  %v1306_v10 = vadd.f32 %v1282_v4, %v1146_v62  ;;  %v2256_v8 = vpop.f32.mrb[57].mxu0  ;;  %v2228_v12 = vpop.f32.mrb[57].mxu1 }
 0x15a   : > { %v1132_v13 = vpop.f32.mrb[58].mxu1  ;;  %v1287_v11 = vpop.f32.mrb[58].mxu0 }
 0x15b   : > { %v1148_v15 = vadd.f32 %v1132_v13, %v988_v32  ;;  %v1307_v14 = vadd.f32 %v1287_v11, %v1147_v9  ;;  %v2259_v16 = vpop.f32.mrb[59].mxu0  ;;  %v2231_v18 = vpop.f32.mrb[59].mxu1 }
 0x15e   : > { %v1137_v19 = vpop.f32.mrb[60].mxu1  ;;  %v1292_v17 = vpop.f32.mrb[60].mxu0 }
 0x15f   : > { %v1149_v20 = vadd.f32 %v1137_v19, %v989_v37  ;;  %v2871_v21 = vadd.f32 %v1292_v17, %v1148_v15  ;;  %v2262_v22 = vpop.f32.mrb[61].mxu0  ;;  %v2234_v24 = vpop.f32.mrb[61].mxu1 }
 0x162   : > { %v1297_v25 = vpop.f32.mrb[62].mxu0  ;;  %v1417_v26 = vpop.f32.mrb[62].mxu1 }
 0x163   : > { %v2873_v23 = vadd.f32 %v1297_v25, %v1149_v20  ;;  %v1461_v27 = vadd.f32 %v1417_v26, %v1301_v45  ;;  %v2265_v28 = vpop.f32.mrb[63].mxu0  ;;  %v2272_v30 = vpop.f32.mrb[63].mxu1 }
 0x166   : > { %v1422_v31 = vpop.f32.mrb[64].mxu1  ;;  %v1577_v32 = vpop.f32.mrb[64].mxu0 }
 0x167   : > { %v1462_v33 = vadd.f32 %v1422_v31, %v1302_v51  ;;  %v1621_v34 = vadd.f32 %v1577_v32, %v1461_v27  ;;  %v2303_v36 = vpop.f32.mrb[65].mxu0  ;;  %v2275_v37 = vpop.f32.mrb[65].mxu1 }
 0x169   : > { %v1637_v38 = vadd.f32 %v2880_v29, %v1621_v34 }
 0x16a   : > { %v1427_v35 = vpop.f32.mrb[66].mxu1  ;;  %v1582_v39 = vpop.f32.mrb[66].mxu0 }
 0x16b   : > { %1646 = vst.msk [vmem:[%s2885_s16] sm:$0xff] %vm235_vm1, %v1637_v38  ;;  %v1463_v41 = vadd.f32 %v1427_v35, %v1303_v56  ;;  %v1622_v40 = vadd.f32 %v1582_v39, %v1462_v33  ;;  %v2306_v43 = vpop.f32.mrb[67].mxu0  ;;  %v2278_v45 = vpop.f32.mrb[67].mxu1 }
 0x16d   : > { %v1638_v42 = vadd.f32 %v2880_v29, %v1622_v40 }
 0x16e   : > { %v1432_v46 = vpop.f32.mrb[68].mxu1  ;;  %v1587_v49 = vpop.f32.mrb[68].mxu0 }
 0x16f   : > { %1647 = vst.msk [vmem:[%s2885_s16 + $0x8] sm:$0xff] %vm235_vm1, %v1638_v42  ;;  %v1464_v44 = vadd.f32 %v1432_v46, %v1304_v61  ;;  %v1623_v50 = vadd.f32 %v1587_v49, %v1463_v41  ;;  %v2309_v51 = vpop.f32.mrb[69].mxu0  ;;  %v2281_v47 = vpop.f32.mrb[69].mxu1 }
 0x171   : > { %v1639_v53 = vadd.f32 %v2880_v29, %v1623_v50 }
 0x172   : > { %v1437_v54 = vpop.f32.mrb[70].mxu1  ;;  %v1592_v48 = vpop.f32.mrb[70].mxu0 }
 0x173   : > { %1648 = vst.msk [vmem:[%s2885_s16 + $0x10] sm:$0xff] %vm235_vm1, %v1639_v53  ;;  %v1465_v55 = vadd.f32 %v1437_v54, %v1305_v3  ;;  %v1624_v56 = vadd.f32 %v1592_v48, %v1464_v44  ;;  %v2312_v57 = vpop.f32.mrb[71].mxu0  ;;  %v2284_v5 = vpop.f32.mrb[71].mxu1 }
 0x175   : > { %v1640_v58 = vadd.f32 %v2880_v29, %v1624_v56 }
 0x176   : > { %v1442_v52 = vpop.f32.mrb[72].mxu1  ;;  %v1597_v60 = vpop.f32.mrb[72].mxu0 }
 0x177   : > { %1649 = vst.msk [vmem:[%s2885_s16 + $0x18] sm:$0xff] %vm235_vm1, %v1640_v58  ;;  %v1466_v61 = vadd.f32 %v1442_v52, %v1306_v10  ;;  %v1625_v59 = vadd.f32 %v1597_v60, %v1465_v55  ;;  %v2315_v63 = vpop.f32.mrb[73].mxu0  ;;  %v2287_v0 = vpop.f32.mrb[73].mxu1 }
 0x179   : > { %v1641_v2 = vadd.f32 %v2880_v29, %v1625_v59 }
 0x17a   : > { %v1447_v62 = vpop.f32.mrb[74].mxu1  ;;  %v1602_v1 = vpop.f32.mrb[74].mxu0 }
 0x17b   : > { %1650 = vst.msk [vmem:[%s2885_s16 + $0x20] sm:$0xff] %vm235_vm1, %v1641_v2  ;;  %v1467_v3 = vadd.f32 %v1447_v62, %v1307_v14  ;;  %v1626_v6 = vadd.f32 %v1602_v1, %v1466_v61  ;;  %v2318_v7 = vpop.f32.mrb[75].mxu0  ;;  %v2290_v4 = vpop.f32.mrb[75].mxu1 }
 0x17d   : > { %v1642_v9 = vadd.f32 %v2880_v29, %v1626_v6 }
 0x17e   : > { %v1452_v8 = vpop.f32.mrb[76].mxu1  ;;  %v1607_v12 = vpop.f32.mrb[76].mxu0 }
 0x17f   : > { %1651 = vst.msk [vmem:[%s2885_s16 + $0x28] sm:$0xff] %vm235_vm1, %v1642_v9  ;;  %v1468_v10 = vadd.f32 %v1452_v8, %v2871_v21  ;;  %v1627_v13 = vadd.f32 %v1607_v12, %v1467_v3  ;;  %v2321_v11 = vpop.f32.mrb[77].mxu0  ;;  %v2293_v15 = vpop.f32.mrb[77].mxu1 }
 0x181   : > { %v1643_v16 = vadd.f32 %v2880_v29, %v1627_v13 }
 0x182   : > { %v1457_v18 = vpop.f32.mrb[78].mxu1  ;;  %v1612_v14 = vpop.f32.mrb[78].mxu0 }
 0x183   : > { %1652 = vst.msk [vmem:[%s2885_s16 + $0x30] sm:$0xff] %vm235_vm1, %v1643_v16  ;;  %v1469_v19 = vadd.f32 %v1457_v18, %v2873_v23  ;;  %v1628_v17 = vadd.f32 %v1612_v14, %v1468_v10  ;;  %v2324_v20 = vpop.f32.mrb[79].mxu0  ;;  %v2296_v22 = vpop.f32.mrb[79].mxu1 }
 0x185   : > { %v1644_v24 = vadd.f32 %v2880_v29, %v1628_v17 }
 0x186   : > { %v1617_v25 = vpop.f32.mrb[80].mxu0 }
 0x187   : > { %1653 = vst.msk [vmem:[%s2885_s16 + $0x38] sm:$0xff] %vm235_vm1, %v1644_v24  ;;  %v1629_v21 = vadd.f32 %v1617_v25, %v1469_v19  ;;  %v2327_v26 = vpop.f32.mrb[81].mxu0 }
 0x189   : > { %v1645_v27 = vadd.f32 %v2880_v29, %v1629_v21 }
 0x18b   : > { %1654 = vst.msk [vmem:[%s2885_s16 + $0x40] sm:$0xff] %vm235_vm1, %v1645_v27 }
 0x18c PF: > { %s13_s14 = sadd.s32 1, %s2408_s14   ;;  %s2929_s12 = smov %s2404_s13 }
 0x18d   : > { %p10_p5 = scmp.ge.s32.totalorder %s13_s14, 10   ;;  %s2930_s13 = smov %s2932_s15 }
 0x18f   :  { %12 = sbr.rel (!%p10_p5) target bundleno = 2 (0x2), region = 82 }

</bundles_post_ra>
